<compile_context>
chip_gen: v7x
topology: tpu7x:2x2x1
jax: 0.10.0
libtpu: 0.0.40
codegen_flags: <defaults>
</compile_context>

<pallas_src>
import math
import numpy as np
import jax
import jax.numpy as jnp
from jax.experimental import pallas as pl
from jax.experimental.pallas import tpu as pltpu

EPS = 1e-5                     # BatchNorm2d / LayerNorm default eps

# Per-image lane padding keeps the lane (last) dim a multiple of 128 for any B.
P_HI, P_LO = 256, 128          # padded lanes per image at 14x14 / 7x7
H_HI, H_LO = 14, 7             # spatial side lengths
V_HI, V_LO = 196, 49           # valid lanes per image


# --------------------------- in-kernel helpers -------------------------------

def _bn_relu(y, g, bt, vmask, inv_n):
    """BatchNorm2d (training-mode batch stats over B*H*W) + ReLU.

    Pad lanes are zeroed first so plain lane sums * inv_n give the true mean
    and (biased) variance over the valid positions only.
    TODO(synk): running-stat (momentum) updates are training-only state and do
    not affect this forward; eval-mode running stats are not modeled.
    """
    y = y * vmask
    mu = jnp.sum(y, axis=1, keepdims=True) * inv_n
    var = jnp.sum(y * y, axis=1, keepdims=True) * inv_n - mu * mu
    var = jnp.maximum(var, 0.0)          # guard one-pass E[y^2]-mu^2 round-off
    yn = (y - mu) * jax.lax.rsqrt(var + EPS) * g + bt
    return jnp.maximum(yn, 0.0)


def _conv3x3(y, w, b, masks, width, im2col_ref=None):
    """3x3 / stride-1 / pad-1 conv on a (Cin, M = B*P) channel-major activation.

    w: (Cout, 9*Cin) bf16, column order (dy, dx, ci); b: (Cout, 1) f32;
    masks: (9, M) f32 validity masks (zero padding + per-image lane padding).
    """
    cin, M = y.shape
    out = None
    for dy in range(3):
        for dx in range(3):
            t = dy * 3 + dx
            off = (dy - 1) * width + (dx - 1)        # tap[m] = y[m + off]
            shift = (-off) % M                       # jnp.roll sign convention
            rolled = pltpu.roll(y, shift=shift, axis=1) if shift else y
            tap = rolled * masks[t:t + 1, :]
            if im2col_ref is not None:
                # cin == 16: write the tap at a bf16-tile-aligned row offset of
                # the preallocated (144, M) im2col scratch (one MXU matmul).
                im2col_ref[t * cin:(t + 1) * cin, :] = tap.astype(jnp.bfloat16)
            elif cin == 1:
                # 1->1 conv: 9 VPU broadcast FMAs are cheaper than MXU setup.
                part = w[:, t:t + 1].astype(jnp.float32) * tap
                out = part if out is None else out + part
            else:
                # small cin: per-tap MXU matmul, f32 accumulation (MXU is idle).
                part = jnp.dot(w[:, t * cin:(t + 1) * cin],
                               tap.astype(jnp.bfloat16),
                               preferred_element_type=jnp.float32)
                out = part if out is None else out + part
    if im2col_ref is not None:
        out = jnp.dot(w, im2col_ref[...], preferred_element_type=jnp.float32)
    return out + b


def fused_encoder_kernel(*refs):
    p1_ref, mhi_ref, mlo_ref, d_ref = refs[:4]
    rb1, rb2, rb3 = refs[4:14], refs[14:24], refs[24:34]
    lw_ref, lb_ref, lg_ref, lbt_ref = refs[34:38]
    o_ref = refs[38]
    im2col_ref, ds_ref, flat_ref = refs[39], refs[40], refs[41]

    mask_hi = mhi_ref[...]                     # (9, B*P_HI) 0/1 padding masks
    mask_lo = mlo_ref[...]                     # (9, B*P_LO)
    vmask_hi = mask_hi[4:5, :]                 # center tap == "lane is valid"
    vmask_lo = mask_lo[4:5, :]
    d_sel = d_ref[...]                         # (P_HI, P_LO) stride-2 selector

    B = mask_hi.shape[1] // P_HI
    inv_hi = 1.0 / (B * V_HI)
    inv_lo = 1.0 / (B * V_LO)

    # ---------------- block 1: 1 -> 16, stride 2 (28x28 -> 14x14) ------------
    w1, b1, g1, t1, w2, b2, g2, t2, w3, b3 = [r[...] for r in rb1]
    y = jnp.dot(w1, p1_ref[...], preferred_element_type=jnp.float32) + b1   # (16, B*256)
    y = _bn_relu(y, g1, t1, vmask_hi, inv_hi)
    y = _bn_relu(_conv3x3(y, w2, b2, mask_hi, H_HI, im2col_ref),
                 g2, t2, vmask_hi, inv_hi)
    # residual added before the final ReLU is conv3's own input, as in PyTorch
    y = jnp.maximum(_conv3x3(y, w3, b3, mask_hi, H_HI, im2col_ref) + y, 0.0)

    # ---------------- block 2: 16 -> 4, stride 2 (14x14 -> 7x7) --------------
    w1, b1, g1, t1, w2, b2, g2, t2, w3, b3 = [r[...] for r in rb2]
    yf = _conv3x3(y, w1, b1, mask_hi, H_HI, im2col_ref)        # (4, B*256) full-res
    # stride-2 downsample: one tiny per-image selection matmul, O(B) instead of
    # the old dense O(B^2) matrix; pad output lanes come out exactly zero.
    for b_i in range(B):
        ds_ref[:, b_i * P_LO:(b_i + 1) * P_LO] = jnp.dot(
            yf[:, b_i * P_HI:(b_i + 1) * P_HI], d_sel,
            preferred_element_type=jnp.float32)
    y = _bn_relu(ds_ref[...], g1, t1, vmask_lo, inv_lo)        # (4, B*128)
    y = _bn_relu(_conv3x3(y, w2, b2, mask_lo, H_LO), g2, t2, vmask_lo, inv_lo)
    y = jnp.maximum(_conv3x3(y, w3, b3, mask_lo, H_LO) + y, 0.0)

    # ---------------- block 3: 4 -> 1, stride 1 ------------------------------
    w1, b1, g1, t1, w2, b2, g2, t2, w3, b3 = [r[...] for r in rb3]
    y = _bn_relu(_conv3x3(y, w1, b1, mask_lo, H_LO), g1, t1, vmask_lo, inv_lo)
    y = _bn_relu(_conv3x3(y, w2, b2, mask_lo, H_LO), g2, t2, vmask_lo, inv_lo)
    y = jnp.maximum(_conv3x3(y, w3, b3, mask_lo, H_LO) + y, 0.0)   # (1, B*128)

    # ---- Flatten (torch NCHW order) + Linear(49,8) + LayerNorm(8), batched ---
    for b_i in range(B):
        flat_ref[b_i:b_i + 1, :] = y[:, b_i * P_LO:(b_i + 1) * P_LO]
    # lw is zero-padded to (128, 8): pad lanes of flat_ref never contribute.
    h = jnp.dot(flat_ref[...].astype(jnp.bfloat16), lw_ref[...],
                preferred_element_type=jnp.float32) + lb_ref[...]      # (B, 8)
    mu = jnp.mean(h, axis=-1, keepdims=True)
    var = jnp.maximum(jnp.mean(h * h, axis=-1, keepdims=True) - mu * mu, 0.0)
    o_ref[...] = (h - mu) * jax.lax.rsqrt(var + EPS) * lg_ref[...] + lbt_ref[...]


# ------------------------------ host-side glue --------------------------------

def _input_patches(x_nchw):
    """Stride-2 / pad-1 im2col of the raw 28x28 input -> (9, B*P_HI) bf16,
    per-image zero-padded from 196 to P_HI lanes."""
    B = x_nchw.shape[0]
    xs = x_nchw[:, 0]                                       # (B, 28, 28)
    xp = jnp.pad(xs, ((0, 0), (1, 1), (1, 1)))              # (B, 30, 30)
    taps = [xp[:, dy:dy + 27:2, dx:dx + 27:2].reshape(B, V_HI)
            for dy in range(3) for dx in range(3)]
    p = jnp.stack(taps, axis=0)                             # (9, B, 196)
    p = jnp.pad(p, ((0, 0), (0, 0), (0, P_HI - V_HI)))      # (9, B, 256)
    return p.reshape(9, B * P_HI).astype(jnp.bfloat16)


def _conv_masks(B, P, hw, valid):
    """Compile-time (9, B*P) 0/1 masks: zero padding for the 3x3 taps plus the
    per-image lane padding (built with NumPy; ~28 KB of constants at B=2)."""
    m = np.arange(B * P)
    p = m % P
    h, w = p // hw, p % hw
    rows = []
    for dy in range(3):
        for dx in range(3):
            ok = (p < valid) & (h + dy - 1 >= 0) & (h + dy - 1 < hw) \
                 & (w + dx - 1 >= 0) & (w + dx - 1 < hw)
            rows.append(ok)
    return jnp.asarray(np.stack(rows).astype(np.float32))


def _downsample_sel():
    """(P_HI, P_LO) per-image 0/1 matrix: picks the stride-2 centers of the
    full-resolution 14x14 conv output into the padded 7x7 layout."""
    d = np.zeros((P_HI, P_LO), np.float32)
    for ho in range(H_LO):
        for wo in range(H_LO):
            d[2 * ho * H_HI + 2 * wo, ho * H_LO + wo] = 1.0
    return jnp.asarray(d)


def _cast_block(blk):
    blk = list(blk)
    for i in (0, 4, 8):                     # conv weights -> bf16 MXU operands
        blk[i] = blk[i].astype(jnp.bfloat16)
    return blk


def image_encoder_resnet(x_nchw, params):
    B = x_nchw.shape[0]
    lw_pad = jnp.pad(params["lw"], ((0, P_LO - V_LO), (0, 0))).astype(jnp.bfloat16)
    inputs = [
        _input_patches(x_nchw),             # raw-input stride-2 patches (bf16)
        _conv_masks(B, P_HI, H_HI, V_HI),   # compile-time constants
        _conv_masks(B, P_LO, H_LO, V_LO),
        _downsample_sel(),
    ]
    for blk in ("rb1", "rb2", "rb3"):
        inputs.extend(_cast_block(params[blk]))
    inputs.extend([lw_pad, params["lb"], params["lg"], params["lbt"]])

    # TODO(synk): at large batch, split the batch over a ("parallel",) grid
    # (2 TensorCores on v7x) with a two-phase BatchNorm reduction; at B=2 the
    # whole network needs well under 1 MiB of VMEM, so stay gridless.
    return pl.pallas_call(
        fused_encoder_kernel,
        out_shape=jax.ShapeDtypeStruct((B, 8), jnp.float32),
        in_specs=[pl.BlockSpec(memory_space=pltpu.MemorySpace.VMEM)] * len(inputs),
        out_specs=pl.BlockSpec(memory_space=pltpu.MemorySpace.VMEM),
        scratch_shapes=[
            pltpu.VMEM((144, B * P_HI), jnp.bfloat16),  # (9*16, M) im2col operand
            pltpu.VMEM((4, B * P_LO), jnp.float32),     # downsampled block2.conv1
            pltpu.VMEM((B, P_LO), jnp.float32),         # flattened final features
        ],
        compiler_params=pltpu.CompilerParams(vmem_limit_bytes=32 * 1024 * 1024),
    )(*inputs)


# ------------------------------ parameter init --------------------------------

def _init_conv(key, cin, cout):
    k1, k2 = jax.random.split(key)
    bound = 1.0 / math.sqrt(cin * 9)
    # (Cout, 3, 3, Cin) flattened row-major -> column order (dy, dx, ci),
    # matching the in-kernel tap construction.
    w = jax.random.uniform(k1, (cout, 3, 3, cin), jnp.float32, -bound, bound)
    b = jax.random.uniform(k2, (cout, 1), jnp.float32, -bound, bound)
    return w.reshape(cout, 9 * cin), b


def _init_res_block(key, cin, cout):
    ks = jax.random.split(key, 3)
    w1, b1 = _init_conv(ks[0], cin, cout)
    w2, b2 = _init_conv(ks[1], cout, cout)
    w3, b3 = _init_conv(ks[2], cout, cout)
    ones = jnp.ones((cout, 1), jnp.float32)
    zeros = jnp.zeros((cout, 1), jnp.float32)
    # (w1, b1, gamma1, beta1, w2, b2, gamma2, beta2, w3, b3)
    return (w1, b1, ones, zeros, w2, b2, ones, zeros, w3, b3)


if __name__ == "__main__":
    key = jax.random.PRNGKey(0)
    kx, k1, k2, k3, kl = jax.random.split(key, 5)

    params = {
        "rb1": _init_res_block(k1, 1, 16),
        "rb2": _init_res_block(k2, 16, 4),
        "rb3": _init_res_block(k3, 4, 1),
    }
    kw, kb = jax.random.split(kl)
    bound = 1.0 / math.sqrt(49)
    params["lw"] = jax.random.uniform(kw, (49, 8), jnp.float32, -bound, bound)
    params["lb"] = jax.random.uniform(kb, (1, 8), jnp.float32, -bound, bound)
    params["lg"] = jnp.ones((1, 8), jnp.float32)
    params["lbt"] = jnp.zeros((1, 8), jnp.float32)

    # 28x28 single-channel input is implied by Linear(49, 8): 28 -> 14 -> 7.
    x = jax.random.normal(kx, (2, 1, 28, 28), jnp.float32)

    out = jax.jit(image_encoder_resnet)(x, params)
    jax.block_until_ready(out)
    assert out.shape == (2, 8) and out.dtype == jnp.float32
    print("KERNEL_OK")
</pallas_src>

<mosaic_0001>
module attributes {stable_mosaic.version = 11 : i64} {
  func.func @fused_encoder_kernel(%arg0: memref<9x512xbf16, #tpu.memory_space<vmem>>, %arg1: memref<9x512xf32, #tpu.memory_space<vmem>>, %arg2: memref<9x256xf32, #tpu.memory_space<vmem>>, %arg3: memref<256x128xf32, #tpu.memory_space<vmem>>, %arg4: memref<16x9xbf16, #tpu.memory_space<vmem>>, %arg5: memref<16x1xf32, #tpu.memory_space<vmem>>, %arg6: memref<16x1xf32, #tpu.memory_space<vmem>>, %arg7: memref<16x1xf32, #tpu.memory_space<vmem>>, %arg8: memref<16x144xbf16, #tpu.memory_space<vmem>>, %arg9: memref<16x1xf32, #tpu.memory_space<vmem>>, %arg10: memref<16x1xf32, #tpu.memory_space<vmem>>, %arg11: memref<16x1xf32, #tpu.memory_space<vmem>>, %arg12: memref<16x144xbf16, #tpu.memory_space<vmem>>, %arg13: memref<16x1xf32, #tpu.memory_space<vmem>>, %arg14: memref<4x144xbf16, #tpu.memory_space<vmem>>, %arg15: memref<4x1xf32, #tpu.memory_space<vmem>>, %arg16: memref<4x1xf32, #tpu.memory_space<vmem>>, %arg17: memref<4x1xf32, #tpu.memory_space<vmem>>, %arg18: memref<4x36xbf16, #tpu.memory_space<vmem>>, %arg19: memref<4x1xf32, #tpu.memory_space<vmem>>, %arg20: memref<4x1xf32, #tpu.memory_space<vmem>>, %arg21: memref<4x1xf32, #tpu.memory_space<vmem>>, %arg22: memref<4x36xbf16, #tpu.memory_space<vmem>>, %arg23: memref<4x1xf32, #tpu.memory_space<vmem>>, %arg24: memref<1x36xbf16, #tpu.memory_space<vmem>>, %arg25: memref<1x1xf32, #tpu.memory_space<vmem>>, %arg26: memref<1x1xf32, #tpu.memory_space<vmem>>, %arg27: memref<1x1xf32, #tpu.memory_space<vmem>>, %arg28: memref<1x9xbf16, #tpu.memory_space<vmem>>, %arg29: memref<1x1xf32, #tpu.memory_space<vmem>>, %arg30: memref<1x1xf32, #tpu.memory_space<vmem>>, %arg31: memref<1x1xf32, #tpu.memory_space<vmem>>, %arg32: memref<1x9xbf16, #tpu.memory_space<vmem>>, %arg33: memref<1x1xf32, #tpu.memory_space<vmem>>, %arg34: memref<128x8xbf16, #tpu.memory_space<vmem>>, %arg35: memref<1x8xf32, #tpu.memory_space<vmem>>, %arg36: memref<1x8xf32, #tpu.memory_space<vmem>>, %arg37: memref<1x8xf32, #tpu.memory_space<vmem>>, %arg38: memref<2x8xf32, #tpu.memory_space<vmem>>, %arg39: memref<144x512xbf16, #tpu.memory_space<vmem>>, %arg40: memref<4x256xf32, #tpu.memory_space<vmem>>, %arg41: memref<2x128xf32, #tpu.memory_space<vmem>>) attributes {dimension_semantics = [], scalar_prefetch = 0 : i64, scratch_operands = 3 : i64, tpu.core_type = #tpu.core_type<tc>} {
    %c0 = arith.constant 0 : index
    %c0_0 = arith.constant 0 : index
    %0 = vector.load %arg1[%c0, %c0_0] : memref<9x512xf32, #tpu.memory_space<vmem>>, vector<9x512xf32>
    %c0_1 = arith.constant 0 : index
    %c0_2 = arith.constant 0 : index
    %1 = vector.load %arg2[%c0_1, %c0_2] : memref<9x256xf32, #tpu.memory_space<vmem>>, vector<9x256xf32>
    %2 = vector.extract_strided_slice %0 {offsets = [4, 0], sizes = [1, 512], strides = [1, 1]} : vector<9x512xf32> to vector<1x512xf32>
    %3 = vector.extract_strided_slice %1 {offsets = [4, 0], sizes = [1, 256], strides = [1, 1]} : vector<9x256xf32> to vector<1x256xf32>
    %c0_3 = arith.constant 0 : index
    %c0_4 = arith.constant 0 : index
    %4 = vector.load %arg3[%c0_3, %c0_4] : memref<256x128xf32, #tpu.memory_space<vmem>>, vector<256x128xf32>
    %c0_5 = arith.constant 0 : index
    %c0_6 = arith.constant 0 : index
    %5 = vector.load %arg4[%c0_5, %c0_6] : memref<16x9xbf16, #tpu.memory_space<vmem>>, vector<16x9xbf16>
    %c0_7 = arith.constant 0 : index
    %c0_8 = arith.constant 0 : index
    %6 = vector.load %arg5[%c0_7, %c0_8] : memref<16x1xf32, #tpu.memory_space<vmem>>, vector<16x1xf32>
    %c0_9 = arith.constant 0 : index
    %c0_10 = arith.constant 0 : index
    %7 = vector.load %arg6[%c0_9, %c0_10] : memref<16x1xf32, #tpu.memory_space<vmem>>, vector<16x1xf32>
    %c0_11 = arith.constant 0 : index
    %c0_12 = arith.constant 0 : index
    %8 = vector.load %arg7[%c0_11, %c0_12] : memref<16x1xf32, #tpu.memory_space<vmem>>, vector<16x1xf32>
    %c0_13 = arith.constant 0 : index
    %c0_14 = arith.constant 0 : index
    %9 = vector.load %arg8[%c0_13, %c0_14] : memref<16x144xbf16, #tpu.memory_space<vmem>>, vector<16x144xbf16>
    %c0_15 = arith.constant 0 : index
    %c0_16 = arith.constant 0 : index
    %10 = vector.load %arg9[%c0_15, %c0_16] : memref<16x1xf32, #tpu.memory_space<vmem>>, vector<16x1xf32>
    %c0_17 = arith.constant 0 : index
    %c0_18 = arith.constant 0 : index
    %11 = vector.load %arg10[%c0_17, %c0_18] : memref<16x1xf32, #tpu.memory_space<vmem>>, vector<16x1xf32>
    %c0_19 = arith.constant 0 : index
    %c0_20 = arith.constant 0 : index
    %12 = vector.load %arg11[%c0_19, %c0_20] : memref<16x1xf32, #tpu.memory_space<vmem>>, vector<16x1xf32>
    %c0_21 = arith.constant 0 : index
    %c0_22 = arith.constant 0 : index
    %13 = vector.load %arg12[%c0_21, %c0_22] : memref<16x144xbf16, #tpu.memory_space<vmem>>, vector<16x144xbf16>
    %c0_23 = arith.constant 0 : index
    %c0_24 = arith.constant 0 : index
    %14 = vector.load %arg13[%c0_23, %c0_24] : memref<16x1xf32, #tpu.memory_space<vmem>>, vector<16x1xf32>
    %c0_25 = arith.constant 0 : index
    %c0_26 = arith.constant 0 : index
    %15 = vector.load %arg0[%c0_25, %c0_26] : memref<9x512xbf16, #tpu.memory_space<vmem>>, vector<9x512xbf16>
    %cst = arith.constant dense<0.000000e+00> : vector<16x512xf32>
    %16 = tpu.matmul %5, %15, %cst {dimension_numbers = #tpu.dot_dimension_numbers<[1], [0], [0], [1], [0, 0, 1, 1], [], []>} : vector<16x9xbf16>, vector<9x512xbf16>, vector<16x512xf32> -> vector<16x512xf32>
    %17 = vector.broadcast %6 : vector<16x1xf32> to vector<16x512xf32>
    %18 = arith.addf %16, %17 : vector<16x512xf32>
    %19 = vector.broadcast %2 : vector<1x512xf32> to vector<16x512xf32>
    %20 = arith.mulf %18, %19 : vector<16x512xf32>
    %cst_27 = arith.constant dense<0.000000e+00> : vector<16xf32>
    %21 = vector.multi_reduction <add>, %20, %cst_27 [1] : vector<16x512xf32> to vector<16xf32>
    %22 = vector.shape_cast %21 : vector<16xf32> to vector<16x1xf32>
    %cst_28 = arith.constant 0.00255102036 : f32
    %23 = vector.broadcast %cst_28 : f32 to vector<16x1xf32>
    %24 = arith.mulf %22, %23 : vector<16x1xf32>
    %25 = arith.mulf %20, %20 : vector<16x512xf32>
    %cst_29 = arith.constant dense<0.000000e+00> : vector<16xf32>
    %26 = vector.multi_reduction <add>, %25, %cst_29 [1] : vector<16x512xf32> to vector<16xf32>
    %27 = vector.shape_cast %26 : vector<16xf32> to vector<16x1xf32>
    %cst_30 = arith.constant 0.00255102036 : f32
    %28 = vector.broadcast %cst_30 : f32 to vector<16x1xf32>
    %29 = arith.mulf %27, %28 : vector<16x1xf32>
    %30 = arith.mulf %24, %24 : vector<16x1xf32>
    %31 = arith.subf %29, %30 : vector<16x1xf32>
    %cst_31 = arith.constant 0.000000e+00 : f32
    %32 = vector.broadcast %cst_31 : f32 to vector<16x1xf32>
    %33 = arith.maximumf %31, %32 : vector<16x1xf32>
    %34 = vector.broadcast %24 : vector<16x1xf32> to vector<16x512xf32>
    %35 = arith.subf %20, %34 : vector<16x512xf32>
    %cst_32 = arith.constant 9.99999974E-6 : f32
    %36 = vector.broadcast %cst_32 : f32 to vector<16x1xf32>
    %37 = arith.addf %33, %36 : vector<16x1xf32>
    %38 = math.rsqrt %37 : vector<16x1xf32>
    %39 = vector.broadcast %38 : vector<16x1xf32> to vector<16x512xf32>
    %40 = arith.mulf %35, %39 : vector<16x512xf32>
    %41 = vector.broadcast %7 : vector<16x1xf32> to vector<16x512xf32>
    %42 = arith.mulf %40, %41 : vector<16x512xf32>
    %43 = vector.broadcast %8 : vector<16x1xf32> to vector<16x512xf32>
    %44 = arith.addf %42, %43 : vector<16x512xf32>
    %cst_33 = arith.constant 0.000000e+00 : f32
    %45 = vector.broadcast %cst_33 : f32 to vector<16x512xf32>
    %46 = arith.maximumf %44, %45 : vector<16x512xf32>
    %c15_i32 = arith.constant 15 : i32
    %47 = tpu.dynamic_rotate %46 by %c15_i32 dim 1 : vector<16x512xf32>, i32 -> vector<16x512xf32>
    %48 = vector.extract_strided_slice %0 {offsets = [0, 0], sizes = [1, 512], strides = [1, 1]} : vector<9x512xf32> to vector<1x512xf32>
    %49 = vector.broadcast %48 : vector<1x512xf32> to vector<16x512xf32>
    %50 = arith.mulf %47, %49 : vector<16x512xf32>
    %51 = arith.truncf %50 : vector<16x512xf32> to vector<16x512xbf16>
    %c0_34 = arith.constant 0 : index
    %c0_35 = arith.constant 0 : index
    %52 = vector.load %arg39[%c0_34, %c0_35] : memref<144x512xbf16, #tpu.memory_space<vmem>>, vector<16x512xbf16>
    tpu.vector_store %arg39[%c0_34, %c0_35], %51 {strides = array<i32>} : memref<144x512xbf16, #tpu.memory_space<vmem>>, vector<16x512xbf16>,
    %c14_i32 = arith.constant 14 : i32
    %53 = tpu.dynamic_rotate %46 by %c14_i32 dim 1 : vector<16x512xf32>, i32 -> vector<16x512xf32>
    %54 = vector.extract_strided_slice %0 {offsets = [1, 0], sizes = [1, 512], strides = [1, 1]} : vector<9x512xf32> to vector<1x512xf32>
    %55 = vector.broadcast %54 : vector<1x512xf32> to vector<16x512xf32>
    %56 = arith.mulf %53, %55 : vector<16x512xf32>
    %57 = arith.truncf %56 : vector<16x512xf32> to vector<16x512xbf16>
    %c16 = arith.constant 16 : index
    %c0_36 = arith.constant 0 : index
    %58 = vector.load %arg39[%c16, %c0_36] : memref<144x512xbf16, #tpu.memory_space<vmem>>, vector<16x512xbf16>
    tpu.vector_store %arg39[%c16, %c0_36], %57 {strides = array<i32>} : memref<144x512xbf16, #tpu.memory_space<vmem>>, vector<16x512xbf16>,
    %c13_i32 = arith.constant 13 : i32
    %59 = tpu.dynamic_rotate %46 by %c13_i32 dim 1 : vector<16x512xf32>, i32 -> vector<16x512xf32>
    %60 = vector.extract_strided_slice %0 {offsets = [2, 0], sizes = [1, 512], strides = [1, 1]} : vector<9x512xf32> to vector<1x512xf32>
    %61 = vector.broadcast %60 : vector<1x512xf32> to vector<16x512xf32>
    %62 = arith.mulf %59, %61 : vector<16x512xf32>
    %63 = arith.truncf %62 : vector<16x512xf32> to vector<16x512xbf16>
    %c32 = arith.constant 32 : index
    %c0_37 = arith.constant 0 : index
    %64 = vector.load %arg39[%c32, %c0_37] : memref<144x512xbf16, #tpu.memory_space<vmem>>, vector<16x512xbf16>
    tpu.vector_store %arg39[%c32, %c0_37], %63 {strides = array<i32>} : memref<144x512xbf16, #tpu.memory_space<vmem>>, vector<16x512xbf16>,
    %c1_i32 = arith.constant 1 : i32
    %65 = tpu.dynamic_rotate %46 by %c1_i32 dim 1 : vector<16x512xf32>, i32 -> vector<16x512xf32>
    %66 = vector.extract_strided_slice %0 {offsets = [3, 0], sizes = [1, 512], strides = [1, 1]} : vector<9x512xf32> to vector<1x512xf32>
    %67 = vector.broadcast %66 : vector<1x512xf32> to vector<16x512xf32>
    %68 = arith.mulf %65, %67 : vector<16x512xf32>
    %69 = arith.truncf %68 : vector<16x512xf32> to vector<16x512xbf16>
    %c48 = arith.constant 48 : index
    %c0_38 = arith.constant 0 : index
    %70 = vector.load %arg39[%c48, %c0_38] : memref<144x512xbf16, #tpu.memory_space<vmem>>, vector<16x512xbf16>
    tpu.vector_store %arg39[%c48, %c0_38], %69 {strides = array<i32>} : memref<144x512xbf16, #tpu.memory_space<vmem>>, vector<16x512xbf16>,
    %71 = vector.extract_strided_slice %0 {offsets = [4, 0], sizes = [1, 512], strides = [1, 1]} : vector<9x512xf32> to vector<1x512xf32>
    %72 = vector.broadcast %71 : vector<1x512xf32> to vector<16x512xf32>
    %73 = arith.mulf %46, %72 : vector<16x512xf32>
    %74 = arith.truncf %73 : vector<16x512xf32> to vector<16x512xbf16>
    %c64 = arith.constant 64 : index
    %c0_39 = arith.constant 0 : index
    %75 = vector.load %arg39[%c64, %c0_39] : memref<144x512xbf16, #tpu.memory_space<vmem>>, vector<16x512xbf16>
    tpu.vector_store %arg39[%c64, %c0_39], %74 {strides = array<i32>} : memref<144x512xbf16, #tpu.memory_space<vmem>>, vector<16x512xbf16>,
    %c511_i32 = arith.constant 511 : i32
    %76 = tpu.dynamic_rotate %46 by %c511_i32 dim 1 : vector<16x512xf32>, i32 -> vector<16x512xf32>
    %77 = vector.extract_strided_slice %0 {offsets = [5, 0], sizes = [1, 512], strides = [1, 1]} : vector<9x512xf32> to vector<1x512xf32>
    %78 = vector.broadcast %77 : vector<1x512xf32> to vector<16x512xf32>
    %79 = arith.mulf %76, %78 : vector<16x512xf32>
    %80 = arith.truncf %79 : vector<16x512xf32> to vector<16x512xbf16>
    %c80 = arith.constant 80 : index
    %c0_40 = arith.constant 0 : index
    %81 = vector.load %arg39[%c80, %c0_40] : memref<144x512xbf16, #tpu.memory_space<vmem>>, vector<16x512xbf16>
    tpu.vector_store %arg39[%c80, %c0_40], %80 {strides = array<i32>} : memref<144x512xbf16, #tpu.memory_space<vmem>>, vector<16x512xbf16>,
    %c499_i32 = arith.constant 499 : i32
    %82 = tpu.dynamic_rotate %46 by %c499_i32 dim 1 : vector<16x512xf32>, i32 -> vector<16x512xf32>
    %83 = vector.extract_strided_slice %0 {offsets = [6, 0], sizes = [1, 512], strides = [1, 1]} : vector<9x512xf32> to vector<1x512xf32>
    %84 = vector.broadcast %83 : vector<1x512xf32> to vector<16x512xf32>
    %85 = arith.mulf %82, %84 : vector<16x512xf32>
    %86 = arith.truncf %85 : vector<16x512xf32> to vector<16x512xbf16>
    %c96 = arith.constant 96 : index
    %c0_41 = arith.constant 0 : index
    %87 = vector.load %arg39[%c96, %c0_41] : memref<144x512xbf16, #tpu.memory_space<vmem>>, vector<16x512xbf16>
    tpu.vector_store %arg39[%c96, %c0_41], %86 {strides = array<i32>} : memref<144x512xbf16, #tpu.memory_space<vmem>>, vector<16x512xbf16>,
    %c498_i32 = arith.constant 498 : i32
    %88 = tpu.dynamic_rotate %46 by %c498_i32 dim 1 : vector<16x512xf32>, i32 -> vector<16x512xf32>
    %89 = vector.extract_strided_slice %0 {offsets = [7, 0], sizes = [1, 512], strides = [1, 1]} : vector<9x512xf32> to vector<1x512xf32>
    %90 = vector.broadcast %89 : vector<1x512xf32> to vector<16x512xf32>
    %91 = arith.mulf %88, %90 : vector<16x512xf32>
    %92 = arith.truncf %91 : vector<16x512xf32> to vector<16x512xbf16>
    %c112 = arith.constant 112 : index
    %c0_42 = arith.constant 0 : index
    %93 = vector.load %arg39[%c112, %c0_42] : memref<144x512xbf16, #tpu.memory_space<vmem>>, vector<16x512xbf16>
    tpu.vector_store %arg39[%c112, %c0_42], %92 {strides = array<i32>} : memref<144x512xbf16, #tpu.memory_space<vmem>>, vector<16x512xbf16>,
    %c497_i32 = arith.constant 497 : i32
    %94 = tpu.dynamic_rotate %46 by %c497_i32 dim 1 : vector<16x512xf32>, i32 -> vector<16x512xf32>
    %95 = vector.extract_strided_slice %0 {offsets = [8, 0], sizes = [1, 512], strides = [1, 1]} : vector<9x512xf32> to vector<1x512xf32>
    %96 = vector.broadcast %95 : vector<1x512xf32> to vector<16x512xf32>
    %97 = arith.mulf %94, %96 : vector<16x512xf32>
    %98 = arith.truncf %97 : vector<16x512xf32> to vector<16x512xbf16>
    %c128 = arith.constant 128 : index
    %c0_43 = arith.constant 0 : index
    %99 = vector.load %arg39[%c128, %c0_43] : memref<144x512xbf16, #tpu.memory_space<vmem>>, vector<16x512xbf16>
    tpu.vector_store %arg39[%c128, %c0_43], %98 {strides = array<i32>} : memref<144x512xbf16, #tpu.memory_space<vmem>>, vector<16x512xbf16>,
    %c0_44 = arith.constant 0 : index
    %c0_45 = arith.constant 0 : index
    %100 = vector.load %arg39[%c0_44, %c0_45] : memref<144x512xbf16, #tpu.memory_space<vmem>>, vector<144x512xbf16>
    %cst_46 = arith.constant dense<0.000000e+00> : vector<16x512xf32>
    %101 = tpu.matmul %9, %100, %cst_46 {dimension_numbers = #tpu.dot_dimension_numbers<[1], [0], [0], [1], [0, 0, 1, 1], [], []>} : vector<16x144xbf16>, vector<144x512xbf16>, vector<16x512xf32> -> vector<16x512xf32>
    %102 = vector.broadcast %10 : vector<16x1xf32> to vector<16x512xf32>
    %103 = arith.addf %101, %102 : vector<16x512xf32>
    %104 = vector.broadcast %2 : vector<1x512xf32> to vector<16x512xf32>
    %105 = arith.mulf %103, %104 : vector<16x512xf32>
    %cst_47 = arith.constant dense<0.000000e+00> : vector<16xf32>
    %106 = vector.multi_reduction <add>, %105, %cst_47 [1] : vector<16x512xf32> to vector<16xf32>
    %107 = vector.shape_cast %106 : vector<16xf32> to vector<16x1xf32>
    %cst_48 = arith.constant 0.00255102036 : f32
    %108 = vector.broadcast %cst_48 : f32 to vector<16x1xf32>
    %109 = arith.mulf %107, %108 : vector<16x1xf32>
    %110 = arith.mulf %105, %105 : vector<16x512xf32>
    %cst_49 = arith.constant dense<0.000000e+00> : vector<16xf32>
    %111 = vector.multi_reduction <add>, %110, %cst_49 [1] : vector<16x512xf32> to vector<16xf32>
    %112 = vector.shape_cast %111 : vector<16xf32> to vector<16x1xf32>
    %cst_50 = arith.constant 0.00255102036 : f32
    %113 = vector.broadcast %cst_50 : f32 to vector<16x1xf32>
    %114 = arith.mulf %112, %113 : vector<16x1xf32>
    %115 = arith.mulf %109, %109 : vector<16x1xf32>
    %116 = arith.subf %114, %115 : vector<16x1xf32>
    %cst_51 = arith.constant 0.000000e+00 : f32
    %117 = vector.broadcast %cst_51 : f32 to vector<16x1xf32>
    %118 = arith.maximumf %116, %117 : vector<16x1xf32>
    %119 = vector.broadcast %109 : vector<16x1xf32> to vector<16x512xf32>
    %120 = arith.subf %105, %119 : vector<16x512xf32>
    %cst_52 = arith.constant 9.99999974E-6 : f32
    %121 = vector.broadcast %cst_52 : f32 to vector<16x1xf32>
    %122 = arith.addf %118, %121 : vector<16x1xf32>
    %123 = math.rsqrt %122 : vector<16x1xf32>
    %124 = vector.broadcast %123 : vector<16x1xf32> to vector<16x512xf32>
    %125 = arith.mulf %120, %124 : vector<16x512xf32>
    %126 = vector.broadcast %11 : vector<16x1xf32> to vector<16x512xf32>
    %127 = arith.mulf %125, %126 : vector<16x512xf32>
    %128 = vector.broadcast %12 : vector<16x1xf32> to vector<16x512xf32>
    %129 = arith.addf %127, %128 : vector<16x512xf32>
    %cst_53 = arith.constant 0.000000e+00 : f32
    %130 = vector.broadcast %cst_53 : f32 to vector<16x512xf32>
    %131 = arith.maximumf %129, %130 : vector<16x512xf32>
    %c15_i32_54 = arith.constant 15 : i32
    %132 = tpu.dynamic_rotate %131 by %c15_i32_54 dim 1 : vector<16x512xf32>, i32 -> vector<16x512xf32>
    %133 = vector.extract_strided_slice %0 {offsets = [0, 0], sizes = [1, 512], strides = [1, 1]} : vector<9x512xf32> to vector<1x512xf32>
    %134 = vector.broadcast %133 : vector<1x512xf32> to vector<16x512xf32>
    %135 = arith.mulf %132, %134 : vector<16x512xf32>
    %136 = arith.truncf %135 : vector<16x512xf32> to vector<16x512xbf16>
    %c0_55 = arith.constant 0 : index
    %c0_56 = arith.constant 0 : index
    %137 = vector.load %arg39[%c0_55, %c0_56] : memref<144x512xbf16, #tpu.memory_space<vmem>>, vector<16x512xbf16>
    tpu.vector_store %arg39[%c0_55, %c0_56], %136 {strides = array<i32>} : memref<144x512xbf16, #tpu.memory_space<vmem>>, vector<16x512xbf16>,
    %c14_i32_57 = arith.constant 14 : i32
    %138 = tpu.dynamic_rotate %131 by %c14_i32_57 dim 1 : vector<16x512xf32>, i32 -> vector<16x512xf32>
    %139 = vector.extract_strided_slice %0 {offsets = [1, 0], sizes = [1, 512], strides = [1, 1]} : vector<9x512xf32> to vector<1x512xf32>
    %140 = vector.broadcast %139 : vector<1x512xf32> to vector<16x512xf32>
    %141 = arith.mulf %138, %140 : vector<16x512xf32>
    %142 = arith.truncf %141 : vector<16x512xf32> to vector<16x512xbf16>
    %c16_58 = arith.constant 16 : index
    %c0_59 = arith.constant 0 : index
    %143 = vector.load %arg39[%c16_58, %c0_59] : memref<144x512xbf16, #tpu.memory_space<vmem>>, vector<16x512xbf16>
    tpu.vector_store %arg39[%c16_58, %c0_59], %142 {strides = array<i32>} : memref<144x512xbf16, #tpu.memory_space<vmem>>, vector<16x512xbf16>,
    %c13_i32_60 = arith.constant 13 : i32
    %144 = tpu.dynamic_rotate %131 by %c13_i32_60 dim 1 : vector<16x512xf32>, i32 -> vector<16x512xf32>
    %145 = vector.extract_strided_slice %0 {offsets = [2, 0], sizes = [1, 512], strides = [1, 1]} : vector<9x512xf32> to vector<1x512xf32>
    %146 = vector.broadcast %145 : vector<1x512xf32> to vector<16x512xf32>
    %147 = arith.mulf %144, %146 : vector<16x512xf32>
    %148 = arith.truncf %147 : vector<16x512xf32> to vector<16x512xbf16>
    %c32_61 = arith.constant 32 : index
    %c0_62 = arith.constant 0 : index
    %149 = vector.load %arg39[%c32_61, %c0_62] : memref<144x512xbf16, #tpu.memory_space<vmem>>, vector<16x512xbf16>
    tpu.vector_store %arg39[%c32_61, %c0_62], %148 {strides = array<i32>} : memref<144x512xbf16, #tpu.memory_space<vmem>>, vector<16x512xbf16>,
    %c1_i32_63 = arith.constant 1 : i32
    %150 = tpu.dynamic_rotate %131 by %c1_i32_63 dim 1 : vector<16x512xf32>, i32 -> vector<16x512xf32>
    %151 = vector.extract_strided_slice %0 {offsets = [3, 0], sizes = [1, 512], strides = [1, 1]} : vector<9x512xf32> to vector<1x512xf32>
    %152 = vector.broadcast %151 : vector<1x512xf32> to vector<16x512xf32>
    %153 = arith.mulf %150, %152 : vector<16x512xf32>
    %154 = arith.truncf %153 : vector<16x512xf32> to vector<16x512xbf16>
    %c48_64 = arith.constant 48 : index
    %c0_65 = arith.constant 0 : index
    %155 = vector.load %arg39[%c48_64, %c0_65] : memref<144x512xbf16, #tpu.memory_space<vmem>>, vector<16x512xbf16>
    tpu.vector_store %arg39[%c48_64, %c0_65], %154 {strides = array<i32>} : memref<144x512xbf16, #tpu.memory_space<vmem>>, vector<16x512xbf16>,
    %156 = vector.extract_strided_slice %0 {offsets = [4, 0], sizes = [1, 512], strides = [1, 1]} : vector<9x512xf32> to vector<1x512xf32>
    %157 = vector.broadcast %156 : vector<1x512xf32> to vector<16x512xf32>
    %158 = arith.mulf %131, %157 : vector<16x512xf32>
    %159 = arith.truncf %158 : vector<16x512xf32> to vector<16x512xbf16>
    %c64_66 = arith.constant 64 : index
    %c0_67 = arith.constant 0 : index
    %160 = vector.load %arg39[%c64_66, %c0_67] : memref<144x512xbf16, #tpu.memory_space<vmem>>, vector<16x512xbf16>
    tpu.vector_store %arg39[%c64_66, %c0_67], %159 {strides = array<i32>} : memref<144x512xbf16, #tpu.memory_space<vmem>>, vector<16x512xbf16>,
    %c511_i32_68 = arith.constant 511 : i32
    %161 = tpu.dynamic_rotate %131 by %c511_i32_68 dim 1 : vector<16x512xf32>, i32 -> vector<16x512xf32>
    %162 = vector.extract_strided_slice %0 {offsets = [5, 0], sizes = [1, 512], strides = [1, 1]} : vector<9x512xf32> to vector<1x512xf32>
    %163 = vector.broadcast %162 : vector<1x512xf32> to vector<16x512xf32>
    %164 = arith.mulf %161, %163 : vector<16x512xf32>
    %165 = arith.truncf %164 : vector<16x512xf32> to vector<16x512xbf16>
    %c80_69 = arith.constant 80 : index
    %c0_70 = arith.constant 0 : index
    %166 = vector.load %arg39[%c80_69, %c0_70] : memref<144x512xbf16, #tpu.memory_space<vmem>>, vector<16x512xbf16>
    tpu.vector_store %arg39[%c80_69, %c0_70], %165 {strides = array<i32>} : memref<144x512xbf16, #tpu.memory_space<vmem>>, vector<16x512xbf16>,
    %c499_i32_71 = arith.constant 499 : i32
    %167 = tpu.dynamic_rotate %131 by %c499_i32_71 dim 1 : vector<16x512xf32>, i32 -> vector<16x512xf32>
    %168 = vector.extract_strided_slice %0 {offsets = [6, 0], sizes = [1, 512], strides = [1, 1]} : vector<9x512xf32> to vector<1x512xf32>
    %169 = vector.broadcast %168 : vector<1x512xf32> to vector<16x512xf32>
    %170 = arith.mulf %167, %169 : vector<16x512xf32>
    %171 = arith.truncf %170 : vector<16x512xf32> to vector<16x512xbf16>
    %c96_72 = arith.constant 96 : index
    %c0_73 = arith.constant 0 : index
    %172 = vector.load %arg39[%c96_72, %c0_73] : memref<144x512xbf16, #tpu.memory_space<vmem>>, vector<16x512xbf16>
    tpu.vector_store %arg39[%c96_72, %c0_73], %171 {strides = array<i32>} : memref<144x512xbf16, #tpu.memory_space<vmem>>, vector<16x512xbf16>,
    %c498_i32_74 = arith.constant 498 : i32
    %173 = tpu.dynamic_rotate %131 by %c498_i32_74 dim 1 : vector<16x512xf32>, i32 -> vector<16x512xf32>
    %174 = vector.extract_strided_slice %0 {offsets = [7, 0], sizes = [1, 512], strides = [1, 1]} : vector<9x512xf32> to vector<1x512xf32>
    %175 = vector.broadcast %174 : vector<1x512xf32> to vector<16x512xf32>
    %176 = arith.mulf %173, %175 : vector<16x512xf32>
    %177 = arith.truncf %176 : vector<16x512xf32> to vector<16x512xbf16>
    %c112_75 = arith.constant 112 : index
    %c0_76 = arith.constant 0 : index
    %178 = vector.load %arg39[%c112_75, %c0_76] : memref<144x512xbf16, #tpu.memory_space<vmem>>, vector<16x512xbf16>
    tpu.vector_store %arg39[%c112_75, %c0_76], %177 {strides = array<i32>} : memref<144x512xbf16, #tpu.memory_space<vmem>>, vector<16x512xbf16>,
    %c497_i32_77 = arith.constant 497 : i32
    %179 = tpu.dynamic_rotate %131 by %c497_i32_77 dim 1 : vector<16x512xf32>, i32 -> vector<16x512xf32>
    %180 = vector.extract_strided_slice %0 {offsets = [8, 0], sizes = [1, 512], strides = [1, 1]} : vector<9x512xf32> to vector<1x512xf32>
    %181 = vector.broadcast %180 : vector<1x512xf32> to vector<16x512xf32>
    %182 = arith.mulf %179, %181 : vector<16x512xf32>
    %183 = arith.truncf %182 : vector<16x512xf32> to vector<16x512xbf16>
    %c128_78 = arith.constant 128 : index
    %c0_79 = arith.constant 0 : index
    %184 = vector.load %arg39[%c128_78, %c0_79] : memref<144x512xbf16, #tpu.memory_space<vmem>>, vector<16x512xbf16>
    tpu.vector_store %arg39[%c128_78, %c0_79], %183 {strides = array<i32>} : memref<144x512xbf16, #tpu.memory_space<vmem>>, vector<16x512xbf16>,
    %c0_80 = arith.constant 0 : index
    %c0_81 = arith.constant 0 : index
    %185 = vector.load %arg39[%c0_80, %c0_81] : memref<144x512xbf16, #tpu.memory_space<vmem>>, vector<144x512xbf16>
    %cst_82 = arith.constant dense<0.000000e+00> : vector<16x512xf32>
    %186 = tpu.matmul %13, %185, %cst_82 {dimension_numbers = #tpu.dot_dimension_numbers<[1], [0], [0], [1], [0, 0, 1, 1], [], []>} : vector<16x144xbf16>, vector<144x512xbf16>, vector<16x512xf32> -> vector<16x512xf32>
    %187 = vector.broadcast %14 : vector<16x1xf32> to vector<16x512xf32>
    %188 = arith.addf %186, %187 : vector<16x512xf32>
    %189 = arith.addf %188, %131 : vector<16x512xf32>
    %cst_83 = arith.constant 0.000000e+00 : f32
    %190 = vector.broadcast %cst_83 : f32 to vector<16x512xf32>
    %191 = arith.maximumf %189, %190 : vector<16x512xf32>
    %c0_84 = arith.constant 0 : index
    %c0_85 = arith.constant 0 : index
    %192 = vector.load %arg14[%c0_84, %c0_85] : memref<4x144xbf16, #tpu.memory_space<vmem>>, vector<4x144xbf16>
    %c0_86 = arith.constant 0 : index
    %c0_87 = arith.constant 0 : index
    %193 = vector.load %arg15[%c0_86, %c0_87] : memref<4x1xf32, #tpu.memory_space<vmem>>, vector<4x1xf32>
    %c0_88 = arith.constant 0 : index
    %c0_89 = arith.constant 0 : index
    %194 = vector.load %arg16[%c0_88, %c0_89] : memref<4x1xf32, #tpu.memory_space<vmem>>, vector<4x1xf32>
    %c0_90 = arith.constant 0 : index
    %c0_91 = arith.constant 0 : index
    %195 = vector.load %arg17[%c0_90, %c0_91] : memref<4x1xf32, #tpu.memory_space<vmem>>, vector<4x1xf32>
    %c0_92 = arith.constant 0 : index
    %c0_93 = arith.constant 0 : index
    %196 = vector.load %arg18[%c0_92, %c0_93] : memref<4x36xbf16, #tpu.memory_space<vmem>>, vector<4x36xbf16>
    %c0_94 = arith.constant 0 : index
    %c0_95 = arith.constant 0 : index
    %197 = vector.load %arg19[%c0_94, %c0_95] : memref<4x1xf32, #tpu.memory_space<vmem>>, vector<4x1xf32>
    %c0_96 = arith.constant 0 : index
    %c0_97 = arith.constant 0 : index
    %198 = vector.load %arg20[%c0_96, %c0_97] : memref<4x1xf32, #tpu.memory_space<vmem>>, vector<4x1xf32>
    %c0_98 = arith.constant 0 : index
    %c0_99 = arith.constant 0 : index
    %199 = vector.load %arg21[%c0_98, %c0_99] : memref<4x1xf32, #tpu.memory_space<vmem>>, vector<4x1xf32>
    %c0_100 = arith.constant 0 : index
    %c0_101 = arith.constant 0 : index
    %200 = vector.load %arg22[%c0_100, %c0_101] : memref<4x36xbf16, #tpu.memory_space<vmem>>, vector<4x36xbf16>
    %c0_102 = arith.constant 0 : index
    %c0_103 = arith.constant 0 : index
    %201 = vector.load %arg23[%c0_102, %c0_103] : memref<4x1xf32, #tpu.memory_space<vmem>>, vector<4x1xf32>
    %c15_i32_104 = arith.constant 15 : i32
    %202 = tpu.dynamic_rotate %191 by %c15_i32_104 dim 1 : vector<16x512xf32>, i32 -> vector<16x512xf32>
    %203 = vector.extract_strided_slice %0 {offsets = [0, 0], sizes = [1, 512], strides = [1, 1]} : vector<9x512xf32> to vector<1x512xf32>
    %204 = vector.broadcast %203 : vector<1x512xf32> to vector<16x512xf32>
    %205 = arith.mulf %202, %204 : vector<16x512xf32>
    %206 = arith.truncf %205 : vector<16x512xf32> to vector<16x512xbf16>
    %c0_105 = arith.constant 0 : index
    %c0_106 = arith.constant 0 : index
    %207 = vector.load %arg39[%c0_105, %c0_106] : memref<144x512xbf16, #tpu.memory_space<vmem>>, vector<16x512xbf16>
    tpu.vector_store %arg39[%c0_105, %c0_106], %206 {strides = array<i32>} : memref<144x512xbf16, #tpu.memory_space<vmem>>, vector<16x512xbf16>,
    %c14_i32_107 = arith.constant 14 : i32
    %208 = tpu.dynamic_rotate %191 by %c14_i32_107 dim 1 : vector<16x512xf32>, i32 -> vector<16x512xf32>
    %209 = vector.extract_strided_slice %0 {offsets = [1, 0], sizes = [1, 512], strides = [1, 1]} : vector<9x512xf32> to vector<1x512xf32>
    %210 = vector.broadcast %209 : vector<1x512xf32> to vector<16x512xf32>
    %211 = arith.mulf %208, %210 : vector<16x512xf32>
    %212 = arith.truncf %211 : vector<16x512xf32> to vector<16x512xbf16>
    %c16_108 = arith.constant 16 : index
    %c0_109 = arith.constant 0 : index
    %213 = vector.load %arg39[%c16_108, %c0_109] : memref<144x512xbf16, #tpu.memory_space<vmem>>, vector<16x512xbf16>
    tpu.vector_store %arg39[%c16_108, %c0_109], %212 {strides = array<i32>} : memref<144x512xbf16, #tpu.memory_space<vmem>>, vector<16x512xbf16>,
    %c13_i32_110 = arith.constant 13 : i32
    %214 = tpu.dynamic_rotate %191 by %c13_i32_110 dim 1 : vector<16x512xf32>, i32 -> vector<16x512xf32>
    %215 = vector.extract_strided_slice %0 {offsets = [2, 0], sizes = [1, 512], strides = [1, 1]} : vector<9x512xf32> to vector<1x512xf32>
    %216 = vector.broadcast %215 : vector<1x512xf32> to vector<16x512xf32>
    %217 = arith.mulf %214, %216 : vector<16x512xf32>
    %218 = arith.truncf %217 : vector<16x512xf32> to vector<16x512xbf16>
    %c32_111 = arith.constant 32 : index
    %c0_112 = arith.constant 0 : index
    %219 = vector.load %arg39[%c32_111, %c0_112] : memref<144x512xbf16, #tpu.memory_space<vmem>>, vector<16x512xbf16>
    tpu.vector_store %arg39[%c32_111, %c0_112], %218 {strides = array<i32>} : memref<144x512xbf16, #tpu.memory_space<vmem>>, vector<16x512xbf16>,
    %c1_i32_113 = arith.constant 1 : i32
    %220 = tpu.dynamic_rotate %191 by %c1_i32_113 dim 1 : vector<16x512xf32>, i32 -> vector<16x512xf32>
    %221 = vector.extract_strided_slice %0 {offsets = [3, 0], sizes = [1, 512], strides = [1, 1]} : vector<9x512xf32> to vector<1x512xf32>
    %222 = vector.broadcast %221 : vector<1x512xf32> to vector<16x512xf32>
    %223 = arith.mulf %220, %222 : vector<16x512xf32>
    %224 = arith.truncf %223 : vector<16x512xf32> to vector<16x512xbf16>
    %c48_114 = arith.constant 48 : index
    %c0_115 = arith.constant 0 : index
    %225 = vector.load %arg39[%c48_114, %c0_115] : memref<144x512xbf16, #tpu.memory_space<vmem>>, vector<16x512xbf16>
    tpu.vector_store %arg39[%c48_114, %c0_115], %224 {strides = array<i32>} : memref<144x512xbf16, #tpu.memory_space<vmem>>, vector<16x512xbf16>,
    %226 = vector.extract_strided_slice %0 {offsets = [4, 0], sizes = [1, 512], strides = [1, 1]} : vector<9x512xf32> to vector<1x512xf32>
    %227 = vector.broadcast %226 : vector<1x512xf32> to vector<16x512xf32>
    %228 = arith.mulf %191, %227 : vector<16x512xf32>
    %229 = arith.truncf %228 : vector<16x512xf32> to vector<16x512xbf16>
    %c64_116 = arith.constant 64 : index
    %c0_117 = arith.constant 0 : index
    %230 = vector.load %arg39[%c64_116, %c0_117] : memref<144x512xbf16, #tpu.memory_space<vmem>>, vector<16x512xbf16>
    tpu.vector_store %arg39[%c64_116, %c0_117], %229 {strides = array<i32>} : memref<144x512xbf16, #tpu.memory_space<vmem>>, vector<16x512xbf16>,
    %c511_i32_118 = arith.constant 511 : i32
    %231 = tpu.dynamic_rotate %191 by %c511_i32_118 dim 1 : vector<16x512xf32>, i32 -> vector<16x512xf32>
    %232 = vector.extract_strided_slice %0 {offsets = [5, 0], sizes = [1, 512], strides = [1, 1]} : vector<9x512xf32> to vector<1x512xf32>
    %233 = vector.broadcast %232 : vector<1x512xf32> to vector<16x512xf32>
    %234 = arith.mulf %231, %233 : vector<16x512xf32>
    %235 = arith.truncf %234 : vector<16x512xf32> to vector<16x512xbf16>
    %c80_119 = arith.constant 80 : index
    %c0_120 = arith.constant 0 : index
    %236 = vector.load %arg39[%c80_119, %c0_120] : memref<144x512xbf16, #tpu.memory_space<vmem>>, vector<16x512xbf16>
    tpu.vector_store %arg39[%c80_119, %c0_120], %235 {strides = array<i32>} : memref<144x512xbf16, #tpu.memory_space<vmem>>, vector<16x512xbf16>,
    %c499_i32_121 = arith.constant 499 : i32
    %237 = tpu.dynamic_rotate %191 by %c499_i32_121 dim 1 : vector<16x512xf32>, i32 -> vector<16x512xf32>
    %238 = vector.extract_strided_slice %0 {offsets = [6, 0], sizes = [1, 512], strides = [1, 1]} : vector<9x512xf32> to vector<1x512xf32>
    %239 = vector.broadcast %238 : vector<1x512xf32> to vector<16x512xf32>
    %240 = arith.mulf %237, %239 : vector<16x512xf32>
    %241 = arith.truncf %240 : vector<16x512xf32> to vector<16x512xbf16>
    %c96_122 = arith.constant 96 : index
    %c0_123 = arith.constant 0 : index
    %242 = vector.load %arg39[%c96_122, %c0_123] : memref<144x512xbf16, #tpu.memory_space<vmem>>, vector<16x512xbf16>
    tpu.vector_store %arg39[%c96_122, %c0_123], %241 {strides = array<i32>} : memref<144x512xbf16, #tpu.memory_space<vmem>>, vector<16x512xbf16>,
    %c498_i32_124 = arith.constant 498 : i32
    %243 = tpu.dynamic_rotate %191 by %c498_i32_124 dim 1 : vector<16x512xf32>, i32 -> vector<16x512xf32>
    %244 = vector.extract_strided_slice %0 {offsets = [7, 0], sizes = [1, 512], strides = [1, 1]} : vector<9x512xf32> to vector<1x512xf32>
    %245 = vector.broadcast %244 : vector<1x512xf32> to vector<16x512xf32>
    %246 = arith.mulf %243, %245 : vector<16x512xf32>
    %247 = arith.truncf %246 : vector<16x512xf32> to vector<16x512xbf16>
    %c112_125 = arith.constant 112 : index
    %c0_126 = arith.constant 0 : index
    %248 = vector.load %arg39[%c112_125, %c0_126] : memref<144x512xbf16, #tpu.memory_space<vmem>>, vector<16x512xbf16>
    tpu.vector_store %arg39[%c112_125, %c0_126], %247 {strides = array<i32>} : memref<144x512xbf16, #tpu.memory_space<vmem>>, vector<16x512xbf16>,
    %c497_i32_127 = arith.constant 497 : i32
    %249 = tpu.dynamic_rotate %191 by %c497_i32_127 dim 1 : vector<16x512xf32>, i32 -> vector<16x512xf32>
    %250 = vector.extract_strided_slice %0 {offsets = [8, 0], sizes = [1, 512], strides = [1, 1]} : vector<9x512xf32> to vector<1x512xf32>
    %251 = vector.broadcast %250 : vector<1x512xf32> to vector<16x512xf32>
    %252 = arith.mulf %249, %251 : vector<16x512xf32>
    %253 = arith.truncf %252 : vector<16x512xf32> to vector<16x512xbf16>
    %c128_128 = arith.constant 128 : index
    %c0_129 = arith.constant 0 : index
    %254 = vector.load %arg39[%c128_128, %c0_129] : memref<144x512xbf16, #tpu.memory_space<vmem>>, vector<16x512xbf16>
    tpu.vector_store %arg39[%c128_128, %c0_129], %253 {strides = array<i32>} : memref<144x512xbf16, #tpu.memory_space<vmem>>, vector<16x512xbf16>,
    %c0_130 = arith.constant 0 : index
    %c0_131 = arith.constant 0 : index
    %255 = vector.load %arg39[%c0_130, %c0_131] : memref<144x512xbf16, #tpu.memory_space<vmem>>, vector<144x512xbf16>
    %cst_132 = arith.constant dense<0.000000e+00> : vector<4x512xf32>
    %256 = tpu.matmul %192, %255, %cst_132 {dimension_numbers = #tpu.dot_dimension_numbers<[1], [0], [0], [1], [0, 0, 1, 1], [], []>} : vector<4x144xbf16>, vector<144x512xbf16>, vector<4x512xf32> -> vector<4x512xf32>
    %257 = vector.broadcast %193 : vector<4x1xf32> to vector<4x512xf32>
    %258 = arith.addf %256, %257 : vector<4x512xf32>
    %259 = vector.extract_strided_slice %258 {offsets = [0, 0], sizes = [4, 256], strides = [1, 1]} : vector<4x512xf32> to vector<4x256xf32>
    %cst_133 = arith.constant dense<0.000000e+00> : vector<4x128xf32>
    %260 = tpu.matmul %259, %4, %cst_133 {dimension_numbers = #tpu.dot_dimension_numbers<[1], [0], [0], [1], [0, 0, 1, 1], [], []>} : vector<4x256xf32>, vector<256x128xf32>, vector<4x128xf32> -> vector<4x128xf32>
    %c0_134 = arith.constant 0 : index
    %c0_135 = arith.constant 0 : index
    %261 = vector.load %arg40[%c0_134, %c0_135] : memref<4x256xf32, #tpu.memory_space<vmem>>, vector<4x128xf32>
    tpu.vector_store %arg40[%c0_134, %c0_135], %260 {strides = array<i32>} : memref<4x256xf32, #tpu.memory_space<vmem>>, vector<4x128xf32>,
    %262 = vector.extract_strided_slice %258 {offsets = [0, 256], sizes = [4, 256], strides = [1, 1]} : vector<4x512xf32> to vector<4x256xf32>
    %cst_136 = arith.constant dense<0.000000e+00> : vector<4x128xf32>
    %263 = tpu.matmul %262, %4, %cst_136 {dimension_numbers = #tpu.dot_dimension_numbers<[1], [0], [0], [1], [0, 0, 1, 1], [], []>} : vector<4x256xf32>, vector<256x128xf32>, vector<4x128xf32> -> vector<4x128xf32>
    %c0_137 = arith.constant 0 : index
    %c128_138 = arith.constant 128 : index
    %264 = vector.load %arg40[%c0_137, %c128_138] : memref<4x256xf32, #tpu.memory_space<vmem>>, vector<4x128xf32>
    tpu.vector_store %arg40[%c0_137, %c128_138], %263 {strides = array<i32>} : memref<4x256xf32, #tpu.memory_space<vmem>>, vector<4x128xf32>,
    %c0_139 = arith.constant 0 : index
    %c0_140 = arith.constant 0 : index
    %265 = vector.load %arg40[%c0_139, %c0_140] : memref<4x256xf32, #tpu.memory_space<vmem>>, vector<4x256xf32>
    %266 = vector.broadcast %3 : vector<1x256xf32> to vector<4x256xf32>
    %267 = arith.mulf %265, %266 : vector<4x256xf32>
    %cst_141 = arith.constant dense<0.000000e+00> : vector<4xf32>
    %268 = vector.multi_reduction <add>, %267, %cst_141 [1] : vector<4x256xf32> to vector<4xf32>
    %269 = vector.shape_cast %268 : vector<4xf32> to vector<4x1xf32>
    %cst_142 = arith.constant 0.0102040814 : f32
    %270 = vector.broadcast %cst_142 : f32 to vector<4x1xf32>
    %271 = arith.mulf %269, %270 : vector<4x1xf32>
    %272 = arith.mulf %267, %267 : vector<4x256xf32>
    %cst_143 = arith.constant dense<0.000000e+00> : vector<4xf32>
    %273 = vector.multi_reduction <add>, %272, %cst_143 [1] : vector<4x256xf32> to vector<4xf32>
    %274 = vector.shape_cast %273 : vector<4xf32> to vector<4x1xf32>
    %cst_144 = arith.constant 0.0102040814 : f32
    %275 = vector.broadcast %cst_144 : f32 to vector<4x1xf32>
    %276 = arith.mulf %274, %275 : vector<4x1xf32>
    %277 = arith.mulf %271, %271 : vector<4x1xf32>
    %278 = arith.subf %276, %277 : vector<4x1xf32>
    %cst_145 = arith.constant 0.000000e+00 : f32
    %279 = vector.broadcast %cst_145 : f32 to vector<4x1xf32>
    %280 = arith.maximumf %278, %279 : vector<4x1xf32>
    %281 = vector.broadcast %271 : vector<4x1xf32> to vector<4x256xf32>
    %282 = arith.subf %267, %281 : vector<4x256xf32>
    %cst_146 = arith.constant 9.99999974E-6 : f32
    %283 = vector.broadcast %cst_146 : f32 to vector<4x1xf32>
    %284 = arith.addf %280, %283 : vector<4x1xf32>
    %285 = math.rsqrt %284 : vector<4x1xf32>
    %286 = vector.broadcast %285 : vector<4x1xf32> to vector<4x256xf32>
    %287 = arith.mulf %282, %286 : vector<4x256xf32>
    %288 = vector.broadcast %194 : vector<4x1xf32> to vector<4x256xf32>
    %289 = arith.mulf %287, %288 : vector<4x256xf32>
    %290 = vector.broadcast %195 : vector<4x1xf32> to vector<4x256xf32>
    %291 = arith.addf %289, %290 : vector<4x256xf32>
    %cst_147 = arith.constant 0.000000e+00 : f32
    %292 = vector.broadcast %cst_147 : f32 to vector<4x256xf32>
    %293 = arith.maximumf %291, %292 : vector<4x256xf32>
    %c8_i32 = arith.constant 8 : i32
    %294 = tpu.dynamic_rotate %293 by %c8_i32 dim 1 : vector<4x256xf32>, i32 -> vector<4x256xf32>
    %295 = vector.extract_strided_slice %1 {offsets = [0, 0], sizes = [1, 256], strides = [1, 1]} : vector<9x256xf32> to vector<1x256xf32>
    %296 = vector.broadcast %295 : vector<1x256xf32> to vector<4x256xf32>
    %297 = arith.mulf %294, %296 : vector<4x256xf32>
    %298 = vector.extract_strided_slice %196 {offsets = [0, 0], sizes = [4, 4], strides = [1, 1]} : vector<4x36xbf16> to vector<4x4xbf16>
    %299 = arith.truncf %297 : vector<4x256xf32> to vector<4x256xbf16>
    %cst_148 = arith.constant dense<0.000000e+00> : vector<4x256xf32>
    %300 = tpu.matmul %298, %299, %cst_148 {dimension_numbers = #tpu.dot_dimension_numbers<[1], [0], [0], [1], [0, 0, 1, 1], [], []>} : vector<4x4xbf16>, vector<4x256xbf16>, vector<4x256xf32> -> vector<4x256xf32>
    %c7_i32 = arith.constant 7 : i32
    %301 = tpu.dynamic_rotate %293 by %c7_i32 dim 1 : vector<4x256xf32>, i32 -> vector<4x256xf32>
    %302 = vector.extract_strided_slice %1 {offsets = [1, 0], sizes = [1, 256], strides = [1, 1]} : vector<9x256xf32> to vector<1x256xf32>
    %303 = vector.broadcast %302 : vector<1x256xf32> to vector<4x256xf32>
    %304 = arith.mulf %301, %303 : vector<4x256xf32>
    %305 = vector.extract_strided_slice %196 {offsets = [0, 4], sizes = [4, 4], strides = [1, 1]} : vector<4x36xbf16> to vector<4x4xbf16>
    %306 = arith.truncf %304 : vector<4x256xf32> to vector<4x256xbf16>
    %cst_149 = arith.constant dense<0.000000e+00> : vector<4x256xf32>
    %307 = tpu.matmul %305, %306, %cst_149 {dimension_numbers = #tpu.dot_dimension_numbers<[1], [0], [0], [1], [0, 0, 1, 1], [], []>} : vector<4x4xbf16>, vector<4x256xbf16>, vector<4x256xf32> -> vector<4x256xf32>
    %308 = arith.addf %300, %307 : vector<4x256xf32>
    %c6_i32 = arith.constant 6 : i32
    %309 = tpu.dynamic_rotate %293 by %c6_i32 dim 1 : vector<4x256xf32>, i32 -> vector<4x256xf32>
    %310 = vector.extract_strided_slice %1 {offsets = [2, 0], sizes = [1, 256], strides = [1, 1]} : vector<9x256xf32> to vector<1x256xf32>
    %311 = vector.broadcast %310 : vector<1x256xf32> to vector<4x256xf32>
    %312 = arith.mulf %309, %311 : vector<4x256xf32>
    %313 = vector.extract_strided_slice %196 {offsets = [0, 8], sizes = [4, 4], strides = [1, 1]} : vector<4x36xbf16> to vector<4x4xbf16>
    %314 = arith.truncf %312 : vector<4x256xf32> to vector<4x256xbf16>
    %cst_150 = arith.constant dense<0.000000e+00> : vector<4x256xf32>
    %315 = tpu.matmul %313, %314, %cst_150 {dimension_numbers = #tpu.dot_dimension_numbers<[1], [0], [0], [1], [0, 0, 1, 1], [], []>} : vector<4x4xbf16>, vector<4x256xbf16>, vector<4x256xf32> -> vector<4x256xf32>
    %316 = arith.addf %308, %315 : vector<4x256xf32>
    %c1_i32_151 = arith.constant 1 : i32
    %317 = tpu.dynamic_rotate %293 by %c1_i32_151 dim 1 : vector<4x256xf32>, i32 -> vector<4x256xf32>
    %318 = vector.extract_strided_slice %1 {offsets = [3, 0], sizes = [1, 256], strides = [1, 1]} : vector<9x256xf32> to vector<1x256xf32>
    %319 = vector.broadcast %318 : vector<1x256xf32> to vector<4x256xf32>
    %320 = arith.mulf %317, %319 : vector<4x256xf32>
    %321 = vector.extract_strided_slice %196 {offsets = [0, 12], sizes = [4, 4], strides = [1, 1]} : vector<4x36xbf16> to vector<4x4xbf16>
    %322 = arith.truncf %320 : vector<4x256xf32> to vector<4x256xbf16>
    %cst_152 = arith.constant dense<0.000000e+00> : vector<4x256xf32>
    %323 = tpu.matmul %321, %322, %cst_152 {dimension_numbers = #tpu.dot_dimension_numbers<[1], [0], [0], [1], [0, 0, 1, 1], [], []>} : vector<4x4xbf16>, vector<4x256xbf16>, vector<4x256xf32> -> vector<4x256xf32>
    %324 = arith.addf %316, %323 : vector<4x256xf32>
    %325 = vector.extract_strided_slice %1 {offsets = [4, 0], sizes = [1, 256], strides = [1, 1]} : vector<9x256xf32> to vector<1x256xf32>
    %326 = vector.broadcast %325 : vector<1x256xf32> to vector<4x256xf32>
    %327 = arith.mulf %293, %326 : vector<4x256xf32>
    %328 = vector.extract_strided_slice %196 {offsets = [0, 16], sizes = [4, 4], strides = [1, 1]} : vector<4x36xbf16> to vector<4x4xbf16>
    %329 = arith.truncf %327 : vector<4x256xf32> to vector<4x256xbf16>
    %cst_153 = arith.constant dense<0.000000e+00> : vector<4x256xf32>
    %330 = tpu.matmul %328, %329, %cst_153 {dimension_numbers = #tpu.dot_dimension_numbers<[1], [0], [0], [1], [0, 0, 1, 1], [], []>} : vector<4x4xbf16>, vector<4x256xbf16>, vector<4x256xf32> -> vector<4x256xf32>
    %331 = arith.addf %324, %330 : vector<4x256xf32>
    %c255_i32 = arith.constant 255 : i32
    %332 = tpu.dynamic_rotate %293 by %c255_i32 dim 1 : vector<4x256xf32>, i32 -> vector<4x256xf32>
    %333 = vector.extract_strided_slice %1 {offsets = [5, 0], sizes = [1, 256], strides = [1, 1]} : vector<9x256xf32> to vector<1x256xf32>
    %334 = vector.broadcast %333 : vector<1x256xf32> to vector<4x256xf32>
    %335 = arith.mulf %332, %334 : vector<4x256xf32>
    %336 = vector.extract_strided_slice %196 {offsets = [0, 20], sizes = [4, 4], strides = [1, 1]} : vector<4x36xbf16> to vector<4x4xbf16>
    %337 = arith.truncf %335 : vector<4x256xf32> to vector<4x256xbf16>
    %cst_154 = arith.constant dense<0.000000e+00> : vector<4x256xf32>
    %338 = tpu.matmul %336, %337, %cst_154 {dimension_numbers = #tpu.dot_dimension_numbers<[1], [0], [0], [1], [0, 0, 1, 1], [], []>} : vector<4x4xbf16>, vector<4x256xbf16>, vector<4x256xf32> -> vector<4x256xf32>
    %339 = arith.addf %331, %338 : vector<4x256xf32>
    %c250_i32 = arith.constant 250 : i32
    %340 = tpu.dynamic_rotate %293 by %c250_i32 dim 1 : vector<4x256xf32>, i32 -> vector<4x256xf32>
    %341 = vector.extract_strided_slice %1 {offsets = [6, 0], sizes = [1, 256], strides = [1, 1]} : vector<9x256xf32> to vector<1x256xf32>
    %342 = vector.broadcast %341 : vector<1x256xf32> to vector<4x256xf32>
    %343 = arith.mulf %340, %342 : vector<4x256xf32>
    %344 = vector.extract_strided_slice %196 {offsets = [0, 24], sizes = [4, 4], strides = [1, 1]} : vector<4x36xbf16> to vector<4x4xbf16>
    %345 = arith.truncf %343 : vector<4x256xf32> to vector<4x256xbf16>
    %cst_155 = arith.constant dense<0.000000e+00> : vector<4x256xf32>
    %346 = tpu.matmul %344, %345, %cst_155 {dimension_numbers = #tpu.dot_dimension_numbers<[1], [0], [0], [1], [0, 0, 1, 1], [], []>} : vector<4x4xbf16>, vector<4x256xbf16>, vector<4x256xf32> -> vector<4x256xf32>
    %347 = arith.addf %339, %346 : vector<4x256xf32>
    %c249_i32 = arith.constant 249 : i32
    %348 = tpu.dynamic_rotate %293 by %c249_i32 dim 1 : vector<4x256xf32>, i32 -> vector<4x256xf32>
    %349 = vector.extract_strided_slice %1 {offsets = [7, 0], sizes = [1, 256], strides = [1, 1]} : vector<9x256xf32> to vector<1x256xf32>
    %350 = vector.broadcast %349 : vector<1x256xf32> to vector<4x256xf32>
    %351 = arith.mulf %348, %350 : vector<4x256xf32>
    %352 = vector.extract_strided_slice %196 {offsets = [0, 28], sizes = [4, 4], strides = [1, 1]} : vector<4x36xbf16> to vector<4x4xbf16>
    %353 = arith.truncf %351 : vector<4x256xf32> to vector<4x256xbf16>
    %cst_156 = arith.constant dense<0.000000e+00> : vector<4x256xf32>
    %354 = tpu.matmul %352, %353, %cst_156 {dimension_numbers = #tpu.dot_dimension_numbers<[1], [0], [0], [1], [0, 0, 1, 1], [], []>} : vector<4x4xbf16>, vector<4x256xbf16>, vector<4x256xf32> -> vector<4x256xf32>
    %355 = arith.addf %347, %354 : vector<4x256xf32>
    %c248_i32 = arith.constant 248 : i32
    %356 = tpu.dynamic_rotate %293 by %c248_i32 dim 1 : vector<4x256xf32>, i32 -> vector<4x256xf32>
    %357 = vector.extract_strided_slice %1 {offsets = [8, 0], sizes = [1, 256], strides = [1, 1]} : vector<9x256xf32> to vector<1x256xf32>
    %358 = vector.broadcast %357 : vector<1x256xf32> to vector<4x256xf32>
    %359 = arith.mulf %356, %358 : vector<4x256xf32>
    %360 = vector.extract_strided_slice %196 {offsets = [0, 32], sizes = [4, 4], strides = [1, 1]} : vector<4x36xbf16> to vector<4x4xbf16>
    %361 = arith.truncf %359 : vector<4x256xf32> to vector<4x256xbf16>
    %cst_157 = arith.constant dense<0.000000e+00> : vector<4x256xf32>
    %362 = tpu.matmul %360, %361, %cst_157 {dimension_numbers = #tpu.dot_dimension_numbers<[1], [0], [0], [1], [0, 0, 1, 1], [], []>} : vector<4x4xbf16>, vector<4x256xbf16>, vector<4x256xf32> -> vector<4x256xf32>
    %363 = arith.addf %355, %362 : vector<4x256xf32>
    %364 = vector.broadcast %197 : vector<4x1xf32> to vector<4x256xf32>
    %365 = arith.addf %363, %364 : vector<4x256xf32>
    %366 = vector.broadcast %3 : vector<1x256xf32> to vector<4x256xf32>
    %367 = arith.mulf %365, %366 : vector<4x256xf32>
    %cst_158 = arith.constant dense<0.000000e+00> : vector<4xf32>
    %368 = vector.multi_reduction <add>, %367, %cst_158 [1] : vector<4x256xf32> to vector<4xf32>
    %369 = vector.shape_cast %368 : vector<4xf32> to vector<4x1xf32>
    %cst_159 = arith.constant 0.0102040814 : f32
    %370 = vector.broadcast %cst_159 : f32 to vector<4x1xf32>
    %371 = arith.mulf %369, %370 : vector<4x1xf32>
    %372 = arith.mulf %367, %367 : vector<4x256xf32>
    %cst_160 = arith.constant dense<0.000000e+00> : vector<4xf32>
    %373 = vector.multi_reduction <add>, %372, %cst_160 [1] : vector<4x256xf32> to vector<4xf32>
    %374 = vector.shape_cast %373 : vector<4xf32> to vector<4x1xf32>
    %cst_161 = arith.constant 0.0102040814 : f32
    %375 = vector.broadcast %cst_161 : f32 to vector<4x1xf32>
    %376 = arith.mulf %374, %375 : vector<4x1xf32>
    %377 = arith.mulf %371, %371 : vector<4x1xf32>
    %378 = arith.subf %376, %377 : vector<4x1xf32>
    %cst_162 = arith.constant 0.000000e+00 : f32
    %379 = vector.broadcast %cst_162 : f32 to vector<4x1xf32>
    %380 = arith.maximumf %378, %379 : vector<4x1xf32>
    %381 = vector.broadcast %371 : vector<4x1xf32> to vector<4x256xf32>
    %382 = arith.subf %367, %381 : vector<4x256xf32>
    %cst_163 = arith.constant 9.99999974E-6 : f32
    %383 = vector.broadcast %cst_163 : f32 to vector<4x1xf32>
    %384 = arith.addf %380, %383 : vector<4x1xf32>
    %385 = math.rsqrt %384 : vector<4x1xf32>
    %386 = vector.broadcast %385 : vector<4x1xf32> to vector<4x256xf32>
    %387 = arith.mulf %382, %386 : vector<4x256xf32>
    %388 = vector.broadcast %198 : vector<4x1xf32> to vector<4x256xf32>
    %389 = arith.mulf %387, %388 : vector<4x256xf32>
    %390 = vector.broadcast %199 : vector<4x1xf32> to vector<4x256xf32>
    %391 = arith.addf %389, %390 : vector<4x256xf32>
    %cst_164 = arith.constant 0.000000e+00 : f32
    %392 = vector.broadcast %cst_164 : f32 to vector<4x256xf32>
    %393 = arith.maximumf %391, %392 : vector<4x256xf32>
    %c8_i32_165 = arith.constant 8 : i32
    %394 = tpu.dynamic_rotate %393 by %c8_i32_165 dim 1 : vector<4x256xf32>, i32 -> vector<4x256xf32>
    %395 = vector.extract_strided_slice %1 {offsets = [0, 0], sizes = [1, 256], strides = [1, 1]} : vector<9x256xf32> to vector<1x256xf32>
    %396 = vector.broadcast %395 : vector<1x256xf32> to vector<4x256xf32>
    %397 = arith.mulf %394, %396 : vector<4x256xf32>
    %398 = vector.extract_strided_slice %200 {offsets = [0, 0], sizes = [4, 4], strides = [1, 1]} : vector<4x36xbf16> to vector<4x4xbf16>
    %399 = arith.truncf %397 : vector<4x256xf32> to vector<4x256xbf16>
    %cst_166 = arith.constant dense<0.000000e+00> : vector<4x256xf32>
    %400 = tpu.matmul %398, %399, %cst_166 {dimension_numbers = #tpu.dot_dimension_numbers<[1], [0], [0], [1], [0, 0, 1, 1], [], []>} : vector<4x4xbf16>, vector<4x256xbf16>, vector<4x256xf32> -> vector<4x256xf32>
    %c7_i32_167 = arith.constant 7 : i32
    %401 = tpu.dynamic_rotate %393 by %c7_i32_167 dim 1 : vector<4x256xf32>, i32 -> vector<4x256xf32>
    %402 = vector.extract_strided_slice %1 {offsets = [1, 0], sizes = [1, 256], strides = [1, 1]} : vector<9x256xf32> to vector<1x256xf32>
    %403 = vector.broadcast %402 : vector<1x256xf32> to vector<4x256xf32>
    %404 = arith.mulf %401, %403 : vector<4x256xf32>
    %405 = vector.extract_strided_slice %200 {offsets = [0, 4], sizes = [4, 4], strides = [1, 1]} : vector<4x36xbf16> to vector<4x4xbf16>
    %406 = arith.truncf %404 : vector<4x256xf32> to vector<4x256xbf16>
    %cst_168 = arith.constant dense<0.000000e+00> : vector<4x256xf32>
    %407 = tpu.matmul %405, %406, %cst_168 {dimension_numbers = #tpu.dot_dimension_numbers<[1], [0], [0], [1], [0, 0, 1, 1], [], []>} : vector<4x4xbf16>, vector<4x256xbf16>, vector<4x256xf32> -> vector<4x256xf32>
    %408 = arith.addf %400, %407 : vector<4x256xf32>
    %c6_i32_169 = arith.constant 6 : i32
    %409 = tpu.dynamic_rotate %393 by %c6_i32_169 dim 1 : vector<4x256xf32>, i32 -> vector<4x256xf32>
    %410 = vector.extract_strided_slice %1 {offsets = [2, 0], sizes = [1, 256], strides = [1, 1]} : vector<9x256xf32> to vector<1x256xf32>
    %411 = vector.broadcast %410 : vector<1x256xf32> to vector<4x256xf32>
    %412 = arith.mulf %409, %411 : vector<4x256xf32>
    %413 = vector.extract_strided_slice %200 {offsets = [0, 8], sizes = [4, 4], strides = [1, 1]} : vector<4x36xbf16> to vector<4x4xbf16>
    %414 = arith.truncf %412 : vector<4x256xf32> to vector<4x256xbf16>
    %cst_170 = arith.constant dense<0.000000e+00> : vector<4x256xf32>
    %415 = tpu.matmul %413, %414, %cst_170 {dimension_numbers = #tpu.dot_dimension_numbers<[1], [0], [0], [1], [0, 0, 1, 1], [], []>} : vector<4x4xbf16>, vector<4x256xbf16>, vector<4x256xf32> -> vector<4x256xf32>
    %416 = arith.addf %408, %415 : vector<4x256xf32>
    %c1_i32_171 = arith.constant 1 : i32
    %417 = tpu.dynamic_rotate %393 by %c1_i32_171 dim 1 : vector<4x256xf32>, i32 -> vector<4x256xf32>
    %418 = vector.extract_strided_slice %1 {offsets = [3, 0], sizes = [1, 256], strides = [1, 1]} : vector<9x256xf32> to vector<1x256xf32>
    %419 = vector.broadcast %418 : vector<1x256xf32> to vector<4x256xf32>
    %420 = arith.mulf %417, %419 : vector<4x256xf32>
    %421 = vector.extract_strided_slice %200 {offsets = [0, 12], sizes = [4, 4], strides = [1, 1]} : vector<4x36xbf16> to vector<4x4xbf16>
    %422 = arith.truncf %420 : vector<4x256xf32> to vector<4x256xbf16>
    %cst_172 = arith.constant dense<0.000000e+00> : vector<4x256xf32>
    %423 = tpu.matmul %421, %422, %cst_172 {dimension_numbers = #tpu.dot_dimension_numbers<[1], [0], [0], [1], [0, 0, 1, 1], [], []>} : vector<4x4xbf16>, vector<4x256xbf16>, vector<4x256xf32> -> vector<4x256xf32>
    %424 = arith.addf %416, %423 : vector<4x256xf32>
    %425 = vector.extract_strided_slice %1 {offsets = [4, 0], sizes = [1, 256], strides = [1, 1]} : vector<9x256xf32> to vector<1x256xf32>
    %426 = vector.broadcast %425 : vector<1x256xf32> to vector<4x256xf32>
    %427 = arith.mulf %393, %426 : vector<4x256xf32>
    %428 = vector.extract_strided_slice %200 {offsets = [0, 16], sizes = [4, 4], strides = [1, 1]} : vector<4x36xbf16> to vector<4x4xbf16>
    %429 = arith.truncf %427 : vector<4x256xf32> to vector<4x256xbf16>
    %cst_173 = arith.constant dense<0.000000e+00> : vector<4x256xf32>
    %430 = tpu.matmul %428, %429, %cst_173 {dimension_numbers = #tpu.dot_dimension_numbers<[1], [0], [0], [1], [0, 0, 1, 1], [], []>} : vector<4x4xbf16>, vector<4x256xbf16>, vector<4x256xf32> -> vector<4x256xf32>
    %431 = arith.addf %424, %430 : vector<4x256xf32>
    %c255_i32_174 = arith.constant 255 : i32
    %432 = tpu.dynamic_rotate %393 by %c255_i32_174 dim 1 : vector<4x256xf32>, i32 -> vector<4x256xf32>
    %433 = vector.extract_strided_slice %1 {offsets = [5, 0], sizes = [1, 256], strides = [1, 1]} : vector<9x256xf32> to vector<1x256xf32>
    %434 = vector.broadcast %433 : vector<1x256xf32> to vector<4x256xf32>
    %435 = arith.mulf %432, %434 : vector<4x256xf32>
    %436 = vector.extract_strided_slice %200 {offsets = [0, 20], sizes = [4, 4], strides = [1, 1]} : vector<4x36xbf16> to vector<4x4xbf16>
    %437 = arith.truncf %435 : vector<4x256xf32> to vector<4x256xbf16>
    %cst_175 = arith.constant dense<0.000000e+00> : vector<4x256xf32>
    %438 = tpu.matmul %436, %437, %cst_175 {dimension_numbers = #tpu.dot_dimension_numbers<[1], [0], [0], [1], [0, 0, 1, 1], [], []>} : vector<4x4xbf16>, vector<4x256xbf16>, vector<4x256xf32> -> vector<4x256xf32>
    %439 = arith.addf %431, %438 : vector<4x256xf32>
    %c250_i32_176 = arith.constant 250 : i32
    %440 = tpu.dynamic_rotate %393 by %c250_i32_176 dim 1 : vector<4x256xf32>, i32 -> vector<4x256xf32>
    %441 = vector.extract_strided_slice %1 {offsets = [6, 0], sizes = [1, 256], strides = [1, 1]} : vector<9x256xf32> to vector<1x256xf32>
    %442 = vector.broadcast %441 : vector<1x256xf32> to vector<4x256xf32>
    %443 = arith.mulf %440, %442 : vector<4x256xf32>
    %444 = vector.extract_strided_slice %200 {offsets = [0, 24], sizes = [4, 4], strides = [1, 1]} : vector<4x36xbf16> to vector<4x4xbf16>
    %445 = arith.truncf %443 : vector<4x256xf32> to vector<4x256xbf16>
    %cst_177 = arith.constant dense<0.000000e+00> : vector<4x256xf32>
    %446 = tpu.matmul %444, %445, %cst_177 {dimension_numbers = #tpu.dot_dimension_numbers<[1], [0], [0], [1], [0, 0, 1, 1], [], []>} : vector<4x4xbf16>, vector<4x256xbf16>, vector<4x256xf32> -> vector<4x256xf32>
    %447 = arith.addf %439, %446 : vector<4x256xf32>
    %c249_i32_178 = arith.constant 249 : i32
    %448 = tpu.dynamic_rotate %393 by %c249_i32_178 dim 1 : vector<4x256xf32>, i32 -> vector<4x256xf32>
    %449 = vector.extract_strided_slice %1 {offsets = [7, 0], sizes = [1, 256], strides = [1, 1]} : vector<9x256xf32> to vector<1x256xf32>
    %450 = vector.broadcast %449 : vector<1x256xf32> to vector<4x256xf32>
    %451 = arith.mulf %448, %450 : vector<4x256xf32>
    %452 = vector.extract_strided_slice %200 {offsets = [0, 28], sizes = [4, 4], strides = [1, 1]} : vector<4x36xbf16> to vector<4x4xbf16>
    %453 = arith.truncf %451 : vector<4x256xf32> to vector<4x256xbf16>
    %cst_179 = arith.constant dense<0.000000e+00> : vector<4x256xf32>
    %454 = tpu.matmul %452, %453, %cst_179 {dimension_numbers = #tpu.dot_dimension_numbers<[1], [0], [0], [1], [0, 0, 1, 1], [], []>} : vector<4x4xbf16>, vector<4x256xbf16>, vector<4x256xf32> -> vector<4x256xf32>
    %455 = arith.addf %447, %454 : vector<4x256xf32>
    %c248_i32_180 = arith.constant 248 : i32
    %456 = tpu.dynamic_rotate %393 by %c248_i32_180 dim 1 : vector<4x256xf32>, i32 -> vector<4x256xf32>
    %457 = vector.extract_strided_slice %1 {offsets = [8, 0], sizes = [1, 256], strides = [1, 1]} : vector<9x256xf32> to vector<1x256xf32>
    %458 = vector.broadcast %457 : vector<1x256xf32> to vector<4x256xf32>
    %459 = arith.mulf %456, %458 : vector<4x256xf32>
    %460 = vector.extract_strided_slice %200 {offsets = [0, 32], sizes = [4, 4], strides = [1, 1]} : vector<4x36xbf16> to vector<4x4xbf16>
    %461 = arith.truncf %459 : vector<4x256xf32> to vector<4x256xbf16>
    %cst_181 = arith.constant dense<0.000000e+00> : vector<4x256xf32>
    %462 = tpu.matmul %460, %461, %cst_181 {dimension_numbers = #tpu.dot_dimension_numbers<[1], [0], [0], [1], [0, 0, 1, 1], [], []>} : vector<4x4xbf16>, vector<4x256xbf16>, vector<4x256xf32> -> vector<4x256xf32>
    %463 = arith.addf %455, %462 : vector<4x256xf32>
    %464 = vector.broadcast %201 : vector<4x1xf32> to vector<4x256xf32>
    %465 = arith.addf %463, %464 : vector<4x256xf32>
    %466 = arith.addf %465, %393 : vector<4x256xf32>
    %cst_182 = arith.constant 0.000000e+00 : f32
    %467 = vector.broadcast %cst_182 : f32 to vector<4x256xf32>
    %468 = arith.maximumf %466, %467 : vector<4x256xf32>
    %c0_183 = arith.constant 0 : index
    %c0_184 = arith.constant 0 : index
    %469 = vector.load %arg24[%c0_183, %c0_184] : memref<1x36xbf16, #tpu.memory_space<vmem>>, vector<1x36xbf16>
    %c0_185 = arith.constant 0 : index
    %c0_186 = arith.constant 0 : index
    %470 = vector.load %arg25[%c0_185, %c0_186] : memref<1x1xf32, #tpu.memory_space<vmem>>, vector<1x1xf32>
    %c0_187 = arith.constant 0 : index
    %c0_188 = arith.constant 0 : index
    %471 = vector.load %arg26[%c0_187, %c0_188] : memref<1x1xf32, #tpu.memory_space<vmem>>, vector<1x1xf32>
    %c0_189 = arith.constant 0 : index
    %c0_190 = arith.constant 0 : index
    %472 = vector.load %arg27[%c0_189, %c0_190] : memref<1x1xf32, #tpu.memory_space<vmem>>, vector<1x1xf32>
    %c0_191 = arith.constant 0 : index
    %c0_192 = arith.constant 0 : index
    %473 = vector.load %arg28[%c0_191, %c0_192] : memref<1x9xbf16, #tpu.memory_space<vmem>>, vector<1x9xbf16>
    %c0_193 = arith.constant 0 : index
    %c0_194 = arith.constant 0 : index
    %474 = vector.load %arg29[%c0_193, %c0_194] : memref<1x1xf32, #tpu.memory_space<vmem>>, vector<1x1xf32>
    %c0_195 = arith.constant 0 : index
    %c0_196 = arith.constant 0 : index
    %475 = vector.load %arg30[%c0_195, %c0_196] : memref<1x1xf32, #tpu.memory_space<vmem>>, vector<1x1xf32>
    %c0_197 = arith.constant 0 : index
    %c0_198 = arith.constant 0 : index
    %476 = vector.load %arg31[%c0_197, %c0_198] : memref<1x1xf32, #tpu.memory_space<vmem>>, vector<1x1xf32>
    %c0_199 = arith.constant 0 : index
    %c0_200 = arith.constant 0 : index
    %477 = vector.load %arg32[%c0_199, %c0_200] : memref<1x9xbf16, #tpu.memory_space<vmem>>, vector<1x9xbf16>
    %c0_201 = arith.constant 0 : index
    %c0_202 = arith.constant 0 : index
    %478 = vector.load %arg33[%c0_201, %c0_202] : memref<1x1xf32, #tpu.memory_space<vmem>>, vector<1x1xf32>
    %c8_i32_203 = arith.constant 8 : i32
    %479 = tpu.dynamic_rotate %468 by %c8_i32_203 dim 1 : vector<4x256xf32>, i32 -> vector<4x256xf32>
    %480 = vector.extract_strided_slice %1 {offsets = [0, 0], sizes = [1, 256], strides = [1, 1]} : vector<9x256xf32> to vector<1x256xf32>
    %481 = vector.broadcast %480 : vector<1x256xf32> to vector<4x256xf32>
    %482 = arith.mulf %479, %481 : vector<4x256xf32>
    %483 = vector.extract_strided_slice %469 {offsets = [0, 0], sizes = [1, 4], strides = [1, 1]} : vector<1x36xbf16> to vector<1x4xbf16>
    %484 = arith.truncf %482 : vector<4x256xf32> to vector<4x256xbf16>
    %cst_204 = arith.constant dense<0.000000e+00> : vector<1x256xf32>
    %485 = tpu.matmul %483, %484, %cst_204 {dimension_numbers = #tpu.dot_dimension_numbers<[1], [0], [0], [1], [0, 0, 1, 1], [], []>} : vector<1x4xbf16>, vector<4x256xbf16>, vector<1x256xf32> -> vector<1x256xf32>
    %c7_i32_205 = arith.constant 7 : i32
    %486 = tpu.dynamic_rotate %468 by %c7_i32_205 dim 1 : vector<4x256xf32>, i32 -> vector<4x256xf32>
    %487 = vector.extract_strided_slice %1 {offsets = [1, 0], sizes = [1, 256], strides = [1, 1]} : vector<9x256xf32> to vector<1x256xf32>
    %488 = vector.broadcast %487 : vector<1x256xf32> to vector<4x256xf32>
    %489 = arith.mulf %486, %488 : vector<4x256xf32>
    %490 = vector.extract_strided_slice %469 {offsets = [0, 4], sizes = [1, 4], strides = [1, 1]} : vector<1x36xbf16> to vector<1x4xbf16>
    %491 = arith.truncf %489 : vector<4x256xf32> to vector<4x256xbf16>
    %cst_206 = arith.constant dense<0.000000e+00> : vector<1x256xf32>
    %492 = tpu.matmul %490, %491, %cst_206 {dimension_numbers = #tpu.dot_dimension_numbers<[1], [0], [0], [1], [0, 0, 1, 1], [], []>} : vector<1x4xbf16>, vector<4x256xbf16>, vector<1x256xf32> -> vector<1x256xf32>
    %493 = arith.addf %485, %492 : vector<1x256xf32>
    %c6_i32_207 = arith.constant 6 : i32
    %494 = tpu.dynamic_rotate %468 by %c6_i32_207 dim 1 : vector<4x256xf32>, i32 -> vector<4x256xf32>
    %495 = vector.extract_strided_slice %1 {offsets = [2, 0], sizes = [1, 256], strides = [1, 1]} : vector<9x256xf32> to vector<1x256xf32>
    %496 = vector.broadcast %495 : vector<1x256xf32> to vector<4x256xf32>
    %497 = arith.mulf %494, %496 : vector<4x256xf32>
    %498 = vector.extract_strided_slice %469 {offsets = [0, 8], sizes = [1, 4], strides = [1, 1]} : vector<1x36xbf16> to vector<1x4xbf16>
    %499 = arith.truncf %497 : vector<4x256xf32> to vector<4x256xbf16>
    %cst_208 = arith.constant dense<0.000000e+00> : vector<1x256xf32>
    %500 = tpu.matmul %498, %499, %cst_208 {dimension_numbers = #tpu.dot_dimension_numbers<[1], [0], [0], [1], [0, 0, 1, 1], [], []>} : vector<1x4xbf16>, vector<4x256xbf16>, vector<1x256xf32> -> vector<1x256xf32>
    %501 = arith.addf %493, %500 : vector<1x256xf32>
    %c1_i32_209 = arith.constant 1 : i32
    %502 = tpu.dynamic_rotate %468 by %c1_i32_209 dim 1 : vector<4x256xf32>, i32 -> vector<4x256xf32>
    %503 = vector.extract_strided_slice %1 {offsets = [3, 0], sizes = [1, 256], strides = [1, 1]} : vector<9x256xf32> to vector<1x256xf32>
    %504 = vector.broadcast %503 : vector<1x256xf32> to vector<4x256xf32>
    %505 = arith.mulf %502, %504 : vector<4x256xf32>
    %506 = vector.extract_strided_slice %469 {offsets = [0, 12], sizes = [1, 4], strides = [1, 1]} : vector<1x36xbf16> to vector<1x4xbf16>
    %507 = arith.truncf %505 : vector<4x256xf32> to vector<4x256xbf16>
    %cst_210 = arith.constant dense<0.000000e+00> : vector<1x256xf32>
    %508 = tpu.matmul %506, %507, %cst_210 {dimension_numbers = #tpu.dot_dimension_numbers<[1], [0], [0], [1], [0, 0, 1, 1], [], []>} : vector<1x4xbf16>, vector<4x256xbf16>, vector<1x256xf32> -> vector<1x256xf32>
    %509 = arith.addf %501, %508 : vector<1x256xf32>
    %510 = vector.extract_strided_slice %1 {offsets = [4, 0], sizes = [1, 256], strides = [1, 1]} : vector<9x256xf32> to vector<1x256xf32>
    %511 = vector.broadcast %510 : vector<1x256xf32> to vector<4x256xf32>
    %512 = arith.mulf %468, %511 : vector<4x256xf32>
    %513 = vector.extract_strided_slice %469 {offsets = [0, 16], sizes = [1, 4], strides = [1, 1]} : vector<1x36xbf16> to vector<1x4xbf16>
    %514 = arith.truncf %512 : vector<4x256xf32> to vector<4x256xbf16>
    %cst_211 = arith.constant dense<0.000000e+00> : vector<1x256xf32>
    %515 = tpu.matmul %513, %514, %cst_211 {dimension_numbers = #tpu.dot_dimension_numbers<[1], [0], [0], [1], [0, 0, 1, 1], [], []>} : vector<1x4xbf16>, vector<4x256xbf16>, vector<1x256xf32> -> vector<1x256xf32>
    %516 = arith.addf %509, %515 : vector<1x256xf32>
    %c255_i32_212 = arith.constant 255 : i32
    %517 = tpu.dynamic_rotate %468 by %c255_i32_212 dim 1 : vector<4x256xf32>, i32 -> vector<4x256xf32>
    %518 = vector.extract_strided_slice %1 {offsets = [5, 0], sizes = [1, 256], strides = [1, 1]} : vector<9x256xf32> to vector<1x256xf32>
    %519 = vector.broadcast %518 : vector<1x256xf32> to vector<4x256xf32>
    %520 = arith.mulf %517, %519 : vector<4x256xf32>
    %521 = vector.extract_strided_slice %469 {offsets = [0, 20], sizes = [1, 4], strides = [1, 1]} : vector<1x36xbf16> to vector<1x4xbf16>
    %522 = arith.truncf %520 : vector<4x256xf32> to vector<4x256xbf16>
    %cst_213 = arith.constant dense<0.000000e+00> : vector<1x256xf32>
    %523 = tpu.matmul %521, %522, %cst_213 {dimension_numbers = #tpu.dot_dimension_numbers<[1], [0], [0], [1], [0, 0, 1, 1], [], []>} : vector<1x4xbf16>, vector<4x256xbf16>, vector<1x256xf32> -> vector<1x256xf32>
    %524 = arith.addf %516, %523 : vector<1x256xf32>
    %c250_i32_214 = arith.constant 250 : i32
    %525 = tpu.dynamic_rotate %468 by %c250_i32_214 dim 1 : vector<4x256xf32>, i32 -> vector<4x256xf32>
    %526 = vector.extract_strided_slice %1 {offsets = [6, 0], sizes = [1, 256], strides = [1, 1]} : vector<9x256xf32> to vector<1x256xf32>
    %527 = vector.broadcast %526 : vector<1x256xf32> to vector<4x256xf32>
    %528 = arith.mulf %525, %527 : vector<4x256xf32>
    %529 = vector.extract_strided_slice %469 {offsets = [0, 24], sizes = [1, 4], strides = [1, 1]} : vector<1x36xbf16> to vector<1x4xbf16>
    %530 = arith.truncf %528 : vector<4x256xf32> to vector<4x256xbf16>
    %cst_215 = arith.constant dense<0.000000e+00> : vector<1x256xf32>
    %531 = tpu.matmul %529, %530, %cst_215 {dimension_numbers = #tpu.dot_dimension_numbers<[1], [0], [0], [1], [0, 0, 1, 1], [], []>} : vector<1x4xbf16>, vector<4x256xbf16>, vector<1x256xf32> -> vector<1x256xf32>
    %532 = arith.addf %524, %531 : vector<1x256xf32>
    %c249_i32_216 = arith.constant 249 : i32
    %533 = tpu.dynamic_rotate %468 by %c249_i32_216 dim 1 : vector<4x256xf32>, i32 -> vector<4x256xf32>
    %534 = vector.extract_strided_slice %1 {offsets = [7, 0], sizes = [1, 256], strides = [1, 1]} : vector<9x256xf32> to vector<1x256xf32>
    %535 = vector.broadcast %534 : vector<1x256xf32> to vector<4x256xf32>
    %536 = arith.mulf %533, %535 : vector<4x256xf32>
    %537 = vector.extract_strided_slice %469 {offsets = [0, 28], sizes = [1, 4], strides = [1, 1]} : vector<1x36xbf16> to vector<1x4xbf16>
    %538 = arith.truncf %536 : vector<4x256xf32> to vector<4x256xbf16>
    %cst_217 = arith.constant dense<0.000000e+00> : vector<1x256xf32>
    %539 = tpu.matmul %537, %538, %cst_217 {dimension_numbers = #tpu.dot_dimension_numbers<[1], [0], [0], [1], [0, 0, 1, 1], [], []>} : vector<1x4xbf16>, vector<4x256xbf16>, vector<1x256xf32> -> vector<1x256xf32>
    %540 = arith.addf %532, %539 : vector<1x256xf32>
    %c248_i32_218 = arith.constant 248 : i32
    %541 = tpu.dynamic_rotate %468 by %c248_i32_218 dim 1 : vector<4x256xf32>, i32 -> vector<4x256xf32>
    %542 = vector.extract_strided_slice %1 {offsets = [8, 0], sizes = [1, 256], strides = [1, 1]} : vector<9x256xf32> to vector<1x256xf32>
    %543 = vector.broadcast %542 : vector<1x256xf32> to vector<4x256xf32>
    %544 = arith.mulf %541, %543 : vector<4x256xf32>
    %545 = vector.extract_strided_slice %469 {offsets = [0, 32], sizes = [1, 4], strides = [1, 1]} : vector<1x36xbf16> to vector<1x4xbf16>
    %546 = arith.truncf %544 : vector<4x256xf32> to vector<4x256xbf16>
    %cst_219 = arith.constant dense<0.000000e+00> : vector<1x256xf32>
    %547 = tpu.matmul %545, %546, %cst_219 {dimension_numbers = #tpu.dot_dimension_numbers<[1], [0], [0], [1], [0, 0, 1, 1], [], []>} : vector<1x4xbf16>, vector<4x256xbf16>, vector<1x256xf32> -> vector<1x256xf32>
    %548 = arith.addf %540, %547 : vector<1x256xf32>
    %549 = vector.broadcast %470 : vector<1x1xf32> to vector<1x256xf32>
    %550 = arith.addf %548, %549 : vector<1x256xf32>
    %551 = arith.mulf %550, %3 : vector<1x256xf32>
    %cst_220 = arith.constant dense<0.000000e+00> : vector<1xf32>
    %552 = vector.multi_reduction <add>, %551, %cst_220 [1] : vector<1x256xf32> to vector<1xf32>
    %553 = vector.shape_cast %552 : vector<1xf32> to vector<1x1xf32>
    %cst_221 = arith.constant 0.0102040814 : f32
    %554 = vector.broadcast %cst_221 : f32 to vector<1x1xf32>
    %555 = arith.mulf %553, %554 : vector<1x1xf32>
    %556 = arith.mulf %551, %551 : vector<1x256xf32>
    %cst_222 = arith.constant dense<0.000000e+00> : vector<1xf32>
    %557 = vector.multi_reduction <add>, %556, %cst_222 [1] : vector<1x256xf32> to vector<1xf32>
    %558 = vector.shape_cast %557 : vector<1xf32> to vector<1x1xf32>
    %cst_223 = arith.constant 0.0102040814 : f32
    %559 = vector.broadcast %cst_223 : f32 to vector<1x1xf32>
    %560 = arith.mulf %558, %559 : vector<1x1xf32>
    %561 = arith.mulf %555, %555 : vector<1x1xf32>
    %562 = arith.subf %560, %561 : vector<1x1xf32>
    %cst_224 = arith.constant 0.000000e+00 : f32
    %563 = vector.broadcast %cst_224 : f32 to vector<1x1xf32>
    %564 = arith.maximumf %562, %563 : vector<1x1xf32>
    %565 = vector.broadcast %555 : vector<1x1xf32> to vector<1x256xf32>
    %566 = arith.subf %551, %565 : vector<1x256xf32>
    %cst_225 = arith.constant 9.99999974E-6 : f32
    %567 = vector.broadcast %cst_225 : f32 to vector<1x1xf32>
    %568 = arith.addf %564, %567 : vector<1x1xf32>
    %569 = math.rsqrt %568 : vector<1x1xf32>
    %570 = vector.broadcast %569 : vector<1x1xf32> to vector<1x256xf32>
    %571 = arith.mulf %566, %570 : vector<1x256xf32>
    %572 = vector.broadcast %471 : vector<1x1xf32> to vector<1x256xf32>
    %573 = arith.mulf %571, %572 : vector<1x256xf32>
    %574 = vector.broadcast %472 : vector<1x1xf32> to vector<1x256xf32>
    %575 = arith.addf %573, %574 : vector<1x256xf32>
    %cst_226 = arith.constant 0.000000e+00 : f32
    %576 = vector.broadcast %cst_226 : f32 to vector<1x256xf32>
    %577 = arith.maximumf %575, %576 : vector<1x256xf32>
    %c8_i32_227 = arith.constant 8 : i32
    %578 = tpu.dynamic_rotate %577 by %c8_i32_227 dim 1 : vector<1x256xf32>, i32 -> vector<1x256xf32>
    %579 = vector.extract_strided_slice %1 {offsets = [0, 0], sizes = [1, 256], strides = [1, 1]} : vector<9x256xf32> to vector<1x256xf32>
    %580 = arith.mulf %578, %579 : vector<1x256xf32>
    %581 = vector.extract_strided_slice %473 {offsets = [0, 0], sizes = [1, 1], strides = [1, 1]} : vector<1x9xbf16> to vector<1x1xbf16>
    %582 = arith.extf %581 : vector<1x1xbf16> to vector<1x1xf32>
    %583 = vector.broadcast %582 : vector<1x1xf32> to vector<1x256xf32>
    %584 = arith.mulf %583, %580 : vector<1x256xf32>
    %c7_i32_228 = arith.constant 7 : i32
    %585 = tpu.dynamic_rotate %577 by %c7_i32_228 dim 1 : vector<1x256xf32>, i32 -> vector<1x256xf32>
    %586 = vector.extract_strided_slice %1 {offsets = [1, 0], sizes = [1, 256], strides = [1, 1]} : vector<9x256xf32> to vector<1x256xf32>
    %587 = arith.mulf %585, %586 : vector<1x256xf32>
    %588 = vector.extract_strided_slice %473 {offsets = [0, 1], sizes = [1, 1], strides = [1, 1]} : vector<1x9xbf16> to vector<1x1xbf16>
    %589 = arith.extf %588 : vector<1x1xbf16> to vector<1x1xf32>
    %590 = vector.broadcast %589 : vector<1x1xf32> to vector<1x256xf32>
    %591 = arith.mulf %590, %587 : vector<1x256xf32>
    %592 = arith.addf %584, %591 : vector<1x256xf32>
    %c6_i32_229 = arith.constant 6 : i32
    %593 = tpu.dynamic_rotate %577 by %c6_i32_229 dim 1 : vector<1x256xf32>, i32 -> vector<1x256xf32>
    %594 = vector.extract_strided_slice %1 {offsets = [2, 0], sizes = [1, 256], strides = [1, 1]} : vector<9x256xf32> to vector<1x256xf32>
    %595 = arith.mulf %593, %594 : vector<1x256xf32>
    %596 = vector.extract_strided_slice %473 {offsets = [0, 2], sizes = [1, 1], strides = [1, 1]} : vector<1x9xbf16> to vector<1x1xbf16>
    %597 = arith.extf %596 : vector<1x1xbf16> to vector<1x1xf32>
    %598 = vector.broadcast %597 : vector<1x1xf32> to vector<1x256xf32>
    %599 = arith.mulf %598, %595 : vector<1x256xf32>
    %600 = arith.addf %592, %599 : vector<1x256xf32>
    %c1_i32_230 = arith.constant 1 : i32
    %601 = tpu.dynamic_rotate %577 by %c1_i32_230 dim 1 : vector<1x256xf32>, i32 -> vector<1x256xf32>
    %602 = vector.extract_strided_slice %1 {offsets = [3, 0], sizes = [1, 256], strides = [1, 1]} : vector<9x256xf32> to vector<1x256xf32>
    %603 = arith.mulf %601, %602 : vector<1x256xf32>
    %604 = vector.extract_strided_slice %473 {offsets = [0, 3], sizes = [1, 1], strides = [1, 1]} : vector<1x9xbf16> to vector<1x1xbf16>
    %605 = arith.extf %604 : vector<1x1xbf16> to vector<1x1xf32>
    %606 = vector.broadcast %605 : vector<1x1xf32> to vector<1x256xf32>
    %607 = arith.mulf %606, %603 : vector<1x256xf32>
    %608 = arith.addf %600, %607 : vector<1x256xf32>
    %609 = vector.extract_strided_slice %1 {offsets = [4, 0], sizes = [1, 256], strides = [1, 1]} : vector<9x256xf32> to vector<1x256xf32>
    %610 = arith.mulf %577, %609 : vector<1x256xf32>
    %611 = vector.extract_strided_slice %473 {offsets = [0, 4], sizes = [1, 1], strides = [1, 1]} : vector<1x9xbf16> to vector<1x1xbf16>
    %612 = arith.extf %611 : vector<1x1xbf16> to vector<1x1xf32>
    %613 = vector.broadcast %612 : vector<1x1xf32> to vector<1x256xf32>
    %614 = arith.mulf %613, %610 : vector<1x256xf32>
    %615 = arith.addf %608, %614 : vector<1x256xf32>
    %c255_i32_231 = arith.constant 255 : i32
    %616 = tpu.dynamic_rotate %577 by %c255_i32_231 dim 1 : vector<1x256xf32>, i32 -> vector<1x256xf32>
    %617 = vector.extract_strided_slice %1 {offsets = [5, 0], sizes = [1, 256], strides = [1, 1]} : vector<9x256xf32> to vector<1x256xf32>
    %618 = arith.mulf %616, %617 : vector<1x256xf32>
    %619 = vector.extract_strided_slice %473 {offsets = [0, 5], sizes = [1, 1], strides = [1, 1]} : vector<1x9xbf16> to vector<1x1xbf16>
    %620 = arith.extf %619 : vector<1x1xbf16> to vector<1x1xf32>
    %621 = vector.broadcast %620 : vector<1x1xf32> to vector<1x256xf32>
    %622 = arith.mulf %621, %618 : vector<1x256xf32>
    %623 = arith.addf %615, %622 : vector<1x256xf32>
    %c250_i32_232 = arith.constant 250 : i32
    %624 = tpu.dynamic_rotate %577 by %c250_i32_232 dim 1 : vector<1x256xf32>, i32 -> vector<1x256xf32>
    %625 = vector.extract_strided_slice %1 {offsets = [6, 0], sizes = [1, 256], strides = [1, 1]} : vector<9x256xf32> to vector<1x256xf32>
    %626 = arith.mulf %624, %625 : vector<1x256xf32>
    %627 = vector.extract_strided_slice %473 {offsets = [0, 6], sizes = [1, 1], strides = [1, 1]} : vector<1x9xbf16> to vector<1x1xbf16>
    %628 = arith.extf %627 : vector<1x1xbf16> to vector<1x1xf32>
    %629 = vector.broadcast %628 : vector<1x1xf32> to vector<1x256xf32>
    %630 = arith.mulf %629, %626 : vector<1x256xf32>
    %631 = arith.addf %623, %630 : vector<1x256xf32>
    %c249_i32_233 = arith.constant 249 : i32
    %632 = tpu.dynamic_rotate %577 by %c249_i32_233 dim 1 : vector<1x256xf32>, i32 -> vector<1x256xf32>
    %633 = vector.extract_strided_slice %1 {offsets = [7, 0], sizes = [1, 256], strides = [1, 1]} : vector<9x256xf32> to vector<1x256xf32>
    %634 = arith.mulf %632, %633 : vector<1x256xf32>
    %635 = vector.extract_strided_slice %473 {offsets = [0, 7], sizes = [1, 1], strides = [1, 1]} : vector<1x9xbf16> to vector<1x1xbf16>
    %636 = arith.extf %635 : vector<1x1xbf16> to vector<1x1xf32>
    %637 = vector.broadcast %636 : vector<1x1xf32> to vector<1x256xf32>
    %638 = arith.mulf %637, %634 : vector<1x256xf32>
    %639 = arith.addf %631, %638 : vector<1x256xf32>
    %c248_i32_234 = arith.constant 248 : i32
    %640 = tpu.dynamic_rotate %577 by %c248_i32_234 dim 1 : vector<1x256xf32>, i32 -> vector<1x256xf32>
    %641 = vector.extract_strided_slice %1 {offsets = [8, 0], sizes = [1, 256], strides = [1, 1]} : vector<9x256xf32> to vector<1x256xf32>
    %642 = arith.mulf %640, %641 : vector<1x256xf32>
    %643 = vector.extract_strided_slice %473 {offsets = [0, 8], sizes = [1, 1], strides = [1, 1]} : vector<1x9xbf16> to vector<1x1xbf16>
    %644 = arith.extf %643 : vector<1x1xbf16> to vector<1x1xf32>
    %645 = vector.broadcast %644 : vector<1x1xf32> to vector<1x256xf32>
    %646 = arith.mulf %645, %642 : vector<1x256xf32>
    %647 = arith.addf %639, %646 : vector<1x256xf32>
    %648 = vector.broadcast %474 : vector<1x1xf32> to vector<1x256xf32>
    %649 = arith.addf %647, %648 : vector<1x256xf32>
    %650 = arith.mulf %649, %3 : vector<1x256xf32>
    %cst_235 = arith.constant dense<0.000000e+00> : vector<1xf32>
    %651 = vector.multi_reduction <add>, %650, %cst_235 [1] : vector<1x256xf32> to vector<1xf32>
    %652 = vector.shape_cast %651 : vector<1xf32> to vector<1x1xf32>
    %cst_236 = arith.constant 0.0102040814 : f32
    %653 = vector.broadcast %cst_236 : f32 to vector<1x1xf32>
    %654 = arith.mulf %652, %653 : vector<1x1xf32>
    %655 = arith.mulf %650, %650 : vector<1x256xf32>
    %cst_237 = arith.constant dense<0.000000e+00> : vector<1xf32>
    %656 = vector.multi_reduction <add>, %655, %cst_237 [1] : vector<1x256xf32> to vector<1xf32>
    %657 = vector.shape_cast %656 : vector<1xf32> to vector<1x1xf32>
    %cst_238 = arith.constant 0.0102040814 : f32
    %658 = vector.broadcast %cst_238 : f32 to vector<1x1xf32>
    %659 = arith.mulf %657, %658 : vector<1x1xf32>
    %660 = arith.mulf %654, %654 : vector<1x1xf32>
    %661 = arith.subf %659, %660 : vector<1x1xf32>
    %cst_239 = arith.constant 0.000000e+00 : f32
    %662 = vector.broadcast %cst_239 : f32 to vector<1x1xf32>
    %663 = arith.maximumf %661, %662 : vector<1x1xf32>
    %664 = vector.broadcast %654 : vector<1x1xf32> to vector<1x256xf32>
    %665 = arith.subf %650, %664 : vector<1x256xf32>
    %cst_240 = arith.constant 9.99999974E-6 : f32
    %666 = vector.broadcast %cst_240 : f32 to vector<1x1xf32>
    %667 = arith.addf %663, %666 : vector<1x1xf32>
    %668 = math.rsqrt %667 : vector<1x1xf32>
    %669 = vector.broadcast %668 : vector<1x1xf32> to vector<1x256xf32>
    %670 = arith.mulf %665, %669 : vector<1x256xf32>
    %671 = vector.broadcast %475 : vector<1x1xf32> to vector<1x256xf32>
    %672 = arith.mulf %670, %671 : vector<1x256xf32>
    %673 = vector.broadcast %476 : vector<1x1xf32> to vector<1x256xf32>
    %674 = arith.addf %672, %673 : vector<1x256xf32>
    %cst_241 = arith.constant 0.000000e+00 : f32
    %675 = vector.broadcast %cst_241 : f32 to vector<1x256xf32>
    %676 = arith.maximumf %674, %675 : vector<1x256xf32>
    %c8_i32_242 = arith.constant 8 : i32
    %677 = tpu.dynamic_rotate %676 by %c8_i32_242 dim 1 : vector<1x256xf32>, i32 -> vector<1x256xf32>
    %678 = vector.extract_strided_slice %1 {offsets = [0, 0], sizes = [1, 256], strides = [1, 1]} : vector<9x256xf32> to vector<1x256xf32>
    %679 = arith.mulf %677, %678 : vector<1x256xf32>
    %680 = vector.extract_strided_slice %477 {offsets = [0, 0], sizes = [1, 1], strides = [1, 1]} : vector<1x9xbf16> to vector<1x1xbf16>
    %681 = arith.extf %680 : vector<1x1xbf16> to vector<1x1xf32>
    %682 = vector.broadcast %681 : vector<1x1xf32> to vector<1x256xf32>
    %683 = arith.mulf %682, %679 : vector<1x256xf32>
    %c7_i32_243 = arith.constant 7 : i32
    %684 = tpu.dynamic_rotate %676 by %c7_i32_243 dim 1 : vector<1x256xf32>, i32 -> vector<1x256xf32>
    %685 = vector.extract_strided_slice %1 {offsets = [1, 0], sizes = [1, 256], strides = [1, 1]} : vector<9x256xf32> to vector<1x256xf32>
    %686 = arith.mulf %684, %685 : vector<1x256xf32>
    %687 = vector.extract_strided_slice %477 {offsets = [0, 1], sizes = [1, 1], strides = [1, 1]} : vector<1x9xbf16> to vector<1x1xbf16>
    %688 = arith.extf %687 : vector<1x1xbf16> to vector<1x1xf32>
    %689 = vector.broadcast %688 : vector<1x1xf32> to vector<1x256xf32>
    %690 = arith.mulf %689, %686 : vector<1x256xf32>
    %691 = arith.addf %683, %690 : vector<1x256xf32>
    %c6_i32_244 = arith.constant 6 : i32
    %692 = tpu.dynamic_rotate %676 by %c6_i32_244 dim 1 : vector<1x256xf32>, i32 -> vector<1x256xf32>
    %693 = vector.extract_strided_slice %1 {offsets = [2, 0], sizes = [1, 256], strides = [1, 1]} : vector<9x256xf32> to vector<1x256xf32>
    %694 = arith.mulf %692, %693 : vector<1x256xf32>
    %695 = vector.extract_strided_slice %477 {offsets = [0, 2], sizes = [1, 1], strides = [1, 1]} : vector<1x9xbf16> to vector<1x1xbf16>
    %696 = arith.extf %695 : vector<1x1xbf16> to vector<1x1xf32>
    %697 = vector.broadcast %696 : vector<1x1xf32> to vector<1x256xf32>
    %698 = arith.mulf %697, %694 : vector<1x256xf32>
    %699 = arith.addf %691, %698 : vector<1x256xf32>
    %c1_i32_245 = arith.constant 1 : i32
    %700 = tpu.dynamic_rotate %676 by %c1_i32_245 dim 1 : vector<1x256xf32>, i32 -> vector<1x256xf32>
    %701 = vector.extract_strided_slice %1 {offsets = [3, 0], sizes = [1, 256], strides = [1, 1]} : vector<9x256xf32> to vector<1x256xf32>
    %702 = arith.mulf %700, %701 : vector<1x256xf32>
    %703 = vector.extract_strided_slice %477 {offsets = [0, 3], sizes = [1, 1], strides = [1, 1]} : vector<1x9xbf16> to vector<1x1xbf16>
    %704 = arith.extf %703 : vector<1x1xbf16> to vector<1x1xf32>
    %705 = vector.broadcast %704 : vector<1x1xf32> to vector<1x256xf32>
    %706 = arith.mulf %705, %702 : vector<1x256xf32>
    %707 = arith.addf %699, %706 : vector<1x256xf32>
    %708 = vector.extract_strided_slice %1 {offsets = [4, 0], sizes = [1, 256], strides = [1, 1]} : vector<9x256xf32> to vector<1x256xf32>
    %709 = arith.mulf %676, %708 : vector<1x256xf32>
    %710 = vector.extract_strided_slice %477 {offsets = [0, 4], sizes = [1, 1], strides = [1, 1]} : vector<1x9xbf16> to vector<1x1xbf16>
    %711 = arith.extf %710 : vector<1x1xbf16> to vector<1x1xf32>
    %712 = vector.broadcast %711 : vector<1x1xf32> to vector<1x256xf32>
    %713 = arith.mulf %712, %709 : vector<1x256xf32>
    %714 = arith.addf %707, %713 : vector<1x256xf32>
    %c255_i32_246 = arith.constant 255 : i32
    %715 = tpu.dynamic_rotate %676 by %c255_i32_246 dim 1 : vector<1x256xf32>, i32 -> vector<1x256xf32>
    %716 = vector.extract_strided_slice %1 {offsets = [5, 0], sizes = [1, 256], strides = [1, 1]} : vector<9x256xf32> to vector<1x256xf32>
    %717 = arith.mulf %715, %716 : vector<1x256xf32>
    %718 = vector.extract_strided_slice %477 {offsets = [0, 5], sizes = [1, 1], strides = [1, 1]} : vector<1x9xbf16> to vector<1x1xbf16>
    %719 = arith.extf %718 : vector<1x1xbf16> to vector<1x1xf32>
    %720 = vector.broadcast %719 : vector<1x1xf32> to vector<1x256xf32>
    %721 = arith.mulf %720, %717 : vector<1x256xf32>
    %722 = arith.addf %714, %721 : vector<1x256xf32>
    %c250_i32_247 = arith.constant 250 : i32
    %723 = tpu.dynamic_rotate %676 by %c250_i32_247 dim 1 : vector<1x256xf32>, i32 -> vector<1x256xf32>
    %724 = vector.extract_strided_slice %1 {offsets = [6, 0], sizes = [1, 256], strides = [1, 1]} : vector<9x256xf32> to vector<1x256xf32>
    %725 = arith.mulf %723, %724 : vector<1x256xf32>
    %726 = vector.extract_strided_slice %477 {offsets = [0, 6], sizes = [1, 1], strides = [1, 1]} : vector<1x9xbf16> to vector<1x1xbf16>
    %727 = arith.extf %726 : vector<1x1xbf16> to vector<1x1xf32>
    %728 = vector.broadcast %727 : vector<1x1xf32> to vector<1x256xf32>
    %729 = arith.mulf %728, %725 : vector<1x256xf32>
    %730 = arith.addf %722, %729 : vector<1x256xf32>
    %c249_i32_248 = arith.constant 249 : i32
    %731 = tpu.dynamic_rotate %676 by %c249_i32_248 dim 1 : vector<1x256xf32>, i32 -> vector<1x256xf32>
    %732 = vector.extract_strided_slice %1 {offsets = [7, 0], sizes = [1, 256], strides = [1, 1]} : vector<9x256xf32> to vector<1x256xf32>
    %733 = arith.mulf %731, %732 : vector<1x256xf32>
    %734 = vector.extract_strided_slice %477 {offsets = [0, 7], sizes = [1, 1], strides = [1, 1]} : vector<1x9xbf16> to vector<1x1xbf16>
    %735 = arith.extf %734 : vector<1x1xbf16> to vector<1x1xf32>
    %736 = vector.broadcast %735 : vector<1x1xf32> to vector<1x256xf32>
    %737 = arith.mulf %736, %733 : vector<1x256xf32>
    %738 = arith.addf %730, %737 : vector<1x256xf32>
    %c248_i32_249 = arith.constant 248 : i32
    %739 = tpu.dynamic_rotate %676 by %c248_i32_249 dim 1 : vector<1x256xf32>, i32 -> vector<1x256xf32>
    %740 = vector.extract_strided_slice %1 {offsets = [8, 0], sizes = [1, 256], strides = [1, 1]} : vector<9x256xf32> to vector<1x256xf32>
    %741 = arith.mulf %739, %740 : vector<1x256xf32>
    %742 = vector.extract_strided_slice %477 {offsets = [0, 8], sizes = [1, 1], strides = [1, 1]} : vector<1x9xbf16> to vector<1x1xbf16>
    %743 = arith.extf %742 : vector<1x1xbf16> to vector<1x1xf32>
    %744 = vector.broadcast %743 : vector<1x1xf32> to vector<1x256xf32>
    %745 = arith.mulf %744, %741 : vector<1x256xf32>
    %746 = arith.addf %738, %745 : vector<1x256xf32>
    %747 = vector.broadcast %478 : vector<1x1xf32> to vector<1x256xf32>
    %748 = arith.addf %746, %747 : vector<1x256xf32>
    %749 = arith.addf %748, %676 : vector<1x256xf32>
    %cst_250 = arith.constant 0.000000e+00 : f32
    %750 = vector.broadcast %cst_250 : f32 to vector<1x256xf32>
    %751 = arith.maximumf %749, %750 : vector<1x256xf32>
    %752 = vector.extract_strided_slice %751 {offsets = [0, 0], sizes = [1, 128], strides = [1, 1]} : vector<1x256xf32> to vector<1x128xf32>
    %c0_251 = arith.constant 0 : index
    %c0_252 = arith.constant 0 : index
    %753 = vector.load %arg41[%c0_251, %c0_252] : memref<2x128xf32, #tpu.memory_space<vmem>>, vector<1x128xf32>
    tpu.vector_store %arg41[%c0_251, %c0_252], %752 {strides = array<i32>} : memref<2x128xf32, #tpu.memory_space<vmem>>, vector<1x128xf32>,
    %754 = vector.extract_strided_slice %751 {offsets = [0, 128], sizes = [1, 128], strides = [1, 1]} : vector<1x256xf32> to vector<1x128xf32>
    %c1 = arith.constant 1 : index
    %c0_253 = arith.constant 0 : index
    %755 = vector.load %arg41[%c1, %c0_253] : memref<2x128xf32, #tpu.memory_space<vmem>>, vector<1x128xf32>
    tpu.vector_store %arg41[%c1, %c0_253], %754 {strides = array<i32>} : memref<2x128xf32, #tpu.memory_space<vmem>>, vector<1x128xf32>,
    %c0_254 = arith.constant 0 : index
    %c0_255 = arith.constant 0 : index
    %756 = vector.load %arg41[%c0_254, %c0_255] : memref<2x128xf32, #tpu.memory_space<vmem>>, vector<2x128xf32>
    %757 = arith.truncf %756 : vector<2x128xf32> to vector<2x128xbf16>
    %c0_256 = arith.constant 0 : index
    %c0_257 = arith.constant 0 : index
    %758 = vector.load %arg34[%c0_256, %c0_257] : memref<128x8xbf16, #tpu.memory_space<vmem>>, vector<128x8xbf16>
    %cst_258 = arith.constant dense<0.000000e+00> : vector<2x8xf32>
    %759 = tpu.matmul %757, %758, %cst_258 {dimension_numbers = #tpu.dot_dimension_numbers<[1], [0], [0], [1], [0, 0, 1, 1], [], []>} : vector<2x128xbf16>, vector<128x8xbf16>, vector<2x8xf32> -> vector<2x8xf32>
    %c0_259 = arith.constant 0 : index
    %c0_260 = arith.constant 0 : index
    %760 = vector.load %arg35[%c0_259, %c0_260] : memref<1x8xf32, #tpu.memory_space<vmem>>, vector<1x8xf32>
    %761 = vector.broadcast %760 : vector<1x8xf32> to vector<2x8xf32>
    %762 = arith.addf %759, %761 : vector<2x8xf32>
    %cst_261 = arith.constant dense<0.000000e+00> : vector<2xf32>
    %763 = vector.multi_reduction <add>, %762, %cst_261 [1] : vector<2x8xf32> to vector<2xf32>
    %764 = vector.shape_cast %763 : vector<2xf32> to vector<2x1xf32>
    %cst_262 = arith.constant 8.000000e+00 : f32
    %765 = vector.broadcast %cst_262 : f32 to vector<2x1xf32>
    %766 = arith.divf %764, %765 : vector<2x1xf32>
    %767 = arith.mulf %762, %762 : vector<2x8xf32>
    %cst_263 = arith.constant dense<0.000000e+00> : vector<2xf32>
    %768 = vector.multi_reduction <add>, %767, %cst_263 [1] : vector<2x8xf32> to vector<2xf32>
    %769 = vector.shape_cast %768 : vector<2xf32> to vector<2x1xf32>
    %cst_264 = arith.constant 8.000000e+00 : f32
    %770 = vector.broadcast %cst_264 : f32 to vector<2x1xf32>
    %771 = arith.divf %769, %770 : vector<2x1xf32>
    %772 = arith.mulf %766, %766 : vector<2x1xf32>
    %773 = arith.subf %771, %772 : vector<2x1xf32>
    %cst_265 = arith.constant 0.000000e+00 : f32
    %774 = vector.broadcast %cst_265 : f32 to vector<2x1xf32>
    %775 = arith.maximumf %773, %774 : vector<2x1xf32>
    %776 = vector.broadcast %766 : vector<2x1xf32> to vector<2x8xf32>
    %777 = arith.subf %762, %776 : vector<2x8xf32>
    %cst_266 = arith.constant 9.99999974E-6 : f32
    %778 = vector.broadcast %cst_266 : f32 to vector<2x1xf32>
    %779 = arith.addf %775, %778 : vector<2x1xf32>
    %780 = math.rsqrt %779 : vector<2x1xf32>
    %781 = vector.broadcast %780 : vector<2x1xf32> to vector<2x8xf32>
    %782 = arith.mulf %777, %781 : vector<2x8xf32>
    %c0_267 = arith.constant 0 : index
    %c0_268 = arith.constant 0 : index
    %783 = vector.load %arg36[%c0_267, %c0_268] : memref<1x8xf32, #tpu.memory_space<vmem>>, vector<1x8xf32>
    %784 = vector.broadcast %783 : vector<1x8xf32> to vector<2x8xf32>
    %785 = arith.mulf %782, %784 : vector<2x8xf32>
    %c0_269 = arith.constant 0 : index
    %c0_270 = arith.constant 0 : index
    %786 = vector.load %arg37[%c0_269, %c0_270] : memref<1x8xf32, #tpu.memory_space<vmem>>, vector<1x8xf32>
    %787 = vector.broadcast %786 : vector<1x8xf32> to vector<2x8xf32>
    %788 = arith.addf %785, %787 : vector<2x8xf32>
    %c0_271 = arith.constant 0 : index
    %c0_272 = arith.constant 0 : index
    %789 = vector.load %arg38[%c0_271, %c0_272] : memref<2x8xf32, #tpu.memory_space<vmem>>, vector<2x8xf32>
    tpu.vector_store %arg38[%c0_271, %c0_272], %788 {strides = array<i32>} : memref<2x8xf32, #tpu.memory_space<vmem>>, vector<2x8xf32>,
    return
  }
}

</mosaic_0001>

<bundles_post_ra>
// kernel: image_encoder_resnet.1
= control target key start
LH: loop header
LB: loop body
LE: loop exit
PB: predicated region body
PF: predicated region fallthrough
CT: control target
= control target key end

     0   :  { %s5706_s6 = smov 1   ;;  %s5707_s10 = smov 2   ;;  %s8353_s0 = inlined_call_operand.smem [shape: u32[39], index: -1, kind: input, shape index: {}] }
   0x1   :  { %s5790_s5 = sld [smem:[%s8353_s0]]   ;;  %s5708_s14 = smov 3  }
   0x2   :  { %s5795_s9 = sld [smem:[%s8353_s0 + %s5706_s6]]   ;;  %s5709_s18 = smov 4  }
   0x3   :  { %s5800_s13 = sld [smem:[%s8353_s0 + %s5707_s10]]   ;;  %s5710_s22 = smov 5  }
   0x4   :  { %s5805_s17 = sld [smem:[%s8353_s0 + %s5708_s14]]   ;;  %s5711_s26 = smov 6  }
   0x5   :  { %s5810_s21 = sld [smem:[%s8353_s0 + %s5709_s18]]   ;;  %s5712_s30 = smov 7  }
   0x6   :  { %s5815_s25 = sld [smem:[%s8353_s0 + %s5710_s22]]   ;;  %s5713_s4 = smov 8  }
   0x7   :  { %s5820_s29 = sld [smem:[%s8353_s0 + %s5711_s26]]   ;;  %s5714_s10 = smov 9  }
   0x8   :  { %s5825_s3 = sld [smem:[%s8353_s0 + %s5712_s30]]   ;;  %s5715_s15 = smov 10  }
   0x9   :  { %8421 = sst [smem:[#allocation15_spill]] %s5800_s13  ;;  %s5716_s20 = smov 11  }
   0xa   :  { %8422 = sst [smem:[#allocation16_spill]] %s5805_s17  ;;  %s5717_s26 = smov 12  }
   0xb   :  { %s5830_s8 = sld [smem:[%s8353_s0 + %s5713_s4]]   ;;  %s5718_s1 = smov 13  }
   0xc   :  { %s5835_s14 = sld [smem:[%s8353_s0 + %s5714_s10]]   ;;  %s5719_s7 = smov 14  }
   0xd   :  { %s5840_s19 = sld [smem:[%s8353_s0 + %s5715_s15]]   ;;  %s5720_s15 = smov 15  }
   0xe   :  { %s5845_s24 = sld [smem:[%s8353_s0 + %s5716_s20]]   ;;  %s5721_s22 = smov 16  }
   0xf   :  { %s5850_s30 = sld [smem:[%s8353_s0 + %s5717_s26]]   ;;  %s5722_s28 = smov 17  }
  0x10   :  { %s5855_s6 = sld [smem:[%s8353_s0 + %s5718_s1]]   ;;  %s5731_s10 = smov 28  }
  0x11   :  { %s5860_s12 = sld [smem:[%s8353_s0 + %s5719_s7]]   ;;  %s5723_s7 = smov 18  }
  0x12   :  { %s5865_s20 = sld [smem:[%s8353_s0 + %s5720_s15]]   ;;  %s5724_s15 = smov 19  }
  0x13   :  { %s5870_s27 = sld [smem:[%s8353_s0 + %s5721_s22]]   ;;  %s5725_s22 = smov 20  }
  0x14   :  { %s5875_s4 = sld [smem:[%s8353_s0 + %s5722_s28]]   ;;  %s5726_s28 = smov 21  }
  0x15   :  { %8423 = sst [smem:[#allocation17_spill]] %s5850_s30  ;;  %s5732_s16 = smov 32  }
  0x16   :  { %8424 = sst [smem:[#allocation18_spill]] %s5855_s6  ;;  %s5733_s23 = smov 34  }
  0x17   :  { %8425 = sst [smem:[#allocation19_spill]] %s5860_s12  ;;  %s5734_s1 = smov 35  }
  0x18   :  { %8426 = sst [smem:[#allocation20_spill]] %s5865_s20 }
  0x19   :  { %8427 = sst [smem:[#allocation21_spill]] %s5870_s27 }
  0x1a   :  { %8428 = sst [smem:[#allocation22_spill]] %s5875_s4 }
  0x1b   :  { %s5880_s13 = sld [smem:[%s8353_s0 + %s5723_s7]]   ;;  %s5727_s7 = smov 22  }
  0x1c   :  { %s5885_s17 = sld [smem:[%s8353_s0 + %s5724_s15]]   ;;  %s5728_s15 = smov 23  }
  0x1d   :  { %s5890_s27 = sld [smem:[%s8353_s0 + %s5725_s22]]   ;;  %s5729_s22 = smov 24  }
  0x1e   :  { %s5895_s4 = sld [smem:[%s8353_s0 + %s5726_s28]]   ;;  %s5730_s28 = smov 25  }
  0x1f   :  { %s5933_s20 = sld [smem:[%s8353_s0 + %s5734_s1]]   ;;  %s5738_s1 = smov 26  }
  0x21   :  { %8429 = sst [smem:[#allocation23_spill]] %s5880_s13 }
  0x22   :  { %8430 = sst [smem:[#allocation24_spill]] %s5885_s17 }
  0x23   :  { %8431 = sst [smem:[#allocation25_spill]] %s5890_s27 }
  0x24   :  { %8432 = sst [smem:[#allocation26_spill]] %s5895_s4 }
  0x25   :  { %s5900_s13 = sld [smem:[%s8353_s0 + %s5727_s7]]   ;;  %s5739_s7 = smov 27  }
  0x26   :  { %s5905_s17 = sld [smem:[%s8353_s0 + %s5728_s15]]  }
  0x27   :  { %s5910_s27 = sld [smem:[%s8353_s0 + %s5729_s22]]  }
  0x28   :  { %s5271_s4 = sld [smem:[%s8353_s0 + %s5730_s28]]  }
  0x29   :  { %8439 = sst [smem:[#allocation33_spill]] %s5933_s20 }
  0x2a   :  { %s5273_s15 = sld [smem:[%s8353_s0 + %s5739_s7]]  }
  0x2b   :  { %8433 = sst [smem:[#allocation27_spill]] %s5900_s13 }
  0x2c   :  { %8434 = sst [smem:[#allocation28_spill]] %s5905_s17 }
  0x2d   :  { %8435 = sst [smem:[#allocation29_spill]] %s5910_s27 }
  0x2e   :  { %s5918_s13 = sld [smem:[%s8353_s0 + %s5731_s10]]   ;;  %s5735_s10 = smov 36   ;;  %v82_v0 = vstv %s5271_s4 }
  0x2f   :  { %s5923_s17 = sld [smem:[%s8353_s0 + %s5732_s16]]   ;;  %s5736_s16 = smov 37   ;;  %83 = vst [vmem:[#allocation5] sm:$0x1] %v82_v0 }
  0x30   :  { %s5928_s27 = sld [smem:[%s8353_s0 + %s5733_s23]]   ;;  %s5737_s23 = smov 38   ;;  %v86_v2 = vstv %s5273_s15 }
  0x31   :  { %s5948_s28 = sld [smem:[%s8353_s0 + %s5737_s23]]   ;;  %87 = vst [vmem:[#allocation7] sm:$0x1] %v86_v2 }
  0x34   :  { %8436 = sst [smem:[#allocation30_spill]] %s5918_s13 }
  0x35   :  { %8437 = sst [smem:[#allocation31_spill]] %s5923_s17 }
  0x36   :  { %8438 = sst [smem:[#allocation32_spill]] %s5928_s27  ;;  %s5741_s27 = smov 30  }
  0x37   :  { %s5938_s13 = sld [smem:[%s8353_s0 + %s5735_s10]]  }
  0x38   :  { %s5943_s17 = sld [smem:[%s8353_s0 + %s5736_s16]]   ;;  %s5740_s16 = smov 29  }
  0x39   :  { %8442 = sst [smem:[#allocation36_spill]] %s5948_s28  ;;  %s5742_s28 = smov 31  }
  0x3a   :  { %s5272_s10 = sld [smem:[%s8353_s0 + %s5738_s1]]   ;;  %s5743_s1 = smov 33  }
  0x3b   :  { %s5276_s26 = sld [smem:[%s8353_s0 + %s5741_s27]]  }
  0x3c   :  { %s5277_s20 = sld [smem:[%s8353_s0 + %s5742_s28]]  }
  0x3d   :  { %8440 = sst [smem:[#allocation34_spill]] %s5938_s13 }
  0x3e   :  { %8441 = sst [smem:[#allocation35_spill]] %s5943_s17 }
  0x3f   :  { %s5275_s17 = sld [smem:[%s8353_s0 + %s5740_s16]]  }
  0x40   :  { %s5279_s13 = sld [smem:[%s8353_s0 + %s5743_s1]]   ;;  %v84_v1 = vstv %s5272_s10 }
  0x41   :  { %85 = vst [vmem:[#allocation6] sm:$0x1] %v84_v1  ;;  %v90_v4 = vstv %s5276_s26 }
  0x42   :  { %91 = vst [vmem:[#allocation9] sm:$0x1] %v90_v4  ;;  %v92_v5 = vstv %s5277_s20 }
  0x43   :  { %93 = vst [vmem:[#allocation10] sm:$0x1] %v92_v5 }
  0x45   :  { %v88_v3 = vstv %s5275_s17 }
  0x46   :  { %89 = vst [vmem:[#allocation8] sm:$0x1] %v88_v3  ;;  %v94_v6 = vstv %s5279_s13 }
  0x47   :  { %95 = vst [vmem:[#allocation11] sm:$0x1] %v94_v6 }
  0x48   :  { %v5632_v7 = vld [vmem:[%s5790_s5 + $0x4] ss:$16 sps:$4 sm:$0x1f]   ;;  %vm277_vm0 = vcmask 1043456   ;;  %vm278_vm1 = vcmask 1044480   ;;  %v5744_v8 = vmov 65535  }
  0x49   :  { %v279_v9 = vsel %vm277_vm0, 4294967295, %v5744_v8  ;;  %v5634_v10 = vld [vmem:[%s5790_s5 + $0xc] ss:$16 sps:$4 sm:$0x1f]   ;;  %v8360_v13 = vmov 0   ;;  %v220_v18 = vld [vmem:[%s5815_s25] sm:$0xff] }
  0x4a   :  { %v280_v11 = vsel %vm278_vm1, %v279_v9, 0  ;;  %v5636_v12 = vld [vmem:[%s5790_s5] ss:$16 sps:$4 sm:$0x1f]   ;;  %325 = vmatprep.mubr.bf16.mxu0 %v8360_v13  ;;  %368 = vmatprep.mubr.bf16.mxu1 %v8360_v13  ;;  %v221_v22 = vld [vmem:[%s5815_s25 + $0x8] sm:$0xff]  ;;  %vm273_vm2 = vcmask 72704  }
  0x4b   :  { %v285_v14 = vand.u32 %v5632_v7, %v280_v11  ;;  %v291_v15 = vand.u32 %v5634_v10, %v280_v11  ;;  %v5637_v16 = vld [vmem:[%s5790_s5 + $0x8] ss:$16 sps:$4 sm:$0x1f]   ;;  %5611 = vset.pattern.permute.xlu0 %v8360_v13  ;;  %5612 = vset.pattern.permute.xlu1 %v8360_v13  ;;  %v282_v17 = vand.u32 %v5636_v12, %v280_v11  ;;  %v222_v19 = vld [vmem:[%s5820_s29] sm:$0xff] }
  0x4c   :  { %v288_v20 = vand.u32 %v5637_v16, %v280_v11  ;;  %v5638_v21 = vld [vmem:[%s5810_s21] sm:$0xff]   ;;  %244 = vperm.xlu0 %5611, %v220_v18   ;;  %v223_v23 = vld [vmem:[%s5820_s29 + $0x8] sm:$0xff]  ;;  %463 = vperm.xlu1 %5612, %v222_v19  }
  0x4d   :  { %293 = vmatprep.subr.bf16.mxu0 %v285_v14  ;;  %336 = vmatprep.subr.bf16.mxu1 %v291_v15  ;;  %v224_v24 = vld [vmem:[%s5825_s3] sm:$0xff] }
  0x4e   :  { %294 = vmatpush1.bf16.msra.mxu0 %v282_v17  ;;  %337 = vmatpush1.bf16.msra.mxu1 %v288_v20 }
  0x50   :  { %249 = vperm.xlu0 %5611, %v221_v22   ;;  %468 = vperm.xlu1 %5612, %v223_v23  }
  0x51   :  { %5290 = vmatmul.mubr.msk.bf16.vlgmr.msra.gmra.mrb[0].mxu0 %vm273_vm2, %v5638_v21  ;;  %5291 = vmatmul.mubr.msk.bf16.vlgmr.msra.gmra.mrb[0].mxu1 %vm273_vm2, %v5638_v21 }
  0x52   :  { %96 = vsyncpa [#allocation13], 0  ;;  %v225_v25 = vld [vmem:[%s5825_s3 + $0x8] sm:$0xff]  ;;  %v379_v26 = vlaneseq  ;;  %v5991_v30 = vld [vmem:[%s5795_s9] sm:$0xff]  ;;  %s5746_s0 = smov 15   ;;  %s5747_s5 = smov 14  }
  0x53   :  { %v5994_v31 = vld [vmem:[%s5795_s9 + $0x10] sm:$0xff]  ;;  %v5997_v32 = vld [vmem:[%s5795_s9 + $0x8] sm:$0xff]  ;;  %v6000_v33 = vld [vmem:[%s5795_s9 + $0x18] sm:$0xff]  ;;  %s5748_s17 = smov 13   ;;  %s5749_s21 = smov 1   ;;  %vm1034_vm4 = vcmask 130048  }
  0x54   :  { %481 = vperm.xlu1 %5612, %v224_v24   ;;  %v5985_v27 = vshrl.u32 %v379_v26, 7  ;;  %s5750_s25 = smov 127   ;;  %s5751_s29 = smov 115   ;;  %vm2494_vm14 = vcmask 1041408   ;;  %vm2490_vm15 = vcmask 31744  }
  0x55   :  { %s5752_s3 = smov 114   ;;  %s5753_s30 = smov 113  }
  0x56   :  { %8443 = vst [vmem:[#allocation37_spill] sm:$0xff] %v5985_v27  ;;  %v5988_v29 = vsub.s32 4, %v5985_v27  ;;  %s8506_s6 = sld [smem:[#allocation16_spill]]  ;;  %s8517_s12 = sld [smem:[#allocation22_spill]] }
  0x57   :  { %s8518_s27 = sld [smem:[#allocation21_spill]]  ;;  %s8520_s28 = sld [smem:[#allocation23_spill]] }
  0x58   :  { %486 = vperm.xlu1 %5612, %v225_v25   ;;  %8444 = vst [vmem:[#allocation38_spill] sm:$0xff] %v5988_v29  ;;  %v6004_v34 = vrot.slane %v5991_v30, %v5988_v29  ;;  %v6008_v36 = vrot.slane %v5994_v31, %v5988_v29  ;;  %v6012_v38 = vrot.slane %v5997_v32, %v5988_v29  ;;  %s5756_s10 = smov 7   ;;  %s5757_s7 = smov 8  }
  0x59   :  { %v6016_v42 = vrot.slane %v6000_v33, %v5988_v29  ;;  %s5758_s11 = smov 124   ;;  %s5759_s15 = smov 6  }
  0x5a   :  { %s5760_s16 = smov 120   ;;  %s5761_s18 = smov 122  }
  0x5b   :  { %s5762_s4 = smov 116   ;;  %s8521_s22 = sld [smem:[#allocation24_spill]] }
  0x5c   :  { %s5763_s23 = smov 112   ;;  %s5764_s26 = smov 121  }
  0x5d   :  { %s5765_s20 = smov 108   ;;  %s5766_s1 = smov 104  }
  0x5e   :  { %s5767_s2 = smov 100   ;;  %s5768_s13 = smov 96  }
  0xcb   :  { %v245_v28 = vpop.permute.xlu0 %244  ;;  %v464_v20 = vpop.permute.xlu1 %463 }
  0xcf   :  { %v250_v37 = vpop.permute.xlu0 %249  ;;  %v6056_v21 = vpop.permute.xlu1 %468 }
  0xd3   :  { %v482_v22 = vpop.permute.xlu1 %481 }
  0xd7   :  { %v6058_v23 = vpop.permute.xlu1 %486 }
 0x124   :  { %v327_v35 = vpop.f32.mrb[0].mxu0  ;;  %v370_v40 = vpop.f32.mrb[0].mxu1 }
 0x125   :  { %v328_v39 = vadd.f32 %v327_v35, %v245_v28  ;;  %v329_v41 = vpop.f32.mrb[1].mxu0  ;;  %v371_v43 = vadd.f32 %v370_v40, %v245_v28  ;;  %v372_v45 = vpop.f32.mrb[1].mxu1 }
 0x126   :  { %v330_v44 = vadd.f32 %v329_v41, %v245_v28  ;;  %v331_v46 = vpop.f32.mrb[2].mxu0  ;;  %v373_v48 = vadd.f32 %v372_v45, %v245_v28  ;;  %v374_v50 = vpop.f32.mrb[2].mxu1 }
 0x127   :  { %v6019_v47 = vmul.f32 %v6004_v34, %v328_v39  ;;  %v332_v49 = vadd.f32 %v331_v46, %v250_v37  ;;  %v333_v51 = vpop.f32.mrb[3].mxu0  ;;  %v6022_v52 = vmul.f32 %v6008_v36, %v371_v43  ;;  %v375_v54 = vadd.f32 %v374_v50, %v250_v37  ;;  %v376_v56 = vpop.f32.mrb[3].mxu1 }
 0x128   :  { %v396_v53 = vmul.f32 %v6012_v38, %v330_v44  ;;  %v334_v55 = vadd.f32 %v333_v51, %v250_v37  ;;  %v398_v58 = vmul.f32 %v6016_v42, %v373_v48  ;;  %v377_v1 = vadd.f32 %v376_v56, %v250_v37 }
 0x129   :  { %v415_v57 = vmul.f32 %v6019_v47, %v6019_v47  ;;  %v6029_v59 = vmul.f32 %v6004_v34, %v332_v49  ;;  %v6038_v0 = vmul.f32 %v6008_v36, %v375_v54  ;;  %v417_v2 = vmul.f32 %v6022_v52, %v6022_v52 }
 0x12a   :  { %v416_v60 = vmul.f32 %v396_v53, %v396_v53  ;;  %v6032_v61 = vmul.f32 %v6012_v38, %v334_v55  ;;  %v403_v62 = vadd.f32 %v396_v53, %v6019_v47  ;;  %v418_v7 = vmul.f32 %v398_v58, %v398_v58 }
 0x12b   :  { %v419_v63 = vmul.f32 %v6029_v59, %v6029_v59  ;;  %v6049_v12 = vmul.f32 %v6016_v42, %v377_v1  ;;  %v421_v15 = vmul.f32 %v6038_v0, %v6038_v0 }
 0x12c   :  { %v420_v3 = vmul.f32 %v6032_v61, %v6032_v61  ;;  %v404_v4 = vadd.f32 %v403_v62, %v6022_v52  ;;  %v423_v5 = vadd.f32 %v416_v60, %v415_v57  ;;  %v408_v6 = vadd.f32 %v6032_v61, %v6029_v59 }
 0x12d   :  { %v422_v18 = vmul.f32 %v6049_v12, %v6049_v12 }
 0x12e   :  { %v405_v8 = vadd.f32 %v404_v4, %v398_v58  ;;  %v424_v9 = vadd.f32 %v423_v5, %v417_v2  ;;  %v409_v10 = vadd.f32 %v408_v6, %v6038_v0  ;;  %v428_v11 = vadd.f32 %v420_v3, %v419_v63 }
 0x130   :  { %406 = vadd.xlane.f32.xlu1 %v405_v8  ;;  %v425_v14 = vadd.f32 %v424_v9, %v418_v7  ;;  %v410_v16 = vadd.f32 %v409_v10, %v6049_v12  ;;  %v429_v17 = vadd.f32 %v428_v11, %v421_v15 }
 0x132   :  { %426 = vadd.xlane.f32.xlu0 %v425_v14  ;;  %v430_v19 = vadd.f32 %v429_v17, %v422_v18 }
 0x134   :  { %411 = vadd.xlane.f32.xlu1 %v410_v16 }
 0x138   :  { %431 = vadd.xlane.f32.xlu1 %v430_v19 }
 0x1bd   :  { %v407_v24 = vpop.xlane.xlu1 %406 }
 0x1be   :  { %v413_v25 = vmul.f32 0.0025510204, %v407_v24 }
 0x1bf   :  { %v427_v28 = vpop.xlane.xlu0 %426 }
 0x1c0   :  { %v433_v35 = vmul.f32 0.0025510204, %v427_v28  ;;  %v435_v37 = vmul.f32 %v413_v25, %v413_v25  ;;  %v441_v54 = vsub.f32 %v6019_v47, %v413_v25  ;;  %v442_v55 = vsub.f32 %v396_v53, %v413_v25 }
 0x1c1   :  { %v412_v39 = vpop.xlane.xlu1 %411  ;;  %v443_v56 = vsub.f32 %v6022_v52, %v413_v25  ;;  %v444_v57 = vsub.f32 %v398_v58, %v413_v25 }
 0x1c2   :  { %v414_v40 = vmul.f32 0.0025510204, %v412_v39  ;;  %v437_v41 = vsub.f32 %v433_v35, %v435_v37 }
 0x1c4   :  { %v439_v43 = vmax.f32 %v437_v41, 0.0  ;;  %v436_v45 = vmul.f32 %v414_v40, %v414_v40  ;;  %v445_v7 = vsub.f32 %v6029_v59, %v414_v40  ;;  %v446_v9 = vsub.f32 %v6032_v61, %v414_v40 }
 0x1c5   :  { %v432_v44 = vpop.xlane.xlu1 %431  ;;  %v448_v16 = vsub.f32 %v6049_v12, %v414_v40  ;;  %v447_v12 = vsub.f32 %v6038_v0, %v414_v40 }
 0x1c6   :  { %v434_v46 = vmul.f32 0.0025510204, %v432_v44  ;;  %v449_v48 = vadd.f32 1e-05, %v439_v43  ;;  %v228_v43 = vld [vmem:[%s5835_s14] sm:$0xff]  ;;  %v6212_v44 = vand.u32 127, %v379_v26 }
 0x1c8   :  { %v438_v49 = vsub.f32 %v434_v46, %v436_v45  ;;  %5654 = vrsqrt.f32 %v449_v48  ;;  %v6215_v48 = vsub.s32 0, %v5985_v27  ;;  %vm523_vm3 = vcmp.lt.s32.totalorder %v6212_v44, 15 }
 0x1c9   :  { %vm580_vm5 = vcmp.lt.s32.totalorder %v6212_v44, 14  ;;  %vm637_vm6 = vcmp.lt.s32.totalorder %v6212_v44, 13  ;;  %vm694_vm7 = vcmp.lt.s32.totalorder %v6212_v44, 1  ;;  %vm767_vm8 = vcmp.lt.s32.totalorder %v6212_v44, 127 }
 0x1ca   :  { %v440_v50 = vmax.f32 %v438_v49, 0.0  ;;  %8445 = vst [vmem:[#allocation39_spill] sm:$0xff] %v6215_v48  ;;  %v231_v49 = vld [vmem:[%s5840_s19 + $0x8] sm:$0xff]  ;;  %v6226_v26 = vrot.slane %v5997_v32, %v6215_v48  ;;  %vm824_vm9 = vcmp.lt.s32.totalorder %v6212_v44, 115  ;;  %vm881_vm10 = vcmp.lt.s32.totalorder %v6212_v44, 114 }
 0x1cb   :  { %vm938_vm11 = vcmp.lt.s32.totalorder %v6212_v44, 113  ;;  %vm2465_vm12 = vcmp.lt.s32.totalorder %v6212_v44, 7  ;;  %vm2446_vm13 = vcmp.lt.s32.totalorder %v6212_v44, 8  ;;  %vm2596_vm1 = vcmp.lt.s32.totalorder %v6212_v44, 6 }
 0x1cc   :  { %v450_v51 = vadd.f32 1e-05, %v440_v50  ;;  %vm2873_vm2 = vcmp.lt.s32.totalorder %v6212_v44, 122 }
 0x1ce   :  { %5656 = vrsqrt.f32 %v450_v51 }
 0x1d2   :  { %v5655_v60 = vpop.eup %5654 }
 0x1d3   :  { %v454_v62 = vmul.f32 %v5655_v60, %v442_v55  ;;  %v453_v63 = vmul.f32 %v5655_v60, %v441_v54  ;;  %v456_v1 = vmul.f32 %v5655_v60, %v444_v57  ;;  %v455_v2 = vmul.f32 %v5655_v60, %v443_v56  ;;  %v5639_v54 = vld [vmem:[%s5830_s8 + $0x4] ss:$8 sps:$4 sm:$0xff]  }
 0x1d4   :  { %5298 = vmatprep.mubr.msk.bf16.mxu0 %vm1034_vm4, %v5639_v54  ;;  %5299 = vmatprep.mubr.msk.bf16.mxu1 %vm1034_vm4, %v5639_v54 }
 0x1d5   :  { %v472_v3 = vmul.f32 %v464_v20, %v454_v62  ;;  %v471_v4 = vmul.f32 %v464_v20, %v453_v63  ;;  %v474_v5 = vmul.f32 %v464_v20, %v456_v1  ;;  %v473_v6 = vmul.f32 %v464_v20, %v455_v2 }
 0x1d6   :  { %v6241_v63 = vrot.slane %v5991_v30, %v6215_v48 }
 0x1d7   :  { %v490_v10 = vadd.f32 %v482_v22, %v472_v3  ;;  %v489_v47 = vadd.f32 %v482_v22, %v471_v4  ;;  %v492_v53 = vadd.f32 %v482_v22, %v474_v5  ;;  %v491_v14 = vadd.f32 %v482_v22, %v473_v6 }
 0x1d8   :  { %v5657_v8 = vpop.eup %5656  ;;  %v6250_v6 = vrot.slane %v5994_v31, %v6215_v48 }
 0x1d9   :  { %v457_v11 = vmul.f32 %v5657_v8, %v445_v7  ;;  %v6064_v52 = vmax.f32 %v490_v10, 0.0  ;;  %v6066_v58 = vmax.f32 %v489_v47, 0.0  ;;  %v458_v15 = vmul.f32 %v5657_v8, %v446_v9 }
 0x1da   :  { %v460_v59 = vmul.f32 %v5657_v8, %v448_v16  ;;  %v6074_v61 = vmax.f32 %v492_v53, 0.0  ;;  %v6076_v18 = vmax.f32 %v491_v14, 0.0  ;;  %v459_v28 = vmul.f32 %v5657_v8, %v447_v12 }
 0x1db   :  { %v475_v17 = vmul.f32 %v6056_v21, %v457_v11  ;;  %509 = vrot.lane.b32.xlu1 %v6064_v52, %s5746_s0  ;;  %505 = vrot.lane.b32.xlu0 %v6066_v58, %s5746_s0  ;;  %v476_v20 = vmul.f32 %v6056_v21, %v458_v15  ;;  %v6256_v8 = vrot.slane %v6000_v33, %v6215_v48  ;;  %v229_v11 = vld [vmem:[%s5835_s14 + $0x8] sm:$0xff]  ;;  %s8465_s14 = sld [smem:[#allocation18_spill]] }
 0x1dc   :  { %v478_v25 = vmul.f32 %v6056_v21, %v460_v59  ;;  %v477_v37 = vmul.f32 %v6056_v21, %v459_v28  ;;  %v230_v28 = vld [vmem:[%s5840_s19] sm:$0xff]  ;;  %s8473_s19 = sld [smem:[#allocation19_spill]] }
 0x1dd   :  { %v493_v19 = vadd.f32 %v6058_v23, %v475_v17  ;;  %v494_v24 = vadd.f32 %v6058_v23, %v476_v20  ;;  %v6268_v17 = vsub.s32 1, %v5985_v27 }
 0x1de   :  { %v496_v35 = vadd.f32 %v6058_v23, %v478_v25  ;;  %v495_v40 = vadd.f32 %v6058_v23, %v477_v37 }
 0x1df   :  { %517 = vrot.lane.b32.xlu1 %v6074_v61, %s5746_s0  ;;  %513 = vrot.lane.b32.xlu0 %v6076_v18, %s5746_s0  ;;  %v6085_v22 = vmax.f32 %v493_v19, 0.0  ;;  %v6093_v0 = vmax.f32 %v494_v24, 0.0  ;;  %8446 = vst [vmem:[#allocation40_spill] sm:$0xff] %v6268_v17 }
 0x1e0   :  { %v6101_v39 = vmax.f32 %v496_v35, 0.0  ;;  %v6108_v41 = vmax.f32 %v495_v40, 0.0 }
 0x1e3   :  { %564 = vrot.lane.b32.xlu0 %v6066_v58, %s5747_s5  ;;  %507 = vrot.lane.b32.xlu1 %v6085_v22, %s5746_s0 }
 0x1e7   :  { %568 = vrot.lane.b32.xlu0 %v6064_v52, %s5747_s5  ;;  %511 = vrot.lane.b32.xlu1 %v6093_v0, %s5746_s0 }
 0x1eb   :  { %576 = vrot.lane.b32.xlu0 %v6074_v61, %s5747_s5  ;;  %519 = vrot.lane.b32.xlu1 %v6101_v39, %s5746_s0 }
 0x1ef   :  { %572 = vrot.lane.b32.xlu0 %v6076_v18, %s5747_s5  ;;  %515 = vrot.lane.b32.xlu1 %v6108_v41, %s5746_s0 }
 0x1f3   :  { %621 = vrot.lane.b32.xlu0 %v6066_v58, %s5748_s17  ;;  %566 = vrot.lane.b32.xlu1 %v6085_v22, %s5747_s5 }
 0x1f7   :  { %625 = vrot.lane.b32.xlu0 %v6064_v52, %s5748_s17  ;;  %570 = vrot.lane.b32.xlu1 %v6093_v0, %s5747_s5 }
 0x1fb   :  { %633 = vrot.lane.b32.xlu0 %v6074_v61, %s5748_s17  ;;  %578 = vrot.lane.b32.xlu1 %v6101_v39, %s5747_s5 }
 0x1ff   :  { %629 = vrot.lane.b32.xlu0 %v6076_v18, %s5748_s17  ;;  %574 = vrot.lane.b32.xlu1 %v6108_v41, %s5747_s5 }
 0x203   :  { %678 = vrot.lane.b32.xlu0 %v6066_v58, %s5749_s21  ;;  %623 = vrot.lane.b32.xlu1 %v6085_v22, %s5748_s17 }
 0x207   :  { %682 = vrot.lane.b32.xlu0 %v6064_v52, %s5749_s21  ;;  %627 = vrot.lane.b32.xlu1 %v6093_v0, %s5748_s17 }
 0x20b   :  { %690 = vrot.lane.b32.xlu0 %v6074_v61, %s5749_s21  ;;  %635 = vrot.lane.b32.xlu1 %v6101_v39, %s5748_s17 }
 0x20f   :  { %686 = vrot.lane.b32.xlu0 %v6076_v18, %s5749_s21  ;;  %631 = vrot.lane.b32.xlu1 %v6108_v41, %s5748_s17 }
 0x213   :  { %755 = vrot.lane.b32.xlu0 %v6064_v52, %s5750_s25  ;;  %680 = vrot.lane.b32.xlu1 %v6085_v22, %s5749_s21 }
 0x217   :  { %759 = vrot.lane.b32.xlu0 %v6076_v18, %s5750_s25  ;;  %684 = vrot.lane.b32.xlu1 %v6093_v0, %s5749_s21 }
 0x21b   :  { %751 = vrot.lane.b32.xlu0 %v6066_v58, %s5750_s25  ;;  %692 = vrot.lane.b32.xlu1 %v6101_v39, %s5749_s21 }
 0x21f   :  { %763 = vrot.lane.b32.xlu0 %v6074_v61, %s5750_s25  ;;  %688 = vrot.lane.b32.xlu1 %v6108_v41, %s5749_s21 }
 0x223   :  { %812 = vrot.lane.b32.xlu0 %v6064_v52, %s5751_s29  ;;  %757 = vrot.lane.b32.xlu1 %v6093_v0, %s5750_s25 }
 0x227   :  { %816 = vrot.lane.b32.xlu0 %v6076_v18, %s5751_s29  ;;  %761 = vrot.lane.b32.xlu1 %v6108_v41, %s5750_s25 }
 0x22b   :  { %808 = vrot.lane.b32.xlu0 %v6066_v58, %s5751_s29  ;;  %753 = vrot.lane.b32.xlu1 %v6085_v22, %s5750_s25 }
 0x22f   :  { %820 = vrot.lane.b32.xlu0 %v6074_v61, %s5751_s29  ;;  %765 = vrot.lane.b32.xlu1 %v6101_v39, %s5750_s25 }
 0x233   :  { %869 = vrot.lane.b32.xlu0 %v6064_v52, %s5752_s3  ;;  %814 = vrot.lane.b32.xlu1 %v6093_v0, %s5751_s29 }
 0x237   :  { %873 = vrot.lane.b32.xlu0 %v6076_v18, %s5752_s3  ;;  %818 = vrot.lane.b32.xlu1 %v6108_v41, %s5751_s29 }
 0x23b   :  { %865 = vrot.lane.b32.xlu0 %v6066_v58, %s5752_s3  ;;  %810 = vrot.lane.b32.xlu1 %v6085_v22, %s5751_s29 }
 0x23f   :  { %877 = vrot.lane.b32.xlu0 %v6074_v61, %s5752_s3  ;;  %822 = vrot.lane.b32.xlu1 %v6101_v39, %s5751_s29 }
 0x243   :  { %926 = vrot.lane.b32.xlu0 %v6064_v52, %s5753_s30  ;;  %871 = vrot.lane.b32.xlu1 %v6093_v0, %s5752_s3 }
 0x247   :  { %930 = vrot.lane.b32.xlu0 %v6076_v18, %s5753_s30  ;;  %875 = vrot.lane.b32.xlu1 %v6108_v41, %s5752_s3 }
 0x24b   :  { %922 = vrot.lane.b32.xlu0 %v6066_v58, %s5753_s30  ;;  %867 = vrot.lane.b32.xlu1 %v6085_v22, %s5752_s3 }
 0x24d   :  { %v506_v21 = vpop.permute.xlu0 %505  ;;  %v510_v23 = vpop.permute.xlu1 %509 }
 0x24e   :  { %v528_v55 = vsel %vm523_vm3, %v506_v21, %v510_v23 }
 0x24f   :  { %934 = vrot.lane.b32.xlu0 %v6074_v61, %s5753_s30  ;;  %879 = vrot.lane.b32.xlu1 %v6101_v39, %s5752_s3  ;;  %v549_v62 = vmul.f32 %v6226_v26, %v528_v55  ;;  %v6294_v55 = vrot.slane %v5991_v30, %v6268_v17 }
 0x251   :  { %v514_v45 = vpop.permute.xlu0 %513  ;;  %v518_v46 = vpop.permute.xlu1 %517 }
 0x252   :  { %v530_v2 = vsel %vm523_vm3, %v518_v46, %v506_v21  ;;  %v526_v47 = vsel %vm523_vm3, %v510_v23, %v514_v45  ;;  %v524_v53 = vsel %vm523_vm3, %v514_v45, %v518_v46  ;;  %v6282_v23 = vrot.slane %v5997_v32, %v6268_v17  ;;  %v232_v45 = vld [vmem:[%s5845_s24] sm:$0xff] }
 0x253   :  { %1017 = vperm.xlu0 %5611, %v228_v43   ;;  %928 = vrot.lane.b32.xlu1 %v6093_v0, %s5753_s30  ;;  %v548_v9 = vmul.f32 %v6241_v63, %v530_v2  ;;  %v550_v20 = vmul.f32 %v6250_v6, %v526_v47  ;;  %v551_v12 = vmul.f32 %v6256_v8, %v524_v53 }
 0x255   :  { %v6221_v50 = vpop.permute.xlu0 %564  ;;  %v508_v51 = vpop.permute.xlu1 %507 }
 0x257   :  { %1197 = vperm.xlu0 %5611, %v231_v49   ;;  %932 = vrot.lane.b32.xlu1 %v6108_v41, %s5753_s30 }
 0x259   :  { %v6234_v56 = vpop.permute.xlu0 %568  ;;  %v512_v57 = vpop.permute.xlu1 %511 }
 0x25a   :  { %v529_v60 = vsel %vm523_vm3, %v508_v51, %v512_v57  ;;  %v585_v43 = vsel %vm580_vm5, %v6221_v50, %v6234_v56 }
 0x25b   :  { %v553_v1 = vmul.f32 %v6226_v26, %v529_v60  ;;  %924 = vrot.lane.b32.xlu1 %v6085_v22, %s5753_s30  ;;  %v606_v54 = vmul.f32 %v6282_v23, %v585_v43 }
 0x25d   :  { %v577_v3 = vpop.permute.xlu0 %576  ;;  %v520_v4 = vpop.permute.xlu1 %519  ;;  %v557_v5 = vpack.c.bf16 %v553_v1, %v549_v62  ;;  %v233_v62 = vld [vmem:[%s5845_s24 + $0x8] sm:$0xff]  ;;  %s8474_s24 = sld [smem:[#allocation20_spill]] }
 0x25e   :  { %v531_v7 = vsel %vm523_vm3, %v520_v4, %v508_v51  ;;  %v587_v60 = vsel %vm580_vm5, %v577_v3, %v6221_v50 }
 0x25f   :  { %v552_v10 = vmul.f32 %v6241_v63, %v531_v7  ;;  %936 = vrot.lane.b32.xlu1 %v6101_v39, %s5753_s30  ;;  %1038 = vmatprep.subr.bf16.mxu0 %v557_v5  ;;  %v6303_v5 = vrot.slane %v5994_v31, %v6268_v17 }
 0x261   :  { %v556_v14 = vpack.c.bf16 %v552_v10, %v548_v9  ;;  %v573_v15 = vpop.permute.xlu0 %572  ;;  %v516_v16 = vpop.permute.xlu1 %515  ;;  %v605_v9 = vmul.f32 %v6294_v55, %v587_v60  ;;  %v6310_v10 = vrot.slane %v6000_v33, %v6268_v17 }
 0x262   :  { %v525_v59 = vsel %vm523_vm3, %v516_v16, %v520_v4  ;;  %v527_v19 = vsel %vm523_vm3, %v512_v57, %v516_v16  ;;  %v581_v50 = vsel %vm580_vm5, %v573_v15, %v577_v3  ;;  %v583_v53 = vsel %vm580_vm5, %v6234_v56, %v573_v15 }
 0x263   :  { %v554_v24 = vmul.f32 %v6250_v6, %v527_v19  ;;  %v555_v25 = vmul.f32 %v6256_v8, %v525_v59  ;;  %1022 = vperm.xlu1 %5612, %v229_v11   ;;  %1039 = vmatpush1.bf16.msra.mxu0 %v556_v14  ;;  %v6319_v59 = vsub.s32 2, %v5985_v27  ;;  %v608_v3 = vmul.f32 %v6310_v10, %v581_v50 }
 0x265   :  { %v558_v35 = vpack.c.bf16 %v554_v24, %v550_v20  ;;  %v622_v37 = vpop.permute.xlu0 %621  ;;  %v567_v40 = vpop.permute.xlu1 %566  ;;  %v559_v21 = vpack.c.bf16 %v555_v25, %v551_v12  ;;  %8447 = vst [vmem:[#allocation41_spill] sm:$0xff] %v6319_v59  ;;  %v607_v12 = vmul.f32 %v6303_v5, %v583_v53  ;;  %v6355_v50 = vrot.slane %v6000_v33, %v6319_v59 }
 0x267   :  { %1192 = vperm.xlu1 %5612, %v230_v28   ;;  %1081 = vmatprep.subr.bf16.mxu1 %v559_v21 }
 0x268   :  { %1082 = vmatpush1.bf16.msra.mxu1 %v558_v35 }
 0x269   :  { %v626_v46 = vpop.permute.xlu0 %625  ;;  %v571_v49 = vpop.permute.xlu1 %570 }
 0x26a   :  { %v586_v51 = vsel %vm580_vm5, %v567_v40, %v571_v49  ;;  %v642_v21 = vsel %vm637_vm6, %v622_v37, %v626_v46 }
 0x26b   :  { %v610_v57 = vmul.f32 %v6282_v23, %v586_v51  ;;  %1210 = vperm.xlu1 %5612, %v232_v45  }
 0x26d   :  { %v634_v1 = vpop.permute.xlu0 %633  ;;  %v579_v2 = vpop.permute.xlu1 %578  ;;  %v614_v4 = vpack.c.bf16 %v610_v57, %v606_v54  ;;  %v6341_v54 = vrot.slane %v5991_v30, %v6319_v59 }
 0x26e   :  { %v588_v7 = vsel %vm580_vm5, %v579_v2, %v567_v40  ;;  %v6332_v40 = vrot.slane %v5997_v32, %v6319_v59  ;;  %v644_v60 = vsel %vm637_vm6, %v634_v1, %v622_v37 }
 0x26f   :  { %v609_v47 = vmul.f32 %v6294_v55, %v588_v7  ;;  %1215 = vperm.xlu1 %5612, %v233_v62   ;;  %1040 = vmatprep.subr.bf16.mxu0 %v614_v4 }
 0x270   :  { %v663_v51 = vmul.f32 %v6332_v40, %v642_v21 }
 0x271   :  { %v613_v11 = vpack.c.bf16 %v609_v47, %v605_v9  ;;  %v630_v14 = vpop.permute.xlu0 %629  ;;  %v575_v16 = vpop.permute.xlu1 %574  ;;  %v662_v9 = vmul.f32 %v6341_v54, %v644_v60  ;;  %v6351_v47 = vrot.slane %v5994_v31, %v6319_v59 }
 0x272   :  { %v582_v19 = vsel %vm580_vm5, %v575_v16, %v579_v2  ;;  %v584_v20 = vsel %vm580_vm5, %v571_v49, %v575_v16  ;;  %v638_v37 = vsel %vm637_vm6, %v630_v14, %v634_v1 }
 0x273   :  { %v611_v24 = vmul.f32 %v6303_v5, %v584_v20  ;;  %v612_v56 = vmul.f32 %v6310_v10, %v582_v19  ;;  %1041 = vmatpush1.bf16.msra.mxu0 %v613_v11  ;;  %v640_v11 = vsel %vm637_vm6, %v626_v46, %v630_v14 }
 0x275   :  { %v615_v15 = vpack.c.bf16 %v611_v24, %v607_v12  ;;  %v679_v25 = vpop.permute.xlu0 %678  ;;  %v624_v28 = vpop.permute.xlu1 %623  ;;  %v616_v35 = vpack.c.bf16 %v612_v56, %v608_v3  ;;  %v6363_v12 = vsub.s32 3, %v5985_v27  ;;  %v664_v56 = vmul.f32 %v6351_v47, %v640_v11 }
 0x277   :  { %1083 = vmatprep.subr.bf16.mxu1 %v616_v35  ;;  %8448 = vst [vmem:[#allocation42_spill] sm:$0xff] %v6363_v12 }
 0x278   :  { %1084 = vmatpush1.bf16.msra.mxu1 %v615_v15  ;;  %v665_v15 = vmul.f32 %v6355_v50, %v638_v37 }
 0x279   :  { %v683_v43 = vpop.permute.xlu0 %682  ;;  %v628_v45 = vpop.permute.xlu1 %627 }
 0x27a   :  { %v643_v49 = vsel %vm637_vm6, %v624_v28, %v628_v45 }
 0x27b   :  { %v667_v57 = vmul.f32 %v6332_v40, %v643_v49  ;;  %v6378_v49 = vrot.slane %v5997_v32, %v6363_v12 }
 0x27d   :  { %v691_v62 = vpop.permute.xlu0 %690  ;;  %v636_v2 = vpop.permute.xlu1 %635  ;;  %v671_v4 = vpack.c.bf16 %v667_v57, %v663_v51 }
 0x27e   :  { %v645_v7 = vsel %vm637_vm6, %v636_v2, %v624_v28 }
 0x27f   :  { %v666_v53 = vmul.f32 %v6341_v54, %v645_v7  ;;  %1042 = vmatprep.subr.bf16.mxu0 %v671_v4  ;;  %v6389_v4 = vrot.slane %v5991_v30, %v6363_v12 }
 0x281   :  { %v670_v16 = vpack.c.bf16 %v666_v53, %v662_v9  ;;  %v687_v19 = vpop.permute.xlu0 %686  ;;  %v632_v20 = vpop.permute.xlu1 %631  ;;  %v701_v9 = vsel %vm694_vm7, %v691_v62, %v679_v25 }
 0x282   :  { %v639_v3 = vsel %vm637_vm6, %v632_v20, %v636_v2  ;;  %v641_v24 = vsel %vm637_vm6, %v628_v45, %v632_v20  ;;  %v699_v45 = vsel %vm694_vm7, %v679_v25, %v683_v43  ;;  %v740_v20 = vmul.f32 %v6093_v0, %v6012_v38 }
 0x283   :  { %v668_v1 = vmul.f32 %v6351_v47, %v641_v24  ;;  %v669_v46 = vmul.f32 %v6355_v50, %v639_v3  ;;  %1043 = vmatpush1.bf16.msra.mxu0 %v670_v16  ;;  %v720_v2 = vmul.f32 %v6378_v49, %v699_v45  ;;  %v719_v3 = vmul.f32 %v6389_v4, %v701_v9 }
 0x284   :  { %v6403_v24 = vrot.slane %v5994_v31, %v6363_v12  ;;  %v736_v0 = vmul.f32 %v6064_v52, %v6012_v38  ;;  %v739_v45 = vmul.f32 %v6085_v22, %v6004_v34 }
 0x285   :  { %v672_v14 = vpack.c.bf16 %v668_v1, %v664_v56  ;;  %v6374_v28 = vpop.permute.xlu0 %755  ;;  %v681_v35 = vpop.permute.xlu1 %680  ;;  %v673_v21 = vpack.c.bf16 %v669_v46, %v665_v15  ;;  %v6407_v56 = vrot.slane %v6000_v33, %v6363_v12  ;;  %v695_v15 = vsel %vm694_vm7, %v687_v19, %v691_v62 }
 0x286   :  { %v697_v1 = vsel %vm694_vm7, %v683_v43, %v687_v19  ;;  %v6423_v62 = vsub.s32 5, %v5985_v27  ;;  %v744_v19 = vpack.c.bf16 %v740_v20, %v736_v0  ;;  %v741_v20 = vmul.f32 %v6108_v41, %v6008_v36 }
 0x287   :  { %1085 = vmatprep.subr.bf16.mxu1 %v673_v21  ;;  %v735_v21 = vmul.f32 %v6066_v58, %v6004_v34  ;;  %v722_v58 = vmul.f32 %v6407_v56, %v695_v15 }
 0x288   :  { %1086 = vmatpush1.bf16.msra.mxu1 %v672_v14  ;;  %8449 = vst [vmem:[#allocation43_spill] sm:$0xff] %v6423_v62 }
 0x289   :  { %v6382_v51 = vpop.permute.xlu0 %759  ;;  %v685_v57 = vpop.permute.xlu1 %684 }
 0x28a   :  { %v700_v60 = vsel %vm694_vm7, %v681_v35, %v685_v57  ;;  %v770_v15 = vsel %vm767_vm8, %v6374_v28, %v6382_v51 }
 0x28b   :  { %v724_v7 = vmul.f32 %v6378_v49, %v700_v60  ;;  %v742_v60 = vmul.f32 %v6101_v39, %v6016_v42 }
 0x28d   :  { %v6394_v53 = vpop.permute.xlu0 %751  ;;  %v693_v37 = vpop.permute.xlu1 %692  ;;  %v728_v11 = vpack.c.bf16 %v724_v7, %v720_v2  ;;  %v721_v2 = vmul.f32 %v6403_v24, %v697_v1  ;;  %v737_v1 = vmul.f32 %v6076_v18, %v6008_v36 }
 0x28e   :  { %v702_v16 = vsel %vm694_vm7, %v693_v37, %v681_v35  ;;  %v772_v18 = vsel %vm767_vm8, %v6394_v53, %v6374_v28 }
 0x28f   :  { %v723_v25 = vmul.f32 %v6389_v4, %v702_v16  ;;  %1044 = vmatprep.subr.bf16.mxu0 %v728_v11 }
 0x291   :  { %v727_v46 = vpack.c.bf16 %v723_v25, %v719_v3  ;;  %v764_v14 = vpop.permute.xlu0 %763  ;;  %v689_v35 = vpop.permute.xlu1 %688  ;;  %v6440_v3 = vrot.slane %v5997_v32, %v6423_v62 }
 0x292   :  { %v696_v43 = vsel %vm694_vm7, %v689_v35, %v693_v37  ;;  %v698_v52 = vsel %vm694_vm7, %v685_v57, %v689_v35  ;;  %v743_v37 = vpack.c.bf16 %v739_v45, %v735_v21  ;;  %v738_v57 = vmul.f32 %v6074_v61, %v6016_v42 }
 0x293   :  { %v725_v7 = vmul.f32 %v6403_v24, %v698_v52  ;;  %v726_v22 = vmul.f32 %v6407_v56, %v696_v43  ;;  %1045 = vmatpush1.bf16.msra.mxu0 %v727_v46  ;;  %v745_v46 = vpack.c.bf16 %v741_v20, %v737_v1  ;;  %v793_v35 = vmul.f32 %v6440_v3, %v770_v15 }
 0x294   :  { %1046 = vmatprep.subr.bf16.mxu0 %v744_v19  ;;  %v746_v25 = vpack.c.bf16 %v742_v60, %v738_v57  ;;  %v6453_v21 = vrot.slane %v5991_v30, %v6423_v62  ;;  %v768_v28 = vsel %vm767_vm8, %v6382_v51, %v764_v14  ;;  %v6479_v57 = vsub.s32 6, %v5985_v27 }
 0x295   :  { %v729_v39 = vpack.c.bf16 %v725_v7, %v721_v2  ;;  %v813_v9 = vpop.permute.xlu0 %812  ;;  %v758_v11 = vpop.permute.xlu1 %757  ;;  %v730_v16 = vpack.c.bf16 %v726_v22, %v722_v58  ;;  %v6465_v58 = vrot.slane %v5994_v31, %v6423_v62  ;;  %v6469_v7 = vrot.slane %v6000_v33, %v6423_v62 }
 0x296   :  { %v792_v2 = vmul.f32 %v6453_v21, %v772_v18  ;;  %8450 = vst [vmem:[#allocation44_spill] sm:$0xff] %v6479_v57 }
 0x297   :  { %1047 = vmatpush1.bf16.msra.mxu0 %v743_v37  ;;  %1087 = vmatprep.subr.bf16.mxu1 %v730_v16  ;;  %v794_v15 = vmul.f32 %v6465_v58, %v768_v28 }
 0x298   :  { %1088 = vmatpush1.bf16.msra.mxu1 %v729_v39  ;;  %v774_v39 = vsel %vm767_vm8, %v764_v14, %v6394_v53 }
 0x299   :  { %v817_v61 = vpop.permute.xlu0 %816  ;;  %1089 = vmatprep.subr.bf16.mxu1 %v746_v25  ;;  %v762_v0 = vpop.permute.xlu1 %761  ;;  %v795_v51 = vmul.f32 %v6469_v7, %v774_v39 }
 0x29a   :  { %v771_v41 = vsel %vm767_vm8, %v758_v11, %v762_v0 }
 0x29b   :  { %v797_v45 = vmul.f32 %v6440_v3, %v771_v41 }
 0x29c   :  { %1090 = vmatpush1.bf16.msra.mxu1 %v745_v46 }
 0x29d   :  { %v809_v60 = vpop.permute.xlu0 %808  ;;  %v754_v43 = vpop.permute.xlu1 %753  ;;  %v801_v52 = vpack.c.bf16 %v797_v45, %v793_v35  ;;  %v827_v45 = vsel %vm824_vm9, %v813_v9, %v817_v61 }
 0x29e   :  { %v773_v19 = vsel %vm767_vm8, %v754_v43, %v758_v11  ;;  %v829_v28 = vsel %vm824_vm9, %v809_v60, %v813_v9 }
 0x29f   :  { %v796_v22 = vmul.f32 %v6453_v21, %v773_v19  ;;  %1048 = vmatprep.subr.bf16.mxu0 %v801_v52 }
 0x2a1   :  { %v800_v11 = vpack.c.bf16 %v796_v22, %v792_v2  ;;  %v821_v37 = vpop.permute.xlu0 %820  ;;  %v766_v16 = vpop.permute.xlu1 %765  ;;  %v6501_v2 = vrot.slane %v5991_v30, %v6479_v57 }
 0x2a2   :  { %v769_v20 = vsel %vm767_vm8, %v762_v0, %v766_v16  ;;  %v775_v25 = vsel %vm767_vm8, %v766_v16, %v754_v43  ;;  %v6492_v0 = vrot.slane %v5997_v32, %v6479_v57  ;;  %v825_v9 = vsel %vm824_vm9, %v817_v61, %v821_v37 }
 0x2a3   :  { %v798_v1 = vmul.f32 %v6465_v58, %v769_v20  ;;  %v799_v53 = vmul.f32 %v6469_v7, %v775_v25  ;;  %1049 = vmatpush1.bf16.msra.mxu0 %v800_v11  ;;  %8452 = vst [vmem:[#allocation46_spill] sm:$0xff] %v6501_v2  ;;  %v849_v20 = vmul.f32 %v6501_v2, %v829_v28 }
 0x2a4   :  { %8451 = vst [vmem:[#allocation45_spill] sm:$0xff] %v6492_v0  ;;  %v850_v19 = vmul.f32 %v6492_v0, %v827_v45  ;;  %v6511_v25 = vrot.slane %v5994_v31, %v6479_v57 }
 0x2a5   :  { %v802_v14 = vpack.c.bf16 %v798_v1, %v794_v15  ;;  %v870_v41 = vpop.permute.xlu0 %869  ;;  %v815_v46 = vpop.permute.xlu1 %814  ;;  %v803_v35 = vpack.c.bf16 %v799_v53, %v795_v51  ;;  %v6515_v15 = vrot.slane %v6000_v33, %v6479_v57  ;;  %v831_v53 = vsel %vm824_vm9, %v821_v37, %v809_v60 }
 0x2a6   :  { %8453 = vst [vmem:[#allocation47_spill] sm:$0xff] %v6511_v25 }
 0x2a7   :  { %1091 = vmatprep.subr.bf16.mxu1 %v803_v35  ;;  %8454 = vst [vmem:[#allocation48_spill] sm:$0xff] %v6515_v15  ;;  %v6523_v35 = vsub.s32 7, %v5985_v27 }
 0x2a8   :  { %1092 = vmatpush1.bf16.msra.mxu1 %v802_v14 }
 0x2a9   :  { %v874_v18 = vpop.permute.xlu0 %873  ;;  %v819_v43 = vpop.permute.xlu1 %818  ;;  %8455 = vst [vmem:[#allocation49_spill] sm:$0xff] %v6523_v35 }
 0x2aa   :  { %v828_v52 = vsel %vm824_vm9, %v815_v46, %v819_v43 }
 0x2ab   :  { %v854_v22 = vmul.f32 %v6492_v0, %v828_v52 }
 0x2ad   :  { %v811_v39 = vpop.permute.xlu1 %810  ;;  %v858_v11 = vpack.c.bf16 %v854_v22, %v850_v19  ;;  %v866_v51 = vpop.permute.xlu0 %865  ;;  %v851_v19 = vmul.f32 %v6511_v25, %v825_v9  ;;  %v852_v22 = vmul.f32 %v6515_v15, %v831_v53  ;;  %v6545_v53 = vrot.slane %v5991_v30, %v6523_v35 }
 0x2ae   :  { %v830_v16 = vsel %vm824_vm9, %v811_v39, %v815_v46  ;;  %v6559_v30 = vrot.slane %v6000_v33, %v6523_v35 }
 0x2af   :  { %v853_v1 = vmul.f32 %v6501_v2, %v830_v16  ;;  %1050 = vmatprep.subr.bf16.mxu0 %v858_v11  ;;  %8457 = vst [vmem:[#allocation51_spill] sm:$0xff] %v6545_v53 }
 0x2b0   :  { %8459 = vst [vmem:[#allocation53_spill] sm:$0xff] %v6559_v30 }
 0x2b1   :  { %v857_v14 = vpack.c.bf16 %v853_v1, %v849_v20  ;;  %v823_v46 = vpop.permute.xlu1 %822  ;;  %v878_v60 = vpop.permute.xlu0 %877 }
 0x2b2   :  { %v826_v45 = vsel %vm824_vm9, %v819_v43, %v823_v46  ;;  %v832_v52 = vsel %vm824_vm9, %v823_v46, %v811_v39  ;;  %v6536_v43 = vrot.slane %v5997_v32, %v6523_v35  ;;  %v884_v39 = vsel %vm881_vm10, %v870_v41, %v874_v18 }
 0x2b3   :  { %v855_v61 = vmul.f32 %v6511_v25, %v826_v45  ;;  %v856_v28 = vmul.f32 %v6515_v15, %v832_v52  ;;  %1051 = vmatpush1.bf16.msra.mxu0 %v857_v14  ;;  %v886_v32 = vsel %vm881_vm10, %v866_v51, %v870_v41  ;;  %v882_v41 = vsel %vm881_vm10, %v874_v18, %v878_v60 }
 0x2b4   :  { %8456 = vst [vmem:[#allocation50_spill] sm:$0xff] %v6536_v43  ;;  %v907_v9 = vmul.f32 %v6536_v43, %v884_v39 }
 0x2b5   :  { %v859_v37 = vpack.c.bf16 %v855_v61, %v851_v19  ;;  %v872_v11 = vpop.permute.xlu1 %871  ;;  %v860_v16 = vpack.c.bf16 %v856_v28, %v852_v22  ;;  %v927_v14 = vpop.permute.xlu0 %926  ;;  %v906_v22 = vmul.f32 %v6545_v53, %v886_v32  ;;  %v6555_v61 = vrot.slane %v5994_v31, %v6523_v35 }
 0x2b7   :  { %1093 = vmatprep.subr.bf16.mxu1 %v860_v16  ;;  %8458 = vst [vmem:[#allocation52_spill] sm:$0xff] %v6555_v61 }
 0x2b8   :  { %1094 = vmatpush1.bf16.msra.mxu1 %v859_v37  ;;  %v888_v37 = vsel %vm881_vm10, %v878_v60, %v866_v51 }
 0x2b9   :  { %v876_v20 = vpop.permute.xlu1 %875 }
 0x2ba   :  { %v885_v1 = vsel %vm881_vm10, %v872_v11, %v876_v20 }
 0x2bb   :  { %v911_v46 = vmul.f32 %v6536_v43, %v885_v1  ;;  %v908_v1 = vmul.f32 %v6555_v61, %v882_v41 }
 0x2bd   :  { %v868_v45 = vpop.permute.xlu1 %867  ;;  %v915_v52 = vpack.c.bf16 %v911_v46, %v907_v9  ;;  %v909_v9 = vmul.f32 %v6559_v30, %v888_v37  ;;  %v6585_v37 = vld [vmem:[%s5795_s9 + $0x20] ss:$0 sm:$0xff] }
 0x2be   :  { %v887_v19 = vsel %vm881_vm10, %v868_v45, %v872_v11  ;;  %v931_v11 = vpop.permute.xlu0 %930  ;;  %8461 = vst [vmem:[#allocation55_spill] sm:$0xff] %v6585_v37 }
 0x2bf   :  { %v910_v28 = vmul.f32 %v6545_v53, %v887_v19  ;;  %1052 = vmatprep.subr.bf16.mxu0 %v915_v52 }
 0x2c1   :  { %v914_v16 = vpack.c.bf16 %v910_v28, %v906_v22  ;;  %v880_v39 = vpop.permute.xlu1 %879 }
 0x2c2   :  { %v883_v31 = vsel %vm881_vm10, %v876_v20, %v880_v39  ;;  %v889_v33 = vsel %vm881_vm10, %v880_v39, %v868_v45  ;;  %v923_v52 = vpop.permute.xlu0 %922  ;;  %v6576_v20 = vld [vmem:[%s5795_s9 + $0x28] ss:$0 sm:$0xff]  ;;  %v941_v45 = vsel %vm938_vm11, %v927_v14, %v931_v11 }
 0x2c3   :  { %v912_v46 = vmul.f32 %v6555_v61, %v883_v31  ;;  %v913_v18 = vmul.f32 %v6559_v30, %v889_v33  ;;  %1053 = vmatpush1.bf16.msra.mxu0 %v914_v16  ;;  %8460 = vst [vmem:[#allocation54_spill] sm:$0xff] %v6576_v20  ;;  %v964_v28 = vmul.f32 %v6576_v20, %v941_v45 }
 0x2c4   :  { %v943_v16 = vsel %vm938_vm11, %v923_v52, %v927_v14 }
 0x2c5   :  { %v916_v51 = vpack.c.bf16 %v912_v46, %v908_v1  ;;  %v929_v60 = vpop.permute.xlu1 %928  ;;  %v917_v32 = vpack.c.bf16 %v913_v18, %v909_v9  ;;  %v963_v9 = vmul.f32 %v6585_v37, %v943_v16  ;;  %v6594_v18 = vld [vmem:[%s5795_s9 + $0x30] ss:$0 sm:$0xff] }
 0x2c6   :  { %v935_v39 = vpop.permute.xlu0 %934  ;;  %8462 = vst [vmem:[#allocation56_spill] sm:$0xff] %v6594_v18 }
 0x2c7   :  { %1095 = vmatprep.subr.bf16.mxu1 %v917_v32  ;;  %v939_v32 = vsel %vm938_vm11, %v931_v11, %v935_v39  ;;  %v945_v14 = vsel %vm938_vm11, %v935_v39, %v923_v52 }
 0x2c8   :  { %1096 = vmatpush1.bf16.msra.mxu1 %v916_v51  ;;  %v6597_v51 = vld [vmem:[%s5795_s9 + $0x38] ss:$0 sm:$0xff]  ;;  %v965_v16 = vmul.f32 %v6594_v18, %v939_v32 }
 0x2c9   :  { %v933_v19 = vpop.permute.xlu1 %932  ;;  %8463 = vst [vmem:[#allocation57_spill] sm:$0xff] %v6597_v51 }
 0x2ca   :  { %v942_v22 = vsel %vm938_vm11, %v929_v60, %v933_v19 }
 0x2cb   :  { %v968_v41 = vmul.f32 %v6576_v20, %v942_v22 }
 0x2cd   :  { %v925_v31 = vpop.permute.xlu1 %924  ;;  %v972_v33 = vpack.c.bf16 %v968_v41, %v964_v28  ;;  %v5641_v41 = vld [vmem:[%s5830_s8] ss:$8 sps:$4 sm:$0xff]   ;;  %s8464_s8 = sld [smem:[#allocation17_spill]] }
 0x2ce   :  { %v944_v1 = vsel %vm938_vm11, %v925_v31, %v929_v60 }
 0x2cf   :  { %v967_v46 = vmul.f32 %v6585_v37, %v944_v1  ;;  %1054 = vmatprep.subr.bf16.mxu0 %v972_v33  ;;  %v966_v33 = vmul.f32 %v6597_v51, %v945_v14 }
 0x2d1   :  { %v971_v45 = vpack.c.bf16 %v967_v46, %v963_v9  ;;  %v937_v22 = vpop.permute.xlu1 %936 }
 0x2d2   :  { %v940_v60 = vsel %vm938_vm11, %v933_v19, %v937_v22  ;;  %v946_v28 = vsel %vm938_vm11, %v937_v22, %v925_v31  ;;  %v1018_v19 = vpop.permute.xlu0 %1017 }
 0x2d3   :  { %v969_v1 = vmul.f32 %v6594_v18, %v940_v60  ;;  %v970_v11 = vmul.f32 %v6597_v51, %v946_v28  ;;  %1055 = vmatpush1.bf16.msra.mxu0 %v971_v45 }
 0x2d5   :  { %v973_v13 = vpack.c.bf16 %v969_v1, %v965_v16  ;;  %v974_v52 = vpack.c.bf16 %v970_v11, %v966_v33 }
 0x2d6   :  { %1071 = vmatmul.mubr.bf16.vlgmr.msra.gmra.mrb[4].mxu0 %v5641_v41  ;;  %v1198_v51 = vpop.permute.xlu0 %1197 }
 0x2d7   :  { %1097 = vmatprep.subr.bf16.mxu1 %v974_v52 }
 0x2d8   :  { %1098 = vmatpush1.bf16.msra.mxu1 %v973_v13 }
 0x2db   :  { %1114 = vmatmul.mubr.bf16.vlgmr.msra.gmra.mrb[4].mxu1 %v5641_v41 }
 0x2e2   :  { %v1023_v46 = vpop.permute.xlu1 %1022 }
 0x3a9   :  { %v1072_v39 = vpop.f32.mrb[4].mxu0 }
 0x3aa   :  { %v1073_v9 = vadd.f32 %v1072_v39, %v1018_v19  ;;  %v1074_v31 = vpop.f32.mrb[5].mxu0 }
 0x3ab   :  { %v1075_v22 = vadd.f32 %v1074_v31, %v1018_v19  ;;  %v1076_v32 = vpop.f32.mrb[6].mxu0 }
 0x3ac   :  { %v6613_v14 = vmul.f32 %v1073_v9, %v6004_v34  ;;  %v1077_v60 = vadd.f32 %v1076_v32, %v1023_v46  ;;  %v1078_v35 = vpop.f32.mrb[7].mxu0 }
 0x3ad   :  { %v6616_v45 = vmul.f32 %v1075_v22, %v6012_v38  ;;  %v1079_v28 = vadd.f32 %v1078_v35, %v1023_v46 }
 0x3ae   :  { %v6619_v16 = vmul.f32 %v1077_v60, %v6004_v34  ;;  %v1115_v13 = vpop.f32.mrb[4].mxu1  ;;  %v1144_v41 = vmul.f32 %v6613_v14, %v6613_v14 }
 0x3af   :  { %v1145_v33 = vmul.f32 %v6616_v45, %v6616_v45  ;;  %v6626_v1 = vmul.f32 %v1079_v28, %v6012_v38  ;;  %v1116_v11 = vadd.f32 %v1115_v13, %v1018_v19  ;;  %v1117_v52 = vpop.f32.mrb[5].mxu1  ;;  %v1132_v60 = vadd.f32 %v6616_v45, %v6613_v14 }
 0x3b0   :  { %v1118_v39 = vadd.f32 %v1117_v52, %v1018_v19  ;;  %v1119_v9 = vpop.f32.mrb[6].mxu1  ;;  %v1148_v35 = vmul.f32 %v6619_v16, %v6619_v16 }
 0x3b1   :  { %v1126_v31 = vmul.f32 %v1116_v11, %v6008_v36  ;;  %v1120_v22 = vadd.f32 %v1119_v9, %v1023_v46  ;;  %v1121_v32 = vpop.f32.mrb[7].mxu1  ;;  %v1149_v57 = vmul.f32 %v6626_v1, %v6626_v1  ;;  %v1137_v19 = vadd.f32 %v6626_v1, %v6619_v16 }
 0x3b2   :  { %v6636_v28 = vmul.f32 %v1118_v39, %v6016_v42  ;;  %v1122_v13 = vadd.f32 %v1121_v32, %v1023_v46  ;;  %v1152_v11 = vadd.f32 %v1145_v33, %v1144_v41 }
 0x3b3   :  { %v1130_v52 = vmul.f32 %v1120_v22, %v6008_v36  ;;  %v1133_v62 = vadd.f32 %v1132_v60, %v1126_v31  ;;  %v1146_v12 = vmul.f32 %v1126_v31, %v1126_v31  ;;  %v1157_v32 = vadd.f32 %v1149_v57, %v1148_v35 }
 0x3b4   :  { %v6642_v9 = vmul.f32 %v1122_v13, %v6016_v42  ;;  %v1147_v59 = vmul.f32 %v6636_v28, %v6636_v28  ;;  %v1193_v13 = vpop.permute.xlu1 %1192 }
 0x3b5   :  { %v1134_v48 = vadd.f32 %v1133_v62, %v6636_v28  ;;  %v1138_v17 = vadd.f32 %v1137_v19, %v1130_v52  ;;  %v1153_v39 = vadd.f32 %v1152_v11, %v1146_v12  ;;  %v1150_v27 = vmul.f32 %v1130_v52, %v1130_v52 }
 0x3b6   :  { %v1151_v41 = vmul.f32 %v6642_v9, %v6642_v9 }
 0x3b7   :  { %1135 = vadd.xlane.f32.xlu0 %v1134_v48  ;;  %v1139_v46 = vadd.f32 %v1138_v17, %v6642_v9  ;;  %v1154_v22 = vadd.f32 %v1153_v39, %v1147_v59  ;;  %v1158_v33 = vadd.f32 %v1157_v32, %v1150_v27 }
 0x3b8   :  { %v1211_v29 = vpop.permute.xlu1 %1210 }
 0x3b9   :  { %1140 = vadd.xlane.f32.xlu1 %v1139_v46  ;;  %v1159_v60 = vadd.f32 %v1158_v33, %v1151_v41 }
 0x3bb   :  { %1155 = vadd.xlane.f32.xlu0 %v1154_v22 }
 0x3bc   :  { %v6650_v62 = vpop.permute.xlu1 %1215 }
 0x3bf   :  { %1160 = vadd.xlane.f32.xlu0 %v1159_v60 }
 0x444   :  { %v1136_v12 = vpop.xlane.xlu0 %1135 }
 0x445   :  { %v1142_v19 = vmul.f32 0.0025510204, %v1136_v12 }
 0x446   :  { %v1141_v48 = vpop.xlane.xlu1 %1140 }
 0x447   :  { %v1143_v17 = vmul.f32 0.0025510204, %v1141_v48  ;;  %v1164_v57 = vmul.f32 %v1142_v19, %v1142_v19  ;;  %v1170_v60 = vsub.f32 %v6613_v14, %v1142_v19  ;;  %v1171_v12 = vsub.f32 %v6616_v45, %v1142_v19 }
 0x448   :  { %v1156_v11 = vpop.xlane.xlu0 %1155  ;;  %v1172_v30 = vsub.f32 %v1126_v31, %v1142_v19 }
 0x449   :  { %v1162_v35 = vmul.f32 0.0025510204, %v1156_v11  ;;  %v1165_v27 = vmul.f32 %v1143_v17, %v1143_v17  ;;  %v1174_v11 = vsub.f32 %v6619_v16, %v1143_v17 }
 0x44b   :  { %v1166_v59 = vsub.f32 %v1162_v35, %v1164_v57  ;;  %v1175_v57 = vsub.f32 %v6626_v1, %v1143_v17  ;;  %v1177_v1 = vsub.f32 %v6642_v9, %v1143_v17 }
 0x44c   :  { %v1161_v39 = vpop.xlane.xlu0 %1160 }
 0x44d   :  { %v1168_v46 = vmax.f32 %v1166_v59, 0.0  ;;  %v1163_v18 = vmul.f32 0.0025510204, %v1161_v39 }
 0x44f   :  { %v1178_v32 = vadd.f32 1e-05, %v1168_v46  ;;  %v1167_v22 = vsub.f32 %v1163_v18, %v1165_v27  ;;  %v1176_v46 = vsub.f32 %v1130_v52, %v1143_v17 }
 0x451   :  { %5658 = vrsqrt.f32 %v1178_v32  ;;  %v1169_v41 = vmax.f32 %v1167_v22, 0.0  ;;  %v1173_v22 = vsub.f32 %v6636_v28, %v1142_v19 }
 0x453   :  { %v1179_v33 = vadd.f32 1e-05, %v1169_v41 }
 0x455   :  { %5660 = vrsqrt.f32 %v1179_v33 }
 0x45b   :  { %v5659_v20 = vpop.eup %5658 }
 0x45c   :  { %v1182_v37 = vmul.f32 %v5659_v20, %v1170_v60  ;;  %v1183_v48 = vmul.f32 %v5659_v20, %v1171_v12  ;;  %v1184_v39 = vmul.f32 %v5659_v20, %v1172_v30  ;;  %v1185_v60 = vmul.f32 %v5659_v20, %v1173_v22 }
 0x45e   :  { %v1200_v35 = vmul.f32 %v1193_v13, %v1182_v37  ;;  %v1201_v18 = vmul.f32 %v1193_v13, %v1183_v48  ;;  %v1202_v12 = vmul.f32 %v1193_v13, %v1184_v39  ;;  %v1203_v19 = vmul.f32 %v1193_v13, %v1185_v60 }
 0x45f   :  { %v5661_v59 = vpop.eup %5660 }
 0x460   :  { %v1186_v27 = vmul.f32 %v5661_v59, %v1174_v11  ;;  %v1187_v32 = vmul.f32 %v5661_v59, %v1175_v57  ;;  %v1218_v14 = vadd.f32 %v1211_v29, %v1200_v35  ;;  %v1188_v41 = vmul.f32 %v5661_v59, %v1176_v46  ;;  %v5642_v46 = vld [vmem:[%s8464_s8 + $0x4] ss:$8 sps:$4 sm:$0xff]  }
 0x461   :  { %v1219_v16 = vadd.f32 %v1211_v29, %v1201_v18  ;;  %v1189_v30 = vmul.f32 %v5661_v59, %v1177_v1  ;;  %v1220_v20 = vadd.f32 %v1211_v29, %v1202_v12  ;;  %v1221_v59 = vadd.f32 %v1211_v29, %v1203_v19  ;;  %5302 = vmatprep.mubr.msk.bf16.mxu0 %vm1034_vm4, %v5642_v46  ;;  %v236_v12 = vld [vmem:[%s8465_s14] sm:$0xff] }
 0x462   :  { %v1204_v45 = vmul.f32 %v1198_v51, %v1186_v27  ;;  %v1205_v33 = vmul.f32 %v1198_v51, %v1187_v32  ;;  %v6657_v31 = vmax.f32 %v1218_v14, 0.0  ;;  %v1206_v52 = vmul.f32 %v1198_v51, %v1188_v41  ;;  %5303 = vmatprep.mubr.msk.bf16.mxu1 %vm1034_vm4, %v5642_v46 }
 0x463   :  { %v6666_v11 = vmax.f32 %v1219_v16, 0.0  ;;  %v1207_v9 = vmul.f32 %v1198_v51, %v1189_v30  ;;  %v6675_v35 = vmax.f32 %v1220_v20, 0.0  ;;  %v6684_v18 = vmax.f32 %v1221_v59, 0.0 }
 0x464   :  { %v1222_v37 = vadd.f32 %v6650_v62, %v1204_v45  ;;  %1234 = vrot.lane.b32.xlu0 %v6657_v31, %s5746_s0  ;;  %v1223_v28 = vadd.f32 %v6650_v62, %v1205_v33  ;;  %v1224_v57 = vadd.f32 %v6650_v62, %v1206_v52 }
 0x465   :  { %v1225_v39 = vadd.f32 %v6650_v62, %v1207_v9 }
 0x466   :  { %v6663_v48 = vmax.f32 %v1222_v37, 0.0  ;;  %v6672_v17 = vmax.f32 %v1223_v28, 0.0  ;;  %v6681_v13 = vmax.f32 %v1224_v57, 0.0  ;;  %v237_v28 = vld [vmem:[%s8465_s14 + $0x8] sm:$0xff]  ;;  %s8536_s14 = sld [smem:[#allocation32_spill]] }
 0x467   :  { %v6690_v51 = vmax.f32 %v1225_v39, 0.0 }
 0x468   :  { %1236 = vrot.lane.b32.xlu1 %v6663_v48, %s5746_s0  ;;  %1238 = vrot.lane.b32.xlu0 %v6666_v11, %s5746_s0 }
 0x46c   :  { %1240 = vrot.lane.b32.xlu1 %v6672_v17, %s5746_s0  ;;  %1242 = vrot.lane.b32.xlu0 %v6675_v35, %s5746_s0 }
 0x470   :  { %1244 = vrot.lane.b32.xlu1 %v6681_v13, %s5746_s0  ;;  %1246 = vrot.lane.b32.xlu0 %v6684_v18, %s5746_s0 }
 0x474   :  { %1248 = vrot.lane.b32.xlu1 %v6690_v51, %s5746_s0  ;;  %1274 = vrot.lane.b32.xlu0 %v6657_v31, %s5747_s5 }
 0x478   :  { %1276 = vrot.lane.b32.xlu1 %v6663_v48, %s5747_s5  ;;  %1278 = vrot.lane.b32.xlu0 %v6666_v11, %s5747_s5 }
 0x47c   :  { %1280 = vrot.lane.b32.xlu1 %v6672_v17, %s5747_s5  ;;  %1282 = vrot.lane.b32.xlu0 %v6675_v35, %s5747_s5 }
 0x480   :  { %1284 = vrot.lane.b32.xlu1 %v6681_v13, %s5747_s5  ;;  %1286 = vrot.lane.b32.xlu0 %v6684_v18, %s5747_s5 }
 0x484   :  { %1288 = vrot.lane.b32.xlu1 %v6690_v51, %s5747_s5  ;;  %1314 = vrot.lane.b32.xlu0 %v6657_v31, %s5748_s17 }
 0x488   :  { %1316 = vrot.lane.b32.xlu1 %v6663_v48, %s5748_s17  ;;  %1318 = vrot.lane.b32.xlu0 %v6666_v11, %s5748_s17 }
 0x48c   :  { %1320 = vrot.lane.b32.xlu1 %v6672_v17, %s5748_s17  ;;  %1322 = vrot.lane.b32.xlu0 %v6675_v35, %s5748_s17 }
 0x490   :  { %1324 = vrot.lane.b32.xlu1 %v6681_v13, %s5748_s17  ;;  %1326 = vrot.lane.b32.xlu0 %v6684_v18, %s5748_s17 }
 0x494   :  { %1328 = vrot.lane.b32.xlu1 %v6690_v51, %s5748_s17  ;;  %1354 = vrot.lane.b32.xlu0 %v6657_v31, %s5749_s21 }
 0x498   :  { %1356 = vrot.lane.b32.xlu1 %v6663_v48, %s5749_s21  ;;  %1358 = vrot.lane.b32.xlu0 %v6666_v11, %s5749_s21 }
 0x49c   :  { %1360 = vrot.lane.b32.xlu1 %v6672_v17, %s5749_s21  ;;  %1362 = vrot.lane.b32.xlu0 %v6675_v35, %s5749_s21 }
 0x4a0   :  { %1364 = vrot.lane.b32.xlu1 %v6681_v13, %s5749_s21  ;;  %1366 = vrot.lane.b32.xlu0 %v6684_v18, %s5749_s21 }
 0x4a4   :  { %1368 = vrot.lane.b32.xlu1 %v6690_v51, %s5749_s21  ;;  %1410 = vrot.lane.b32.xlu0 %v6657_v31, %s5750_s25 }
 0x4a8   :  { %1412 = vrot.lane.b32.xlu1 %v6663_v48, %s5750_s25  ;;  %1414 = vrot.lane.b32.xlu0 %v6666_v11, %s5750_s25 }
 0x4ac   :  { %1416 = vrot.lane.b32.xlu1 %v6672_v17, %s5750_s25  ;;  %1418 = vrot.lane.b32.xlu0 %v6675_v35, %s5750_s25 }
 0x4b0   :  { %1420 = vrot.lane.b32.xlu1 %v6681_v13, %s5750_s25  ;;  %1422 = vrot.lane.b32.xlu0 %v6684_v18, %s5750_s25 }
 0x4b4   :  { %1424 = vrot.lane.b32.xlu1 %v6690_v51, %s5750_s25  ;;  %1450 = vrot.lane.b32.xlu0 %v6657_v31, %s5751_s29 }
 0x4b8   :  { %1452 = vrot.lane.b32.xlu1 %v6663_v48, %s5751_s29  ;;  %1454 = vrot.lane.b32.xlu0 %v6666_v11, %s5751_s29 }
 0x4bc   :  { %1456 = vrot.lane.b32.xlu1 %v6672_v17, %s5751_s29  ;;  %1458 = vrot.lane.b32.xlu0 %v6675_v35, %s5751_s29 }
 0x4c0   :  { %1460 = vrot.lane.b32.xlu1 %v6681_v13, %s5751_s29  ;;  %1462 = vrot.lane.b32.xlu0 %v6684_v18, %s5751_s29 }
 0x4c4   :  { %1464 = vrot.lane.b32.xlu1 %v6690_v51, %s5751_s29  ;;  %1490 = vrot.lane.b32.xlu0 %v6657_v31, %s5752_s3 }
 0x4c8   :  { %1492 = vrot.lane.b32.xlu1 %v6663_v48, %s5752_s3  ;;  %1494 = vrot.lane.b32.xlu0 %v6666_v11, %s5752_s3 }
 0x4cc   :  { %1496 = vrot.lane.b32.xlu1 %v6672_v17, %s5752_s3  ;;  %1498 = vrot.lane.b32.xlu0 %v6675_v35, %s5752_s3 }
 0x4d0   :  { %1500 = vrot.lane.b32.xlu1 %v6681_v13, %s5752_s3  ;;  %1502 = vrot.lane.b32.xlu0 %v6684_v18, %s5752_s3 }
 0x4d4   :  { %1504 = vrot.lane.b32.xlu1 %v6690_v51, %s5752_s3  ;;  %1530 = vrot.lane.b32.xlu0 %v6657_v31, %s5753_s30 }
 0x4d6   :  { %v1235_v29 = vpop.permute.xlu0 %1234 }
 0x4d8   :  { %1532 = vrot.lane.b32.xlu1 %v6663_v48, %s5753_s30  ;;  %1534 = vrot.lane.b32.xlu0 %v6666_v11, %s5753_s30 }
 0x4da   :  { %v1237_v62 = vpop.permute.xlu1 %1236  ;;  %v1239_v27 = vpop.permute.xlu0 %1238 }
 0x4db   :  { %v1254_v32 = vsel %vm523_vm3, %v1235_v29, %v1239_v27 }
 0x4dc   :  { %1536 = vrot.lane.b32.xlu1 %v6672_v17, %s5753_s30  ;;  %1538 = vrot.lane.b32.xlu0 %v6675_v35, %s5753_s30  ;;  %v1259_v45 = vmul.f32 %v1254_v32, %v6226_v26 }
 0x4de   :  { %v1241_v22 = vpop.permute.xlu1 %1240  ;;  %v1243_v14 = vpop.permute.xlu0 %1242 }
 0x4df   :  { %v1255_v41 = vsel %vm523_vm3, %v1237_v62, %v1241_v22  ;;  %v1252_v19 = vsel %vm523_vm3, %v1239_v27, %v1243_v14 }
 0x4e0   :  { %v1263_v33 = vmul.f32 %v1255_v41, %v6226_v26  ;;  %1540 = vrot.lane.b32.xlu1 %v6681_v13, %s5753_s30  ;;  %1542 = vrot.lane.b32.xlu0 %v6684_v18, %s5753_s30  ;;  %v1260_v27 = vmul.f32 %v1252_v19, %v6250_v6 }
 0x4e2   :  { %v1245_v60 = vpop.permute.xlu1 %1244  ;;  %v1267_v16 = vpack.c.bf16 %v1263_v33, %v1259_v45  ;;  %v1247_v1 = vpop.permute.xlu0 %1246 }
 0x4e3   :  { %v1253_v37 = vsel %vm523_vm3, %v1241_v22, %v1245_v60  ;;  %v1250_v30 = vsel %vm523_vm3, %v1243_v14, %v1247_v1  ;;  %v1256_v52 = vsel %vm523_vm3, %v1247_v1, %v1235_v29 }
 0x4e4   :  { %1544 = vrot.lane.b32.xlu1 %v6690_v51, %s5753_s30  ;;  %1628 = vmatprep.subr.bf16.mxu0 %v1267_v16  ;;  %v1264_v9 = vmul.f32 %v1253_v37, %v6250_v6  ;;  %v1258_v46 = vmul.f32 %v1256_v52, %v6241_v63  ;;  %v1261_v32 = vmul.f32 %v1250_v30, %v6256_v8 }
 0x4e5   :  { %1608 = vperm.xlu0 %5611, %v236_v12  }
 0x4e6   :  { %v1249_v20 = vpop.permute.xlu1 %1248  ;;  %v1275_v57 = vpop.permute.xlu0 %1274  ;;  %v1268_v33 = vpack.c.bf16 %v1264_v9, %v1260_v27 }
 0x4e7   :  { %v1251_v59 = vsel %vm523_vm3, %v1245_v60, %v1249_v20  ;;  %v1257_v39 = vsel %vm523_vm3, %v1249_v20, %v1237_v62 }
 0x4e8   :  { %v1262_v29 = vmul.f32 %v1257_v39, %v6241_v63  ;;  %v1265_v22 = vmul.f32 %v1251_v59, %v6256_v8  ;;  %1613 = vperm.xlu1 %5612, %v237_v28  }
 0x4ea   :  { %v1266_v14 = vpack.c.bf16 %v1262_v29, %v1258_v46  ;;  %v1277_v41 = vpop.permute.xlu1 %1276  ;;  %v1269_v45 = vpack.c.bf16 %v1265_v22, %v1261_v32  ;;  %v1279_v12 = vpop.permute.xlu0 %1278 }
 0x4eb   :  { %v1294_v62 = vsel %vm580_vm5, %v1275_v57, %v1279_v12 }
 0x4ec   :  { %1629 = vmatpush1.bf16.msra.mxu0 %v1266_v14  ;;  %1671 = vmatprep.subr.bf16.mxu1 %v1269_v45  ;;  %v1299_v37 = vmul.f32 %v1294_v62, %v6282_v23 }
 0x4ed   :  { %1672 = vmatpush1.bf16.msra.mxu1 %v1268_v33 }
 0x4ee   :  { %v1281_v60 = vpop.permute.xlu1 %1280  ;;  %v1283_v16 = vpop.permute.xlu0 %1282 }
 0x4ef   :  { %v1295_v1 = vsel %vm580_vm5, %v1277_v41, %v1281_v60  ;;  %v1292_v39 = vsel %vm580_vm5, %v1279_v12, %v1283_v16 }
 0x4f0   :  { %v1303_v30 = vmul.f32 %v1295_v1, %v6282_v23  ;;  %v1300_v12 = vmul.f32 %v1292_v39, %v6303_v5 }
 0x4f2   :  { %v1285_v52 = vpop.permute.xlu1 %1284  ;;  %v1307_v28 = vpack.c.bf16 %v1303_v30, %v1299_v37  ;;  %v1287_v19 = vpop.permute.xlu0 %1286 }
 0x4f3   :  { %v1293_v20 = vsel %vm580_vm5, %v1281_v60, %v1285_v52  ;;  %v1290_v9 = vsel %vm580_vm5, %v1283_v16, %v1287_v19  ;;  %v1296_v59 = vsel %vm580_vm5, %v1287_v19, %v1275_v57 }
 0x4f4   :  { %1630 = vmatprep.subr.bf16.mxu0 %v1307_v28  ;;  %v1304_v32 = vmul.f32 %v1293_v20, %v6303_v5  ;;  %v1298_v14 = vmul.f32 %v1296_v59, %v6294_v55  ;;  %v1301_v45 = vmul.f32 %v1290_v9, %v6310_v10 }
 0x4f6   :  { %v1289_v46 = vpop.permute.xlu1 %1288  ;;  %v1315_v29 = vpop.permute.xlu0 %1314  ;;  %v1308_v1 = vpack.c.bf16 %v1304_v32, %v1300_v12 }
 0x4f7   :  { %v1291_v22 = vsel %vm580_vm5, %v1285_v52, %v1289_v46  ;;  %v1297_v27 = vsel %vm580_vm5, %v1289_v46, %v1277_v41 }
 0x4f8   :  { %v1302_v33 = vmul.f32 %v1297_v27, %v6294_v55  ;;  %v1305_v57 = vmul.f32 %v1291_v22, %v6310_v10 }
 0x4fa   :  { %v1306_v62 = vpack.c.bf16 %v1302_v33, %v1298_v14  ;;  %v1317_v60 = vpop.permute.xlu1 %1316  ;;  %v1309_v16 = vpack.c.bf16 %v1305_v57, %v1301_v45  ;;  %v1319_v37 = vpop.permute.xlu0 %1318 }
 0x4fb   :  { %v1334_v41 = vsel %vm637_vm6, %v1315_v29, %v1319_v37 }
 0x4fc   :  { %1631 = vmatpush1.bf16.msra.mxu0 %v1306_v62  ;;  %1673 = vmatprep.subr.bf16.mxu1 %v1309_v16  ;;  %v1339_v19 = vmul.f32 %v1334_v41, %v6332_v40 }
 0x4fd   :  { %1674 = vmatpush1.bf16.msra.mxu1 %v1308_v1 }
 0x4fe   :  { %v1321_v30 = vpop.permute.xlu1 %1320  ;;  %v1323_v52 = vpop.permute.xlu0 %1322 }
 0x4ff   :  { %v1335_v28 = vsel %vm637_vm6, %v1317_v60, %v1321_v30  ;;  %v1332_v27 = vsel %vm637_vm6, %v1319_v37, %v1323_v52 }
 0x500   :  { %v1343_v20 = vmul.f32 %v1335_v28, %v6332_v40  ;;  %v1340_v37 = vmul.f32 %v1332_v27, %v6351_v47 }
 0x502   :  { %v1325_v9 = vpop.permute.xlu1 %1324  ;;  %v1347_v59 = vpack.c.bf16 %v1343_v20, %v1339_v19  ;;  %v1327_v39 = vpop.permute.xlu0 %1326 }
 0x503   :  { %v1333_v46 = vsel %vm637_vm6, %v1321_v30, %v1325_v9  ;;  %v1330_v32 = vsel %vm637_vm6, %v1323_v52, %v1327_v39  ;;  %v1336_v22 = vsel %vm637_vm6, %v1327_v39, %v1315_v29 }
 0x504   :  { %1632 = vmatprep.subr.bf16.mxu0 %v1347_v59  ;;  %v1344_v45 = vmul.f32 %v1333_v46, %v6351_v47  ;;  %v1338_v62 = vmul.f32 %v1336_v22, %v6341_v54  ;;  %v1341_v16 = vmul.f32 %v1330_v32, %v6355_v50 }
 0x506   :  { %v1329_v14 = vpop.permute.xlu1 %1328  ;;  %v1355_v33 = vpop.permute.xlu0 %1354  ;;  %v1348_v28 = vpack.c.bf16 %v1344_v45, %v1340_v37 }
 0x507   :  { %v1331_v57 = vsel %vm637_vm6, %v1325_v9, %v1329_v14  ;;  %v1337_v12 = vsel %vm637_vm6, %v1329_v14, %v1317_v60 }
 0x508   :  { %v1342_v1 = vmul.f32 %v1337_v12, %v6341_v54  ;;  %v1345_v29 = vmul.f32 %v1331_v57, %v6355_v50 }
 0x50a   :  { %v1346_v41 = vpack.c.bf16 %v1342_v1, %v1338_v62  ;;  %v1357_v30 = vpop.permute.xlu1 %1356  ;;  %v1349_v52 = vpack.c.bf16 %v1345_v29, %v1341_v16  ;;  %v1359_v19 = vpop.permute.xlu0 %1358  ;;  %v1399_v16 = vmul.f32 %v6672_v17, %v6012_v38 }
 0x50b   :  { %v1374_v60 = vsel %vm694_vm7, %v1355_v33, %v1359_v19 }
 0x50c   :  { %1633 = vmatpush1.bf16.msra.mxu0 %v1346_v41  ;;  %1675 = vmatprep.subr.bf16.mxu1 %v1349_v52  ;;  %v1379_v39 = vmul.f32 %v1374_v60, %v6378_v49  ;;  %v1401_v52 = vmul.f32 %v6690_v51, %v6016_v42 }
 0x50d   :  { %1676 = vmatpush1.bf16.msra.mxu1 %v1348_v28 }
 0x50e   :  { %v1361_v20 = vpop.permute.xlu1 %1360  ;;  %v1363_v9 = vpop.permute.xlu0 %1362 }
 0x50f   :  { %v1375_v59 = vsel %vm694_vm7, %v1357_v30, %v1361_v20  ;;  %v1372_v12 = vsel %vm694_vm7, %v1359_v19, %v1363_v9 }
 0x510   :  { %v1383_v46 = vmul.f32 %v1375_v59, %v6378_v49 }
 0x512   :  { %v1365_v32 = vpop.permute.xlu1 %1364  ;;  %v1387_v22 = vpack.c.bf16 %v1383_v46, %v1379_v39  ;;  %v1367_v27 = vpop.permute.xlu0 %1366 }
 0x513   :  { %v1373_v14 = vsel %vm694_vm7, %v1361_v20, %v1365_v32  ;;  %v1370_v45 = vsel %vm694_vm7, %v1363_v9, %v1367_v27  ;;  %v1376_v57 = vsel %vm694_vm7, %v1367_v27, %v1355_v33  ;;  %v1380_v20 = vmul.f32 %v1372_v12, %v6403_v24 }
 0x514   :  { %1634 = vmatprep.subr.bf16.mxu0 %v1387_v22  ;;  %v1384_v1 = vmul.f32 %v1373_v14, %v6403_v24  ;;  %v1378_v33 = vmul.f32 %v1376_v57, %v6389_v4  ;;  %v1381_v28 = vmul.f32 %v1370_v45, %v6407_v56  ;;  %v1395_v9 = vmul.f32 %v6666_v11, %v6012_v38 }
 0x515   :  { %v1400_v45 = vmul.f32 %v6681_v13, %v6008_v36  ;;  %v1394_v12 = vmul.f32 %v6657_v31, %v6004_v34 }
 0x516   :  { %v1369_v62 = vpop.permute.xlu1 %1368  ;;  %v1411_v29 = vpop.permute.xlu0 %1410  ;;  %v1388_v22 = vpack.c.bf16 %v1384_v1, %v1380_v20  ;;  %v1403_v14 = vpack.c.bf16 %v1399_v16, %v1395_v9 }
 0x517   :  { %v1371_v37 = vsel %vm694_vm7, %v1365_v32, %v1369_v62  ;;  %v1377_v41 = vsel %vm694_vm7, %v1369_v62, %v1357_v30  ;;  %v1397_v30 = vmul.f32 %v6684_v18, %v6016_v42  ;;  %v1398_v32 = vmul.f32 %v6663_v48, %v6004_v34 }
 0x518   :  { %v1382_v19 = vmul.f32 %v1377_v41, %v6389_v4  ;;  %v1385_v60 = vmul.f32 %v1371_v37, %v6407_v56  ;;  %v1396_v62 = vmul.f32 %v6675_v35, %v6008_v36 }
 0x519   :  { %v1405_v57 = vpack.c.bf16 %v1401_v52, %v1397_v30  ;;  %v1402_v41 = vpack.c.bf16 %v1398_v32, %v1394_v12 }
 0x51a   :  { %v1386_v59 = vpack.c.bf16 %v1382_v19, %v1378_v33  ;;  %v1413_v39 = vpop.permute.xlu1 %1412  ;;  %v1389_v46 = vpack.c.bf16 %v1385_v60, %v1381_v28  ;;  %v1415_v27 = vpop.permute.xlu0 %1414  ;;  %v1404_v33 = vpack.c.bf16 %v1400_v45, %v1396_v62 }
 0x51b   :  { %v1430_v28 = vsel %vm767_vm8, %v1411_v29, %v1415_v27 }
 0x51c   :  { %1635 = vmatpush1.bf16.msra.mxu0 %v1386_v59  ;;  %1677 = vmatprep.subr.bf16.mxu1 %v1389_v46  ;;  %v1434_v30 = vmul.f32 %v1430_v28, %v6453_v21 }
 0x51d   :  { %1636 = vmatprep.subr.bf16.mxu0 %v1403_v14  ;;  %1678 = vmatpush1.bf16.msra.mxu1 %v1388_v22 }
 0x51e   :  { %1679 = vmatprep.subr.bf16.mxu1 %v1405_v57  ;;  %v1417_v37 = vpop.permute.xlu1 %1416  ;;  %v1419_v1 = vpop.permute.xlu0 %1418 }
 0x51f   :  { %v1431_v16 = vsel %vm767_vm8, %v1413_v39, %v1417_v37  ;;  %v1428_v52 = vsel %vm767_vm8, %v1415_v27, %v1419_v1 }
 0x520   :  { %1637 = vmatpush1.bf16.msra.mxu0 %v1402_v41  ;;  %v1438_v60 = vmul.f32 %v1431_v16, %v6453_v21  ;;  %v1435_v59 = vmul.f32 %v1428_v52, %v6440_v3 }
 0x521   :  { %1680 = vmatpush1.bf16.msra.mxu1 %v1404_v33 }
 0x522   :  { %v1421_v19 = vpop.permute.xlu1 %1420  ;;  %v1423_v20 = vpop.permute.xlu0 %1422  ;;  %v1442_v45 = vpack.c.bf16 %v1438_v60, %v1434_v30 }
 0x523   :  { %v1429_v9 = vsel %vm767_vm8, %v1417_v37, %v1421_v19  ;;  %v1426_v32 = vsel %vm767_vm8, %v1419_v1, %v1423_v20  ;;  %v1432_v22 = vsel %vm767_vm8, %v1423_v20, %v1411_v29 }
 0x524   :  { %v1439_v46 = vmul.f32 %v1429_v9, %v6440_v3  ;;  %v1436_v37 = vmul.f32 %v1426_v32, %v6465_v58  ;;  %v1437_v41 = vmul.f32 %v1432_v22, %v6469_v7 }
 0x526   :  { %v1425_v27 = vpop.permute.xlu1 %1424  ;;  %v1443_v14 = vpack.c.bf16 %v1439_v46, %v1435_v59  ;;  %v1451_v57 = vpop.permute.xlu0 %1450 }
 0x527   :  { %v1427_v12 = vsel %vm767_vm8, %v1421_v19, %v1425_v27  ;;  %v1433_v62 = vsel %vm767_vm8, %v1425_v27, %v1413_v39 }
 0x528   :  { %v1440_v33 = vmul.f32 %v1427_v12, %v6465_v58  ;;  %v1441_v1 = vmul.f32 %v1433_v62, %v6469_v7  ;;  %1638 = vmatprep.subr.bf16.mxu0 %v1443_v14 }
 0x529   :  { %1639 = vmatpush1.bf16.msra.mxu0 %v1442_v45 }
 0x52a   :  { %v1444_v29 = vpack.c.bf16 %v1440_v33, %v1436_v37  ;;  %v1453_v16 = vpop.permute.xlu1 %1452  ;;  %v1445_v52 = vpack.c.bf16 %v1441_v1, %v1437_v41  ;;  %v1455_v28 = vpop.permute.xlu0 %1454 }
 0x52b   :  { %v1470_v9 = vsel %vm824_vm9, %v1451_v57, %v1455_v28 }
 0x52c   :  { %1681 = vmatprep.subr.bf16.mxu1 %v1445_v52  ;;  %v1474_v14 = vmul.f32 %v1470_v9, %v6501_v2 }
 0x52d   :  { %1682 = vmatpush1.bf16.msra.mxu1 %v1444_v29 }
 0x52e   :  { %v1457_v19 = vpop.permute.xlu1 %1456  ;;  %v1459_v60 = vpop.permute.xlu0 %1458 }
 0x52f   :  { %v1471_v39 = vsel %vm824_vm9, %v1453_v16, %v1457_v19  ;;  %v1468_v20 = vsel %vm824_vm9, %v1455_v28, %v1459_v60 }
 0x530   :  { %v1478_v46 = vmul.f32 %v1471_v39, %v6501_v2  ;;  %v1475_v22 = vmul.f32 %v1468_v20, %v6492_v0 }
 0x532   :  { %v1461_v59 = vpop.permute.xlu1 %1460  ;;  %v1463_v30 = vpop.permute.xlu0 %1462  ;;  %v1482_v41 = vpack.c.bf16 %v1478_v46, %v1474_v14 }
 0x533   :  { %v1469_v32 = vsel %vm824_vm9, %v1457_v19, %v1461_v59  ;;  %v1466_v45 = vsel %vm824_vm9, %v1459_v60, %v1463_v30  ;;  %v1472_v12 = vsel %vm824_vm9, %v1463_v30, %v1451_v57 }
 0x534   :  { %v1479_v27 = vmul.f32 %v1469_v32, %v6492_v0  ;;  %v1476_v52 = vmul.f32 %v1466_v45, %v6511_v25  ;;  %v1477_v28 = vmul.f32 %v1472_v12, %v6515_v15 }
 0x536   :  { %v1465_v62 = vpop.permute.xlu1 %1464  ;;  %v1483_v37 = vpack.c.bf16 %v1479_v27, %v1475_v22  ;;  %v1491_v33 = vpop.permute.xlu0 %1490 }
 0x537   :  { %v1467_v1 = vsel %vm824_vm9, %v1461_v59, %v1465_v62  ;;  %v1473_v29 = vsel %vm824_vm9, %v1465_v62, %v1453_v16 }
 0x538   :  { %v1480_v19 = vmul.f32 %v1467_v1, %v6511_v25  ;;  %v1481_v60 = vmul.f32 %v1473_v29, %v6515_v15  ;;  %1640 = vmatprep.subr.bf16.mxu0 %v1483_v37 }
 0x539   :  { %1641 = vmatpush1.bf16.msra.mxu0 %v1482_v41 }
 0x53a   :  { %v1484_v57 = vpack.c.bf16 %v1480_v19, %v1476_v52  ;;  %v1493_v39 = vpop.permute.xlu1 %1492  ;;  %v1485_v20 = vpack.c.bf16 %v1481_v60, %v1477_v28  ;;  %v1495_v9 = vpop.permute.xlu0 %1494 }
 0x53b   :  { %v1510_v32 = vsel %vm881_vm10, %v1491_v33, %v1495_v9 }
 0x53c   :  { %1683 = vmatprep.subr.bf16.mxu1 %v1485_v20  ;;  %v1514_v37 = vmul.f32 %v1510_v32, %v6545_v53 }
 0x53d   :  { %1684 = vmatpush1.bf16.msra.mxu1 %v1484_v57 }
 0x53e   :  { %v1497_v59 = vpop.permute.xlu1 %1496  ;;  %v1499_v46 = vpop.permute.xlu0 %1498 }
 0x53f   :  { %v1511_v16 = vsel %vm881_vm10, %v1493_v39, %v1497_v59  ;;  %v1508_v30 = vsel %vm881_vm10, %v1495_v9, %v1499_v46  ;;  %v8466_v9 = vld [vmem:[#allocation53_spill] sm:$0xff] }
 0x540   :  { %v1518_v27 = vmul.f32 %v1511_v16, %v6545_v53  ;;  %v1515_v12 = vmul.f32 %v1508_v30, %v6536_v43 }
 0x542   :  { %v1501_v22 = vpop.permute.xlu1 %1500  ;;  %v1503_v14 = vpop.permute.xlu0 %1502  ;;  %v1522_v28 = vpack.c.bf16 %v1518_v27, %v1514_v37  ;;  %v8467_v37 = vld [vmem:[#allocation55_spill] sm:$0xff] }
 0x543   :  { %v1509_v45 = vsel %vm881_vm10, %v1497_v59, %v1501_v22  ;;  %v1506_v41 = vsel %vm881_vm10, %v1499_v46, %v1503_v14  ;;  %v1512_v1 = vsel %vm881_vm10, %v1503_v14, %v1491_v33 }
 0x544   :  { %v1519_v62 = vmul.f32 %v1509_v45, %v6536_v43  ;;  %v1516_v20 = vmul.f32 %v1506_v41, %v6555_v61  ;;  %v1517_v59 = vmul.f32 %v1512_v1, %v8466_v9 }
 0x546   :  { %v1505_v29 = vpop.permute.xlu1 %1504  ;;  %v1523_v52 = vpack.c.bf16 %v1519_v62, %v1515_v12  ;;  %v1531_v19 = vpop.permute.xlu0 %1530 }
 0x547   :  { %v1507_v60 = vsel %vm881_vm10, %v1501_v22, %v1505_v29  ;;  %v1513_v57 = vsel %vm881_vm10, %v1505_v29, %v1493_v39 }
 0x548   :  { %v1520_v16 = vmul.f32 %v1507_v60, %v6555_v61  ;;  %v1521_v46 = vmul.f32 %v1513_v57, %v8466_v9  ;;  %1642 = vmatprep.subr.bf16.mxu0 %v1523_v52  ;;  %v8468_v52 = vld [vmem:[#allocation54_spill] sm:$0xff] }
 0x549   :  { %1643 = vmatpush1.bf16.msra.mxu0 %v1522_v28 }
 0x54a   :  { %v1524_v33 = vpack.c.bf16 %v1520_v16, %v1516_v20  ;;  %v1533_v30 = vpop.permute.xlu1 %1532  ;;  %v1525_v32 = vpack.c.bf16 %v1521_v46, %v1517_v59  ;;  %v1535_v27 = vpop.permute.xlu0 %1534 }
 0x54b   :  { %v1550_v12 = vsel %vm938_vm11, %v1531_v19, %v1535_v27 }
 0x54c   :  { %1685 = vmatprep.subr.bf16.mxu1 %v1525_v32  ;;  %v1554_v57 = vmul.f32 %v8467_v37, %v1550_v12 }
 0x54d   :  { %1686 = vmatpush1.bf16.msra.mxu1 %v1524_v33 }
 0x54e   :  { %v1537_v22 = vpop.permute.xlu1 %1536  ;;  %v1539_v14 = vpop.permute.xlu0 %1538 }
 0x54f   :  { %v1551_v39 = vsel %vm938_vm11, %v1533_v30, %v1537_v22  ;;  %v1548_v45 = vsel %vm938_vm11, %v1535_v27, %v1539_v14 }
 0x550   :  { %v1558_v41 = vmul.f32 %v8467_v37, %v1551_v39  ;;  %v1555_v28 = vmul.f32 %v8468_v52, %v1548_v45  ;;  %v8470_v45 = vld [vmem:[#allocation57_spill] sm:$0xff]  ;;  %v5644_v37 = vld [vmem:[%s8464_s8] ss:$8 sps:$4 sm:$0xff]   ;;  %s8535_s8 = sld [smem:[#allocation31_spill]] }
 0x552   :  { %v1541_v62 = vpop.permute.xlu1 %1540  ;;  %v1543_v1 = vpop.permute.xlu0 %1542  ;;  %v1562_v33 = vpack.c.bf16 %v1558_v41, %v1554_v57 }
 0x553   :  { %v1549_v29 = vsel %vm938_vm11, %v1537_v22, %v1541_v62  ;;  %v1546_v20 = vsel %vm938_vm11, %v1539_v14, %v1543_v1  ;;  %v1552_v59 = vsel %vm938_vm11, %v1543_v1, %v1531_v19  ;;  %v8469_v22 = vld [vmem:[#allocation56_spill] sm:$0xff] }
 0x554   :  { %v1559_v60 = vmul.f32 %v8468_v52, %v1549_v29  ;;  %v1556_v39 = vmul.f32 %v8469_v22, %v1546_v20  ;;  %v1557_v29 = vmul.f32 %v8470_v45, %v1552_v59 }
 0x556   :  { %v1545_v16 = vpop.permute.xlu1 %1544  ;;  %v1563_v46 = vpack.c.bf16 %v1559_v60, %v1555_v28 }
 0x557   :  { %v1547_v32 = vsel %vm938_vm11, %v1541_v62, %v1545_v16  ;;  %v1553_v27 = vsel %vm938_vm11, %v1545_v16, %v1533_v30 }
 0x558   :  { %v1560_v12 = vmul.f32 %v8469_v22, %v1547_v32  ;;  %v1561_v14 = vmul.f32 %v8470_v45, %v1553_v27  ;;  %1644 = vmatprep.subr.bf16.mxu0 %v1563_v46 }
 0x559   :  { %1645 = vmatpush1.bf16.msra.mxu0 %v1562_v33 }
 0x55a   :  { %v1564_v19 = vpack.c.bf16 %v1560_v12, %v1556_v39  ;;  %v1565_v1 = vpack.c.bf16 %v1561_v14, %v1557_v29 }
 0x55c   :  { %1661 = vmatmul.mubr.bf16.vlgmr.msra.gmra.mrb[8].mxu0 %v5644_v37  ;;  %1687 = vmatprep.subr.bf16.mxu1 %v1565_v1 }
 0x55d   :  { %1688 = vmatpush1.bf16.msra.mxu1 %v1564_v19 }
 0x560   :  { %1704 = vmatmul.mubr.bf16.vlgmr.msra.gmra.mrb[8].mxu1 %v5644_v37 }
 0x564   :  { %v1609_v62 = vpop.permute.xlu0 %1608 }
 0x567   :  { %v1614_v28 = vpop.permute.xlu1 %1613 }
 0x62f   :  { %v1662_v41 = vpop.f32.mrb[8].mxu0 }
 0x630   :  { %v1663_v30 = vadd.f32 %v1662_v41, %v1609_v62  ;;  %v1664_v52 = vpop.f32.mrb[9].mxu0 }
 0x631   :  { %v1666_v60 = vpop.f32.mrb[10].mxu0 }
 0x632   :  { %v1714_v57 = vadd.f32 %v1663_v30, %v6657_v31  ;;  %v1667_v20 = vadd.f32 %v1666_v60, %v1614_v28  ;;  %v1668_v59 = vpop.f32.mrb[11].mxu0 }
 0x633   :  { %v1705_v16 = vpop.f32.mrb[8].mxu1  ;;  %v1669_v41 = vadd.f32 %v1668_v59, %v1614_v28 }
 0x634   :  { %v1722_v46 = vmax.f32 %v1714_v57, 0.0  ;;  %v1718_v33 = vadd.f32 %v1667_v20, %v6663_v48  ;;  %v1706_v32 = vadd.f32 %v1705_v16, %v1609_v62  ;;  %v1707_v27 = vpop.f32.mrb[9].mxu1 }
 0x635   :  { %v1709_v22 = vpop.f32.mrb[10].mxu1  ;;  %v1708_v60 = vadd.f32 %v1707_v27, %v1609_v62  ;;  %v1719_v57 = vadd.f32 %v1669_v41, %v6672_v17 }
 0x636   :  { %v1726_v39 = vmax.f32 %v1718_v33, 0.0  ;;  %v1716_v45 = vadd.f32 %v1706_v32, %v6675_v35  ;;  %v1710_v29 = vadd.f32 %v1709_v22, %v1614_v28  ;;  %v1711_v12 = vpop.f32.mrb[11].mxu1  ;;  %1740 = vrot.lane.b32.xlu0 %v1722_v46, %s5746_s0  ;;  %v7027_v31 = vmul.f32 %v1722_v46, %v6004_v34 }
 0x637   :  { %v1712_v20 = vadd.f32 %v1711_v12, %v1614_v28  ;;  %v1717_v33 = vadd.f32 %v1708_v60, %v6684_v18 }
 0x638   :  { %v1724_v14 = vmax.f32 %v1716_v45, 0.0  ;;  %v1720_v37 = vadd.f32 %v1710_v29, %v6681_v13  ;;  %1742 = vrot.lane.b32.xlu1 %v1726_v39, %s5746_s0  ;;  %v7030_v48 = vmul.f32 %v1726_v39, %v6004_v34 }
 0x639   :  { %v1721_v59 = vadd.f32 %v1712_v20, %v6690_v51 }
 0x63a   :  { %v1728_v19 = vmax.f32 %v1720_v37, 0.0  ;;  %1748 = vrot.lane.b32.xlu0 %v1724_v14, %s5746_s0  ;;  %v7037_v1 = vmul.f32 %v1724_v14, %v6008_v36 }
 0x63b   :  { %v7086_v17 = vmax.f32 %v1721_v59, 0.0 }
 0x63c   :  { %1750 = vrot.lane.b32.xlu1 %v1728_v19, %s5746_s0  ;;  %8471 = vst [vmem:[#allocation55_spill] sm:$0xff] %v7037_v1  ;;  %v7040_v13 = vmul.f32 %v1728_v19, %v6008_v36  ;;  %v1665_v36 = vadd.f32 %v1664_v52, %v1609_v62  ;;  %v7077_v52 = vmax.f32 %v1719_v57, 0.0  ;;  %v7139_v62 = vld.sshfl [vmem:[%s8473_s19] sm:$0x33 pattern:$0x76325410] }
 0x63d   :  { %8475 = vst [vmem:[#allocation56_spill] sm:$0xff] %v7139_v62  ;;  %v2125_v28 = vcombine.high %v7139_v62, %v7139_v62  ;;  %s8539_s19 = sld [smem:[#allocation35_spill]] }
 0x63e   :  { %8472 = vst [vmem:[#allocation54_spill] sm:$0xff] %v7040_v13  ;;  %1780 = vrot.lane.b32.xlu0 %v1722_v46, %s5747_s5  ;;  %v1715_v30 = vadd.f32 %v1665_v36, %v6666_v11  ;;  %v7082_v11 = vmax.f32 %v1717_v33, 0.0 }
 0x63f   :  { %5305 = vmatprep.mubr.msk.bf16.mxu0 %vm1034_vm4, %v2125_v28  ;;  %5306 = vmatprep.mubr.msk.bf16.mxu1 %vm1034_vm4, %v2125_v28  ;;  %vm3019_vm4 = vcmp.lt.s32.totalorder %v6212_v44, 120 }
 0x640   :  { %1782 = vrot.lane.b32.xlu1 %v1726_v39, %s5747_s5  ;;  %v7073_v16 = vmax.f32 %v1715_v30, 0.0 }
 0x642   :  { %1788 = vrot.lane.b32.xlu0 %v1724_v14, %s5747_s5 }
 0x644   :  { %1790 = vrot.lane.b32.xlu1 %v1728_v19, %s5747_s5 }
 0x646   :  { %1820 = vrot.lane.b32.xlu0 %v1722_v46, %s5748_s17 }
 0x648   :  { %1822 = vrot.lane.b32.xlu1 %v1726_v39, %s5748_s17 }
 0x64a   :  { %1828 = vrot.lane.b32.xlu0 %v1724_v14, %s5748_s17 }
 0x64c   :  { %1830 = vrot.lane.b32.xlu1 %v1728_v19, %s5748_s17 }
 0x64e   :  { %1860 = vrot.lane.b32.xlu0 %v1722_v46, %s5749_s21 }
 0x650   :  { %1862 = vrot.lane.b32.xlu1 %v1726_v39, %s5749_s21 }
 0x652   :  { %1868 = vrot.lane.b32.xlu0 %v1724_v14, %s5749_s21 }
 0x654   :  { %1870 = vrot.lane.b32.xlu1 %v1728_v19, %s5749_s21 }
 0x656   :  { %1916 = vrot.lane.b32.xlu0 %v1722_v46, %s5750_s25 }
 0x658   :  { %1918 = vrot.lane.b32.xlu1 %v1726_v39, %s5750_s25 }
 0x65a   :  { %1924 = vrot.lane.b32.xlu0 %v1724_v14, %s5750_s25 }
 0x65c   :  { %1926 = vrot.lane.b32.xlu1 %v1728_v19, %s5750_s25 }
 0x65e   :  { %1956 = vrot.lane.b32.xlu0 %v1722_v46, %s5751_s29 }
 0x660   :  { %1958 = vrot.lane.b32.xlu1 %v1726_v39, %s5751_s29 }
 0x662   :  { %1964 = vrot.lane.b32.xlu0 %v1724_v14, %s5751_s29 }
 0x664   :  { %1966 = vrot.lane.b32.xlu1 %v1728_v19, %s5751_s29 }
 0x666   :  { %1996 = vrot.lane.b32.xlu0 %v1722_v46, %s5752_s3 }
 0x668   :  { %1998 = vrot.lane.b32.xlu1 %v1726_v39, %s5752_s3 }
 0x66a   :  { %2004 = vrot.lane.b32.xlu0 %v1724_v14, %s5752_s3 }
 0x66c   :  { %2006 = vrot.lane.b32.xlu1 %v1728_v19, %s5752_s3 }
 0x66e   :  { %2036 = vrot.lane.b32.xlu0 %v1722_v46, %s5753_s30 }
 0x670   :  { %2038 = vrot.lane.b32.xlu1 %v1726_v39, %s5753_s30  ;;  %v1731_v39 = vld [vmem:[%s8474_s24] sm:$0xf]  ;;  %s5781_s24 = smov [#allocation12]  }
 0x672   :  { %2044 = vrot.lane.b32.xlu0 %v1724_v14, %s5753_s30 }
 0x674   :  { %2046 = vrot.lane.b32.xlu1 %v1728_v19, %s5753_s30 }
 0x676   :  { %1744 = vrot.lane.b32.xlu0 %v7073_v16, %s5746_s0 }
 0x678   :  { %1746 = vrot.lane.b32.xlu1 %v7077_v52, %s5746_s0 }
 0x67a   :  { %1752 = vrot.lane.b32.xlu0 %v7082_v11, %s5746_s0 }
 0x67c   :  { %1754 = vrot.lane.b32.xlu1 %v7086_v17, %s5746_s0  ;;  %s8529_s0 = sld [smem:[#allocation26_spill]] }
 0x67e   :  { %1784 = vrot.lane.b32.xlu0 %v7073_v16, %s5747_s5 }
 0x680   :  { %1786 = vrot.lane.b32.xlu1 %v7077_v52, %s5747_s5 }
 0x682   :  { %1792 = vrot.lane.b32.xlu0 %v7082_v11, %s5747_s5 }
 0x684   :  { %1794 = vrot.lane.b32.xlu1 %v7086_v17, %s5747_s5  ;;  %s8530_s5 = sld [smem:[#allocation25_spill]] }
 0x686   :  { %1824 = vrot.lane.b32.xlu0 %v7073_v16, %s5748_s17 }
 0x688   :  { %1826 = vrot.lane.b32.xlu1 %v7077_v52, %s5748_s17 }
 0x68a   :  { %1832 = vrot.lane.b32.xlu0 %v7082_v11, %s5748_s17 }
 0x68c   :  { %1834 = vrot.lane.b32.xlu1 %v7086_v17, %s5748_s17  ;;  %s8531_s17 = sld [smem:[#allocation27_spill]] }
 0x68e   :  { %1864 = vrot.lane.b32.xlu0 %v7073_v16, %s5749_s21 }
 0x690   :  { %1866 = vrot.lane.b32.xlu1 %v7077_v52, %s5749_s21 }
 0x692   :  { %1872 = vrot.lane.b32.xlu0 %v7082_v11, %s5749_s21 }
 0x694   :  { %1874 = vrot.lane.b32.xlu1 %v7086_v17, %s5749_s21 }
 0x696   :  { %1920 = vrot.lane.b32.xlu0 %v7073_v16, %s5750_s25 }
 0x698   :  { %1922 = vrot.lane.b32.xlu1 %v7077_v52, %s5750_s25 }
 0x69a   :  { %1928 = vrot.lane.b32.xlu0 %v7082_v11, %s5750_s25 }
 0x69c   :  { %1930 = vrot.lane.b32.xlu1 %v7086_v17, %s5750_s25 }
 0x69e   :  { %1960 = vrot.lane.b32.xlu0 %v7073_v16, %s5751_s29 }
 0x6a0   :  { %1962 = vrot.lane.b32.xlu1 %v7077_v52, %s5751_s29 }
 0x6a2   :  { %1968 = vrot.lane.b32.xlu0 %v7082_v11, %s5751_s29 }
 0x6a4   :  { %1970 = vrot.lane.b32.xlu1 %v7086_v17, %s5751_s29  ;;  %s8532_s29 = sld [smem:[#allocation28_spill]] }
 0x6a6   :  { %2000 = vrot.lane.b32.xlu0 %v7073_v16, %s5752_s3 }
 0x6a8   :  { %2002 = vrot.lane.b32.xlu1 %v7077_v52, %s5752_s3  ;;  %v1741_v18 = vpop.permute.xlu0 %1740 }
 0x6aa   :  { %v1743_v51 = vpop.permute.xlu1 %1742  ;;  %2008 = vrot.lane.b32.xlu0 %v7082_v11, %s5752_s3 }
 0x6ac   :  { %2010 = vrot.lane.b32.xlu1 %v7086_v17, %s5752_s3  ;;  %v1749_v46 = vpop.permute.xlu0 %1748  ;;  %s8533_s3 = sld [smem:[#allocation29_spill]] }
 0x6ae   :  { %v1751_v32 = vpop.permute.xlu1 %1750  ;;  %2040 = vrot.lane.b32.xlu0 %v7073_v16, %s5753_s30 }
 0x6b0   :  { %2042 = vrot.lane.b32.xlu1 %v7077_v52, %s5753_s30  ;;  %v7151_v27 = vpop.permute.xlu0 %1780 }
 0x6b2   :  { %v7153_v22 = vpop.permute.xlu1 %1782  ;;  %2048 = vrot.lane.b32.xlu0 %v7082_v11, %s5753_s30 }
 0x6b4   :  { %2050 = vrot.lane.b32.xlu1 %v7086_v17, %s5753_s30  ;;  %v7160_v45 = vpop.permute.xlu0 %1788  ;;  %s8534_s30 = sld [smem:[#allocation30_spill]] }
 0x6b6   :  { %v7162_v29 = vpop.permute.xlu1 %1790  ;;  %2114 = vperm.xlu0 %5611, %v1731_v39  }
 0x6b8   :  { %v7164_v12 = vpop.permute.xlu0 %1820 }
 0x6ba   :  { %v7166_v14 = vpop.permute.xlu1 %1822 }
 0x6bc   :  { %v7168_v37 = vpop.permute.xlu0 %1828 }
 0x6be   :  { %v7170_v19 = vpop.permute.xlu1 %1830 }
 0x6c0   :  { %v7172_v36 = vpop.permute.xlu0 %1860 }
 0x6c2   :  { %v7174_v41 = vpop.permute.xlu1 %1862 }
 0x6c4   :  { %v7176_v30 = vpop.permute.xlu0 %1868 }
 0x6c6   :  { %v7178_v60 = vpop.permute.xlu1 %1870 }
 0x6c8   :  { %v7180_v57 = vpop.permute.xlu0 %1916 }
 0x6ca   :  { %v7182_v20 = vpop.permute.xlu1 %1918 }
 0x6cc   :  { %v7184_v33 = vpop.permute.xlu0 %1924 }
 0x6ce   :  { %v7186_v59 = vpop.permute.xlu1 %1926 }
 0x6d0   :  { %v7188_v28 = vpop.permute.xlu0 %1956 }
 0x6d1   :  { %8476 = vst [vmem:[#allocation57_spill] sm:$0xff] %v7188_v28 }
 0x6d2   :  { %v7190_v39 = vpop.permute.xlu1 %1958 }
 0x6d3   :  { %8477 = vst [vmem:[#allocation58_spill] sm:$0xff] %v7190_v39 }
 0x6d4   :  { %v7192_v34 = vpop.permute.xlu0 %1964 }
 0x6d5   :  { %8478 = vst [vmem:[#allocation59_spill] sm:$0xff] %v7192_v34 }
 0x6d6   :  { %v7194_v35 = vpop.permute.xlu1 %1966 }
 0x6d7   :  { %8479 = vst [vmem:[#allocation60_spill] sm:$0xff] %v7194_v35 }
 0x6d8   :  { %v7196_v62 = vpop.permute.xlu0 %1996 }
 0x6d9   :  { %8480 = vst [vmem:[#allocation61_spill] sm:$0xff] %v7196_v62 }
 0x6da   :  { %v7198_v9 = vpop.permute.xlu1 %1998 }
 0x6db   :  { %8481 = vst [vmem:[#allocation62_spill] sm:$0xff] %v7198_v9 }
 0x6dc   :  { %v7200_v61 = vpop.permute.xlu0 %2004 }
 0x6dd   :  { %8482 = vst [vmem:[#allocation63_spill] sm:$0xff] %v7200_v61 }
 0x6de   :  { %v7202_v43 = vpop.permute.xlu1 %2006 }
 0x6df   :  { %8483 = vst [vmem:[#allocation64_spill] sm:$0xff] %v7202_v43 }
 0x6e0   :  { %v7204_v53 = vpop.permute.xlu0 %2036 }
 0x6e1   :  { %8484 = vst [vmem:[#allocation65_spill] sm:$0xff] %v7204_v53 }
 0x6e2   :  { %v7206_v15 = vpop.permute.xlu1 %2038 }
 0x6e3   :  { %8485 = vst [vmem:[#allocation66_spill] sm:$0xff] %v7206_v15 }
 0x6e4   :  { %v7208_v25 = vpop.permute.xlu0 %2044 }
 0x6e5   :  { %8486 = vst [vmem:[#allocation67_spill] sm:$0xff] %v7208_v25 }
 0x6e6   :  { %v7210_v0 = vpop.permute.xlu1 %2046 }
 0x6e7   :  { %8487 = vst [vmem:[#allocation68_spill] sm:$0xff] %v7210_v0 }
 0x6e8   :  { %v1745_v39 = vpop.permute.xlu0 %1744 }
 0x6e9   :  { %v1760_v35 = vsel %vm523_vm3, %v1741_v18, %v1745_v39  ;;  %v1758_v61 = vsel %vm523_vm3, %v1745_v39, %v1749_v46 }
 0x6ea   :  { %v1747_v2 = vpop.permute.xlu1 %1746  ;;  %v1765_v62 = vmul.f32 %v1760_v35, %v6226_v26 }
 0x6eb   :  { %v1761_v9 = vsel %vm523_vm3, %v1743_v51, %v1747_v2  ;;  %v1759_v43 = vsel %vm523_vm3, %v1747_v2, %v1751_v32 }
 0x6ec   :  { %v1769_v53 = vmul.f32 %v1761_v9, %v6226_v26  ;;  %v1753_v15 = vpop.permute.xlu0 %1752  ;;  %v1770_v28 = vmul.f32 %v1759_v43, %v6250_v6 }
 0x6ed   :  { %v1756_v25 = vsel %vm523_vm3, %v1749_v46, %v1753_v15  ;;  %v1762_v0 = vsel %vm523_vm3, %v1753_v15, %v1741_v18 }
 0x6ee   :  { %v1755_v1 = vpop.permute.xlu1 %1754  ;;  %v1773_v13 = vpack.c.bf16 %v1769_v53, %v1765_v62  ;;  %v1764_v2 = vmul.f32 %v1762_v0, %v6241_v63  ;;  %v1767_v9 = vmul.f32 %v1756_v25, %v6256_v8  ;;  %v1766_v53 = vmul.f32 %v1758_v61, %v6250_v6 }
 0x6ef   :  { %v1757_v35 = vsel %vm523_vm3, %v1751_v32, %v1755_v1  ;;  %v1763_v26 = vsel %vm523_vm3, %v1755_v1, %v1743_v51  ;;  %vm2946_vm3 = vcmp.lt.s32.totalorder %v6212_v44, 121 }
 0x6f0   :  { %v1768_v34 = vmul.f32 %v1763_v26, %v6241_v63  ;;  %v1771_v15 = vmul.f32 %v1757_v35, %v6256_v8  ;;  %2130 = vmatprep.subr.bf16.mxu0 %v1773_v13  ;;  %v1785_v18 = vpop.permute.xlu0 %1784  ;;  %v1774_v1 = vpack.c.bf16 %v1770_v28, %v1766_v53 }
 0x6f1   :  { %v1800_v43 = vsel %vm580_vm5, %v7151_v27, %v1785_v18 }
 0x6f2   :  { %v1772_v62 = vpack.c.bf16 %v1768_v34, %v1764_v2  ;;  %v1787_v46 = vpop.permute.xlu1 %1786  ;;  %v1775_v32 = vpack.c.bf16 %v1771_v15, %v1767_v9  ;;  %v1805_v63 = vmul.f32 %v1800_v43, %v6282_v23  ;;  %v1798_v34 = vsel %vm580_vm5, %v1785_v18, %v7160_v45 }
 0x6f3   :  { %v1801_v0 = vsel %vm580_vm5, %v7153_v22, %v1787_v46  ;;  %v1799_v8 = vsel %vm580_vm5, %v1787_v46, %v7162_v29  ;;  %v1806_v15 = vmul.f32 %v1798_v34, %v6303_v5 }
 0x6f4   :  { %v1809_v6 = vmul.f32 %v1801_v0, %v6282_v23  ;;  %2131 = vmatpush1.bf16.msra.mxu0 %v1772_v62  ;;  %2171 = vmatprep.subr.bf16.mxu1 %v1775_v32  ;;  %v1793_v25 = vpop.permute.xlu0 %1792  ;;  %v1810_v23 = vmul.f32 %v1799_v8, %v6303_v5 }
 0x6f5   :  { %v1796_v61 = vsel %vm580_vm5, %v7160_v45, %v1793_v25  ;;  %v1802_v13 = vsel %vm580_vm5, %v1793_v25, %v7151_v27  ;;  %2172 = vmatpush1.bf16.msra.mxu1 %v1774_v1 }
 0x6f6   :  { %v1795_v51 = vpop.permute.xlu1 %1794  ;;  %v1813_v28 = vpack.c.bf16 %v1809_v6, %v1805_v63  ;;  %v1804_v26 = vmul.f32 %v1802_v13, %v6294_v55  ;;  %v1807_v27 = vmul.f32 %v1796_v61, %v6310_v10 }
 0x6f7   :  { %v1797_v39 = vsel %vm580_vm5, %v7162_v29, %v1795_v51  ;;  %v1803_v35 = vsel %vm580_vm5, %v1795_v51, %v7153_v22  ;;  %v1814_v22 = vpack.c.bf16 %v1810_v23, %v1806_v15  ;;  %vm5780_vm5 = vmmov 0  }
 0x6f8   :  { %v1808_v2 = vmul.f32 %v1803_v35, %v6294_v55  ;;  %v1811_v45 = vmul.f32 %v1797_v39, %v6310_v10  ;;  %2132 = vmatprep.subr.bf16.mxu0 %v1813_v28  ;;  %v1825_v9 = vpop.permute.xlu0 %1824 }
 0x6f9   :  { %v1840_v29 = vsel %vm637_vm6, %v7164_v12, %v1825_v9  ;;  %v1838_v0 = vsel %vm637_vm6, %v1825_v9, %v7168_v37 }
 0x6fa   :  { %v1812_v18 = vpack.c.bf16 %v1808_v2, %v1804_v26  ;;  %v1827_v53 = vpop.permute.xlu1 %1826  ;;  %v1815_v43 = vpack.c.bf16 %v1811_v45, %v1807_v27  ;;  %v1845_v55 = vmul.f32 %v1840_v29, %v6332_v40  ;;  %v1846_v51 = vmul.f32 %v1838_v0, %v6351_v47 }
 0x6fb   :  { %v1841_v62 = vsel %vm637_vm6, %v7166_v14, %v1827_v53  ;;  %v1839_v10 = vsel %vm637_vm6, %v1827_v53, %v7170_v19  ;;  %v1905_v29 = vmul.f32 %v7077_v52, %v6012_v38 }
 0x6fc   :  { %v1849_v5 = vmul.f32 %v1841_v62, %v6332_v40  ;;  %2133 = vmatpush1.bf16.msra.mxu0 %v1812_v18  ;;  %2173 = vmatprep.subr.bf16.mxu1 %v1815_v43  ;;  %v1833_v46 = vpop.permute.xlu0 %1832  ;;  %v1850_v40 = vmul.f32 %v1839_v10, %v6351_v47 }
 0x6fd   :  { %v1836_v32 = vsel %vm637_vm6, %v7168_v37, %v1833_v46  ;;  %v1842_v1 = vsel %vm637_vm6, %v1833_v46, %v7164_v12  ;;  %2174 = vmatpush1.bf16.msra.mxu1 %v1814_v22 }
 0x6fe   :  { %v1835_v63 = vpop.permute.xlu1 %1834  ;;  %v1853_v8 = vpack.c.bf16 %v1849_v5, %v1845_v55  ;;  %v1844_v61 = vmul.f32 %v1842_v1, %v6341_v54  ;;  %v1847_v12 = vmul.f32 %v1836_v32, %v6355_v50 }
 0x6ff   :  { %v1837_v6 = vsel %vm637_vm6, %v7170_v19, %v1835_v63  ;;  %v1843_v25 = vsel %vm637_vm6, %v1835_v63, %v7166_v14  ;;  %v1854_v14 = vpack.c.bf16 %v1850_v40, %v1846_v51  ;;  %v8490_v51 = vld [vmem:[#allocation57_spill] sm:$0xff]  ;;  %vm5198_vm6 = vcmask 58368  }
 0x700   :  { %v1848_v13 = vmul.f32 %v1843_v25, %v6341_v54  ;;  %v1851_v37 = vmul.f32 %v1837_v6, %v6355_v50  ;;  %2134 = vmatprep.subr.bf16.mxu0 %v1853_v8  ;;  %v1865_v34 = vpop.permute.xlu0 %1864 }
 0x701   :  { %v1880_v19 = vsel %vm694_vm7, %v7172_v36, %v1865_v34  ;;  %v1878_v45 = vsel %vm694_vm7, %v1865_v34, %v7176_v30  ;;  %v8489_v34 = vld [vmem:[#allocation59_spill] sm:$0xff] }
 0x702   :  { %v1852_v28 = vpack.c.bf16 %v1848_v13, %v1844_v61  ;;  %v1867_v23 = vpop.permute.xlu1 %1866  ;;  %v1855_v39 = vpack.c.bf16 %v1851_v37, %v1847_v12  ;;  %v1885_v54 = vmul.f32 %v1880_v19, %v6378_v49  ;;  %v1886_v62 = vmul.f32 %v1878_v45, %v6403_v24  ;;  %v8491_v19 = vld [vmem:[#allocation54_spill] sm:$0xff] }
 0x703   :  { %v1881_v35 = vsel %vm694_vm7, %v7174_v41, %v1867_v23  ;;  %v1879_v50 = vsel %vm694_vm7, %v1867_v23, %v7178_v60 }
 0x704   :  { %v1889_v47 = vmul.f32 %v1881_v35, %v6378_v49  ;;  %2135 = vmatpush1.bf16.msra.mxu0 %v1852_v28  ;;  %2175 = vmatprep.subr.bf16.mxu1 %v1855_v39  ;;  %v1873_v26 = vpop.permute.xlu0 %1872  ;;  %v1901_v49 = vmul.f32 %v7073_v16, %v6012_v38  ;;  %v1890_v18 = vmul.f32 %v1879_v50, %v6403_v24  ;;  %v8492_v28 = vld [vmem:[#allocation55_spill] sm:$0xff]  ;;  %v8494_v35 = vld [vmem:[#allocation46_spill] sm:$0xff] }
 0x705   :  { %v1876_v27 = vsel %vm694_vm7, %v7176_v30, %v1873_v26  ;;  %v1882_v2 = vsel %vm694_vm7, %v1873_v26, %v7172_v36  ;;  %2176 = vmatpush1.bf16.msra.mxu1 %v1854_v14  ;;  %v1907_v30 = vmul.f32 %v7086_v17, %v6016_v42  ;;  %v8493_v23 = vpack.c.bf16 %v8491_v19, %v8492_v28  ;;  %v8496_v50 = vld [vmem:[#allocation58_spill] sm:$0xff]  ;;  %v8497_v26 = vld [vmem:[#allocation45_spill] sm:$0xff]  ;;  %v8509_v28 = vld [vmem:[#allocation67_spill] sm:$0xff] }
 0x706   :  { %v1875_v9 = vpop.permute.xlu1 %1874  ;;  %v1893_v15 = vpack.c.bf16 %v1889_v47, %v1885_v54  ;;  %v1884_v43 = vmul.f32 %v1882_v2, %v6389_v4  ;;  %v1887_v16 = vmul.f32 %v1876_v27, %v6407_v56  ;;  %v1909_v5 = vpack.c.bf16 %v1905_v29, %v1901_v49 }
 0x707   :  { %v1877_v53 = vsel %vm694_vm7, %v7178_v60, %v1875_v9  ;;  %v1883_v36 = vsel %vm694_vm7, %v1875_v9, %v7174_v41  ;;  %v1903_v41 = vmul.f32 %v7082_v11, %v6016_v42  ;;  %v1894_v46 = vpack.c.bf16 %v1890_v18, %v1886_v62 }
 0x708   :  { %v1888_v22 = vmul.f32 %v1883_v36, %v6389_v4  ;;  %v1891_v38 = vmul.f32 %v1877_v53, %v6407_v56  ;;  %2136 = vmatprep.subr.bf16.mxu0 %v1893_v15  ;;  %v1921_v52 = vpop.permute.xlu0 %1920 }
 0x709   :  { %v1934_v60 = vsel %vm767_vm8, %v1921_v52, %v7184_v33  ;;  %v1911_v56 = vpack.c.bf16 %v1907_v30, %v1903_v41  ;;  %v1936_v32 = vsel %vm767_vm8, %v7180_v57, %v1921_v52  ;;  %v8500_v41 = vld [vmem:[#allocation63_spill] sm:$0xff] }
 0x70a   :  { %v1892_v17 = vpack.c.bf16 %v1888_v22, %v1884_v43  ;;  %v1923_v55 = vpop.permute.xlu1 %1922  ;;  %v1895_v10 = vpack.c.bf16 %v1891_v38, %v1887_v16  ;;  %v1941_v42 = vmul.f32 %v1934_v60, %v6440_v3  ;;  %v8498_v43 = vld [vmem:[#allocation47_spill] sm:$0xff]  ;;  %v8499_v22 = vld [vmem:[#allocation48_spill] sm:$0xff] }
 0x70b   :  { %v1935_v4 = vsel %vm767_vm8, %v1923_v55, %v7186_v59  ;;  %v1937_v24 = vsel %vm767_vm8, %v7182_v20, %v1923_v55  ;;  %v8501_v55 = vld [vmem:[#allocation61_spill] sm:$0xff] }
 0x70c   :  { %v1945_v11 = vmul.f32 %v1935_v4, %v6440_v3  ;;  %2137 = vmatpush1.bf16.msra.mxu0 %v1892_v17  ;;  %2177 = vmatprep.subr.bf16.mxu1 %v1895_v10  ;;  %v1929_v1 = vpop.permute.xlu0 %1928  ;;  %v1944_v8 = vmul.f32 %v1937_v24, %v6453_v21  ;;  %v1940_v3 = vmul.f32 %v1936_v32, %v6453_v21  ;;  %v8502_v24 = vld [vmem:[#allocation64_spill] sm:$0xff]  ;;  %v8503_v32 = vld [vmem:[#allocation62_spill] sm:$0xff] }
 0x70d   :  { %v1932_v0 = vsel %vm767_vm8, %v7184_v33, %v1929_v1  ;;  %v1938_v63 = vsel %vm767_vm8, %v1929_v1, %v7180_v57  ;;  %2138 = vmatprep.subr.bf16.mxu0 %v1909_v5  ;;  %2178 = vmatpush1.bf16.msra.mxu1 %v1894_v46  ;;  %v8488_v21 = vpack.c.bf16 %v7030_v48, %v7027_v31  ;;  %v8495_v48 = vld [vmem:[#allocation60_spill] sm:$0xff] }
 0x70e   :  { %v1931_v40 = vpop.permute.xlu1 %1930  ;;  %2179 = vmatprep.subr.bf16.mxu1 %v1911_v56  ;;  %v1949_v6 = vpack.c.bf16 %v1945_v11, %v1941_v42  ;;  %v1942_v61 = vmul.f32 %v1932_v0, %v6465_v58  ;;  %v1943_v57 = vmul.f32 %v1938_v63, %v6469_v7  ;;  %v8504_v11 = vld [vmem:[#allocation51_spill] sm:$0xff]  ;;  %v8505_v0 = vld [vmem:[#allocation50_spill] sm:$0xff] }
 0x70f   :  { %v1933_v25 = vsel %vm767_vm8, %v7186_v59, %v1931_v40  ;;  %v1939_v33 = vsel %vm767_vm8, %v1931_v40, %v7182_v20 }
 0x710   :  { %v1946_v12 = vmul.f32 %v1933_v25, %v6465_v58  ;;  %v1947_v13 = vmul.f32 %v1939_v33, %v6469_v7  ;;  %v1961_v37 = vpop.permute.xlu0 %1960  ;;  %2139 = vmatpush1.bf16.msra.mxu0 %v8488_v21  ;;  %v1948_v58 = vpack.c.bf16 %v1944_v8, %v1940_v3 }
 0x711   :  { %v1974_v59 = vsel %vm824_vm9, %v1961_v37, %v8489_v34  ;;  %v1976_v20 = vsel %vm824_vm9, %v8490_v51, %v1961_v37  ;;  %2140 = vmatprep.subr.bf16.mxu0 %v1949_v6  ;;  %2180 = vmatpush1.bf16.msra.mxu1 %v8493_v23  ;;  %v8507_v37 = vld [vmem:[#allocation52_spill] sm:$0xff] }
 0x712   :  { %v1950_v7 = vpack.c.bf16 %v1946_v12, %v1942_v61  ;;  %v1963_v39 = vpop.permute.xlu1 %1962  ;;  %v1951_v14 = vpack.c.bf16 %v1947_v13, %v1943_v57  ;;  %v1980_v31 = vmul.f32 %v1976_v20, %v8494_v35  ;;  %v1981_v27 = vmul.f32 %v1974_v59, %v8497_v26 }
 0x713   :  { %v1975_v54 = vsel %vm824_vm9, %v1963_v39, %v8495_v48  ;;  %v1977_v47 = vsel %vm824_vm9, %v8496_v50, %v1963_v39 }
 0x714   :  { %v1984_v2 = vmul.f32 %v1977_v47, %v8494_v35  ;;  %v1985_v45 = vmul.f32 %v1975_v54, %v8497_v26  ;;  %2181 = vmatprep.subr.bf16.mxu1 %v1951_v14  ;;  %v1969_v9 = vpop.permute.xlu0 %1968  ;;  %2141 = vmatpush1.bf16.msra.mxu0 %v1948_v58  ;;  %v8510_v58 = vld [vmem:[#allocation65_spill] sm:$0xff]  ;;  %v8512_v54 = vld [vmem:[#allocation66_spill] sm:$0xff]  ;;  %v203_v26 = vld [vmem:[%s8506_s6 + $0x88] sm:$0xff] }
 0x715   :  { %v1972_v15 = vsel %vm824_vm9, %v8489_v34, %v1969_v9  ;;  %v1978_v49 = vsel %vm824_vm9, %v1969_v9, %v8490_v51  ;;  %2182 = vmatpush1.bf16.msra.mxu1 %v1950_v7  ;;  %v8508_v34 = vld [vmem:[#allocation53_spill] sm:$0xff]  ;;  %v202_v47 = vld [vmem:[%s8506_s6 + $0x80] sm:$0xff] }
 0x716   :  { %v1988_v29 = vpack.c.bf16 %v1984_v2, %v1980_v31  ;;  %v1971_v18 = vpop.permute.xlu1 %1970  ;;  %v1989_v53 = vpack.c.bf16 %v1985_v45, %v1981_v27  ;;  %v1982_v16 = vmul.f32 %v1972_v15, %v8498_v43  ;;  %v1983_v38 = vmul.f32 %v1978_v49, %v8499_v22  ;;  %v8511_v31 = vld [vmem:[#allocation68_spill] sm:$0xff]  ;;  %v5672_v27 = vld [vmem:[%s5795_s9 + $0x20] ss:$0 sm:$0xff]  ;;  %v5673_v45 = vld [vmem:[%s5795_s9 + $0x28] ss:$0 sm:$0xff] }
 0x717   :  { %v1973_v36 = vsel %vm824_vm9, %v8495_v48, %v1971_v18  ;;  %v1979_v30 = vsel %vm824_vm9, %v1971_v18, %v8496_v50 }
 0x718   :  { %v1986_v52 = vmul.f32 %v1973_v36, %v8498_v43  ;;  %v1987_v62 = vmul.f32 %v1979_v30, %v8499_v22  ;;  %v2001_v60 = vpop.permute.xlu0 %2000  ;;  %2142 = vmatprep.subr.bf16.mxu0 %v1989_v53  ;;  %v186_v22 = vld [vmem:[%s8506_s6] sm:$0xff] }
 0x719   :  { %v2014_v17 = vsel %vm881_vm10, %v2001_v60, %v8500_v41  ;;  %v2016_v10 = vsel %vm881_vm10, %v8501_v55, %v2001_v60  ;;  %2143 = vmatpush1.bf16.msra.mxu0 %v1988_v29  ;;  %v204_v60 = vld [vmem:[%s8506_s6 + $0x90] sm:$0xff] }
 0x71a   :  { %v1990_v5 = vpack.c.bf16 %v1986_v52, %v1982_v16  ;;  %v2003_v46 = vpop.permute.xlu1 %2002  ;;  %v1991_v4 = vpack.c.bf16 %v1987_v62, %v1983_v38  ;;  %v2020_v1 = vmul.f32 %v2016_v10, %v8504_v11  ;;  %v2021_v63 = vmul.f32 %v2014_v17, %v8505_v0  ;;  %v187_v38 = vld [vmem:[%s8506_s6 + $0x8] sm:$0xff]  ;;  %v5674_v17 = vld [vmem:[%s5795_s9 + $0x30] ss:$0 sm:$0xff]  ;;  %v5675_v10 = vld [vmem:[%s5795_s9 + $0x38] ss:$0 sm:$0xff]  ;;  %s8514_s9 = sld [smem:[#allocation15_spill]] }
 0x71b   :  { %v2015_v56 = vsel %vm881_vm10, %v2003_v46, %v8502_v24  ;;  %v2017_v42 = vsel %vm881_vm10, %v8503_v32, %v2003_v46  ;;  %v5471_v16 = vpack.c.bf16 %v203_v26, %v202_v47  ;;  %v199_v47 = vld [vmem:[%s8506_s6 + $0x68] sm:$0xff] }
 0x71c   :  { %v2024_v8 = vmul.f32 %v2017_v42, %v8504_v11  ;;  %v2025_v40 = vmul.f32 %v2015_v56, %v8505_v0  ;;  %2183 = vmatprep.subr.bf16.mxu1 %v1991_v4  ;;  %v2009_v6 = vpop.permute.xlu0 %2008  ;;  %v188_v11 = vld [vmem:[%s8506_s6 + $0x10] sm:$0xff]  ;;  %v206_v0 = vld [vmem:[%s8506_s6 + $0xa0] sm:$0xff] }
 0x71d   :  { %v2012_v3 = vsel %vm881_vm10, %v8500_v41, %v2009_v6  ;;  %v2018_v25 = vsel %vm881_vm10, %v2009_v6, %v8501_v55  ;;  %2184 = vmatpush1.bf16.msra.mxu1 %v1990_v5  ;;  %v205_v41 = vld [vmem:[%s8506_s6 + $0x98] sm:$0xff] }
 0x71e   :  { %v2028_v33 = vpack.c.bf16 %v2024_v8, %v2020_v1  ;;  %v2011_v61 = vpop.permute.xlu1 %2010  ;;  %v2029_v57 = vpack.c.bf16 %v2025_v40, %v2021_v63  ;;  %v2022_v21 = vmul.f32 %v2012_v3, %v8507_v37  ;;  %v2023_v59 = vmul.f32 %v2018_v25, %v8508_v34  ;;  %v189_v1 = vld [vmem:[%s8506_s6 + $0x18] sm:$0xff]  ;;  %v207_v63 = vld [vmem:[%s8506_s6 + $0xa8] sm:$0xff]  ;;  %v190_v3 = vld [vmem:[%s8506_s6 + $0x20] sm:$0xff] }
 0x71f   :  { %v2013_v12 = vsel %vm881_vm10, %v8502_v24, %v2011_v61  ;;  %v2019_v13 = vsel %vm881_vm10, %v2011_v61, %v8503_v32  ;;  %v5473_v24 = vpack.c.bf16 %v187_v38, %v186_v22  ;;  %v5475_v42 = vpack.c.bf16 %v205_v41, %v204_v60  ;;  %v8513_v8 = vld [vmem:[#allocation56_spill] sm:$0xff]  ;;  %v209_v61 = vld [vmem:[%s8506_s6 + $0xb8] sm:$0xff] }
 0x720   :  { %v2026_v51 = vmul.f32 %v2013_v12, %v8507_v37  ;;  %v2027_v20 = vmul.f32 %v2019_v13, %v8508_v34  ;;  %v2041_v19 = vpop.permute.xlu0 %2040  ;;  %2144 = vmatprep.subr.bf16.mxu0 %v2029_v57  ;;  %v5477_v40 = vpack.c.bf16 %v189_v1, %v188_v11  ;;  %v5479_v6 = vpack.c.bf16 %v207_v63, %v206_v0  ;;  %v191_v25 = vld [vmem:[%s8506_s6 + $0x28] sm:$0xff]  ;;  %v192_v13 = vld [vmem:[%s8506_s6 + $0x30] sm:$0xff]  ;;  %v193_v37 = vld [vmem:[%s8506_s6 + $0x38] sm:$0xff] }
 0x721   :  { %v2054_v23 = vsel %vm938_vm11, %v2041_v19, %v8509_v28  ;;  %v2056_v7 = vsel %vm938_vm11, %v8510_v58, %v2041_v19  ;;  %2145 = vmatpush1.bf16.msra.mxu0 %v2028_v33  ;;  %v208_v33 = vld [vmem:[%s8506_s6 + $0xb0] sm:$0xff]  ;;  %v5481_v57 = vpack.c.bf16 %v191_v25, %v190_v3  ;;  %v211_v34 = vld [vmem:[%s8506_s6 + $0xc8] sm:$0xff]  ;;  %v8515_v60 = vmov 0  }
 0x722   :  { %v2030_v39 = vpack.c.bf16 %v2026_v51, %v2022_v21  ;;  %v2043_v14 = vpop.permute.xlu1 %2042  ;;  %v2031_v35 = vpack.c.bf16 %v2027_v20, %v2023_v59  ;;  %v2060_v2 = vmul.f32 %v5672_v27, %v2056_v7  ;;  %v2061_v9 = vmul.f32 %v5673_v45, %v2054_v23  ;;  %v210_v21 = vld [vmem:[%s8506_s6 + $0xc0] sm:$0xff]  ;;  %v195_v19 = vld [vmem:[%s8506_s6 + $0x48] sm:$0xff]  ;;  %v213_v23 = vld [vmem:[%s8506_s6 + $0xd8] sm:$0xff] }
 0x723   :  { %v2055_v48 = vsel %vm938_vm11, %v2043_v14, %v8511_v31  ;;  %v2057_v50 = vsel %vm938_vm11, %v8512_v54, %v2043_v14  ;;  %v5483_v12 = vpack.c.bf16 %v209_v61, %v208_v33  ;;  %v5485_v59 = vpack.c.bf16 %v193_v37, %v192_v13  ;;  %v194_v20 = vld [vmem:[%s8506_s6 + $0x40] sm:$0xff]  ;;  %v197_v14 = vld [vmem:[%s8506_s6 + $0x58] sm:$0xff] }
 0x724   :  { %v2064_v15 = vmul.f32 %v5672_v27, %v2057_v50  ;;  %v2065_v49 = vmul.f32 %v5673_v45, %v2055_v48  ;;  %2185 = vmatprep.subr.bf16.mxu1 %v2031_v35  ;;  %v2049_v29 = vpop.permute.xlu0 %2048  ;;  %v5487_v51 = vpack.c.bf16 %v211_v34, %v210_v21  ;;  %v214_v35 = vld [vmem:[%s8506_s6 + $0xe0] sm:$0xff]  ;;  %v216_v27 = vld [vmem:[%s8506_s6 + $0xf0] sm:$0xff] }
 0x725   :  { %v2052_v18 = vsel %vm938_vm11, %v8509_v28, %v2049_v29  ;;  %v2058_v53 = vsel %vm938_vm11, %v2049_v29, %v8510_v58  ;;  %2186 = vmatpush1.bf16.msra.mxu1 %v2030_v39  ;;  %v212_v28 = vld [vmem:[%s8506_s6 + $0xd0] sm:$0xff]  ;;  %v5489_v58 = vpack.c.bf16 %v195_v19, %v194_v20  ;;  %v198_v50 = vld [vmem:[%s8506_s6 + $0x60] sm:$0xff] }
 0x726   :  { %v2068_v36 = vpack.c.bf16 %v2064_v15, %v2060_v2  ;;  %v2051_v30 = vpop.permute.xlu1 %2050  ;;  %v2069_v43 = vpack.c.bf16 %v2065_v49, %v2061_v9  ;;  %v2062_v55 = vmul.f32 %v5674_v17, %v2052_v18  ;;  %v2063_v5 = vmul.f32 %v5675_v10, %v2058_v53  ;;  %v196_v39 = vld [vmem:[%s8506_s6 + $0x50] sm:$0xff]  ;;  %v217_v2 = vld [vmem:[%s8506_s6 + $0xf8] sm:$0xff]  ;;  %v1733_v37 = vld [vmem:[%s8517_s12] sm:$0xf] }
 0x727   :  { %v2053_v52 = vsel %vm938_vm11, %v8511_v31, %v2051_v30  ;;  %v2059_v62 = vsel %vm938_vm11, %v2051_v30, %v8512_v54  ;;  %v5491_v7 = vpack.c.bf16 %v213_v23, %v212_v28  ;;  %v215_v31 = vld [vmem:[%s8506_s6 + $0xe8] sm:$0xff]  ;;  %v5493_v48 = vpack.c.bf16 %v197_v14, %v196_v39  ;;  %v200_v9 = vld [vmem:[%s8506_s6 + $0x70] sm:$0xff]  ;;  %v201_v15 = vld [vmem:[%s8506_s6 + $0x78] sm:$0xff]  ;;  %s5239_s6 = sshll.u32 %s5781_s24, 4  ;;  %s5240_s6 = int_to_ptr.vmem [resolvable:$true] %s5239_s6 }
 0x728   :  { %v2066_v46 = vmul.f32 %v5674_v17, %v2053_v52  ;;  %v2067_v4 = vmul.f32 %v5675_v10, %v2059_v62  ;;  %2146 = vmatprep.subr.bf16.mxu0 %v2069_v43  ;;  %v5495_v54 = vpack.c.bf16 %v215_v31, %v214_v35  ;;  %v5497_v26 = vpack.c.bf16 %v199_v47, %v198_v50  ;;  %v1732_v21 = vld [vmem:[%s8518_s27] sm:$0xf]  ;;  %v8519_v35 = vld [vmem:[#allocation37_spill] sm:$0xff]  ;;  %p5687_p1 = scmp.lt.s32.totalorder %s5240_s6, %s5240_s6 }
 0x729   :  { %2147 = vmatpush1.bf16.msra.mxu0 %v2068_v36  ;;  %v5499_v45 = vpack.c.bf16 %v217_v2, %v216_v27  ;;  %v5501_v49 = vpack.c.bf16 %v201_v15, %v200_v9  ;;  %v5754_v23 = vmov 839922192   ;;  %v5755_v9 = vmov 1983009808  }
 0x72a   :  { %v2070_v56 = vpack.c.bf16 %v2066_v46, %v2062_v55  ;;  %v2071_v32 = vpack.c.bf16 %v2067_v4, %v2063_v5  ;;  %5472 = vmatprep.subr.bf16.mxu0 %v5471_v16  ;;  %v2482_v15 = vunpack.c.l.s4 %v5755_v9 }
 0x72c   :  { %2163 = vmatmul.mubr.bf16.vlgmr.msra.gmra.mrb[12].mxu0 %v8513_v8  ;;  %2187 = vmatprep.subr.bf16.mxu1 %v2071_v32 }
 0x72d   :  { %2188 = vmatpush1.bf16.msra.mxu1 %v2070_v56  ;;  %5474 = vmatpush3.bf16.msra.mxu0 %v5473_v24  ;;  %v7510_v56 = vld [vmem:[%s8514_s9 + $0x8] sm:$0xff] }
 0x72e   :  { %5476 = vmatprep.subr.bf16.mxu0 %v5475_v42  ;;  %5504 = vmatprep.subr.bf16.mxu1 %v5471_v16 }
 0x730   :  { %2204 = vmatmul.mubr.bf16.vlgmr.msra.gmra.mrb[12].mxu1 %v8513_v8 }
 0x731   :  { %5478 = vmatpush3.bf16.msra.mxu0 %v5477_v40  ;;  %5506 = vmatpush3.bf16.msra.mxu1 %v5473_v24  ;;  %v7507_v24 = vld [vmem:[%s8514_s9] sm:$0xff] }
 0x732   :  { %5480 = vmatprep.subr.bf16.mxu0 %v5479_v6  ;;  %5508 = vmatprep.subr.bf16.mxu1 %v5475_v42  ;;  %v8516_v42 = vld [vmem:[#allocation38_spill] sm:$0xff] }
 0x733   :  { %v7514_v11 = vrot.slane %v7507_v24, %v8516_v42  ;;  %v7518_v1 = vrot.slane %v7510_v56, %v8516_v42  ;;  %v8523_v42 = vld [vmem:[#allocation39_spill] sm:$0xff] }
 0x735   :  { %5482 = vmatpush3.bf16.msra.mxu0 %v5481_v57  ;;  %5510 = vmatpush3.bf16.msra.mxu1 %v5477_v40  ;;  %v2115_v18 = vpop.permute.xlu0 %2114  ;;  %v7522_v0 = vcombine.low %v7514_v11, %v7518_v1 }
 0x736   :  { %5484 = vmatprep.subr.bf16.mxu0 %v5483_v12  ;;  %5512 = vmatprep.subr.bf16.mxu1 %v5479_v6 }
 0x739   :  { %5486 = vmatpush3.bf16.msra.mxu0 %v5485_v59  ;;  %5514 = vmatpush3.bf16.msra.mxu1 %v5481_v57 }
 0x73a   :  { %5488 = vmatprep.subr.bf16.mxu0 %v5487_v51  ;;  %5516 = vmatprep.subr.bf16.mxu1 %v5483_v12 }
 0x73d   :  { %5490 = vmatpush3.bf16.msra.mxu0 %v5489_v58  ;;  %5518 = vmatpush3.bf16.msra.mxu1 %v5485_v59 }
 0x73e   :  { %5492 = vmatprep.subr.bf16.mxu0 %v5491_v7  ;;  %5520 = vmatprep.subr.bf16.mxu1 %v5487_v51 }
 0x741   :  { %5494 = vmatpush3.bf16.msra.mxu0 %v5493_v48  ;;  %5522 = vmatpush3.bf16.msra.mxu1 %v5489_v58  ;;  %v2392_v58 = vunpack.c.l.s4 %v5754_v23 }
 0x742   :  { %5496 = vmatprep.subr.bf16.mxu0 %v5495_v54  ;;  %5524 = vmatprep.subr.bf16.mxu1 %v5491_v7 }
 0x743   :  { %v2393_v14 = vunpack.c.0.s8 %v2392_v58 }
 0x745   :  { %5498 = vmatpush3.bf16.msra.mxu0 %v5497_v26  ;;  %5526 = vmatpush3.bf16.msra.mxu1 %v5493_v48  ;;  %v2396_v31 = vsub.s32 %v2393_v14, %v8519_v35 }
 0x746   :  { %5528 = vmatprep.subr.bf16.mxu1 %v5495_v54  ;;  %5500 = vmatprep.subr.bf16.mxu0 %v5499_v45 }
 0x749   :  { %5530 = vmatpush3.bf16.msra.mxu1 %v5497_v26  ;;  %5502 = vmatpush3.bf16.msra.mxu0 %v5501_v49 }
 0x74a   :  { %5532 = vmatprep.subr.bf16.mxu1 %v5499_v45 }
 0x74d   :  { %5534 = vmatpush3.bf16.msra.mxu1 %v5501_v49 }
 0x7ff   :  { %v2164_v29 = vpop.f32.mrb[12].mxu0 }
 0x800   :  { %v2166_v53 = vpop.f32.mrb[13].mxu0  ;;  %v2165_v43 = vadd.f32 %v2164_v29, %v2115_v18 }
 0x801   :  { %v2167_v36 = vadd.f32 %v2166_v53, %v2115_v18  ;;  %v2168_v30 = vpop.f32.mrb[14].mxu0  ;;  %v2483_v53 = vunpack.c.0.s8 %v2482_v15 }
 0x802   :  { %v2169_v16 = vpop.f32.mrb[15].mxu0 }
 0x803   :  { %v2205_v22 = vpop.f32.mrb[12].mxu1  ;;  %2276 = vmatprep.mubr.f32.mxu0 %v2167_v36  ;;  %v7542_v16 = vld [vmem:[%s8520_s28] sm:$0x3] }
 0x804   :  { %v2207_v38 = vpop.f32.mrb[13].mxu1  ;;  %2277 = vmatmul.mubr.f32.vlgmr.msra.gmra.mrb[16].mxu0 %v2165_v43  ;;  %v2206_v41 = vadd.f32 %v2205_v22, %v2115_v18  ;;  %v7539_v43 = vsub.s32 %v2483_v53, %v8519_v35 }
 0x805   :  { %v2208_v52 = vadd.f32 %v2207_v38, %v2115_v18  ;;  %v2209_v62 = vpop.f32.mrb[14].mxu1  ;;  %2533 = vmatprep.mubr.bf16.mxu0 %v8515_v60  ;;  %v1735_v38 = vld [vmem:[%s8521_s22] sm:$0xf] }
 0x806   :  { %v2210_v17 = vpop.f32.mrb[15].mxu1  ;;  %v2487_v22 = vrot.slane %v7542_v16, %v7539_v43  ;;  %v8522_v62 = vld [vmem:[#allocation40_spill] sm:$0xff] }
 0x807   :  { %2347 = vmatprep.mubr.f32.mxu1 %v2208_v52  ;;  %v7584_v17 = vrot.slane %v7510_v56, %v8522_v62 }
 0x808   :  { %2348 = vmatmul.mubr.f32.vlgmr.msra.gmra.mrb[16].mxu1 %v2206_v41  ;;  %v7580_v41 = vrot.slane %v7507_v24, %v8522_v62 }
 0x809   :  { %2726 = vmatprep.mubr.bf16.mxu1 %v8515_v60 }
 0x8d7   :  { %v5404_v55 = vpop.f32.mrb[16].mxu0 }
 0x8d8   :  { %v5405_v10 = vpop.f32.mrb[17].mxu0 }
 0x8d9   :  { %v5406_v5 = vadd.f32 %v5405_v10, %v5404_v55 }
 0x8db   :  { %2282 = vst [vmem:[#allocation3] sm:$0xf] %v5406_v5  ;;  %v5439_v46 = vpop.f32.mrb[16].mxu1 }
 0x8dc   :  { %v5440_v4 = vpop.f32.mrb[17].mxu1 }
 0x8dd   :  { %v5441_v32 = vadd.f32 %v5440_v4, %v5439_v46 }
 0x8df   :  { %2353 = vst [vmem:[#allocation3 + $0x4] sm:$0xf] %v5441_v32 }
 0x8e6   :  { %v2354_v63 = vld [vmem:[#allocation3] sm:$0xff] }
 0x8e7   :  { %v2367_v8 = vmul.f32 %v7522_v0, %v2354_v63  ;;  %v7595_v63 = vrot.slane %v7507_v24, %v8523_v42 }
 0x8e9   :  { %v2369_v40 = vcombine.high %v2367_v8, %v2367_v8  ;;  %v2377_v6 = vmul.f32 %v2367_v8, %v2367_v8  ;;  %v2371_v3 = vsel %vm277_vm0, %v2367_v8, 0.0 }
 0x8eb   :  { %v2372_v25 = vsel %vm277_vm0, %v2369_v40, 0.0  ;;  %v2379_v33 = vcombine.high %v2377_v6, %v2377_v6  ;;  %v2381_v57 = vsel %vm277_vm0, %v2377_v6, 0.0 }
 0x8ec   :  { %v2373_v61 = vadd.f32 %v2372_v25, %v2371_v3 }
 0x8ed   :  { %v2382_v12 = vsel %vm277_vm0, %v2379_v33, 0.0 }
 0x8ee   :  { %2374 = vadd.xlane.f32.xlu1 %v2373_v61  ;;  %v2383_v13 = vadd.f32 %v2382_v12, %v2381_v57 }
 0x8f0   :  { %2384 = vadd.xlane.f32.xlu0 %v2383_v13 }
 0x8ff   :  { %2427 = vperm.xlu1 %5612, %v1733_v37  }
 0x906   :  { %2414 = vperm.xlu0 %5611, %v1732_v21  }
 0x97b   :  { %v2375_v34 = vpop.xlane.xlu1 %2374 }
 0x97c   :  { %v2376_v59 = vmul.f32 0.010204081, %v2375_v34 }
 0x97d   :  { %v2385_v51 = vpop.xlane.xlu0 %2384 }
 0x97e   :  { %v2387_v20 = vmul.f32 %v2376_v59, %v2376_v59  ;;  %v2386_v19 = vmul.f32 0.010204081, %v2385_v51  ;;  %v2397_v48 = vrot.slane %v2376_v59, %v2396_v31 }
 0x97f   :  { %v2428_v27 = vpop.permute.xlu1 %2427 }
 0x980   :  { %v2388_v28 = vsub.f32 %v2386_v19, %v2387_v20  ;;  %v2399_v47 = vsub.f32 %v2367_v8, %v2397_v48  ;;  %v2435_v49 = vrot.slane %v2428_v27, %v2396_v31  ;;  %v7599_v8 = vrot.slane %v7510_v56, %v8523_v42 }
 0x982   :  { %v2389_v7 = vmax.f32 %v2388_v28, 0.0  ;;  %v8524_v28 = vld [vmem:[#allocation41_spill] sm:$0xff] }
 0x983   :  { %v7618_v23 = vrot.slane %v7507_v24, %v8524_v28  ;;  %v7622_v58 = vrot.slane %v7510_v56, %v8524_v28 }
 0x984   :  { %v2400_v39 = vadd.f32 1e-05, %v2389_v7 }
 0x985   :  { %v2415_v50 = vpop.permute.xlu0 %2414 }
 0x986   :  { %5662 = vrsqrt.f32 %v2400_v39  ;;  %v2422_v45 = vrot.slane %v2415_v50, %v2396_v31  ;;  %v8525_v50 = vld [vmem:[#allocation42_spill] sm:$0xff] }
 0x990   :  { %v5663_v54 = vpop.eup %5662 }
 0x991   :  { %v2409_v26 = vrot.slane %v5663_v54, %v2396_v31 }
 0x993   :  { %v2411_v2 = vmul.f32 %v2409_v26, %v2399_v47  ;;  %v7632_v47 = vrot.slane %v7507_v24, %v8525_v50  ;;  %v7636_v26 = vrot.slane %v7510_v56, %v8525_v50 }
 0x995   :  { %v2424_v29 = vmul.f32 %v2422_v45, %v2411_v2 }
 0x997   :  { %v2437_v18 = vadd.f32 %v2435_v49, %v2424_v29 }
 0x999   :  { %v7532_v36 = vmax.f32 %v2437_v18, 0.0 }
 0x99b   :  { %2461 = vrot.lane.b32.xlu1 %v7532_v36, %s5756_s10  ;;  %v2440_v30 = vcombine.high %v7532_v36, %v7532_v36  ;;  %v2737_v20 = vmul.f32 %v7532_v36, %v7522_v0 }
 0x99d   :  { %2463 = vrot.lane.b32.xlu0 %v2440_v30, %s5756_s10  ;;  %v2739_v31 = vcombine.high %v2737_v20, %v2737_v20 }
 0x99f   :  { %2442 = vrot.lane.b32.xlu1 %v7532_v36, %s5757_s7 }
 0x9a1   :  { %2444 = vrot.lane.b32.xlu0 %v2440_v30, %s5757_s7 }
 0x9a3   :  { %2488 = vrot.lane.b32.xlu1 %v2487_v22, %s5758_s11 }
 0x9a5   :  { %2592 = vrot.lane.b32.xlu0 %v7532_v36, %s5759_s15 }
 0x9a7   :  { %2797 = vrot.lane.b32.xlu1 %v7532_v36, %s5750_s25 }
 0x9a9   :  { %2665 = vrot.lane.b32.xlu0 %v7532_v36, %s5749_s21 }
 0x9ab   :  { %2594 = vrot.lane.b32.xlu1 %v2440_v30, %s5759_s15 }
 0x9ad   :  { %2611 = vrot.lane.b32.xlu0 %v2487_v22, %s5760_s16 }
 0x9af   :  { %2667 = vrot.lane.b32.xlu1 %v2440_v30, %s5749_s21 }
 0x9b1   :  { %2869 = vrot.lane.b32.xlu0 %v7532_v36, %s5761_s18 }
 0x9b3   :  { %2683 = vrot.lane.b32.xlu1 %v2487_v22, %s5762_s4 }
 0x9b5   :  { %2743 = vrot.lane.b32.xlu0 %v2487_v22, %s5763_s23 }
 0x9b7   :  { %2942 = vrot.lane.b32.xlu1 %v7532_v36, %s5764_s26 }
 0x9b9   :  { %2799 = vrot.lane.b32.xlu0 %v2440_v30, %s5750_s25 }
 0x9bb   :  { %2871 = vrot.lane.b32.xlu1 %v2440_v30, %s5761_s18 }
 0x9bd   :  { %3015 = vrot.lane.b32.xlu0 %v7532_v36, %s5760_s16  ;;  %v2742_v36 = vpack.c.bf16 %v2739_v31, %v2739_v31 }
 0x9bf   :  { %2815 = vrot.lane.b32.xlu1 %v2487_v22, %s5765_s20 }
 0x9c1   :  { %2944 = vrot.lane.b32.xlu0 %v2440_v30, %s5764_s26 }
 0x9c3   :  { %3017 = vrot.lane.b32.xlu1 %v2440_v30, %s5760_s16 }
 0x9c5   :  { %2888 = vrot.lane.b32.xlu0 %v2487_v22, %s5766_s1 }
 0x9c7   :  { %2961 = vrot.lane.b32.xlu1 %v2487_v22, %s5767_s2 }
 0x9c9   :  { %3034 = vrot.lane.b32.xlu0 %v2487_v22, %s5768_s13 }
 0x9cb   :  { %3090 = vperm.xlu1 %5612, %v1735_v38   ;;  %v2741_v38 = vpack.c.bf16 %v2737_v20, %v2737_v20 }
 0xa0d   :  { %v2462_v52 = vpop.permute.xlu1 %2461 }
 0xa0f   :  { %v2464_v55 = vpop.permute.xlu0 %2463 }
 0xa10   :  { %v2466_v10 = vsel %vm2465_vm12, %v2462_v52, %v2464_v55  ;;  %v2467_v5 = vsel %vm2465_vm12, %v2464_v55, %v2462_v52 }
 0xa11   :  { %v2476_v46 = vmul.f32 %v7580_v41, %v2467_v5  ;;  %v2477_v4 = vmul.f32 %v7584_v17, %v2466_v10  ;;  %v2443_v32 = vpop.permute.xlu1 %2442  ;;  %v2749_v10 = vsel %vm2494_vm14, %v2741_v38, 0  ;;  %v8526_v5 = vld [vmem:[#allocation43_spill] sm:$0xff] }
 0xa13   :  { %v2478_v40 = vpack.c.bf16 %v2476_v46, %v2476_v46  ;;  %v2479_v6 = vpack.c.bf16 %v2477_v4, %v2477_v4  ;;  %v2445_v3 = vpop.permute.xlu0 %2444  ;;  %v7656_v46 = vrot.slane %v7507_v24, %v8526_v5  ;;  %v7660_v4 = vrot.slane %v7510_v56, %v8526_v5 }
 0xa14   :  { %v2447_v25 = vsel %vm2446_vm13, %v2443_v32, %v2445_v3  ;;  %v2448_v33 = vsel %vm2446_vm13, %v2445_v3, %v2443_v32 }
 0xa15   :  { %v2457_v61 = vmul.f32 %v7595_v63, %v2448_v33  ;;  %v2458_v57 = vmul.f32 %v7599_v8, %v2447_v25  ;;  %v2489_v12 = vpop.permute.xlu1 %2488  ;;  %5307 = vmatprep.subr.msk.bf16.mxu0 %vm2494_vm14, %v2479_v6  ;;  %v2496_v13 = vsel %vm2494_vm14, %v2478_v40, 0  ;;  %v8527_v40 = vld [vmem:[#allocation44_spill] sm:$0xff] }
 0xa16   :  { %2502 = vmatpush1.bf16.msra.mxu0 %v2496_v13  ;;  %v7667_v6 = vrot.slane %v7507_v24, %v8527_v40  ;;  %v7671_v3 = vrot.slane %v7510_v56, %v8527_v40 }
 0xa17   :  { %v2459_v37 = vpack.c.bf16 %v2457_v61, %v2457_v61  ;;  %v2460_v21 = vpack.c.bf16 %v2458_v57, %v2458_v57  ;;  %v2593_v34 = vpop.permute.xlu0 %2592 }
 0xa19   :  { %v2798_v59 = vpop.permute.xlu1 %2797  ;;  %5308 = vmatmul.mubr.msk.bf16.vlgmr.msra.gmra.mrb[20].mxu0 %vm2490_vm15, %v2489_v12  ;;  %5309 = vmatprep.subr.msk.bf16.mxu0 %vm2494_vm14, %v2460_v21  ;;  %v2546_v51 = vsel %vm2494_vm14, %v2459_v37, 0 }
 0xa1a   :  { %2552 = vmatpush1.bf16.msra.mxu0 %v2546_v51  ;;  %2583 = vmatprep.mubr.bf16.mxu0 %v8515_v60 }
 0xa1b   :  { %v2666_v19 = vpop.permute.xlu0 %2665 }
 0xa1d   :  { %v2595_v7 = vpop.permute.xlu1 %2594 }
 0xa1e   :  { %v2597_v39 = vsel %vm2596_vm1, %v2593_v34, %v2595_v7  ;;  %v2598_v14 = vsel %vm2596_vm1, %v2595_v7, %v2593_v34 }
 0xa1f   :  { %v2607_v0 = vmul.f32 %v7618_v23, %v2598_v14  ;;  %v2608_v48 = vmul.f32 %v7622_v58, %v2597_v39  ;;  %v2612_v54 = vpop.permute.xlu0 %2611  ;;  %v7692_v39 = vld [vmem:[%s8514_s9 + $0x10] ss:$0 sm:$0xff]  ;;  %v7695_v14 = vld [vmem:[%s8514_s9 + $0x18] ss:$0 sm:$0xff] }
 0xa21   :  { %v2609_v27 = vpack.c.bf16 %v2607_v0, %v2607_v0  ;;  %v2610_v2 = vpack.c.bf16 %v2608_v48, %v2608_v48  ;;  %v2668_v45 = vpop.permute.xlu1 %2667  ;;  %5310 = vmatmul.mubr.msk.bf16.vlgmr.msra.gmra.mrb[24].mxu0 %vm2490_vm15, %v7542_v16 }
 0xa22   :  { %v2669_v9 = vsel %vm694_vm7, %v2666_v19, %v2668_v45  ;;  %v2670_v15 = vsel %vm694_vm7, %v2668_v45, %v2666_v19  ;;  %2654 = vmatprep.mubr.bf16.mxu0 %v8515_v60  ;;  %v8528_v19 = vld [vmem:[#allocation49_spill] sm:$0xff] }
 0xa23   :  { %v2679_v49 = vmul.f32 %v7632_v47, %v2670_v15  ;;  %v2680_v29 = vmul.f32 %v7636_v26, %v2669_v9  ;;  %5311 = vmatprep.subr.msk.bf16.mxu0 %vm2494_vm14, %v2610_v2  ;;  %v2870_v18 = vpop.permute.xlu0 %2869  ;;  %v2617_v53 = vsel %vm2494_vm14, %v2609_v27, 0  ;;  %v7689_v7 = vrot.slane %v7507_v24, %v8528_v19 }
 0xa24   :  { %2623 = vmatpush1.bf16.msra.mxu0 %v2617_v53  ;;  %v7702_v50 = vrot.slane %v7510_v56, %v8528_v19 }
 0xa25   :  { %v2681_v30 = vpack.c.bf16 %v2679_v49, %v2679_v49  ;;  %v2682_v16 = vpack.c.bf16 %v2680_v29, %v2680_v29  ;;  %v2684_v22 = vpop.permute.xlu1 %2683  ;;  %5315 = vmatprep.subr.msk.bf16.mxu0 %vm2494_vm14, %v2742_v36 }
 0xa27   :  { %5313 = vmatprep.subr.msk.bf16.mxu1 %vm2494_vm14, %v2682_v16  ;;  %v2744_v52 = vpop.permute.xlu0 %2743  ;;  %v2689_v62 = vsel %vm2494_vm14, %v2681_v30, 0 }
 0xa28   :  { %2695 = vmatpush1.bf16.msra.mxu1 %v2689_v62 }
 0xa29   :  { %v2943_v55 = vpop.permute.xlu1 %2942  ;;  %5312 = vmatmul.mubr.msk.bf16.vlgmr.msra.gmra.mrb[28].mxu0 %vm2490_vm15, %v2612_v54 }
 0xa2a   :  { %2755 = vmatpush1.bf16.msra.mxu0 %v2749_v10  ;;  %2786 = vmatprep.mubr.bf16.mxu0 %v8515_v60 }
 0xa2b   :  { %5314 = vmatmul.mubr.msk.bf16.vlgmr.msra.gmra.mrb[20].mxu1 %vm2490_vm15, %v2684_v22  ;;  %v2800_v32 = vpop.permute.xlu0 %2799 }
 0xa2c   :  { %v2801_v25 = vsel %vm767_vm8, %v2798_v59, %v2800_v32  ;;  %v2802_v33 = vsel %vm767_vm8, %v2800_v32, %v2798_v59  ;;  %2858 = vmatprep.mubr.bf16.mxu1 %v8515_v60 }
 0xa2d   :  { %v2811_v61 = vmul.f32 %v7656_v46, %v2801_v25  ;;  %v2812_v57 = vmul.f32 %v7660_v4, %v2802_v33  ;;  %v2872_v12 = vpop.permute.xlu1 %2871 }
 0xa2e   :  { %v2874_v13 = vsel %vm2873_vm2, %v2870_v18, %v2872_v12  ;;  %v2875_v37 = vsel %vm2873_vm2, %v2872_v12, %v2870_v18 }
 0xa2f   :  { %v2813_v21 = vpack.c.bf16 %v2811_v61, %v2811_v61  ;;  %v2814_v34 = vpack.c.bf16 %v2812_v57, %v2812_v57  ;;  %v2884_v51 = vmul.f32 %v7667_v6, %v2874_v13  ;;  %v2885_v20 = vmul.f32 %v7671_v3, %v2875_v37  ;;  %v3016_v59 = vpop.permute.xlu0 %3015 }
 0xa31   :  { %v2886_v31 = vpack.c.bf16 %v2884_v51, %v2884_v51  ;;  %v2887_v0 = vpack.c.bf16 %v2885_v20, %v2885_v20  ;;  %v2816_v48 = vpop.permute.xlu1 %2815  ;;  %5316 = vmatmul.mubr.msk.bf16.vlgmr.msra.gmra.mrb[32].mxu0 %vm2490_vm15, %v2744_v52  ;;  %5317 = vmatprep.subr.msk.bf16.mxu1 %vm2494_vm14, %v2814_v34  ;;  %v2821_v54 = vsel %vm2494_vm14, %v2813_v21, 0 }
 0xa32   :  { %2827 = vmatpush1.bf16.msra.mxu1 %v2821_v54  ;;  %2931 = vmatprep.mubr.bf16.mxu0 %v8515_v60 }
 0xa33   :  { %5319 = vmatprep.subr.msk.bf16.mxu0 %vm2494_vm14, %v2887_v0  ;;  %v2945_v24 = vpop.permute.xlu0 %2944  ;;  %v2894_v27 = vsel %vm2494_vm14, %v2886_v31, 0 }
 0xa34   :  { %v2947_v2 = vsel %vm2946_vm3, %v2943_v55, %v2945_v24  ;;  %v2948_v45 = vsel %vm2946_vm3, %v2945_v24, %v2943_v55  ;;  %2900 = vmatpush1.bf16.msra.mxu0 %v2894_v27 }
 0xa35   :  { %v2957_v56 = vmul.f32 %v7689_v7, %v2947_v2  ;;  %v2958_v9 = vmul.f32 %v7702_v50, %v2948_v45  ;;  %v3018_v15 = vpop.permute.xlu1 %3017  ;;  %5318 = vmatmul.mubr.msk.bf16.vlgmr.msra.gmra.mrb[24].mxu1 %vm2490_vm15, %v2816_v48 }
 0xa36   :  { %v3020_v49 = vsel %vm3019_vm4, %v3016_v59, %v3018_v15  ;;  %v3021_v29 = vsel %vm3019_vm4, %v3018_v15, %v3016_v59  ;;  %3004 = vmatprep.mubr.bf16.mxu1 %v8515_v60 }
 0xa37   :  { %v2959_v18 = vpack.c.bf16 %v2957_v56, %v2957_v56  ;;  %v2960_v53 = vpack.c.bf16 %v2958_v9, %v2958_v9  ;;  %v3030_v36 = vmul.f32 %v7692_v39, %v3020_v49  ;;  %v3031_v30 = vmul.f32 %v7695_v14, %v3021_v29  ;;  %v2889_v16 = vpop.permute.xlu0 %2888 }
 0xa39   :  { %v3032_v22 = vpack.c.bf16 %v3030_v36, %v3030_v36  ;;  %v3033_v38 = vpack.c.bf16 %v3031_v30, %v3031_v30  ;;  %5320 = vmatmul.mubr.msk.bf16.vlgmr.msra.gmra.mrb[36].mxu0 %vm2490_vm15, %v2889_v16  ;;  %5321 = vmatprep.subr.msk.bf16.mxu1 %vm2494_vm14, %v2960_v53  ;;  %v2967_v52 = vsel %vm2494_vm14, %v2959_v18, 0  ;;  %v2962_v62 = vpop.permute.xlu1 %2961 }
 0xa3a   :  { %2973 = vmatpush1.bf16.msra.mxu1 %v2967_v52  ;;  %3077 = vmatprep.mubr.bf16.mxu0 %v8515_v60 }
 0xa3b   :  { %5323 = vmatprep.subr.msk.bf16.mxu0 %vm2494_vm14, %v3033_v38  ;;  %v3040_v55 = vsel %vm2494_vm14, %v3032_v22, 0  ;;  %v3035_v10 = vpop.permute.xlu0 %3034 }
 0xa3c   :  { %3046 = vmatpush1.bf16.msra.mxu0 %v3040_v55 }
 0xa3d   :  { %5322 = vmatmul.mubr.msk.bf16.vlgmr.msra.gmra.mrb[28].mxu1 %vm2490_vm15, %v2962_v62 }
 0xa3e   :  { %3207 = vmatprep.mubr.bf16.mxu1 %v8515_v60 }
 0xa41   :  { %5324 = vmatmul.mubr.msk.bf16.vlgmr.msra.gmra.mrb[40].mxu0 %vm2490_vm15, %v3035_v10 }
 0xa42   :  { %3257 = vmatprep.mubr.bf16.mxu0 %v8515_v60 }
 0xaec   :  { %v2535_v5 = vpop.f32.mrb[20].mxu0 }
 0xaed   :  { %v2537_v32 = vpop.f32.mrb[21].mxu0 }
 0xaee   :  { %v2539_v40 = vpop.f32.mrb[22].mxu0 }
 0xaef   :  { %v2540_v25 = vpop.f32.mrb[23].mxu0 }
 0xaf4   :  { %v2585_v33 = vpop.f32.mrb[24].mxu0 }
 0xaf5   :  { %v2586_v61 = vadd.f32 %v2585_v33, %v2535_v5  ;;  %v2587_v57 = vpop.f32.mrb[25].mxu0 }
 0xaf6   :  { %v2588_v12 = vadd.f32 %v2587_v57, %v2537_v32  ;;  %v2589_v13 = vpop.f32.mrb[26].mxu0 }
 0xaf7   :  { %v2590_v37 = vpop.f32.mrb[27].mxu0 }
 0xaf8   :  { %v3091_v37 = vpop.permute.xlu1 %3090 }
 0xafc   :  { %v2656_v21 = vpop.f32.mrb[28].mxu0 }
 0xafd   :  { %v2663_v34 = vadd.f32 %v2656_v21, %v2586_v61  ;;  %v2658_v51 = vpop.f32.mrb[29].mxu0 }
 0xafe   :  { %v2664_v20 = vadd.f32 %v2658_v51, %v2588_v12  ;;  %v2660_v59 = vpop.f32.mrb[30].mxu0  ;;  %v2728_v19 = vpop.f32.mrb[20].mxu1 }
 0xaff   :  { %v2735_v31 = vadd.f32 %v2728_v19, %v2663_v34  ;;  %v2661_v0 = vpop.f32.mrb[31].mxu0  ;;  %v2730_v48 = vpop.f32.mrb[21].mxu1 }
 0xb00   :  { %v2736_v54 = vadd.f32 %v2730_v48, %v2664_v20  ;;  %v2732_v24 = vpop.f32.mrb[22].mxu1 }
 0xb01   :  { %v2733_v27 = vpop.f32.mrb[23].mxu1 }
 0xb04   :  { %v2788_v2 = vpop.f32.mrb[32].mxu0 }
 0xb05   :  { %v2795_v45 = vadd.f32 %v2788_v2, %v2735_v31  ;;  %v2790_v56 = vpop.f32.mrb[33].mxu0 }
 0xb06   :  { %v2796_v9 = vadd.f32 %v2790_v56, %v2736_v54  ;;  %v2792_v15 = vpop.f32.mrb[34].mxu0 }
 0xb07   :  { %v2793_v49 = vpop.f32.mrb[35].mxu0  ;;  %v1736_v15 = vld [vmem:[%s8530_s5] sm:$0xf] }
 0xb08   :  { %v2860_v29 = vpop.f32.mrb[24].mxu1  ;;  %v7741_v49 = vld [vmem:[%s8531_s17] sm:$0x3] }
 0xb09   :  { %v2867_v18 = vadd.f32 %v2860_v29, %v2795_v45  ;;  %v2862_v53 = vpop.f32.mrb[25].mxu1  ;;  %v3163_v29 = vrot.slane %v7741_v49, %v7539_v43 }
 0xb0a   :  { %v2868_v36 = vadd.f32 %v2862_v53, %v2796_v9  ;;  %v2864_v30 = vpop.f32.mrb[26].mxu1  ;;  %v1737_v9 = vld [vmem:[%s8529_s0] sm:$0xf] }
 0xb0b   :  { %v2865_v16 = vpop.f32.mrb[27].mxu1 }
 0xb0c   :  { %v2933_v22 = vpop.f32.mrb[36].mxu0 }
 0xb0d   :  { %v2940_v38 = vadd.f32 %v2933_v22, %v2867_v18  ;;  %v2935_v52 = vpop.f32.mrb[37].mxu0 }
 0xb0e   :  { %v2941_v62 = vadd.f32 %v2935_v52, %v2868_v36  ;;  %v2937_v55 = vpop.f32.mrb[38].mxu0 }
 0xb0f   :  { %v2938_v10 = vpop.f32.mrb[39].mxu0 }
 0xb10   :  { %v3006_v5 = vpop.f32.mrb[28].mxu1 }
 0xb11   :  { %v3013_v32 = vadd.f32 %v3006_v5, %v2940_v38  ;;  %v3008_v40 = vpop.f32.mrb[29].mxu1 }
 0xb12   :  { %v3014_v25 = vadd.f32 %v3008_v40, %v2941_v62  ;;  %v3010_v33 = vpop.f32.mrb[30].mxu1 }
 0xb13   :  { %v3011_v61 = vpop.f32.mrb[31].mxu1 }
 0xb14   :  { %v3079_v57 = vpop.f32.mrb[40].mxu0 }
 0xb15   :  { %v3086_v12 = vadd.f32 %v3079_v57, %v3013_v32  ;;  %v3081_v13 = vpop.f32.mrb[41].mxu0 }
 0xb16   :  { %v3087_v21 = vadd.f32 %v3081_v13, %v3014_v25  ;;  %v3083_v34 = vpop.f32.mrb[42].mxu0 }
 0xb17   :  { %v3093_v51 = vadd.f32 %v3091_v37, %v3086_v12  ;;  %v3084_v20 = vpop.f32.mrb[43].mxu0 }
 0xb18   :  { %v3094_v59 = vadd.f32 %v3091_v37, %v3087_v21  ;;  %v1739_v21 = vld [vmem:[%s8532_s29] sm:$0xf] }
 0xb19   :  { %v3095_v19 = vmul.f32 %v3093_v51, %v7514_v11 }
 0xb1a   :  { %v3096_v31 = vmul.f32 %v3094_v59, %v7518_v1 }
 0xb1b   :  { %v3097_v0 = vsel %vm277_vm0, %v3095_v19, 0.0  ;;  %v3103_v48 = vmul.f32 %v3095_v19, %v3095_v19 }
 0xb1c   :  { %v3098_v54 = vsel %vm277_vm0, %v3096_v31, 0.0  ;;  %v3104_v24 = vmul.f32 %v3096_v31, %v3096_v31 }
 0xb1d   :  { %v3099_v27 = vadd.f32 %v3098_v54, %v3097_v0  ;;  %v3105_v2 = vsel %vm277_vm0, %v3103_v48, 0.0 }
 0xb1e   :  { %v3106_v45 = vsel %vm277_vm0, %v3104_v24, 0.0  ;;  %vm4327_vm0 = vcmask 1040384  }
 0xb1f   :  { %3100 = vadd.xlane.f32.xlu0 %v3099_v27  ;;  %v3107_v56 = vadd.f32 %v3106_v45, %v3105_v2 }
 0xb21   :  { %3108 = vadd.xlane.f32.xlu1 %v3107_v56 }
 0xb32   :  { %3129 = vperm.xlu1 %5612, %v1737_v9  }
 0xb35   :  { %3122 = vperm.xlu0 %5611, %v1736_v15  }
 0xb36   :  { %3276 = vrot.lane.b32.xlu1 %v3163_v29, %s5760_s16 }
 0xb39   :  { %3164 = vrot.lane.b32.xlu0 %v3163_v29, %s5758_s11 }
 0xb3d   :  { %3340 = vrot.lane.b32.xlu0 %v3163_v29, %s5762_s4 }
 0xbac   :  { %v3101_v18 = vpop.xlane.xlu0 %3100 }
 0xbad   :  { %v3102_v53 = vmul.f32 0.010204081, %v3101_v18 }
 0xbae   :  { %v3109_v36 = vpop.xlane.xlu1 %3108 }
 0xbaf   :  { %v3110_v30 = vmul.f32 0.010204081, %v3109_v36  ;;  %v3111_v16 = vmul.f32 %v3102_v53, %v3102_v53  ;;  %v3114_v62 = vsub.f32 %v3095_v19, %v3102_v53  ;;  %v3115_v55 = vsub.f32 %v3096_v31, %v3102_v53 }
 0xbb1   :  { %v3112_v22 = vsub.f32 %v3110_v30, %v3111_v16 }
 0xbb2   :  { %v3130_v61 = vpop.permute.xlu1 %3129 }
 0xbb3   :  { %v3113_v38 = vmax.f32 %v3112_v22, 0.0 }
 0xbb4   :  { %v3123_v40 = vpop.permute.xlu0 %3122 }
 0xbb5   :  { %v3116_v52 = vadd.f32 1e-05, %v3113_v38 }
 0xbb6   :  { %v3277_v51 = vpop.permute.xlu1 %3276 }
 0xbb7   :  { %5664 = vrsqrt.f32 %v3116_v52 }
 0xbb8   :  { %v3165_v34 = vpop.permute.xlu0 %3164 }
 0xbbc   :  { %v7790_v20 = vpop.permute.xlu0 %3340 }
 0xbc1   :  { %v5665_v10 = vpop.eup %5664 }
 0xbc2   :  { %v3118_v5 = vmul.f32 %v5665_v10, %v3114_v62  ;;  %v3119_v32 = vmul.f32 %v5665_v10, %v3115_v55 }
 0xbc4   :  { %v3125_v25 = vmul.f32 %v3123_v40, %v3118_v5  ;;  %v3126_v33 = vmul.f32 %v3123_v40, %v3119_v32 }
 0xbc6   :  { %v3132_v57 = vadd.f32 %v3130_v61, %v3125_v25  ;;  %v3133_v12 = vadd.f32 %v3130_v61, %v3126_v33 }
 0xbc8   :  { %v7748_v13 = vmax.f32 %v3132_v57, 0.0  ;;  %v7750_v37 = vmax.f32 %v3133_v12, 0.0 }
 0xbca   :  { %3148 = vrot.lane.b32.xlu1 %v7750_v37, %s5756_s10  ;;  %3146 = vrot.lane.b32.xlu0 %v7748_v13, %s5756_s10  ;;  %v3395_v52 = vmul.f32 %v7750_v37, %v7518_v1  ;;  %v3394_v5 = vmul.f32 %v7748_v13, %v7514_v11 }
 0xbcc   :  { %v3397_v57 = vpack.c.bf16 %v3395_v52, %v3395_v52  ;;  %v3396_v12 = vpack.c.bf16 %v3394_v5, %v3394_v5 }
 0xbce   :  { %3138 = vrot.lane.b32.xlu1 %v7750_v37, %s5757_s7  ;;  %3136 = vrot.lane.b32.xlu0 %v7748_v13, %s5757_s7 }
 0xbd2   :  { %3268 = vrot.lane.b32.xlu1 %v7750_v37, %s5759_s15  ;;  %3266 = vrot.lane.b32.xlu0 %v7748_v13, %s5759_s15 }
 0xbd6   :  { %3398 = vrot.lane.b32.xlu1 %v3163_v29, %s5763_s23  ;;  %3332 = vrot.lane.b32.xlu0 %v7750_v37, %s5749_s21 }
 0xbda   :  { %3330 = vrot.lane.b32.xlu1 %v7748_v13, %s5749_s21  ;;  %3462 = vrot.lane.b32.xlu0 %v3163_v29, %s5765_s20 }
 0xbde   :  { %3454 = vrot.lane.b32.xlu1 %v7750_v37, %s5750_s25  ;;  %3452 = vrot.lane.b32.xlu0 %v7748_v13, %s5750_s25 }
 0xbe2   :  { %3516 = vrot.lane.b32.xlu1 %v7748_v13, %s5761_s18  ;;  %3518 = vrot.lane.b32.xlu0 %v7750_v37, %s5761_s18 }
 0xbe6   :  { %3582 = vrot.lane.b32.xlu1 %v7750_v37, %s5764_s26  ;;  %3580 = vrot.lane.b32.xlu0 %v7748_v13, %s5764_s26 }
 0xbea   :  { %3644 = vrot.lane.b32.xlu1 %v7748_v13, %s5760_s16  ;;  %3646 = vrot.lane.b32.xlu0 %v7750_v37, %s5760_s16 }
 0xbee   :  { %3526 = vrot.lane.b32.xlu1 %v3163_v29, %s5766_s1  ;;  %3590 = vrot.lane.b32.xlu0 %v3163_v29, %s5767_s2 }
 0xbf2   :  { %3710 = vperm.xlu0 %5611, %v1739_v21   ;;  %3654 = vrot.lane.b32.xlu1 %v3163_v29, %s5768_s13 }
 0xc3c   :  { %v3149_v59 = vpop.permute.xlu1 %3148  ;;  %v3147_v19 = vpop.permute.xlu0 %3146 }
 0xc3d   :  { %v3150_v31 = vsel %vm2465_vm12, %v3147_v19, %v3149_v59  ;;  %v3151_v0 = vsel %vm2465_vm12, %v3149_v59, %v3147_v19 }
 0xc3e   :  { %v3152_v48 = vmul.f32 %v3151_v0, %v7580_v41  ;;  %v3153_v54 = vmul.f32 %v3150_v31, %v7584_v17  ;;  %v3404_v0 = vsel %vm2494_vm14, %v3396_v12, 0 }
 0xc40   :  { %v3154_v24 = vpack.c.bf16 %v3152_v48, %v3152_v48  ;;  %v3155_v27 = vpack.c.bf16 %v3153_v54, %v3153_v54  ;;  %v3139_v2 = vpop.permute.xlu1 %3138  ;;  %v3137_v45 = vpop.permute.xlu0 %3136 }
 0xc41   :  { %v3140_v56 = vsel %vm2446_vm13, %v3137_v45, %v3139_v2  ;;  %v3141_v9 = vsel %vm2446_vm13, %v3139_v2, %v3137_v45 }
 0xc42   :  { %v3142_v15 = vmul.f32 %v3141_v9, %v7595_v63  ;;  %v3143_v29 = vmul.f32 %v3140_v56, %v7599_v8  ;;  %5325 = vmatprep.subr.msk.bf16.mxu1 %vm2494_vm14, %v3155_v27  ;;  %v3170_v18 = vsel %vm2494_vm14, %v3154_v24, 0 }
 0xc43   :  { %3176 = vmatpush1.bf16.msra.mxu1 %v3170_v18 }
 0xc44   :  { %v3144_v53 = vpack.c.bf16 %v3142_v15, %v3142_v15  ;;  %v3145_v36 = vpack.c.bf16 %v3143_v29, %v3143_v29  ;;  %v3269_v30 = vpop.permute.xlu1 %3268  ;;  %v3267_v16 = vpop.permute.xlu0 %3266 }
 0xc45   :  { %v3270_v22 = vsel %vm2596_vm1, %v3267_v16, %v3269_v30  ;;  %v3271_v38 = vsel %vm2596_vm1, %v3269_v30, %v3267_v16 }
 0xc46   :  { %v3272_v62 = vmul.f32 %v3271_v38, %v7618_v23  ;;  %v3273_v55 = vmul.f32 %v3270_v22, %v7622_v58  ;;  %5326 = vmatmul.mubr.msk.bf16.vlgmr.msra.gmra.mrb[32].mxu1 %vm2490_vm15, %v3165_v34  ;;  %5327 = vmatprep.subr.msk.bf16.mxu0 %vm2494_vm14, %v3145_v36  ;;  %v3220_v10 = vsel %vm2494_vm14, %v3144_v53, 0 }
 0xc47   :  { %3226 = vmatpush1.bf16.msra.mxu0 %v3220_v10  ;;  %3319 = vmatprep.mubr.bf16.mxu1 %v8515_v60 }
 0xc48   :  { %v3274_v32 = vpack.c.bf16 %v3272_v62, %v3272_v62  ;;  %v3275_v40 = vpack.c.bf16 %v3273_v55, %v3273_v55  ;;  %v3399_v25 = vpop.permute.xlu1 %3398  ;;  %v3333_v33 = vpop.permute.xlu0 %3332 }
 0xc4a   :  { %5328 = vmatmul.mubr.msk.bf16.vlgmr.msra.gmra.mrb[44].mxu0 %vm2490_vm15, %v7741_v49  ;;  %5329 = vmatprep.subr.msk.bf16.mxu1 %vm2494_vm14, %v3275_v40  ;;  %v3282_v61 = vsel %vm2494_vm14, %v3274_v32, 0 }
 0xc4b   :  { %3288 = vmatpush1.bf16.msra.mxu1 %v3282_v61  ;;  %3383 = vmatprep.mubr.bf16.mxu0 %v8515_v60 }
 0xc4c   :  { %v3331_v21 = vpop.permute.xlu1 %3330  ;;  %5333 = vmatprep.subr.msk.bf16.mxu1 %vm2494_vm14, %v3397_v57  ;;  %v3463_v34 = vpop.permute.xlu0 %3462 }
 0xc4d   :  { %v3334_v59 = vsel %vm694_vm7, %v3331_v21, %v3333_v33  ;;  %v3335_v19 = vsel %vm694_vm7, %v3333_v33, %v3331_v21 }
 0xc4e   :  { %v3336_v49 = vmul.f32 %v3335_v19, %v7632_v47  ;;  %v3337_v31 = vmul.f32 %v3334_v59, %v7636_v26  ;;  %5330 = vmatmul.mubr.msk.bf16.vlgmr.msra.gmra.mrb[36].mxu1 %vm2490_vm15, %v3277_v51 }
 0xc4f   :  { %3410 = vmatpush1.bf16.msra.mxu1 %v3404_v0  ;;  %3441 = vmatprep.mubr.bf16.mxu1 %v8515_v60 }
 0xc50   :  { %v3338_v48 = vpack.c.bf16 %v3336_v49, %v3336_v49  ;;  %v3339_v54 = vpack.c.bf16 %v3337_v31, %v3337_v31  ;;  %v3455_v24 = vpop.permute.xlu1 %3454  ;;  %v3453_v27 = vpop.permute.xlu0 %3452 }
 0xc51   :  { %v3456_v2 = vsel %vm767_vm8, %v3453_v27, %v3455_v24  ;;  %v3457_v45 = vsel %vm767_vm8, %v3455_v24, %v3453_v27 }
 0xc52   :  { %v3458_v56 = vmul.f32 %v3456_v2, %v7656_v46  ;;  %v3459_v9 = vmul.f32 %v3457_v45, %v7660_v4  ;;  %5331 = vmatprep.subr.msk.bf16.mxu0 %vm2494_vm14, %v3339_v54  ;;  %v3346_v51 = vsel %vm2494_vm14, %v3338_v48, 0  ;;  %v5769_v2 = vmov 1966171168  }
 0xc53   :  { %3352 = vmatpush1.bf16.msra.mxu0 %v3346_v51  ;;  %v3751_v45 = vunpack.c.l.s4 %v5769_v2  ;;  %v7884_v51 = vld [vmem:[%s8533_s3] sm:$0x1] }
 0xc54   :  { %v3460_v15 = vpack.c.bf16 %v3458_v56, %v3458_v56  ;;  %v3461_v29 = vpack.c.bf16 %v3459_v9, %v3459_v9  ;;  %v3517_v18 = vpop.permute.xlu1 %3516  ;;  %v3519_v53 = vpop.permute.xlu0 %3518 }
 0xc55   :  { %v3520_v36 = vsel %vm2873_vm2, %v3517_v18, %v3519_v53  ;;  %v3521_v30 = vsel %vm2873_vm2, %v3519_v53, %v3517_v18  ;;  %v3752_v56 = vunpack.c.0.s8 %v3751_v45 }
 0xc56   :  { %v3522_v16 = vmul.f32 %v3520_v36, %v7667_v6  ;;  %v3523_v22 = vmul.f32 %v3521_v30, %v7671_v3  ;;  %5332 = vmatmul.mubr.msk.bf16.vlgmr.msra.gmra.mrb[48].mxu0 %vm2490_vm15, %v7790_v20  ;;  %5334 = vmatmul.mubr.msk.bf16.vlgmr.msra.gmra.mrb[40].mxu1 %vm2490_vm15, %v3399_v25  ;;  %v3468_v38 = vsel %vm2494_vm14, %v3460_v15, 0 }
 0xc57   :  { %5335 = vmatprep.subr.msk.bf16.mxu0 %vm2494_vm14, %v3461_v29  ;;  %3505 = vmatprep.mubr.bf16.mxu0 %v8515_v60  ;;  %v3755_v9 = vsub.s32 %v3752_v56, %v8519_v35 }
 0xc58   :  { %v3524_v52 = vpack.c.bf16 %v3522_v16, %v3522_v16  ;;  %v3525_v62 = vpack.c.bf16 %v3523_v22, %v3523_v22  ;;  %3474 = vmatpush1.bf16.msra.mxu0 %v3468_v38  ;;  %v3583_v55 = vpop.permute.xlu1 %3582  ;;  %v3581_v10 = vpop.permute.xlu0 %3580  ;;  %3569 = vmatprep.mubr.bf16.mxu1 %v8515_v60 }
 0xc59   :  { %v3584_v5 = vsel %vm2946_vm3, %v3581_v10, %v3583_v55  ;;  %v3585_v20 = vsel %vm2946_vm3, %v3583_v55, %v3581_v10  ;;  %v3756_v15 = vrot.slane %v7884_v51, %v3755_v9 }
 0xc5a   :  { %v3586_v32 = vmul.f32 %v3584_v5, %v7689_v7  ;;  %v3587_v40 = vmul.f32 %v3585_v20, %v7702_v50  ;;  %5337 = vmatprep.subr.msk.bf16.mxu1 %vm2494_vm14, %v3525_v62  ;;  %v3532_v25 = vsel %vm2494_vm14, %v3524_v52, 0 }
 0xc5b   :  { %3538 = vmatpush1.bf16.msra.mxu1 %v3532_v25  ;;  %v7887_v29 = vrot.slane %v3756_v15, %v3755_v9 }
 0xc5c   :  { %v3588_v33 = vpack.c.bf16 %v3586_v32, %v3586_v32  ;;  %v3589_v61 = vpack.c.bf16 %v3587_v40, %v3587_v40  ;;  %v3645_v57 = vpop.permute.xlu1 %3644  ;;  %v3647_v12 = vpop.permute.xlu0 %3646 }
 0xc5d   :  { %v3648_v21 = vsel %vm3019_vm4, %v3645_v57, %v3647_v12  ;;  %v3649_v59 = vsel %vm3019_vm4, %v3647_v12, %v3645_v57  ;;  %3764 = vrot.lane.b32.xlu1 %v7887_v29, %s5758_s11 }
 0xc5e   :  { %v3650_v19 = vmul.f32 %v7692_v39, %v3648_v21  ;;  %v3651_v49 = vmul.f32 %v7695_v14, %v3649_v59  ;;  %5336 = vmatmul.mubr.msk.bf16.vlgmr.msra.gmra.mrb[52].mxu0 %vm2490_vm15, %v3463_v34  ;;  %5339 = vmatprep.subr.msk.bf16.mxu0 %vm2494_vm14, %v3589_v61  ;;  %v3596_v31 = vsel %vm2494_vm14, %v3588_v33, 0 }
 0xc5f   :  { %3602 = vmatpush1.bf16.msra.mxu0 %v3596_v31  ;;  %3633 = vmatprep.mubr.bf16.mxu0 %v8515_v60 }
 0xc60   :  { %v3652_v0 = vpack.c.bf16 %v3650_v19, %v3650_v19  ;;  %v3653_v48 = vpack.c.bf16 %v3651_v49, %v3651_v49  ;;  %v3527_v54 = vpop.permute.xlu1 %3526  ;;  %v3591_v34 = vpop.permute.xlu0 %3590 }
 0xc61   :  { %5338 = vmatmul.mubr.msk.bf16.vlgmr.msra.gmra.mrb[44].mxu1 %vm2490_vm15, %v3527_v54 }
 0xc62   :  { %5341 = vmatprep.subr.msk.bf16.mxu1 %vm2494_vm14, %v3653_v48  ;;  %v3660_v24 = vsel %vm2494_vm14, %v3652_v0, 0  ;;  %3697 = vmatprep.mubr.bf16.mxu1 %v8515_v60 }
 0xc63   :  { %3666 = vmatpush1.bf16.msra.mxu1 %v3660_v24 }
 0xc64   :  { %v3655_v27 = vpop.permute.xlu1 %3654 }
 0xc66   :  { %5340 = vmatmul.mubr.msk.bf16.vlgmr.msra.gmra.mrb[56].mxu0 %vm2490_vm15, %v3591_v34 }
 0xc67   :  { %3807 = vmatprep.mubr.bf16.mxu0 %v8515_v60 }
 0xc69   :  { %5342 = vmatmul.mubr.msk.bf16.vlgmr.msra.gmra.mrb[48].mxu1 %vm2490_vm15, %v3655_v27 }
 0xc6a   :  { %3857 = vmatprep.mubr.bf16.mxu1 %v8515_v60 }
 0xd19   :  { %v3209_v18 = vpop.f32.mrb[32].mxu1 }
 0xd1a   :  { %v3211_v53 = vpop.f32.mrb[33].mxu1 }
 0xd1b   :  { %v3213_v36 = vpop.f32.mrb[34].mxu1 }
 0xd1c   :  { %v3214_v30 = vpop.f32.mrb[35].mxu1 }
 0xd1d   :  { %v3259_v16 = vpop.f32.mrb[44].mxu0 }
 0xd1e   :  { %v3260_v22 = vadd.f32 %v3259_v16, %v3209_v18  ;;  %v3261_v38 = vpop.f32.mrb[45].mxu0 }
 0xd1f   :  { %v3262_v52 = vadd.f32 %v3261_v38, %v3211_v53  ;;  %v3263_v62 = vpop.f32.mrb[46].mxu0 }
 0xd20   :  { %v3264_v55 = vpop.f32.mrb[47].mxu0 }
 0xd21   :  { %v3321_v10 = vpop.f32.mrb[36].mxu1 }
 0xd22   :  { %v3328_v5 = vadd.f32 %v3321_v10, %v3260_v22  ;;  %v3323_v20 = vpop.f32.mrb[37].mxu1 }
 0xd23   :  { %v3329_v32 = vadd.f32 %v3323_v20, %v3262_v52  ;;  %v3325_v40 = vpop.f32.mrb[38].mxu1 }
 0xd24   :  { %v3326_v25 = vpop.f32.mrb[39].mxu1 }
 0xd29   :  { %v3385_v33 = vpop.f32.mrb[48].mxu0  ;;  %v3443_v61 = vpop.f32.mrb[40].mxu1 }
 0xd2a   :  { %v3392_v57 = vadd.f32 %v3385_v33, %v3328_v5  ;;  %v3387_v12 = vpop.f32.mrb[49].mxu0  ;;  %v3445_v21 = vpop.f32.mrb[41].mxu1 }
 0xd2b   :  { %v3393_v59 = vadd.f32 %v3387_v12, %v3329_v32  ;;  %v3389_v19 = vpop.f32.mrb[50].mxu0  ;;  %v3447_v49 = vpop.f32.mrb[42].mxu1 }
 0xd2c   :  { %v3450_v31 = vadd.f32 %v3443_v61, %v3392_v57  ;;  %v3390_v0 = vpop.f32.mrb[51].mxu0  ;;  %v3448_v48 = vpop.f32.mrb[43].mxu1 }
 0xd2d   :  { %v3451_v54 = vadd.f32 %v3445_v21, %v3393_v59  ;;  %v3711_v32 = vpop.permute.xlu0 %3710 }
 0xd31   :  { %v3507_v24 = vpop.f32.mrb[52].mxu0 }
 0xd32   :  { %v3514_v34 = vadd.f32 %v3507_v24, %v3450_v31  ;;  %v3509_v27 = vpop.f32.mrb[53].mxu0 }
 0xd33   :  { %v3515_v2 = vadd.f32 %v3509_v27, %v3451_v54  ;;  %v3511_v45 = vpop.f32.mrb[54].mxu0 }
 0xd34   :  { %v3512_v56 = vpop.f32.mrb[55].mxu0  ;;  %v3571_v9 = vpop.f32.mrb[44].mxu1 }
 0xd35   :  { %v3578_v15 = vadd.f32 %v3571_v9, %v3514_v34  ;;  %v3573_v18 = vpop.f32.mrb[45].mxu1 }
 0xd36   :  { %v3579_v53 = vadd.f32 %v3573_v18, %v3515_v2  ;;  %v3575_v36 = vpop.f32.mrb[46].mxu1 }
 0xd37   :  { %v3576_v30 = vpop.f32.mrb[47].mxu1 }
 0xd39   :  { %v3635_v16 = vpop.f32.mrb[56].mxu0 }
 0xd3a   :  { %v3642_v22 = vadd.f32 %v3635_v16, %v3578_v15  ;;  %v3637_v38 = vpop.f32.mrb[57].mxu0 }
 0xd3b   :  { %v3643_v52 = vadd.f32 %v3637_v38, %v3579_v53  ;;  %v3639_v62 = vpop.f32.mrb[58].mxu0 }
 0xd3c   :  { %v3640_v55 = vpop.f32.mrb[59].mxu0  ;;  %v3699_v10 = vpop.f32.mrb[48].mxu1 }
 0xd3d   :  { %v3706_v5 = vadd.f32 %v3699_v10, %v3642_v22  ;;  %v3701_v20 = vpop.f32.mrb[49].mxu1 }
 0xd3e   :  { %v3707_v40 = vadd.f32 %v3701_v20, %v3643_v52  ;;  %v3703_v25 = vpop.f32.mrb[50].mxu1 }
 0xd3f   :  { %v3713_v33 = vadd.f32 %v3711_v32, %v3706_v5  ;;  %v3704_v61 = vpop.f32.mrb[51].mxu1 }
 0xd40   :  { %v3714_v57 = vadd.f32 %v3711_v32, %v3707_v40 }
 0xd41   :  { %v3715_v12 = vadd.f32 %v3713_v33, %v7748_v13  ;;  %v3720_v13 = vld [vmem:[#allocation5] sm:$0x1] }
 0xd42   :  { %v3716_v59 = vadd.f32 %v3714_v57, %v7750_v37  ;;  %v3765_v37 = vpop.permute.xlu1 %3764 }
 0xd43   :  { %v3717_v21 = vmax.f32 %v3715_v12, 0.0 }
 0xd44   :  { %v3718_v19 = vmax.f32 %v3716_v59, 0.0 }
 0xd45   :  { %3930 = vrot.lane.b32.xlu0 %v3717_v21, %s5749_s21  ;;  %3739 = vrot.lane.b32.xlu1 %v3717_v21, %s5756_s10  ;;  %v3994_v52 = vmul.f32 %v3717_v21, %v7514_v11 }
 0xd46   :  { %v3995_v55 = vmul.f32 %v3718_v19, %v7518_v1 }
 0xd48   :  { %v3997_v33 = vpack.c.bf16 %v3995_v55, %v3995_v55 }
 0xd49   :  { %3741 = vrot.lane.b32.xlu0 %v3718_v19, %s5756_s10  ;;  %3729 = vrot.lane.b32.xlu1 %v3717_v21, %s5757_s7 }
 0xd4d   :  { %3731 = vrot.lane.b32.xlu0 %v3718_v19, %s5757_s7  ;;  %3866 = vrot.lane.b32.xlu1 %v3717_v21, %s5759_s15 }
 0xd51   :  { %3868 = vrot.lane.b32.xlu0 %v3718_v19, %s5759_s15  ;;  %4052 = vrot.lane.b32.xlu1 %v3717_v21, %s5750_s25 }
 0xd55   :  { %3876 = vrot.lane.b32.xlu0 %v7887_v29, %s5760_s16  ;;  %3932 = vrot.lane.b32.xlu1 %v3718_v19, %s5749_s21 }
 0xd59   :  { %4116 = vrot.lane.b32.xlu0 %v3717_v21, %s5761_s18  ;;  %3940 = vrot.lane.b32.xlu1 %v7887_v29, %s5762_s4 }
 0xd5d   :  { %3998 = vrot.lane.b32.xlu0 %v7887_v29, %s5763_s23  ;;  %4180 = vrot.lane.b32.xlu1 %v3717_v21, %s5764_s26 }
 0xd61   :  { %4054 = vrot.lane.b32.xlu0 %v3718_v19, %s5750_s25  ;;  %4118 = vrot.lane.b32.xlu1 %v3718_v19, %s5761_s18 }
 0xd65   :  { %4244 = vrot.lane.b32.xlu0 %v3717_v21, %s5760_s16  ;;  %4062 = vrot.lane.b32.xlu1 %v7887_v29, %s5765_s20 }
 0xd69   :  { %4182 = vrot.lane.b32.xlu0 %v3718_v19, %s5764_s26  ;;  %4246 = vrot.lane.b32.xlu1 %v3718_v19, %s5760_s16 }
 0xd6d   :  { %4126 = vrot.lane.b32.xlu0 %v7887_v29, %s5766_s1  ;;  %4190 = vrot.lane.b32.xlu1 %v7887_v29, %s5767_s2 }
 0xd71   :  { %4310 = vperm.xlu1 %5612, %v3720_v13   ;;  %4254 = vrot.lane.b32.xlu0 %v7887_v29, %s5768_s13 }
 0xdb7   :  { %v3931_v49 = vpop.permute.xlu0 %3930  ;;  %v3740_v31 = vpop.permute.xlu1 %3739 }
 0xdbb   :  { %v3742_v0 = vpop.permute.xlu0 %3741  ;;  %v3730_v48 = vpop.permute.xlu1 %3729 }
 0xdbc   :  { %v3743_v54 = vsel %vm2465_vm12, %v3740_v31, %v3742_v0  ;;  %v3744_v24 = vsel %vm2465_vm12, %v3742_v0, %v3740_v31 }
 0xdbd   :  { %v3745_v34 = vmul.f32 %v3744_v24, %v7580_v41  ;;  %v3746_v27 = vmul.f32 %v3743_v54, %v7584_v17 }
 0xdbf   :  { %v3747_v2 = vpack.c.bf16 %v3745_v34, %v3745_v34  ;;  %v3748_v45 = vpack.c.bf16 %v3746_v27, %v3746_v27  ;;  %v3732_v56 = vpop.permute.xlu0 %3731  ;;  %v3867_v9 = vpop.permute.xlu1 %3866 }
 0xdc0   :  { %v3733_v29 = vsel %vm2446_vm13, %v3730_v48, %v3732_v56  ;;  %v3734_v15 = vsel %vm2446_vm13, %v3732_v56, %v3730_v48 }
 0xdc1   :  { %v3735_v18 = vmul.f32 %v3734_v15, %v7595_v63  ;;  %v3736_v53 = vmul.f32 %v3733_v29, %v7599_v8  ;;  %5343 = vmatprep.subr.msk.bf16.mxu0 %vm2494_vm14, %v3748_v45  ;;  %v3770_v41 = vsel %vm2494_vm14, %v3747_v2, 0 }
 0xdc2   :  { %3776 = vmatpush1.bf16.msra.mxu0 %v3770_v41 }
 0xdc3   :  { %v3737_v17 = vpack.c.bf16 %v3735_v18, %v3735_v18  ;;  %v3738_v36 = vpack.c.bf16 %v3736_v53, %v3736_v53  ;;  %v3869_v30 = vpop.permute.xlu0 %3868  ;;  %v4053_v16 = vpop.permute.xlu1 %4052 }
 0xdc4   :  { %v3870_v22 = vsel %vm2596_vm1, %v3867_v9, %v3869_v30  ;;  %v3871_v38 = vsel %vm2596_vm1, %v3869_v30, %v3867_v9 }
 0xdc5   :  { %v3872_v63 = vmul.f32 %v3871_v38, %v7618_v23  ;;  %v3873_v8 = vmul.f32 %v3870_v22, %v7622_v58  ;;  %5344 = vmatmul.mubr.msk.bf16.vlgmr.msra.gmra.mrb[60].mxu0 %vm2490_vm15, %v3765_v37  ;;  %5345 = vmatprep.subr.msk.bf16.mxu1 %vm2494_vm14, %v3738_v36  ;;  %v3820_v62 = vsel %vm2494_vm14, %v3737_v17, 0  ;;  %v3996_v58 = vpack.c.bf16 %v3994_v52, %v3994_v52 }
 0xdc6   :  { %3826 = vmatpush1.bf16.msra.mxu1 %v3820_v62  ;;  %3919 = vmatprep.mubr.bf16.mxu0 %v8515_v60 }
 0xdc7   :  { %v3874_v10 = vpack.c.bf16 %v3872_v63, %v3872_v63  ;;  %v3875_v5 = vpack.c.bf16 %v3873_v8, %v3873_v8  ;;  %v3877_v20 = vpop.permute.xlu0 %3876  ;;  %v3933_v32 = vpop.permute.xlu1 %3932 }
 0xdc8   :  { %v3934_v11 = vsel %vm694_vm7, %v3931_v49, %v3933_v32  ;;  %v3935_v23 = vsel %vm694_vm7, %v3933_v32, %v3931_v49 }
 0xdc9   :  { %v3936_v40 = vmul.f32 %v3935_v23, %v7632_v47  ;;  %v3937_v25 = vmul.f32 %v3934_v11, %v7636_v26  ;;  %5346 = vmatmul.mubr.msk.bf16.vlgmr.msra.gmra.mrb[52].mxu1 %vm2490_vm15, %v7884_v51  ;;  %5347 = vmatprep.subr.msk.bf16.mxu0 %vm2494_vm14, %v3875_v5  ;;  %v3882_v1 = vsel %vm2494_vm14, %v3874_v10, 0  ;;  %v4004_v26 = vsel %vm2494_vm14, %v3996_v58, 0 }
 0xdca   :  { %3888 = vmatpush1.bf16.msra.mxu0 %v3882_v1  ;;  %3983 = vmatprep.mubr.bf16.mxu1 %v8515_v60 }
 0xdcb   :  { %v3938_v61 = vpack.c.bf16 %v3936_v40, %v3936_v40  ;;  %v3939_v57 = vpack.c.bf16 %v3937_v25, %v3937_v25  ;;  %v4117_v12 = vpop.permute.xlu0 %4116  ;;  %5351 = vmatprep.subr.msk.bf16.mxu0 %vm2494_vm14, %v3997_v33  ;;  %v3941_v21 = vpop.permute.xlu1 %3940 }
 0xdcd   :  { %5348 = vmatmul.mubr.msk.bf16.vlgmr.msra.gmra.mrb[64].mxu0 %vm2490_vm15, %v3877_v20  ;;  %5349 = vmatprep.subr.msk.bf16.mxu1 %vm2494_vm14, %v3939_v57  ;;  %v3946_v47 = vsel %vm2494_vm14, %v3938_v61, 0 }
 0xdce   :  { %3952 = vmatpush1.bf16.msra.mxu1 %v3946_v47  ;;  %4010 = vmatpush1.bf16.msra.mxu0 %v4004_v26 }
 0xdcf   :  { %v3999_v51 = vpop.permute.xlu0 %3998  ;;  %v4181_v59 = vpop.permute.xlu1 %4180  ;;  %4041 = vmatprep.mubr.bf16.mxu0 %v8515_v60 }
 0xdd1   :  { %5350 = vmatmul.mubr.msk.bf16.vlgmr.msra.gmra.mrb[56].mxu1 %vm2490_vm15, %v3941_v21 }
 0xdd2   :  { %4105 = vmatprep.mubr.bf16.mxu1 %v8515_v60 }
 0xdd3   :  { %v4055_v19 = vpop.permute.xlu0 %4054  ;;  %v4119_v13 = vpop.permute.xlu1 %4118 }
 0xdd4   :  { %v4056_v37 = vsel %vm767_vm8, %v4053_v16, %v4055_v19  ;;  %v4057_v49 = vsel %vm767_vm8, %v4055_v19, %v4053_v16  ;;  %v4120_v31 = vsel %vm2873_vm2, %v4117_v12, %v4119_v13  ;;  %v4121_v0 = vsel %vm2873_vm2, %v4119_v13, %v4117_v12 }
 0xdd5   :  { %v4058_v48 = vmul.f32 %v4056_v37, %v7656_v46  ;;  %v4059_v54 = vmul.f32 %v4057_v49, %v7660_v4  ;;  %v4122_v24 = vmul.f32 %v4120_v31, %v7667_v6  ;;  %v4123_v34 = vmul.f32 %v4121_v0, %v7671_v3  ;;  %5352 = vmatmul.mubr.msk.bf16.vlgmr.msra.gmra.mrb[68].mxu0 %vm2490_vm15, %v3999_v51 }
 0xdd6   :  { %4169 = vmatprep.mubr.bf16.mxu0 %v8515_v60 }
 0xdd7   :  { %v4060_v27 = vpack.c.bf16 %v4058_v48, %v4058_v48  ;;  %v4061_v2 = vpack.c.bf16 %v4059_v54, %v4059_v54  ;;  %v4124_v45 = vpack.c.bf16 %v4122_v24, %v4122_v24  ;;  %v4125_v56 = vpack.c.bf16 %v4123_v34, %v4123_v34  ;;  %v4245_v9 = vpop.permute.xlu0 %4244  ;;  %v4063_v29 = vpop.permute.xlu1 %4062 }
 0xdd9   :  { %5353 = vmatprep.subr.msk.bf16.mxu1 %vm2494_vm14, %v4061_v2  ;;  %5355 = vmatprep.subr.msk.bf16.mxu0 %vm2494_vm14, %v4125_v56  ;;  %v4068_v46 = vsel %vm2494_vm14, %v4060_v27, 0  ;;  %v4132_v4 = vsel %vm2494_vm14, %v4124_v45, 0 }
 0xdda   :  { %4074 = vmatpush1.bf16.msra.mxu1 %v4068_v46  ;;  %4138 = vmatpush1.bf16.msra.mxu0 %v4132_v4 }
 0xddb   :  { %v4183_v6 = vpop.permute.xlu0 %4182  ;;  %v4247_v3 = vpop.permute.xlu1 %4246 }
 0xddc   :  { %v4184_v15 = vsel %vm2946_vm3, %v4181_v59, %v4183_v6  ;;  %v4185_v18 = vsel %vm2946_vm3, %v4183_v6, %v4181_v59  ;;  %v4248_v53 = vsel %vm3019_vm4, %v4245_v9, %v4247_v3  ;;  %v4249_v41 = vsel %vm3019_vm4, %v4247_v3, %v4245_v9 }
 0xddd   :  { %v4186_v17 = vmul.f32 %v4184_v15, %v7689_v7  ;;  %v4187_v36 = vmul.f32 %v4185_v18, %v7702_v50  ;;  %v4250_v30 = vmul.f32 %v7692_v39, %v4248_v53  ;;  %v4251_v16 = vmul.f32 %v7695_v14, %v4249_v41  ;;  %5354 = vmatmul.mubr.msk.bf16.vlgmr.msra.gmra.mrb[60].mxu1 %vm2490_vm15, %v4063_v29 }
 0xdde   :  { %4233 = vmatprep.mubr.bf16.mxu1 %v8515_v60 }
 0xddf   :  { %v4188_v22 = vpack.c.bf16 %v4186_v17, %v4186_v17  ;;  %v4189_v38 = vpack.c.bf16 %v4187_v36, %v4187_v36  ;;  %v4252_v52 = vpack.c.bf16 %v4250_v30, %v4250_v30  ;;  %v4253_v63 = vpack.c.bf16 %v4251_v16, %v4251_v16  ;;  %v4127_v8 = vpop.permute.xlu0 %4126  ;;  %v4191_v14 = vpop.permute.xlu1 %4190 }
 0xde0   :  { %5356 = vmatmul.mubr.msk.bf16.vlgmr.msra.gmra.mrb[72].mxu0 %vm2490_vm15, %v4127_v8 }
 0xde1   :  { %5357 = vmatprep.subr.msk.bf16.mxu1 %vm2494_vm14, %v4189_v38  ;;  %5359 = vmatprep.subr.msk.bf16.mxu0 %vm2494_vm14, %v4253_v63  ;;  %v4196_v7 = vsel %vm2494_vm14, %v4188_v22, 0  ;;  %v4260_v39 = vsel %vm2494_vm14, %v4252_v52, 0  ;;  %v8010_v38 = vld [vmem:[%s8514_s9] sm:$0xff] }
 0xde2   :  { %4202 = vmatpush1.bf16.msra.mxu1 %v4196_v7  ;;  %4266 = vmatpush1.bf16.msra.mxu0 %v4260_v39  ;;  %v4321_v52 = vrot.slane %v8010_v38, 4  ;;  %v8014_v7 = vld [vmem:[%s8514_s9 + $0x8] sm:$0xff] }
 0xde3   :  { %4297 = vmatprep.mubr.bf16.mxu0 %v8515_v60  ;;  %v4255_v50 = vpop.permute.xlu0 %4254  ;;  %v4322_v39 = vrot.slane %v8014_v7, 4 }
 0xde5   :  { %5358 = vmatmul.mubr.msk.bf16.vlgmr.msra.gmra.mrb[64].mxu1 %vm2490_vm15, %v4191_v14 }
 0xde8   :  { %5360 = vmatmul.mubr.msk.bf16.vlgmr.msra.gmra.mrb[76].mxu0 %vm2490_vm15, %v4255_v50 }
 0xdf0   :  { %v4311_v15 = vpop.permute.xlu1 %4310 }
 0xdf1   :  { %v4316_v16 = vrot.slane %v4311_v15, %v8523_v42 }
 0xe98   :  { %v3809_v62 = vpop.f32.mrb[60].mxu0 }
 0xe99   :  { %v3811_v55 = vpop.f32.mrb[61].mxu0 }
 0xe9a   :  { %v3813_v10 = vpop.f32.mrb[62].mxu0 }
 0xe9b   :  { %v3814_v5 = vpop.f32.mrb[63].mxu0 }
 0xe9c   :  { %v3859_v20 = vpop.f32.mrb[52].mxu1 }
 0xe9d   :  { %v3860_v32 = vadd.f32 %v3859_v20, %v3809_v62  ;;  %v3861_v11 = vpop.f32.mrb[53].mxu1 }
 0xe9e   :  { %v3862_v23 = vadd.f32 %v3861_v11, %v3811_v55  ;;  %v3863_v58 = vpop.f32.mrb[54].mxu1 }
 0xe9f   :  { %v3864_v40 = vpop.f32.mrb[55].mxu1 }
 0xea0   :  { %v3921_v25 = vpop.f32.mrb[64].mxu0 }
 0xea1   :  { %v3928_v1 = vadd.f32 %v3921_v25, %v3860_v32  ;;  %v3923_v33 = vpop.f32.mrb[65].mxu0 }
 0xea2   :  { %v3929_v61 = vadd.f32 %v3923_v33, %v3862_v23  ;;  %v3925_v57 = vpop.f32.mrb[66].mxu0  ;;  %v3722_v33 = vld [vmem:[#allocation7] sm:$0x1] }
 0xea3   :  { %v3926_v12 = vpop.f32.mrb[67].mxu0  ;;  %v3723_v57 = vld [vmem:[%s8534_s30] sm:$0x1] }
 0xea4   :  { %v3985_v21 = vpop.f32.mrb[56].mxu1  ;;  %v4383_v12 = vunpack.c.l.bf16 %v3723_v57  ;;  %v5778_v57 = vmov 269488144  }
 0xea5   :  { %v3992_v47 = vadd.f32 %v3985_v21, %v3928_v1  ;;  %v3987_v26 = vpop.f32.mrb[57].mxu1  ;;  %v5770_v21 = vmov 1  }
 0xea6   :  { %v3993_v51 = vadd.f32 %v3987_v26, %v3929_v61  ;;  %v3989_v59 = vpop.f32.mrb[58].mxu1  ;;  %v3721_v61 = vld [vmem:[#allocation6] sm:$0x1]  ;;  %v5772_v26 = vmov 2  }
 0xea7   :  { %v3990_v19 = vpop.f32.mrb[59].mxu1  ;;  %v5774_v59 = vmov 3  }
 0xea8   :  { %v4043_v13 = vpop.f32.mrb[68].mxu0  ;;  %v5775_v19 = vmov 4  }
 0xea9   :  { %v4050_v37 = vadd.f32 %v4043_v13, %v3992_v47  ;;  %v4045_v49 = vpop.f32.mrb[69].mxu0  ;;  %v5771_v47 = vmov 5   ;;  %v5776_v13 = vmov 7  }
 0xeaa   :  { %v4051_v31 = vadd.f32 %v4045_v49, %v3993_v51  ;;  %v4047_v0 = vpop.f32.mrb[70].mxu0  ;;  %v5773_v51 = vmov 6  }
 0xeab   :  { %v4048_v48 = vpop.f32.mrb[71].mxu0 }
 0xeb0   :  { %v4107_v54 = vpop.f32.mrb[60].mxu1 }
 0xeb1   :  { %v4114_v24 = vadd.f32 %v4107_v54, %v4050_v37  ;;  %v4109_v34 = vpop.f32.mrb[61].mxu1  ;;  %v5777_v37 = vmov 8  }
 0xeb2   :  { %v4115_v27 = vadd.f32 %v4109_v34, %v4051_v31  ;;  %v4111_v2 = vpop.f32.mrb[62].mxu1 }
 0xeb3   :  { %v4112_v45 = vpop.f32.mrb[63].mxu1  ;;  %v4171_v56 = vpop.f32.mrb[72].mxu0 }
 0xeb4   :  { %v4178_v9 = vadd.f32 %v4171_v56, %v4114_v24  ;;  %v4173_v29 = vpop.f32.mrb[73].mxu0 }
 0xeb5   :  { %v4179_v46 = vadd.f32 %v4173_v29, %v4115_v27  ;;  %v4175_v4 = vpop.f32.mrb[74].mxu0 }
 0xeb6   :  { %v4176_v6 = vpop.f32.mrb[75].mxu0 }
 0xeb8   :  { %v4235_v3 = vpop.f32.mrb[64].mxu1 }
 0xeb9   :  { %v4242_v18 = vadd.f32 %v4235_v3, %v4178_v9  ;;  %v4237_v53 = vpop.f32.mrb[65].mxu1 }
 0xeba   :  { %v4243_v41 = vadd.f32 %v4237_v53, %v4179_v46  ;;  %v4239_v17 = vpop.f32.mrb[66].mxu1 }
 0xebb   :  { %v4299_v36 = vpop.f32.mrb[76].mxu0  ;;  %v4240_v30 = vpop.f32.mrb[67].mxu1 }
 0xebc   :  { %v4306_v22 = vadd.f32 %v4299_v36, %v4242_v18  ;;  %v4301_v63 = vpop.f32.mrb[77].mxu0 }
 0xebd   :  { %v4307_v8 = vadd.f32 %v4301_v63, %v4243_v41  ;;  %v4303_v14 = vpop.f32.mrb[78].mxu0 }
 0xebe   :  { %v4317_v50 = vadd.f32 %v4316_v16, %v4306_v22  ;;  %v4304_v62 = vpop.f32.mrb[79].mxu0 }
 0xebf   :  { %v4318_v55 = vadd.f32 %v4316_v16, %v4307_v8 }
 0xec0   :  { %v4325_v10 = vmul.f32 %v4321_v52, %v4317_v50 }
 0xec1   :  { %v4326_v5 = vmul.f32 %v4322_v39, %v4318_v55 }
 0xec2   :  { %v4328_v20 = vsel %vm4327_vm0, %v4325_v10, 0.0  ;;  %v4334_v32 = vmul.f32 %v4325_v10, %v4325_v10 }
 0xec3   :  { %v4329_v11 = vsel %vm4327_vm0, %v4326_v5, 0.0  ;;  %v4335_v23 = vmul.f32 %v4326_v5, %v4326_v5 }
 0xec4   :  { %v4330_v58 = vadd.f32 %v4329_v11, %v4328_v20  ;;  %v4336_v40 = vsel %vm4327_vm0, %v4334_v32, 0.0 }
 0xec5   :  { %v4337_v25 = vsel %vm4327_vm0, %v4335_v23, 0.0 }
 0xec6   :  { %4331 = vadd.xlane.f32.xlu0 %v4330_v58  ;;  %v4338_v1 = vadd.f32 %v4337_v25, %v4336_v40  ;;  %v4414_v40 = vrot.slane %v8010_v38, 1  ;;  %v4415_v25 = vrot.slane %v8014_v7, 1 }
 0xec8   :  { %4339 = vadd.xlane.f32.xlu1 %v4338_v1 }
 0xed9   :  { %4364 = vperm.xlu1 %5612, %v3722_v33  }
 0xedc   :  { %4353 = vperm.xlu0 %5611, %v3721_v61  }
 0xedd   :  { %5613 = vset.pattern.permute.xlu1 %v5770_v21 }
 0xede   :  { %4421 = vperm.xlu1 %5613, %v4383_v12  }
 0xee0   :  { %4386 = vperm.xlu0 %5611, %v4383_v12  }
 0xee2   :  { %5617 = vset.pattern.permute.xlu1 %v5771_v47 }
 0xee3   :  { %4555 = vperm.xlu1 %5617, %v4383_v12  }
 0xee4   :  { %5614 = vset.pattern.permute.xlu0 %v5772_v26 }
 0xee5   :  { %4457 = vperm.xlu0 %5614, %v4383_v12  }
 0xee7   :  { %5618 = vset.pattern.permute.xlu1 %v5773_v51 }
 0xee8   :  { %4591 = vperm.xlu1 %5618, %v4383_v12  }
 0xee9   :  { %5615 = vset.pattern.permute.xlu0 %v5774_v59 }
 0xeea   :  { %4493 = vperm.xlu0 %5615, %v4383_v12  }
 0xeec   :  { %5622 = vset.pattern.permute.xlu1 %v8515_v60 }
 0xeee   :  { %5616 = vset.pattern.permute.xlu0 %v5775_v19 }
 0xeef   :  { %4519 = vperm.xlu0 %5616, %v4383_v12  }
 0xef3   :  { %5619 = vset.pattern.permute.xlu0 %v5776_v13 }
 0xef4   :  { %4627 = vperm.xlu0 %5619, %v4383_v12  }
 0xef8   :  { %5620 = vset.pattern.permute.xlu0 %v5777_v37 }
 0xf53   :  { %v4332_v49 = vpop.xlane.xlu0 %4331 }
 0xf54   :  { %v4333_v31 = vmul.f32 0.010204081, %v4332_v49  ;;  %v4450_v49 = vrot.slane %v8010_v38, 2 }
 0xf55   :  { %v4340_v0 = vpop.xlane.xlu1 %4339 }
 0xf56   :  { %v4341_v48 = vmul.f32 0.010204081, %v4340_v0  ;;  %v4342_v54 = vmul.f32 %v4333_v31, %v4333_v31  ;;  %v4345_v45 = vsub.f32 %v4325_v10, %v4333_v31  ;;  %v4346_v56 = vsub.f32 %v4326_v5, %v4333_v31 }
 0xf57   :  { %v4451_v31 = vrot.slane %v8014_v7, 2 }
 0xf58   :  { %v4343_v24 = vsub.f32 %v4341_v48, %v4342_v54 }
 0xf59   :  { %v4365_v29 = vpop.permute.xlu1 %4364 }
 0xf5a   :  { %v4344_v34 = vmax.f32 %v4343_v24, 0.0  ;;  %v4370_v3 = vrot.slane %v4365_v29, %v8523_v42 }
 0xf5b   :  { %v4354_v2 = vpop.permute.xlu0 %4353 }
 0xf5c   :  { %v4347_v27 = vadd.f32 1e-05, %v4344_v34  ;;  %v4359_v6 = vrot.slane %v4354_v2, %v8523_v42  ;;  %v4486_v2 = vrot.slane %v8010_v38, 3 }
 0xf5d   :  { %v8066_v8 = vpop.permute.xlu1 %4421 }
 0xf5e   :  { %5666 = vrsqrt.f32 %v4347_v27 }
 0xf5f   :  { %v8064_v63 = vpop.permute.xlu0 %4386 }
 0xf62   :  { %v8070_v14 = vpop.permute.xlu1 %4555 }
 0xf67   :  { %v8074_v62 = vpop.permute.xlu1 %4591 }
 0xf68   :  { %v5667_v9 = vpop.eup %5666 }
 0xf69   :  { %v4349_v46 = vmul.f32 %v5667_v9, %v4345_v45  ;;  %v4350_v4 = vmul.f32 %v5667_v9, %v4346_v56  ;;  %v4487_v45 = vrot.slane %v8014_v7, 3 }
 0xf6b   :  { %v4360_v15 = vmul.f32 %v4359_v6, %v4349_v46  ;;  %v4361_v18 = vmul.f32 %v4359_v6, %v4350_v4 }
 0xf6d   :  { %v4371_v53 = vadd.f32 %v4370_v3, %v4360_v15  ;;  %v4372_v41 = vadd.f32 %v4370_v3, %v4361_v18 }
 0xf6f   :  { %v4373_v17 = vmax.f32 %v4371_v53, 0.0  ;;  %v4374_v36 = vmax.f32 %v4372_v41, 0.0 }
 0xf71   :  { %4377 = vrot.lane.b32.xlu1 %v4374_v36, %s5757_s7  ;;  %4375 = vrot.lane.b32.xlu0 %v4373_v17, %s5757_s7  ;;  %v8041_v30 = vmul.f32 %v4373_v17, %v4321_v52  ;;  %v8045_v16 = vmul.f32 %v4374_v36, %v4322_v39  ;;  %v3724_v52 = vld [vmem:[#allocation8] sm:$0x1]  ;;  %v8068_v39 = vpop.permute.xlu0 %4457 }
 0xf73   :  { %v4531_v22 = vcombine.low %v8041_v30, %v8045_v16 }
 0xf75   :  { %4410 = vrot.lane.b32.xlu1 %v4374_v36, %s5756_s10  ;;  %4408 = vrot.lane.b32.xlu0 %v4373_v17, %s5756_s10  ;;  %v8072_v50 = vpop.permute.xlu0 %4493 }
 0xf79   :  { %4444 = vrot.lane.b32.xlu1 %v4373_v17, %s5759_s15  ;;  %4544 = vrot.lane.b32.xlu0 %v4374_v36, %s5750_s25  ;;  %v8076_v55 = vpop.permute.xlu0 %4519 }
 0xf7d   :  { %4446 = vrot.lane.b32.xlu1 %v4374_v36, %s5759_s15  ;;  %4578 = vrot.lane.b32.xlu0 %v4373_v17, %s5761_s18  ;;  %v8078_v5 = vpop.permute.xlu0 %4627 }
 0xf81   :  { %4480 = vrot.lane.b32.xlu1 %v4373_v17, %s5749_s21  ;;  %4659 = vperm.xlu0 %5620, %v4383_v12   ;;  %v4390_v12 = vunpack.c.l.s4 %v5778_v57 }
 0xf83   :  { %v4391_v15 = vunpack.c.0.s8 %v4390_v12 }
 0xf85   :  { %4482 = vrot.lane.b32.xlu1 %v4374_v36, %s5749_s21  ;;  %5621 = vset.pattern.permute.xlu0 %v8515_v60 }
 0xf86   :  { %4684 = vperm.xlu0 %5621, %v3724_v52  }
 0xf89   :  { %4542 = vrot.lane.b32.xlu1 %v4373_v17, %s5750_s25 }
 0xf8d   :  { %4580 = vrot.lane.b32.xlu1 %v4374_v36, %s5761_s18 }
 0xf91   :  { %4614 = vrot.lane.b32.xlu1 %v4373_v17, %s5764_s26 }
 0xf95   :  { %4616 = vrot.lane.b32.xlu1 %v4374_v36, %s5764_s26 }
 0xf99   :  { %4650 = vrot.lane.b32.xlu1 %v4373_v17, %s5760_s16 }
 0xf9d   :  { %4652 = vrot.lane.b32.xlu1 %v4374_v36, %s5760_s16 }
 0xfe3   :  { %v4378_v10 = vpop.permute.xlu1 %4377  ;;  %v4376_v32 = vpop.permute.xlu0 %4375 }
 0xfe4   :  { %v4379_v0 = vsel %vm2446_vm13, %v4376_v32, %v4378_v10  ;;  %v4380_v48 = vsel %vm2446_vm13, %v4378_v10, %v4376_v32 }
 0xfe5   :  { %v4381_v46 = vmul.f32 %v8010_v38, %v4380_v48  ;;  %v4382_v4 = vmul.f32 %v8014_v7, %v4379_v0  ;;  %v4584_v48 = vrot.slane %v8010_v38, 6 }
 0xfe7   :  { %v4411_v20 = vpop.permute.xlu1 %4410  ;;  %v4409_v58 = vpop.permute.xlu0 %4408  ;;  %v4398_v52 = vcombine.low %v4381_v46, %v4382_v4 }
 0xfe8   :  { %v4412_v33 = vsel %vm2465_vm12, %v4409_v58, %v4411_v20  ;;  %v4413_v61 = vsel %vm2465_vm12, %v4411_v20, %v4409_v58  ;;  %v8117_v20 = vsub.s32 %v4391_v15, %v8519_v35  ;;  %v4549_v58 = vrot.slane %v8014_v7, 5 }
 0xfe9   :  { %v4418_v34 = vmul.f32 %v4414_v40, %v4413_v61  ;;  %v4419_v27 = vmul.f32 %v4415_v25, %v4412_v33  ;;  %v4405_v35 = vrot.slane %v4398_v52, %v7539_v43 }
 0xfea   :  { %v4430_v33 = vrot.slane %v8066_v8, %v8117_v20  ;;  %v4466_v8 = vrot.slane %v8068_v39, %v8117_v20  ;;  %v4620_v39 = vrot.slane %v8010_v38, 7 }
 0xfeb   :  { %v4445_v11 = vpop.permute.xlu1 %4444  ;;  %v4433_v18 = vcombine.low %v4418_v34, %v4419_v27  ;;  %v4545_v53 = vpop.permute.xlu0 %4544 }
 0xfed   :  { %v4440_v32 = vrot.slane %v4433_v18, %v7539_v43 }
 0xfef   :  { %v4447_v23 = vpop.permute.xlu1 %4446  ;;  %v4579_v0 = vpop.permute.xlu0 %4578 }
 0xff0   :  { %v4448_v54 = vsel %vm2596_vm1, %v4445_v11, %v4447_v23  ;;  %v4449_v24 = vsel %vm2596_vm1, %v4447_v23, %v4445_v11  ;;  %v4548_v23 = vrot.slane %v8010_v38, 5 }
 0xff1   :  { %v4454_v6 = vmul.f32 %v4450_v49, %v4449_v24  ;;  %v4455_v3 = vmul.f32 %v4451_v31, %v4448_v54  ;;  %v4585_v54 = vrot.slane %v8014_v7, 6  ;;  %v4395_v24 = vrot.slane %v8064_v63, %v8117_v20 }
 0xff2   :  { %v4502_v63 = vrot.slane %v8072_v50, %v8117_v20  ;;  %v4538_v50 = vrot.slane %v4531_v22, %v7539_v43 }
 0xff3   :  { %v4481_v1 = vpop.permute.xlu1 %4480  ;;  %v4469_v10 = vcombine.low %v4454_v6, %v4455_v3  ;;  %v4621_v6 = vrot.slane %v8014_v7, 7  ;;  %v4407_v3 = vmul.f32 %v4405_v35, %v4395_v24 }
 0xff5   :  { %v4476_v12 = vrot.slane %v4469_v10, %v7539_v43  ;;  %v4528_v10 = vrot.slane %v8076_v55, %v8117_v20 }
 0xff7   :  { %v4483_v56 = vpop.permute.xlu1 %4482  ;;  %v4478_v15 = vmul.f32 %v4476_v12, %v4466_v8  ;;  %v4540_v55 = vmul.f32 %v4538_v50, %v4528_v10  ;;  %v4564_v12 = vrot.slane %v8070_v14, %v8117_v20  ;;  %v4600_v8 = vrot.slane %v8074_v62, %v8117_v20  ;;  %v8185_v62 = vld [vmem:[%s8514_s9 + $0x18] sm:$0x1] }
 0xff8   :  { %v4484_v9 = vsel %vm694_vm7, %v4481_v1, %v4483_v56  ;;  %v4485_v29 = vsel %vm694_vm7, %v4483_v56, %v4481_v1  ;;  %v4442_v56 = vmul.f32 %v4440_v32, %v4430_v33  ;;  %v4636_v14 = vrot.slane %v8078_v5, %v8117_v20 }
 0xff9   :  { %v4490_v41 = vmul.f32 %v4486_v2, %v4485_v29  ;;  %v4491_v17 = vmul.f32 %v4487_v45, %v4484_v9  ;;  %v4692_v5 = vcombine.high %v8010_v38, %v8014_v7 }
 0xffb   :  { %v4543_v36 = vpop.permute.xlu1 %4542  ;;  %v4505_v11 = vcombine.low %v4490_v41, %v4491_v17  ;;  %v4443_v41 = vadd.f32 %v4442_v56, %v4407_v3 }
 0xffc   :  { %v4546_v61 = vsel %vm767_vm8, %v4543_v36, %v4545_v53  ;;  %v4547_v57 = vsel %vm767_vm8, %v4545_v53, %v4543_v36 }
 0xffd   :  { %v4512_v9 = vrot.slane %v4505_v11, %v7539_v43  ;;  %v4552_v29 = vmul.f32 %v4548_v23, %v4546_v61  ;;  %v4553_v46 = vmul.f32 %v4549_v58, %v4547_v57 }
 0xfff   :  { %v4581_v1 = vpop.permute.xlu1 %4580  ;;  %v4514_v17 = vmul.f32 %v4512_v9, %v4502_v63  ;;  %v4567_v36 = vcombine.low %v4552_v29, %v4553_v46  ;;  %v8181_v63 = vld [vmem:[%s8514_s9 + $0x10] sm:$0x1]  ;;  %s5682_s9 = scalar_lea.vmem %s5240_s6, 32 }
0x1000   :  { %v4582_v34 = vsel %vm2873_vm2, %v4579_v0, %v4581_v1  ;;  %v4583_v27 = vsel %vm2873_vm2, %v4581_v1, %v4579_v0  ;;  %v4479_v1 = vadd.f32 %v4478_v15, %v4443_v41  ;;  %v4660_v24 = vpop.permute.xlu0 %4659  ;;  %p5683_p0 = scmp.ne.s32.totalorder %s5240_s6, %s5682_s9  ;;  %p5688_p2 = scmp.lt.s32.totalorder %s5682_s9, %s5682_s9 }
0x1001   :  { %v4588_v18 = vmul.f32 %v4584_v48, %v4582_v34  ;;  %v4589_v53 = vmul.f32 %v4585_v54, %v4583_v27  ;;  %v4574_v30 = vrot.slane %v4567_v36, %v7539_v43 }
0x1002   :  { %v4515_v35 = vadd.f32 %v4514_v17, %v4479_v1  ;;  %p5689_p3 = por %p5688_p2, %p5687_p1 }
0x1003   :  { %v4615_v4 = vpop.permute.xlu1 %4614  ;;  %v4603_v33 = vcombine.low %v4588_v18, %v4589_v53  ;;  %v4576_v34 = vmul.f32 %v4574_v30, %v4564_v12  ;;  %v4668_v53 = vrot.slane %v4660_v24, %v8117_v20 }
0x1004   :  { %v4541_v9 = vadd.f32 %v4540_v55, %v4515_v35  ;;  %p5690_p4 = pnand %p5689_p3, %p5683_p0 }
0x1005   :  { %v4610_v0 = vrot.slane %v4603_v33, %v7539_v43  ;;  %v4685_v36 = vpop.permute.xlu0 %4684  ;;  %v8194_v33 = vrot.slane %v4692_v5, %v7539_v43 }
0x1006   :  { %v4577_v41 = vadd.f32 %v4576_v34, %v4541_v9  ;;  %v3727_v9 = vld [vmem:[%s8535_s8] sm:$0x1] }
0x1007   :  { %v4617_v52 = vpop.permute.xlu1 %4616 }
0x1008   :  { %v4618_v32 = vsel %vm2946_vm3, %v4615_v4, %v4617_v52  ;;  %v4619_v11 = vsel %vm2946_vm3, %v4617_v52, %v4615_v4  ;;  %v4612_v4 = vmul.f32 %v4610_v0, %v4600_v8 }
0x1009   :  { %v4624_v61 = vmul.f32 %v4620_v39, %v4618_v32  ;;  %v4625_v57 = vmul.f32 %v4621_v6, %v4619_v11  ;;  %v4690_v11 = vrot.slane %v4685_v36, %v8523_v42 }
0x100a   :  { %v4613_v50 = vadd.f32 %v4612_v4, %v4577_v41 }
0x100b   :  { %v4639_v16 = vcombine.low %v4624_v61, %v4625_v57  ;;  %v4651_v22 = vpop.permute.xlu1 %4650 }
0x100d   :  { %v4646_v27 = vrot.slane %v4639_v16, %v7539_v43 }
0x100f   :  { %v4653_v56 = vpop.permute.xlu1 %4652  ;;  %v4648_v17 = vmul.f32 %v4646_v27, %v4636_v14 }
0x1010   :  { %v4654_v29 = vsel %vm3019_vm4, %v4651_v22, %v4653_v56  ;;  %v4655_v46 = vsel %vm3019_vm4, %v4653_v56, %v4651_v22  ;;  %v3725_v56 = vld [vmem:[#allocation9] sm:$0x1] }
0x1011   :  { %v4656_v3 = vmul.f32 %v8181_v63, %v4654_v29  ;;  %v4657_v15 = vmul.f32 %v8185_v62, %v4655_v46  ;;  %v4649_v32 = vadd.f32 %v4648_v17, %v4613_v50  ;;  %v4802_v29 = vunpack.c.l.bf16 %v3727_v9  ;;  %v3726_v46 = vld [vmem:[#allocation10] sm:$0x1] }
0x1013   :  { %v4671_v18 = vcombine.low %v4656_v3, %v4657_v15 }
0x1015   :  { %v4678_v52 = vrot.slane %v4671_v18, %v7539_v43 }
0x1017   :  { %v4680_v10 = vmul.f32 %v4678_v52, %v4668_v53 }
0x1019   :  { %v4681_v1 = vadd.f32 %v4680_v10, %v4649_v32 }
0x101b   :  { %v4691_v61 = vadd.f32 %v4690_v11, %v4681_v1  ;;  %v3728_v11 = vld [vmem:[#allocation11] sm:$0x1]  ;;  %v5646_v1 = vld [vmem:[%s8536_s14] sm:$0xff]  }
0x101d   :  { %v4701_v57 = vmul.f32 %v8194_v33, %v4691_v61  ;;  %v5779_v61 = vmov 0.0  }
0x101e   :  { %5451 = vmatprep.subr.bf16.mxu1 %v5779_v61  ;;  %5467 = vmatprep.mubr.msk.bf16.mxu1 %vm5780_vm5, %v5779_v61 }
0x101f   :  { %v4706_v35 = vrot.slane %v4701_v57, %v8523_v42  ;;  %v4710_v30 = vrot.slane %v4701_v57, %v8524_v28  ;;  %v4719_v16 = vmul.f32 %v4701_v57, %v4701_v57  ;;  %5452 = vmatpush3.bf16.msra.mxu1 %v5646_v1 }
0x1020   :  { %5453 = vmatprep.subr.bf16.mxu1 %v5779_v61 }
0x1021   :  { %v4713_v22 = vsel %vm4327_vm0, %v4706_v35, 0.0  ;;  %v4714_v55 = vsel %vm4327_vm0, %v4710_v30, 0.0  ;;  %v4724_v12 = vrot.slane %v4719_v16, %v8523_v42  ;;  %v4728_v0 = vrot.slane %v4719_v16, %v8524_v28  ;;  %v5649_v35 = vld [vmem:[%s8536_s14 + $0x18] sm:$0xff]   ;;  %v5650_v30 = vld [vmem:[%s8536_s14 + $0x20] sm:$0xff]   ;;  %v5651_v16 = vld [vmem:[%s8536_s14 + $0x28] sm:$0xff]  }
0x1022   :  { %v4715_v24 = vadd.f32 %v4714_v55, %v4713_v22  ;;  %v5652_v22 = vld [vmem:[%s8536_s14 + $0x30] sm:$0xff]   ;;  %v5653_v55 = vld [vmem:[%s8536_s14 + $0x38] sm:$0xff]  }
0x1023   :  { %v4731_v8 = vsel %vm4327_vm0, %v4724_v12, 0.0  ;;  %v4732_v34 = vsel %vm4327_vm0, %v4728_v0, 0.0 }
0x1024   :  { %4716 = vadd.xlane.f32.xlu1 %v4715_v24  ;;  %v4733_v27 = vadd.f32 %v4732_v34, %v4731_v8 }
0x1026   :  { %4734 = vadd.xlane.f32.xlu0 %v4733_v27 }
0x1035   :  { %4764 = vperm.xlu1 %5622, %v3725_v56  }
0x1039   :  { %4805 = vperm.xlu1 %5622, %v4802_v29  }
0x103c   :  { %4774 = vperm.xlu0 %5621, %v3726_v46  }
0x103d   :  { %5623 = vset.pattern.permute.xlu1 %v5770_v21 }
0x103e   :  { %4836 = vperm.xlu1 %5623, %v4802_v29  }
0x1040   :  { %5624 = vset.pattern.permute.xlu0 %v5772_v26 }
0x1041   :  { %4868 = vperm.xlu0 %5624, %v4802_v29  }
0x1042   :  { %5627 = vset.pattern.permute.xlu1 %v5771_v47 }
0x1043   :  { %4946 = vperm.xlu1 %5627, %v4802_v29  }
0x1045   :  { %5625 = vset.pattern.permute.xlu0 %v5774_v59 }
0x1046   :  { %4900 = vperm.xlu0 %5625, %v4802_v29  }
0x1047   :  { %5628 = vset.pattern.permute.xlu1 %v5773_v51 }
0x1048   :  { %4978 = vperm.xlu1 %5628, %v4802_v29  }
0x104a   :  { %5626 = vset.pattern.permute.xlu0 %v5775_v19 }
0x104b   :  { %4925 = vperm.xlu0 %5626, %v4802_v29  }
0x104f   :  { %5629 = vset.pattern.permute.xlu0 %v5776_v13 }
0x1050   :  { %5010 = vperm.xlu0 %5629, %v4802_v29  }
0x1054   :  { %5630 = vset.pattern.permute.xlu0 %v5777_v37 }
0x10b1   :  { %v4717_v21 = vpop.xlane.xlu1 %4716 }
0x10b2   :  { %v4718_v26 = vmul.f32 0.010204081, %v4717_v21 }
0x10b3   :  { %v4735_v14 = vpop.xlane.xlu0 %4734 }
0x10b4   :  { %v4737_v4 = vmul.f32 %v4718_v26, %v4718_v26  ;;  %v4736_v47 = vmul.f32 0.010204081, %v4735_v14  ;;  %v4747_v51 = vrot.slane %v4718_v26, %v8117_v20 }
0x10b5   :  { %v4765_v53 = vpop.permute.xlu1 %4764 }
0x10b6   :  { %v4738_v3 = vsub.f32 %v4736_v47, %v4737_v4  ;;  %v4749_v19 = vsub.f32 %v4701_v57, %v4747_v51  ;;  %v4770_v13 = vrot.slane %v4765_v53, %v8523_v42  ;;  %v5647_v57 = vld [vmem:[%s8536_s14 + $0x8] sm:$0xff]  }
0x10b7   :  { %5454 = vmatpush3.bf16.msra.mxu1 %v5647_v57 }
0x10b8   :  { %v4739_v15 = vmax.f32 %v4738_v3, 0.0  ;;  %5455 = vmatprep.subr.bf16.mxu1 %v5779_v61 }
0x10b9   :  { %v4806_v12 = vpop.permute.xlu1 %4805 }
0x10ba   :  { %v4750_v59 = vadd.f32 1e-05, %v4739_v15 }
0x10bb   :  { %v4775_v17 = vpop.permute.xlu0 %4774 }
0x10bc   :  { %5668 = vrsqrt.f32 %v4750_v59  ;;  %v4780_v36 = vrot.slane %v4775_v17, %v8523_v42 }
0x10bd   :  { %v4837_v0 = vpop.permute.xlu1 %4836 }
0x10c0   :  { %v4869_v24 = vpop.permute.xlu0 %4868 }
0x10c2   :  { %v8249_v8 = vpop.permute.xlu1 %4946 }
0x10c5   :  { %v4901_v34 = vpop.permute.xlu0 %4900 }
0x10c6   :  { %v5669_v18 = vpop.eup %5668 }
0x10c7   :  { %v4759_v41 = vrot.slane %v5669_v18, %v8117_v20  ;;  %v8251_v27 = vpop.permute.xlu1 %4978 }
0x10c9   :  { %v4761_v37 = vmul.f32 %v4759_v41, %v4749_v19 }
0x10ca   :  { %v8253_v56 = vpop.permute.xlu0 %4925 }
0x10cb   :  { %v4771_v52 = vmul.f32 %v4770_v13, %v4761_v37 }
0x10cd   :  { %v4781_v50 = vadd.f32 %v4780_v36, %v4771_v52 }
0x10cf   :  { %v8218_v5 = vmax.f32 %v4781_v50, 0.0 }
0x10d1   :  { %v4787_v10 = vrot.slane %v8218_v5, %v8523_v42  ;;  %v4791_v32 = vrot.slane %v8218_v5, %v8524_v28 }
0x10d3   :  { %4796 = vrot.lane.b32.xlu1 %v4791_v32, %s5757_s7  ;;  %4794 = vrot.lane.b32.xlu0 %v4787_v10, %s5757_s7 }
0x10d7   :  { %4829 = vrot.lane.b32.xlu1 %v4791_v32, %s5756_s10  ;;  %4827 = vrot.lane.b32.xlu0 %v4787_v10, %s5756_s10 }
0x10db   :  { %4859 = vrot.lane.b32.xlu1 %v4787_v10, %s5759_s15  ;;  %4939 = vrot.lane.b32.xlu0 %v4791_v32, %s5750_s25 }
0x10df   :  { %4861 = vrot.lane.b32.xlu1 %v4791_v32, %s5759_s15  ;;  %4969 = vrot.lane.b32.xlu0 %v4787_v10, %s5761_s18 }
0x10e3   :  { %4891 = vrot.lane.b32.xlu1 %v4787_v10, %s5749_s21  ;;  %5042 = vperm.xlu0 %5630, %v4802_v29   ;;  %v8255_v29 = vpop.permute.xlu0 %5010 }
0x10e7   :  { %4893 = vrot.lane.b32.xlu1 %v4791_v32, %s5749_s21  ;;  %5631 = vset.pattern.permute.xlu0 %v8515_v60  ;;  %v5648_v60 = vld [vmem:[%s8536_s14 + $0x10] sm:$0xff]   ;;  %s8537_s21 = sld [smem:[#allocation33_spill]] }
0x10e8   :  { %5067 = vperm.xlu0 %5631, %v3728_v11   ;;  %5456 = vmatpush3.bf16.msra.mxu1 %v5648_v60 }
0x10e9   :  { %5457 = vmatprep.subr.bf16.mxu1 %v5779_v61 }
0x10eb   :  { %4937 = vrot.lane.b32.xlu1 %v4787_v10, %s5750_s25  ;;  %s8538_s25 = sld [smem:[#allocation34_spill]] }
0x10ec   :  { %5458 = vmatpush3.bf16.msra.mxu1 %v5649_v35 }
0x10ed   :  { %5459 = vmatprep.subr.bf16.mxu1 %v5779_v61 }
0x10ef   :  { %4971 = vrot.lane.b32.xlu1 %v4791_v32, %s5761_s18 }
0x10f0   :  { %5460 = vmatpush3.bf16.msra.mxu1 %v5650_v30 }
0x10f1   :  { %5461 = vmatprep.subr.bf16.mxu1 %v5779_v61 }
0x10f3   :  { %5001 = vrot.lane.b32.xlu1 %v4787_v10, %s5764_s26 }
0x10f4   :  { %5462 = vmatpush3.bf16.msra.mxu1 %v5651_v16  ;;  %v4845_v16 = vrot.slane %v4837_v0, %v8117_v20 }
0x10f5   :  { %5463 = vmatprep.subr.bf16.mxu1 %v5779_v61 }
0x10f7   :  { %5003 = vrot.lane.b32.xlu1 %v4791_v32, %s5764_s26 }
0x10f8   :  { %5464 = vmatpush3.bf16.msra.mxu1 %v5652_v22 }
0x10f9   :  { %5465 = vmatprep.subr.bf16.mxu1 %v5779_v61 }
0x10fb   :  { %5033 = vrot.lane.b32.xlu1 %v4787_v10, %s5760_s16 }
0x10fc   :  { %5466 = vmatpush3.bf16.msra.mxu1 %v5653_v55  ;;  %v4877_v55 = vrot.slane %v4869_v24, %v8117_v20  ;;  %v4909_v24 = vrot.slane %v4901_v34, %v8117_v20 }
0x10ff   :  { %5035 = vrot.lane.b32.xlu1 %v4791_v32, %s5760_s16 }
0x1145   :  { %v4797_v9 = vpop.permute.xlu1 %4796  ;;  %v4795_v21 = vpop.permute.xlu0 %4794 }
0x1146   :  { %v4798_v59 = vsel %vm2446_vm13, %v4795_v21, %v4797_v9  ;;  %v4799_v51 = vsel %vm2446_vm13, %v4797_v9, %v4795_v21  ;;  %v4814_v9 = vrot.slane %v4806_v12, %v8117_v20 }
0x1147   :  { %v4800_v36 = vmul.f32 %v8010_v38, %v4799_v51  ;;  %v4801_v52 = vmul.f32 %v8014_v7, %v4798_v59 }
0x1149   :  { %v4830_v46 = vpop.permute.xlu1 %4829  ;;  %v4828_v4 = vpop.permute.xlu0 %4827  ;;  %v4817_v61 = vcombine.low %v4800_v36, %v4801_v52 }
0x114a   :  { %v4831_v3 = vsel %vm2465_vm12, %v4828_v4, %v4830_v46  ;;  %v4832_v15 = vsel %vm2465_vm12, %v4830_v46, %v4828_v4 }
0x114b   :  { %v4833_v19 = vmul.f32 %v4832_v15, %v4414_v40  ;;  %v4834_v41 = vmul.f32 %v4831_v3, %v4415_v25 }
0x114d   :  { %v4860_v26 = vpop.permute.xlu1 %4859  ;;  %v4848_v10 = vcombine.low %v4833_v19, %v4834_v41  ;;  %v4940_v32 = vpop.permute.xlu0 %4939 }
0x114f   :  { %v4855_v60 = vrot.slane %v4848_v10, %v7539_v43 }
0x1151   :  { %v4862_v14 = vpop.permute.xlu1 %4861  ;;  %v4970_v22 = vpop.permute.xlu0 %4969 }
0x1152   :  { %v4863_v18 = vsel %vm2596_vm1, %v4860_v26, %v4862_v14  ;;  %v4864_v53 = vsel %vm2596_vm1, %v4862_v14, %v4860_v26  ;;  %v4857_v26 = vmul.f32 %v4855_v60, %v4845_v16 }
0x1153   :  { %v4865_v50 = vmul.f32 %v4864_v53, %v4450_v49  ;;  %v4866_v40 = vmul.f32 %v4863_v18, %v4451_v31 }
0x1155   :  { %v4892_v47 = vpop.permute.xlu1 %4891  ;;  %v4880_v57 = vcombine.low %v4865_v50, %v4866_v40  ;;  %v4955_v50 = vrot.slane %v8249_v8, %v8117_v20  ;;  %v5019_v8 = vrot.slane %v8255_v29, %v8117_v20 }
0x1159   :  { %v4894_v13 = vpop.permute.xlu1 %4893 }
0x115a   :  { %v4895_v17 = vsel %vm694_vm7, %v4892_v47, %v4894_v13  ;;  %v4896_v37 = vsel %vm694_vm7, %v4894_v13, %v4892_v47 }
0x115b   :  { %v4897_v25 = vmul.f32 %v4896_v37, %v4486_v2  ;;  %v4898_v11 = vmul.f32 %v4895_v17, %v4487_v45  ;;  %v4824_v2 = vrot.slane %v4817_v61, %v7539_v43  ;;  %v4887_v45 = vrot.slane %v4880_v57, %v7539_v43 }
0x115d   :  { %v4938_v1 = vpop.permute.xlu1 %4937  ;;  %v4912_v35 = vcombine.low %v4897_v25, %v4898_v11  ;;  %v4826_v3 = vmul.f32 %v4824_v2, %v4814_v9  ;;  %v4889_v12 = vmul.f32 %v4887_v45, %v4877_v55 }
0x115e   :  { %v4941_v49 = vsel %vm767_vm8, %v4938_v1, %v4940_v32  ;;  %v4942_v31 = vsel %vm767_vm8, %v4940_v32, %v4938_v1  ;;  %v4987_v32 = vrot.slane %v8251_v27, %v8117_v20 }
0x115f   :  { %v4919_v14 = vrot.slane %v4912_v35, %v7539_v43  ;;  %v4943_v0 = vmul.f32 %v4941_v49, %v4548_v23  ;;  %v4944_v4 = vmul.f32 %v4942_v31, %v4549_v58  ;;  %v4858_v51 = vadd.f32 %v4857_v26, %v4826_v3 }
0x1160   :  { %v4923_v23 = vmul.f32 %v8218_v5, %v8194_v33  ;;  %v4934_v58 = vrot.slane %v8253_v56, %v8117_v20 }
0x1161   :  { %v4972_v30 = vpop.permute.xlu1 %4971  ;;  %v4921_v18 = vmul.f32 %v4919_v14, %v4909_v24  ;;  %v4958_v53 = vcombine.low %v4943_v0, %v4944_v4 }
0x1162   :  { %v4973_v46 = vsel %vm2873_vm2, %v4970_v22, %v4972_v30  ;;  %v4974_v21 = vsel %vm2873_vm2, %v4972_v30, %v4970_v22  ;;  %v4935_v56 = vmul.f32 %v4934_v58, %v4923_v23  ;;  %v5043_v10 = vpop.permute.xlu0 %5042  ;;  %v5371_v58 = vld [vmem:[%s8539_s19] ss:$0 sm:$0xff] }
0x1163   :  { %v4975_v15 = vmul.f32 %v4973_v46, %v4584_v48  ;;  %v4976_v59 = vmul.f32 %v4974_v21, %v4585_v54  ;;  %v4890_v48 = vadd.f32 %v4889_v12, %v4858_v51  ;;  %v4965_v33 = vrot.slane %v4958_v53, %v7539_v43  ;;  %v5361_v46 = vld [vmem:[%s8537_s21] ss:$0 sm:$0xff] }
0x1164   :  { %v5051_v60 = vrot.slane %v5043_v10, %v8117_v20 }
0x1165   :  { %v5002_v47 = vpop.permute.xlu1 %5001  ;;  %v4990_v13 = vcombine.low %v4975_v15, %v4976_v59  ;;  %v4922_v37 = vadd.f32 %v4921_v18, %v4890_v48  ;;  %v4967_v38 = vmul.f32 %v4965_v33, %v4955_v50 }
0x1167   :  { %v4997_v40 = vrot.slane %v4990_v13, %v7539_v43  ;;  %v5068_v49 = vpop.permute.xlu0 %5067 }
0x1168   :  { %v5073_v22 = vrot.slane %v5068_v49, %v8523_v42 }
0x1169   :  { %v5004_v19 = vpop.permute.xlu1 %5003  ;;  %v4999_v1 = vmul.f32 %v4997_v40, %v4987_v32 }
0x116a   :  { %v5005_v34 = vsel %vm2946_vm3, %v5002_v47, %v5004_v19  ;;  %v5006_v41 = vsel %vm2946_vm3, %v5004_v19, %v5002_v47  ;;  %v5370_v19 = vld [vmem:[%s8538_s25] ss:$0 sm:$0xff] }
0x116b   :  { %v5007_v54 = vmul.f32 %v5005_v34, %v4620_v39  ;;  %v5008_v17 = vmul.f32 %v5006_v41, %v4621_v6  ;;  %v4936_v6 = vadd.f32 %v4935_v56, %v4922_v37 }
0x116d   :  { %v5022_v36 = vcombine.low %v5007_v54, %v5008_v17  ;;  %v5034_v52 = vpop.permute.xlu1 %5033  ;;  %v4968_v35 = vadd.f32 %v4967_v38, %v4936_v6 }
0x116f   :  { %v5029_v39 = vrot.slane %v5022_v36, %v7539_v43  ;;  %v5000_v16 = vadd.f32 %v4999_v1, %v4968_v35 }
0x1171   :  { %v5036_v7 = vpop.permute.xlu1 %5035  ;;  %v5031_v30 = vmul.f32 %v5029_v39, %v5019_v8 }
0x1172   :  { %v5037_v25 = vsel %vm3019_vm4, %v5034_v52, %v5036_v7  ;;  %v5038_v11 = vsel %vm3019_vm4, %v5036_v7, %v5034_v52 }
0x1173   :  { %v5039_v61 = vmul.f32 %v8181_v63, %v5037_v25  ;;  %v5040_v57 = vmul.f32 %v8185_v62, %v5038_v11  ;;  %v5032_v2 = vadd.f32 %v5031_v30, %v5000_v16 }
0x1175   :  { %v5054_v27 = vcombine.low %v5039_v61, %v5040_v57 }
0x1177   :  { %v5061_v31 = vrot.slane %v5054_v27, %v7539_v43 }
0x1179   :  { %v5063_v44 = vmul.f32 %v5061_v31, %v5051_v60 }
0x117b   :  { %v5064_v29 = vadd.f32 %v5063_v44, %v5032_v2 }
0x117d   :  { %v5074_v45 = vadd.f32 %v5073_v22, %v5064_v29 }
0x117f   :  { %v5075_v63 = vadd.f32 %v5074_v45, %v8218_v5 }
0x1181   :  { %v5076_v55 = vmax.f32 %v5075_v63, 0.0 }
0x1183   :  { %5077 = vst [vmem:[#allocation4] sm:$0x1] %v5076_v55  ;;  %v5082_v62 = vrot.slane %v5076_v55, %v8524_v28 }
0x1185   :  { %5084 = vst [vmem:[#allocation4 + $0x1] sm:$0x1] %v5082_v62 }
0x118c   :  { %v5085_v20 = vld [vmem:[#allocation4] sm:$0x3] }
0x118d   :  { %v5086_v9 = vpack.c.bf16 %v5085_v20, %v5085_v20 }
0x118f   :  { %5468 = vmatmul.mubr.bf16.vlgmr.msra.gmra.mrb[68].mxu1 %v5086_v9 }
0x1262   :  { %v5192_v21 = vpop.f32.mrb[68].mxu1 }
0x1263   :  { %v5193_v43 = vadd.f32 %v5361_v46, %v5192_v21  ;;  %v5469_v26 = vpop.f32.mrb[69].mxu1 }
0x1264   :  { %v5195_v14 = vpop.f32.mrb[70].mxu1 }
0x1265   :  { %v5470_v0 = vpop.f32.mrb[71].mxu1  ;;  %v5199_v42 = vsel %vm5198_vm6, %v5193_v43, 0.0  ;;  %v5204_v4 = vmul.f32 %v5193_v43, %v5193_v43 }
0x1266   :  { %5200 = vadd.xlane.f32.xlu1 %v5199_v42 }
0x1267   :  { %v5205_v5 = vsel %vm5198_vm6, %v5204_v4, 0.0 }
0x1268   :  { %5206 = vadd.xlane.f32.xlu0 %v5205_v5 }
0x12f3   :  { %v5201_v28 = vpop.xlane.xlu1 %5200 }
0x12f4   :  { %v5203_v47 = vmul.f32 0.125, %v5201_v28 }
0x12f5   :  { %v5207_v24 = vpop.xlane.xlu0 %5206 }
0x12f6   :  { %v5209_v3 = vmul.f32 %v5203_v47, %v5203_v47  ;;  %v5208_v12 = vmul.f32 0.125, %v5207_v24  ;;  %v5212_v18 = vsub.f32 %v5193_v43, %v5203_v47 }
0x12f8   :  { %v5210_v15 = vsub.f32 %v5208_v12, %v5209_v3 }
0x12fa   :  { %v5211_v59 = vmax.f32 %v5210_v15, 0.0 }
0x12fc   :  { %v5213_v51 = vadd.f32 1e-05, %v5211_v59 }
0x12fe   :  { %5670 = vrsqrt.f32 %v5213_v51 }
0x1308   :  { %v5671_v53 = vpop.eup %5670 }
0x1309   :  { %v5215_v23 = vmul.f32 %v5671_v53, %v5212_v18 }
0x130b   :  { %v5223_v34 = vmul.f32 %v5370_v19, %v5215_v23 }
0x130d   :  { %v5231_v41 = vadd.f32 %v5371_v58, %v5223_v34 }
0x130f   :  { %5232 = vst.msk [vmem:[#allocation12] sm:$0x3] %vm5198_vm6, %v5231_v41 }
0x1310   :  { %5693 = shalt.err (!%p5690_p4)
}
0x1311   :  { %s8540_s12 = sld [smem:[#allocation36_spill]] }
0x1317   :  { %s5694_s27 = scalar_lea.hbm %s8540_s12, 32 }
0x1318   :  { %p5695_p5 = scmp.ne.s32.totalorder %s8540_s12, %s5694_s27  ;;  %p5698_p6 = scmp.lt.u32.totalorder %s5694_s27, %s8540_s12 }
0x131a   :  { %p5700_p7 = pnand %p5698_p6, %p5695_p5 }
0x131c   :  { %5703 = shalt.err (!%p5700_p7)
}
0x131d   :  { %5242 = dma.vmem_to_hbm [thread:$0]  %s5240_s6, 32, %s8540_s12, [#allocation13]  }
0x131e   :  { %5704 = dma.done.wait [#allocation13], 32  }
0x131f   :  { %5705 = vsyncadd [#allocation13], 4294967264 }
0x1320   :  { %5246 = vsyncpa [#allocation13], 1 }

</bundles_post_ra>
